<compile_context>
chip_gen: v6e
topology: v6e:2x2x1
jax: 0.10.0
libtpu: 0.0.40
codegen_flags: <defaults>
</compile_context>

<pallas_src>
import jax
import jax.numpy as jnp
import numpy as np
from jax import lax
from jax.experimental import pallas as pl
from jax.experimental.pallas import tpu as pltpu


def _round_up(x, m):
    return (x + m - 1) // m * m


# ----------------------------------------------------------------------------
# Kernel
# ----------------------------------------------------------------------------
def gru_text_kernel(len_ref, x_ref, w_ih_ref, w_hh_ref, b_gi_ref, b_hn_ref,
                    out_ref, h_ref):
    """Grid = (batch tiles [parallel], time tiles [arbitrary]).

    len_ref : (BB, 1) int32            sequence lengths for this batch tile
    x_ref   : (TT, BB, D) bf16         time-major embedded inputs for the tile
    w_ih_ref: (L, D, 3*H) bf16         gate-fused input->hidden weights [r|z|n]
    w_hh_ref: (L, H, 3*H) bf16         gate-fused hidden->hidden weights
    b_gi_ref: (L, 1, 3*H) f32          [b_ir+b_hr | b_iz+b_hz | b_in]
    b_hn_ref: (L, 1, H) f32            b_hn (stays inside the r * (.) term)
    out_ref : (BB, H) f32              resident accumulator -> l2norm(final h)
    h_ref   : (L, BB, H) f32           persistent hidden-state scratch
    """
    t_id = pl.program_id(1)
    n_t = pl.num_programs(1)
    TT, BB, D = x_ref.shape
    L = w_hh_ref.shape[0]
    H = out_ref.shape[1]                 # padded hidden width (multiple of 128)
    H2 = 2 * H
    mm_dtype = x_ref.dtype

    @pl.when(t_id == 0)
    def _init():
        h_ref[...] = jnp.zeros_like(h_ref)
        out_ref[...] = jnp.zeros_like(out_ref)

    # ---- Hoisted layer-0 input projection: one (TT*BB, D) @ (D, 3H) matmul
    # for the whole time tile (large M keeps MXU rows busy); per-step reads
    # gi0[tt] are contiguous sublane-aligned views.
    x2d = x_ref[...].reshape(TT * BB, D)
    gi0 = (jnp.dot(x2d, w_ih_ref[0], preferred_element_type=jnp.float32)
           + b_gi_ref[0]).reshape(TT, BB, 3 * H)

    # ---- Loop-invariant work hoisted out of the timestep loop.
    last_idx = len_ref[...] - 1                       # (BB, 1) int32
    t_base = t_id * TT
    b_gi_v = [None] + [b_gi_ref[l] for l in range(1, L)]
    b_hn_v = [b_hn_ref[l] for l in range(L)]          # (1, H) each

    # Per-layer hidden states as a list of (BB, H) values inside the tile.
    hs = [h_ref[l] for l in range(L)]
    final = out_ref[...]

    # Static (unrolled) loop over the TT timesteps of this tile.
    for tt in range(TT):
        layer_in = None
        for l in range(L):
            h_prev = hs[l]
            if l == 0:
                gi = gi0[tt]                          # (BB, 3H) aligned view
            else:
                gi = jnp.dot(layer_in.astype(mm_dtype), w_ih_ref[l],
                             preferred_element_type=jnp.float32) + b_gi_v[l]
            gh = jnp.dot(h_prev.astype(mm_dtype), w_hh_ref[l],
                         preferred_element_type=jnp.float32)
            # r and z share one sigmoid over a (BB, 2H) slab; slices at
            # H-multiples (128-aligned) are free views.
            rz = jax.nn.sigmoid(gi[:, :H2] + gh[:, :H2])
            r = rz[:, :H]
            z = rz[:, H:]
            n = jnp.tanh(gi[:, H2:] + r * (gh[:, H2:] + b_hn_v[l]))
            h_new = (1.0 - z) * n + z * h_prev
            hs[l] = h_new
            layer_in = h_new
        # Capture the top-layer hidden state at t == length-1 (masked select
        # replaces pack/pad + torch.gather on the padded GRU output).
        is_last = last_idx == (t_base + tt)           # (BB, 1) bool
        final = jnp.where(is_last, layer_in, final)

    # Persist state across time tiles.
    for l in range(L):
        h_ref[l] = hs[l]
    out_ref[...] = final

    @pl.when(t_id == n_t - 1)
    def _finalize():
        v = out_ref[...]
        # l2norm along the hidden dim (no epsilon, faithful to the PyTorch
        # helper); padded hidden columns are exactly 0 so the norm is exact.
        inv = lax.rsqrt(jnp.sum(v * v, axis=1, keepdims=True))
        out_ref[...] = v * inv


# ----------------------------------------------------------------------------
# Wrapper
# ----------------------------------------------------------------------------
def encoder_text_forward(tokens, lengths, kparams, *, block_b=16, block_t=16):
    """tokens: (B, T) int32, lengths: (B,) int32 (>=1, sorted descending)."""
    assert block_b % 16 == 0                 # bf16 sublane tile on the batch dim
    assert block_t % 8 == 0
    B, T = tokens.shape
    H = kparams["H"]
    embed = kparams["embed"]                 # (V, D_pad) f32
    D_pad = embed.shape[1]
    H_pad = kparams["b_hn"].shape[-1]
    H3 = kparams["w_hh"].shape[-1]
    L = kparams["w_hh"].shape[0]
    mm_dtype = kparams["w_hh"].dtype

    # Embedding lookup is glue (a gather); keep it in plain JAX.  Gathering
    # with tokens.T yields the time-major (T, B, D) layout directly — no
    # HBM-side transpose of the embedded activations.
    x = jnp.take(embed, tokens.T, axis=0).astype(mm_dtype)   # (T, B, D_pad)

    BB, TT = block_b, block_t
    B_pad = _round_up(max(B, BB), BB)
    T_pad = _round_up(max(T, TT), TT)
    x = jnp.pad(x, ((0, T_pad - T), (0, B_pad - B), (0, 0)))
    len2d = jnp.pad(lengths.astype(jnp.int32).reshape(B, 1),
                    ((0, B_pad - B), (0, 0)), constant_values=1)

    grid = (B_pad // BB, T_pad // TT)
    out = pl.pallas_call(
        gru_text_kernel,
        out_shape=jax.ShapeDtypeStruct((B_pad, H_pad), jnp.float32),
        grid_spec=pltpu.PrefetchScalarGridSpec(
            num_scalar_prefetch=0,
            grid=grid,
            in_specs=[
                pl.BlockSpec((BB, 1), lambda b, t: (b, 0)),
                pl.BlockSpec((TT, BB, D_pad), lambda b, t: (t, b, 0)),
                pl.BlockSpec((L, D_pad, H3), lambda b, t: (0, 0, 0)),
                pl.BlockSpec((L, H_pad, H3), lambda b, t: (0, 0, 0)),
                pl.BlockSpec((L, 1, H3), lambda b, t: (0, 0, 0)),
                pl.BlockSpec((L, 1, H_pad), lambda b, t: (0, 0, 0)),
            ],
            out_specs=pl.BlockSpec((BB, H_pad), lambda b, t: (b, 0)),
            scratch_shapes=[pltpu.VMEM((L, BB, H_pad), jnp.float32)],
        ),
        compiler_params=pltpu.CompilerParams(
            dimension_semantics=("parallel", "arbitrary"),
            vmem_limit_bytes=32 * 1024 * 1024,
        ),
    )(len2d, x, kparams["w_ih"], kparams["w_hh"],
      kparams["b_gi"], kparams["b_hn"])

    return out[:B, :H]


# ----------------------------------------------------------------------------
# Parameters
# ----------------------------------------------------------------------------
def init_params(key, vocab_size, word_dim, embed_size, num_layers):
    """Logical (PyTorch-like) parameters: embed ~U(-0.1,0.1), GRU ~U(-k,k)."""
    assert word_dim == embed_size, "weights are stacked per-layer; keep dims equal"
    keys = jax.random.split(key, 1 + 4 * num_layers)
    embed = jax.random.uniform(keys[0], (vocab_size, word_dim), jnp.float32,
                               -0.1, 0.1)
    k = 1.0 / np.sqrt(embed_size)
    w_ih, w_hh, b_ih, b_hh = [], [], [], []
    for l in range(num_layers):
        kk = keys[1 + 4 * l: 1 + 4 * (l + 1)]
        in_dim = word_dim if l == 0 else embed_size
        w_ih.append(jax.random.uniform(kk[0], (in_dim, 3 * embed_size),
                                       jnp.float32, -k, k))
        w_hh.append(jax.random.uniform(kk[1], (embed_size, 3 * embed_size),
                                       jnp.float32, -k, k))
        b_ih.append(jax.random.uniform(kk[2], (1, 3 * embed_size),
                                       jnp.float32, -k, k))
        b_hh.append(jax.random.uniform(kk[3], (1, 3 * embed_size),
                                       jnp.float32, -k, k))
    return dict(embed=embed,
                w_ih=jnp.stack(w_ih), w_hh=jnp.stack(w_hh),
                b_ih=jnp.stack(b_ih), b_hh=jnp.stack(b_hh))


def prepare_kernel_params(params, mm_dtype=jnp.bfloat16):
    """Logical params -> kernel layout: gate-fused along the lane axis with
    each gate padded to H_pad lanes, bf16 matmul operands, r/z biases folded."""
    embed = params["embed"]                           # (V, D)
    w_ih, w_hh = params["w_ih"], params["w_hh"]       # (L, D, 3H), (L, H, 3H)
    b_ih, b_hh = params["b_ih"], params["b_hh"]       # (L, 1, 3H)
    L, H = w_hh.shape[0], w_hh.shape[1]
    D = embed.shape[1]
    D_pad, H_pad = _round_up(D, 128), _round_up(H, 128)
    H3 = 3 * H_pad

    # Fold the r/z biases (b_ih + b_hh); gate n keeps b_in (b_hn stays inside
    # the r * (.) term of the GRU update).
    b_gi = b_ih.at[:, :, :2 * H].add(b_hh[:, :, :2 * H])
    b_hn = b_hh[:, :, 2 * H:]                         # (L, 1, H)

    # Zero-pad and place each gate in its own H_pad-wide lane slot.  Padded
    # hidden units stay exactly 0 through the recurrence (zero weights + zero
    # biases => n = 0, h_new = 0), so results are unchanged.
    w_ih_p = jnp.zeros((L, D_pad, H3), mm_dtype)
    w_hh_p = jnp.zeros((L, H_pad, H3), mm_dtype)
    b_gi_p = jnp.zeros((L, 1, H3), jnp.float32)
    b_hn_p = jnp.zeros((L, 1, H_pad), jnp.float32)
    for g in range(3):
        src = slice(g * H, (g + 1) * H)
        dst = slice(g * H_pad, g * H_pad + H)
        w_ih_p = w_ih_p.at[:, :D, dst].set(w_ih[:, :, src].astype(mm_dtype))
        w_hh_p = w_hh_p.at[:, :H, dst].set(w_hh[:, :, src].astype(mm_dtype))
        b_gi_p = b_gi_p.at[:, :, dst].set(b_gi[:, :, src])
    b_hn_p = b_hn_p.at[:, :, :H].set(b_hn)
    embed_p = jnp.zeros((embed.shape[0], D_pad), jnp.float32).at[:, :D].set(embed)
    return dict(embed=embed_p, w_ih=w_ih_p, w_hh=w_hh_p,
                b_gi=b_gi_p, b_hn=b_hn_p, H=int(H), D=int(D))


# ----------------------------------------------------------------------------
# Pure-numpy reference (PyTorch forward semantics)
# ----------------------------------------------------------------------------
def reference_forward(tokens, lengths, params):
    embed = np.asarray(params["embed"])
    w_ih = np.asarray(params["w_ih"]); w_hh = np.asarray(params["w_hh"])
    b_ih = np.asarray(params["b_ih"]); b_hh = np.asarray(params["b_hh"])
    B, T = tokens.shape
    L = w_hh.shape[0]
    H = w_hh.shape[2] // 3
    x = embed[tokens]                                   # (B, T, D)

    def sigmoid(v):
        return 1.0 / (1.0 + np.exp(-v))

    outs = np.zeros((B, T, H), np.float32)
    h = np.zeros((L, B, H), np.float32)
    for t in range(T):
        layer_in = x[:, t, :]
        for l in range(L):
            gi = layer_in @ w_ih[l] + b_ih[l]
            gh = h[l] @ w_hh[l] + b_hh[l]
            r = sigmoid(gi[:, :H] + gh[:, :H])
            z = sigmoid(gi[:, H:2 * H] + gh[:, H:2 * H])
            n = np.tanh(gi[:, 2 * H:] + r * gh[:, 2 * H:])
            h[l] = (1.0 - z) * n + z * h[l]
            layer_in = h[l]
        outs[:, t, :] = h[-1]
    final = outs[np.arange(B), np.asarray(lengths) - 1]  # torch.gather + squeeze
    norm = np.sqrt((final ** 2).sum(axis=1, keepdims=True))
    return final / norm                                  # l2norm(dim=1)


if __name__ == "__main__":
    vocab_size, word_dim, embed_size, num_layers = 50, 32, 32, 2
    B, T = 2, 24

    key = jax.random.PRNGKey(0)
    pkey, tkey = jax.random.split(key)
    params = init_params(pkey, vocab_size, word_dim, embed_size, num_layers)
    kparams = prepare_kernel_params(params)

    tokens = jax.random.randint(tkey, (B, T), 0, vocab_size, dtype=jnp.int32)
    # pack_padded_sequence requires lengths sorted in decreasing order, >= 1.
    lengths = jnp.array([23, 9], dtype=jnp.int32)

    out = encoder_text_forward(tokens, lengths, kparams)
    out = jax.block_until_ready(out)

    ref = reference_forward(np.asarray(tokens), np.asarray(lengths), params)
    # Tolerance reflects bf16 matmul operands (f32 accumulation) in the kernel
    # vs the full-f32 reference.
    np.testing.assert_allclose(np.asarray(out), ref, rtol=5e-2, atol=2e-2)
    print("KERNEL_OK")
</pallas_src>

<mosaic_0001>
module attributes {stable_mosaic.version = 11 : i64} {
  func.func @gru_text_kernel(%arg0: i32, %arg1: i32, %arg2: memref<16x1xi32, #tpu.memory_space<vmem>>, %arg3: memref<16x16x128xbf16, #tpu.memory_space<vmem>>, %arg4: memref<2x128x384xbf16, #tpu.memory_space<vmem>>, %arg5: memref<2x128x384xbf16, #tpu.memory_space<vmem>>, %arg6: memref<2x1x384xf32, #tpu.memory_space<vmem>>, %arg7: memref<2x1x128xf32, #tpu.memory_space<vmem>>, %arg8: memref<16x128xf32, #tpu.memory_space<vmem>>, %arg9: memref<2x16x128xf32, #tpu.memory_space<vmem>>) attributes {dimension_semantics = [#tpu.dimension_semantics<parallel>, #tpu.dimension_semantics<arbitrary>], iteration_bounds = array<i64: 1, 2>, scalar_prefetch = 0 : i64, scratch_operands = 1 : i64, tpu.core_type = #tpu.core_type<tc>, window_params = [{transform_indices = @transform_0, window_bounds = array<i64: 16, 1>}, {transform_indices = @transform_1, window_bounds = array<i64: 16, 16, 128>}, {pipeline_mode = #tpu.pipeline_mode<synchronous>, transform_indices = @transform_2, window_bounds = array<i64: 2, 128, 384>}, {pipeline_mode = #tpu.pipeline_mode<synchronous>, transform_indices = @transform_3, window_bounds = array<i64: 2, 128, 384>}, {pipeline_mode = #tpu.pipeline_mode<synchronous>, transform_indices = @transform_4, window_bounds = array<i64: 2, 1, 384>}, {pipeline_mode = #tpu.pipeline_mode<synchronous>, transform_indices = @transform_5, window_bounds = array<i64: 2, 1, 128>}, {transform_indices = @transform_6, window_bounds = array<i64: 16, 128>}]} {
    %c0_i32 = arith.constant 0 : i32
    %0 = arith.cmpi eq, %arg1, %c0_i32 : i32
    %1 = arith.extui %0 : i1 to i32
    %c0_i32_0 = arith.constant 0 : i32
    %2 = arith.cmpi ne, %1, %c0_i32_0 : i32
    scf.if %2 {
      %cst_295 = arith.constant 0.000000e+00 : f32
      %1094 = vector.broadcast %cst_295 : f32 to vector<2x16x128xf32>
      %c0_296 = arith.constant 0 : index
      %c0_297 = arith.constant 0 : index
      %c0_298 = arith.constant 0 : index
      %1095 = vector.load %arg9[%c0_296, %c0_297, %c0_298] : memref<2x16x128xf32, #tpu.memory_space<vmem>>, vector<2x16x128xf32>
      tpu.vector_store %arg9[%c0_296, %c0_297, %c0_298], %1094 {strides = array<i32>} : memref<2x16x128xf32, #tpu.memory_space<vmem>>, vector<2x16x128xf32>,
      %cst_299 = arith.constant 0.000000e+00 : f32
      %1096 = vector.broadcast %cst_299 : f32 to vector<16x128xf32>
      %c0_300 = arith.constant 0 : index
      %c0_301 = arith.constant 0 : index
      %1097 = vector.load %arg8[%c0_300, %c0_301] : memref<16x128xf32, #tpu.memory_space<vmem>>, vector<16x128xf32>
      tpu.vector_store %arg8[%c0_300, %c0_301], %1096 {strides = array<i32>} : memref<16x128xf32, #tpu.memory_space<vmem>>, vector<16x128xf32>,
    } else {
    }
    %c0 = arith.constant 0 : index
    %c0_1 = arith.constant 0 : index
    %c0_2 = arith.constant 0 : index
    %3 = vector.load %arg3[%c0, %c0_1, %c0_2] : memref<16x16x128xbf16, #tpu.memory_space<vmem>>, vector<16x16x128xbf16>
    %4 = vector.shape_cast %3 : vector<16x16x128xbf16> to vector<256x128xbf16>
    %c0_3 = arith.constant 0 : index
    %c0_4 = arith.constant 0 : index
    %c0_5 = arith.constant 0 : index
    %5 = vector.load %arg4[%c0_3, %c0_4, %c0_5] : memref<2x128x384xbf16, #tpu.memory_space<vmem>>, vector<1x128x384xbf16>
    %6 = vector.shape_cast %5 : vector<1x128x384xbf16> to vector<128x384xbf16>
    %cst = arith.constant dense<0.000000e+00> : vector<256x384xf32>
    %7 = tpu.matmul %4, %6, %cst {dimension_numbers = #tpu.dot_dimension_numbers<[1], [0], [0], [1], [0, 0, 1, 1], [], []>} : vector<256x128xbf16>, vector<128x384xbf16>, vector<256x384xf32> -> vector<256x384xf32>
    %c0_6 = arith.constant 0 : index
    %c0_7 = arith.constant 0 : index
    %c0_8 = arith.constant 0 : index
    %8 = vector.load %arg6[%c0_6, %c0_7, %c0_8] : memref<2x1x384xf32, #tpu.memory_space<vmem>>, vector<1x1x384xf32>
    %9 = vector.shape_cast %8 : vector<1x1x384xf32> to vector<1x384xf32>
    %10 = vector.broadcast %9 : vector<1x384xf32> to vector<256x384xf32>
    %11 = arith.addf %7, %10 : vector<256x384xf32>
    %12 = vector.shape_cast %11 : vector<256x384xf32> to vector<16x16x384xf32>
    %c0_9 = arith.constant 0 : index
    %c0_10 = arith.constant 0 : index
    %13 = vector.load %arg2[%c0_9, %c0_10] : memref<16x1xi32, #tpu.memory_space<vmem>>, vector<16x1xi32>
    %c1_i32 = arith.constant 1 : i32
    %14 = vector.broadcast %c1_i32 : i32 to vector<16x1xi32>
    %15 = arith.subi %13, %14 : vector<16x1xi32>
    %c16_i32 = arith.constant 16 : i32
    %16 = arith.muli %arg1, %c16_i32 : i32
    %c1 = arith.constant 1 : index
    %c0_11 = arith.constant 0 : index
    %c0_12 = arith.constant 0 : index
    %17 = vector.load %arg6[%c1, %c0_11, %c0_12] : memref<2x1x384xf32, #tpu.memory_space<vmem>>, vector<1x1x384xf32>
    %18 = vector.shape_cast %17 : vector<1x1x384xf32> to vector<1x384xf32>
    %c0_13 = arith.constant 0 : index
    %c0_14 = arith.constant 0 : index
    %c0_15 = arith.constant 0 : index
    %19 = vector.load %arg7[%c0_13, %c0_14, %c0_15] : memref<2x1x128xf32, #tpu.memory_space<vmem>>, vector<1x1x128xf32>
    %20 = vector.shape_cast %19 : vector<1x1x128xf32> to vector<1x128xf32>
    %c1_16 = arith.constant 1 : index
    %c0_17 = arith.constant 0 : index
    %c0_18 = arith.constant 0 : index
    %21 = vector.load %arg7[%c1_16, %c0_17, %c0_18] : memref<2x1x128xf32, #tpu.memory_space<vmem>>, vector<1x1x128xf32>
    %22 = vector.shape_cast %21 : vector<1x1x128xf32> to vector<1x128xf32>
    %c0_19 = arith.constant 0 : index
    %c0_20 = arith.constant 0 : index
    %c0_21 = arith.constant 0 : index
    %23 = vector.load %arg9[%c0_19, %c0_20, %c0_21] : memref<2x16x128xf32, #tpu.memory_space<vmem>>, vector<1x16x128xf32>
    %24 = vector.shape_cast %23 : vector<1x16x128xf32> to vector<16x128xf32>
    %c1_22 = arith.constant 1 : index
    %c0_23 = arith.constant 0 : index
    %c0_24 = arith.constant 0 : index
    %25 = vector.load %arg9[%c1_22, %c0_23, %c0_24] : memref<2x16x128xf32, #tpu.memory_space<vmem>>, vector<1x16x128xf32>
    %26 = vector.shape_cast %25 : vector<1x16x128xf32> to vector<16x128xf32>
    %c0_25 = arith.constant 0 : index
    %c0_26 = arith.constant 0 : index
    %27 = vector.load %arg8[%c0_25, %c0_26] : memref<16x128xf32, #tpu.memory_space<vmem>>, vector<16x128xf32>
    %28 = vector.extract_strided_slice %12 {offsets = [0, 0, 0], sizes = [1, 16, 384], strides = [1, 1, 1]} : vector<16x16x384xf32> to vector<1x16x384xf32>
    %29 = vector.shape_cast %28 : vector<1x16x384xf32> to vector<16x384xf32>
    %30 = arith.truncf %24 : vector<16x128xf32> to vector<16x128xbf16>
    %c0_27 = arith.constant 0 : index
    %c0_28 = arith.constant 0 : index
    %c0_29 = arith.constant 0 : index
    %31 = vector.load %arg5[%c0_27, %c0_28, %c0_29] : memref<2x128x384xbf16, #tpu.memory_space<vmem>>, vector<1x128x384xbf16>
    %32 = vector.shape_cast %31 : vector<1x128x384xbf16> to vector<128x384xbf16>
    %cst_30 = arith.constant dense<0.000000e+00> : vector<16x384xf32>
    %33 = tpu.matmul %30, %32, %cst_30 {dimension_numbers = #tpu.dot_dimension_numbers<[1], [0], [0], [1], [0, 0, 1, 1], [], []>} : vector<16x128xbf16>, vector<128x384xbf16>, vector<16x384xf32> -> vector<16x384xf32>
    %34 = vector.extract_strided_slice %29 {offsets = [0, 0], sizes = [16, 256], strides = [1, 1]} : vector<16x384xf32> to vector<16x256xf32>
    %35 = vector.extract_strided_slice %33 {offsets = [0, 0], sizes = [16, 256], strides = [1, 1]} : vector<16x384xf32> to vector<16x256xf32>
    %36 = arith.addf %34, %35 : vector<16x256xf32>
    %37 = arith.negf %36 : vector<16x256xf32>
    %38 = math.exp %37 : vector<16x256xf32>
    %cst_31 = arith.constant 1.000000e+00 : f32
    %39 = vector.broadcast %cst_31 : f32 to vector<16x256xf32>
    %40 = arith.addf %39, %38 : vector<16x256xf32>
    %41 = arith.divf %39, %40 : vector<16x256xf32>
    %42 = vector.extract_strided_slice %41 {offsets = [0, 0], sizes = [16, 128], strides = [1, 1]} : vector<16x256xf32> to vector<16x128xf32>
    %43 = vector.extract_strided_slice %41 {offsets = [0, 128], sizes = [16, 128], strides = [1, 1]} : vector<16x256xf32> to vector<16x128xf32>
    %44 = vector.extract_strided_slice %29 {offsets = [0, 256], sizes = [16, 128], strides = [1, 1]} : vector<16x384xf32> to vector<16x128xf32>
    %45 = vector.extract_strided_slice %33 {offsets = [0, 256], sizes = [16, 128], strides = [1, 1]} : vector<16x384xf32> to vector<16x128xf32>
    %46 = vector.broadcast %20 : vector<1x128xf32> to vector<16x128xf32>
    %47 = arith.addf %45, %46 : vector<16x128xf32>
    %48 = arith.mulf %42, %47 : vector<16x128xf32>
    %49 = arith.addf %44, %48 : vector<16x128xf32>
    %50 = math.tanh %49 : vector<16x128xf32>
    %cst_32 = arith.constant 1.000000e+00 : f32
    %51 = vector.broadcast %cst_32 : f32 to vector<16x128xf32>
    %52 = arith.subf %51, %43 : vector<16x128xf32>
    %53 = arith.mulf %52, %50 : vector<16x128xf32>
    %54 = arith.mulf %43, %24 : vector<16x128xf32>
    %55 = arith.addf %53, %54 : vector<16x128xf32>
    %56 = arith.truncf %55 : vector<16x128xf32> to vector<16x128xbf16>
    %c1_33 = arith.constant 1 : index
    %c0_34 = arith.constant 0 : index
    %c0_35 = arith.constant 0 : index
    %57 = vector.load %arg4[%c1_33, %c0_34, %c0_35] : memref<2x128x384xbf16, #tpu.memory_space<vmem>>, vector<1x128x384xbf16>
    %58 = vector.shape_cast %57 : vector<1x128x384xbf16> to vector<128x384xbf16>
    %cst_36 = arith.constant dense<0.000000e+00> : vector<16x384xf32>
    %59 = tpu.matmul %56, %58, %cst_36 {dimension_numbers = #tpu.dot_dimension_numbers<[1], [0], [0], [1], [0, 0, 1, 1], [], []>} : vector<16x128xbf16>, vector<128x384xbf16>, vector<16x384xf32> -> vector<16x384xf32>
    %60 = vector.broadcast %18 : vector<1x384xf32> to vector<16x384xf32>
    %61 = arith.addf %59, %60 : vector<16x384xf32>
    %62 = arith.truncf %26 : vector<16x128xf32> to vector<16x128xbf16>
    %c1_37 = arith.constant 1 : index
    %c0_38 = arith.constant 0 : index
    %c0_39 = arith.constant 0 : index
    %63 = vector.load %arg5[%c1_37, %c0_38, %c0_39] : memref<2x128x384xbf16, #tpu.memory_space<vmem>>, vector<1x128x384xbf16>
    %64 = vector.shape_cast %63 : vector<1x128x384xbf16> to vector<128x384xbf16>
    %cst_40 = arith.constant dense<0.000000e+00> : vector<16x384xf32>
    %65 = tpu.matmul %62, %64, %cst_40 {dimension_numbers = #tpu.dot_dimension_numbers<[1], [0], [0], [1], [0, 0, 1, 1], [], []>} : vector<16x128xbf16>, vector<128x384xbf16>, vector<16x384xf32> -> vector<16x384xf32>
    %66 = vector.extract_strided_slice %61 {offsets = [0, 0], sizes = [16, 256], strides = [1, 1]} : vector<16x384xf32> to vector<16x256xf32>
    %67 = vector.extract_strided_slice %65 {offsets = [0, 0], sizes = [16, 256], strides = [1, 1]} : vector<16x384xf32> to vector<16x256xf32>
    %68 = arith.addf %66, %67 : vector<16x256xf32>
    %69 = arith.negf %68 : vector<16x256xf32>
    %70 = math.exp %69 : vector<16x256xf32>
    %cst_41 = arith.constant 1.000000e+00 : f32
    %71 = vector.broadcast %cst_41 : f32 to vector<16x256xf32>
    %72 = arith.addf %71, %70 : vector<16x256xf32>
    %73 = arith.divf %71, %72 : vector<16x256xf32>
    %74 = vector.extract_strided_slice %73 {offsets = [0, 0], sizes = [16, 128], strides = [1, 1]} : vector<16x256xf32> to vector<16x128xf32>
    %75 = vector.extract_strided_slice %73 {offsets = [0, 128], sizes = [16, 128], strides = [1, 1]} : vector<16x256xf32> to vector<16x128xf32>
    %76 = vector.extract_strided_slice %61 {offsets = [0, 256], sizes = [16, 128], strides = [1, 1]} : vector<16x384xf32> to vector<16x128xf32>
    %77 = vector.extract_strided_slice %65 {offsets = [0, 256], sizes = [16, 128], strides = [1, 1]} : vector<16x384xf32> to vector<16x128xf32>
    %78 = vector.broadcast %22 : vector<1x128xf32> to vector<16x128xf32>
    %79 = arith.addf %77, %78 : vector<16x128xf32>
    %80 = arith.mulf %74, %79 : vector<16x128xf32>
    %81 = arith.addf %76, %80 : vector<16x128xf32>
    %82 = math.tanh %81 : vector<16x128xf32>
    %cst_42 = arith.constant 1.000000e+00 : f32
    %83 = vector.broadcast %cst_42 : f32 to vector<16x128xf32>
    %84 = arith.subf %83, %75 : vector<16x128xf32>
    %85 = arith.mulf %84, %82 : vector<16x128xf32>
    %86 = arith.mulf %75, %26 : vector<16x128xf32>
    %87 = arith.addf %85, %86 : vector<16x128xf32>
    %c0_i32_43 = arith.constant 0 : i32
    %88 = arith.addi %16, %c0_i32_43 : i32
    %89 = vector.broadcast %88 : i32 to vector<16x1xi32>
    %90 = arith.cmpi eq, %15, %89 : vector<16x1xi32>
    %91 = vector.shape_cast %90 : vector<16x1xi1> to vector<16x1xi1>
    %92 = vector.broadcast %91 : vector<16x1xi1> to vector<16x128xi1>
    %93 = arith.select %92, %87, %27 : vector<16x128xi1>, vector<16x128xf32>
    %94 = vector.extract_strided_slice %12 {offsets = [1, 0, 0], sizes = [1, 16, 384], strides = [1, 1, 1]} : vector<16x16x384xf32> to vector<1x16x384xf32>
    %95 = vector.shape_cast %94 : vector<1x16x384xf32> to vector<16x384xf32>
    %96 = arith.truncf %55 : vector<16x128xf32> to vector<16x128xbf16>
    %c0_44 = arith.constant 0 : index
    %c0_45 = arith.constant 0 : index
    %c0_46 = arith.constant 0 : index
    %97 = vector.load %arg5[%c0_44, %c0_45, %c0_46] : memref<2x128x384xbf16, #tpu.memory_space<vmem>>, vector<1x128x384xbf16>
    %98 = vector.shape_cast %97 : vector<1x128x384xbf16> to vector<128x384xbf16>
    %cst_47 = arith.constant dense<0.000000e+00> : vector<16x384xf32>
    %99 = tpu.matmul %96, %98, %cst_47 {dimension_numbers = #tpu.dot_dimension_numbers<[1], [0], [0], [1], [0, 0, 1, 1], [], []>} : vector<16x128xbf16>, vector<128x384xbf16>, vector<16x384xf32> -> vector<16x384xf32>
    %100 = vector.extract_strided_slice %95 {offsets = [0, 0], sizes = [16, 256], strides = [1, 1]} : vector<16x384xf32> to vector<16x256xf32>
    %101 = vector.extract_strided_slice %99 {offsets = [0, 0], sizes = [16, 256], strides = [1, 1]} : vector<16x384xf32> to vector<16x256xf32>
    %102 = arith.addf %100, %101 : vector<16x256xf32>
    %103 = arith.negf %102 : vector<16x256xf32>
    %104 = math.exp %103 : vector<16x256xf32>
    %cst_48 = arith.constant 1.000000e+00 : f32
    %105 = vector.broadcast %cst_48 : f32 to vector<16x256xf32>
    %106 = arith.addf %105, %104 : vector<16x256xf32>
    %107 = arith.divf %105, %106 : vector<16x256xf32>
    %108 = vector.extract_strided_slice %107 {offsets = [0, 0], sizes = [16, 128], strides = [1, 1]} : vector<16x256xf32> to vector<16x128xf32>
    %109 = vector.extract_strided_slice %107 {offsets = [0, 128], sizes = [16, 128], strides = [1, 1]} : vector<16x256xf32> to vector<16x128xf32>
    %110 = vector.extract_strided_slice %95 {offsets = [0, 256], sizes = [16, 128], strides = [1, 1]} : vector<16x384xf32> to vector<16x128xf32>
    %111 = vector.extract_strided_slice %99 {offsets = [0, 256], sizes = [16, 128], strides = [1, 1]} : vector<16x384xf32> to vector<16x128xf32>
    %112 = vector.broadcast %20 : vector<1x128xf32> to vector<16x128xf32>
    %113 = arith.addf %111, %112 : vector<16x128xf32>
    %114 = arith.mulf %108, %113 : vector<16x128xf32>
    %115 = arith.addf %110, %114 : vector<16x128xf32>
    %116 = math.tanh %115 : vector<16x128xf32>
    %cst_49 = arith.constant 1.000000e+00 : f32
    %117 = vector.broadcast %cst_49 : f32 to vector<16x128xf32>
    %118 = arith.subf %117, %109 : vector<16x128xf32>
    %119 = arith.mulf %118, %116 : vector<16x128xf32>
    %120 = arith.mulf %109, %55 : vector<16x128xf32>
    %121 = arith.addf %119, %120 : vector<16x128xf32>
    %122 = arith.truncf %121 : vector<16x128xf32> to vector<16x128xbf16>
    %c1_50 = arith.constant 1 : index
    %c0_51 = arith.constant 0 : index
    %c0_52 = arith.constant 0 : index
    %123 = vector.load %arg4[%c1_50, %c0_51, %c0_52] : memref<2x128x384xbf16, #tpu.memory_space<vmem>>, vector<1x128x384xbf16>
    %124 = vector.shape_cast %123 : vector<1x128x384xbf16> to vector<128x384xbf16>
    %cst_53 = arith.constant dense<0.000000e+00> : vector<16x384xf32>
    %125 = tpu.matmul %122, %124, %cst_53 {dimension_numbers = #tpu.dot_dimension_numbers<[1], [0], [0], [1], [0, 0, 1, 1], [], []>} : vector<16x128xbf16>, vector<128x384xbf16>, vector<16x384xf32> -> vector<16x384xf32>
    %126 = vector.broadcast %18 : vector<1x384xf32> to vector<16x384xf32>
    %127 = arith.addf %125, %126 : vector<16x384xf32>
    %128 = arith.truncf %87 : vector<16x128xf32> to vector<16x128xbf16>
    %c1_54 = arith.constant 1 : index
    %c0_55 = arith.constant 0 : index
    %c0_56 = arith.constant 0 : index
    %129 = vector.load %arg5[%c1_54, %c0_55, %c0_56] : memref<2x128x384xbf16, #tpu.memory_space<vmem>>, vector<1x128x384xbf16>
    %130 = vector.shape_cast %129 : vector<1x128x384xbf16> to vector<128x384xbf16>
    %cst_57 = arith.constant dense<0.000000e+00> : vector<16x384xf32>
    %131 = tpu.matmul %128, %130, %cst_57 {dimension_numbers = #tpu.dot_dimension_numbers<[1], [0], [0], [1], [0, 0, 1, 1], [], []>} : vector<16x128xbf16>, vector<128x384xbf16>, vector<16x384xf32> -> vector<16x384xf32>
    %132 = vector.extract_strided_slice %127 {offsets = [0, 0], sizes = [16, 256], strides = [1, 1]} : vector<16x384xf32> to vector<16x256xf32>
    %133 = vector.extract_strided_slice %131 {offsets = [0, 0], sizes = [16, 256], strides = [1, 1]} : vector<16x384xf32> to vector<16x256xf32>
    %134 = arith.addf %132, %133 : vector<16x256xf32>
    %135 = arith.negf %134 : vector<16x256xf32>
    %136 = math.exp %135 : vector<16x256xf32>
    %cst_58 = arith.constant 1.000000e+00 : f32
    %137 = vector.broadcast %cst_58 : f32 to vector<16x256xf32>
    %138 = arith.addf %137, %136 : vector<16x256xf32>
    %139 = arith.divf %137, %138 : vector<16x256xf32>
    %140 = vector.extract_strided_slice %139 {offsets = [0, 0], sizes = [16, 128], strides = [1, 1]} : vector<16x256xf32> to vector<16x128xf32>
    %141 = vector.extract_strided_slice %139 {offsets = [0, 128], sizes = [16, 128], strides = [1, 1]} : vector<16x256xf32> to vector<16x128xf32>
    %142 = vector.extract_strided_slice %127 {offsets = [0, 256], sizes = [16, 128], strides = [1, 1]} : vector<16x384xf32> to vector<16x128xf32>
    %143 = vector.extract_strided_slice %131 {offsets = [0, 256], sizes = [16, 128], strides = [1, 1]} : vector<16x384xf32> to vector<16x128xf32>
    %144 = vector.broadcast %22 : vector<1x128xf32> to vector<16x128xf32>
    %145 = arith.addf %143, %144 : vector<16x128xf32>
    %146 = arith.mulf %140, %145 : vector<16x128xf32>
    %147 = arith.addf %142, %146 : vector<16x128xf32>
    %148 = math.tanh %147 : vector<16x128xf32>
    %cst_59 = arith.constant 1.000000e+00 : f32
    %149 = vector.broadcast %cst_59 : f32 to vector<16x128xf32>
    %150 = arith.subf %149, %141 : vector<16x128xf32>
    %151 = arith.mulf %150, %148 : vector<16x128xf32>
    %152 = arith.mulf %141, %87 : vector<16x128xf32>
    %153 = arith.addf %151, %152 : vector<16x128xf32>
    %c1_i32_60 = arith.constant 1 : i32
    %154 = arith.addi %16, %c1_i32_60 : i32
    %155 = vector.broadcast %154 : i32 to vector<16x1xi32>
    %156 = arith.cmpi eq, %15, %155 : vector<16x1xi32>
    %157 = vector.shape_cast %156 : vector<16x1xi1> to vector<16x1xi1>
    %158 = vector.broadcast %157 : vector<16x1xi1> to vector<16x128xi1>
    %159 = arith.select %158, %153, %93 : vector<16x128xi1>, vector<16x128xf32>
    %160 = vector.extract_strided_slice %12 {offsets = [2, 0, 0], sizes = [1, 16, 384], strides = [1, 1, 1]} : vector<16x16x384xf32> to vector<1x16x384xf32>
    %161 = vector.shape_cast %160 : vector<1x16x384xf32> to vector<16x384xf32>
    %162 = arith.truncf %121 : vector<16x128xf32> to vector<16x128xbf16>
    %c0_61 = arith.constant 0 : index
    %c0_62 = arith.constant 0 : index
    %c0_63 = arith.constant 0 : index
    %163 = vector.load %arg5[%c0_61, %c0_62, %c0_63] : memref<2x128x384xbf16, #tpu.memory_space<vmem>>, vector<1x128x384xbf16>
    %164 = vector.shape_cast %163 : vector<1x128x384xbf16> to vector<128x384xbf16>
    %cst_64 = arith.constant dense<0.000000e+00> : vector<16x384xf32>
    %165 = tpu.matmul %162, %164, %cst_64 {dimension_numbers = #tpu.dot_dimension_numbers<[1], [0], [0], [1], [0, 0, 1, 1], [], []>} : vector<16x128xbf16>, vector<128x384xbf16>, vector<16x384xf32> -> vector<16x384xf32>
    %166 = vector.extract_strided_slice %161 {offsets = [0, 0], sizes = [16, 256], strides = [1, 1]} : vector<16x384xf32> to vector<16x256xf32>
    %167 = vector.extract_strided_slice %165 {offsets = [0, 0], sizes = [16, 256], strides = [1, 1]} : vector<16x384xf32> to vector<16x256xf32>
    %168 = arith.addf %166, %167 : vector<16x256xf32>
    %169 = arith.negf %168 : vector<16x256xf32>
    %170 = math.exp %169 : vector<16x256xf32>
    %cst_65 = arith.constant 1.000000e+00 : f32
    %171 = vector.broadcast %cst_65 : f32 to vector<16x256xf32>
    %172 = arith.addf %171, %170 : vector<16x256xf32>
    %173 = arith.divf %171, %172 : vector<16x256xf32>
    %174 = vector.extract_strided_slice %173 {offsets = [0, 0], sizes = [16, 128], strides = [1, 1]} : vector<16x256xf32> to vector<16x128xf32>
    %175 = vector.extract_strided_slice %173 {offsets = [0, 128], sizes = [16, 128], strides = [1, 1]} : vector<16x256xf32> to vector<16x128xf32>
    %176 = vector.extract_strided_slice %161 {offsets = [0, 256], sizes = [16, 128], strides = [1, 1]} : vector<16x384xf32> to vector<16x128xf32>
    %177 = vector.extract_strided_slice %165 {offsets = [0, 256], sizes = [16, 128], strides = [1, 1]} : vector<16x384xf32> to vector<16x128xf32>
    %178 = vector.broadcast %20 : vector<1x128xf32> to vector<16x128xf32>
    %179 = arith.addf %177, %178 : vector<16x128xf32>
    %180 = arith.mulf %174, %179 : vector<16x128xf32>
    %181 = arith.addf %176, %180 : vector<16x128xf32>
    %182 = math.tanh %181 : vector<16x128xf32>
    %cst_66 = arith.constant 1.000000e+00 : f32
    %183 = vector.broadcast %cst_66 : f32 to vector<16x128xf32>
    %184 = arith.subf %183, %175 : vector<16x128xf32>
    %185 = arith.mulf %184, %182 : vector<16x128xf32>
    %186 = arith.mulf %175, %121 : vector<16x128xf32>
    %187 = arith.addf %185, %186 : vector<16x128xf32>
    %188 = arith.truncf %187 : vector<16x128xf32> to vector<16x128xbf16>
    %c1_67 = arith.constant 1 : index
    %c0_68 = arith.constant 0 : index
    %c0_69 = arith.constant 0 : index
    %189 = vector.load %arg4[%c1_67, %c0_68, %c0_69] : memref<2x128x384xbf16, #tpu.memory_space<vmem>>, vector<1x128x384xbf16>
    %190 = vector.shape_cast %189 : vector<1x128x384xbf16> to vector<128x384xbf16>
    %cst_70 = arith.constant dense<0.000000e+00> : vector<16x384xf32>
    %191 = tpu.matmul %188, %190, %cst_70 {dimension_numbers = #tpu.dot_dimension_numbers<[1], [0], [0], [1], [0, 0, 1, 1], [], []>} : vector<16x128xbf16>, vector<128x384xbf16>, vector<16x384xf32> -> vector<16x384xf32>
    %192 = vector.broadcast %18 : vector<1x384xf32> to vector<16x384xf32>
    %193 = arith.addf %191, %192 : vector<16x384xf32>
    %194 = arith.truncf %153 : vector<16x128xf32> to vector<16x128xbf16>
    %c1_71 = arith.constant 1 : index
    %c0_72 = arith.constant 0 : index
    %c0_73 = arith.constant 0 : index
    %195 = vector.load %arg5[%c1_71, %c0_72, %c0_73] : memref<2x128x384xbf16, #tpu.memory_space<vmem>>, vector<1x128x384xbf16>
    %196 = vector.shape_cast %195 : vector<1x128x384xbf16> to vector<128x384xbf16>
    %cst_74 = arith.constant dense<0.000000e+00> : vector<16x384xf32>
    %197 = tpu.matmul %194, %196, %cst_74 {dimension_numbers = #tpu.dot_dimension_numbers<[1], [0], [0], [1], [0, 0, 1, 1], [], []>} : vector<16x128xbf16>, vector<128x384xbf16>, vector<16x384xf32> -> vector<16x384xf32>
    %198 = vector.extract_strided_slice %193 {offsets = [0, 0], sizes = [16, 256], strides = [1, 1]} : vector<16x384xf32> to vector<16x256xf32>
    %199 = vector.extract_strided_slice %197 {offsets = [0, 0], sizes = [16, 256], strides = [1, 1]} : vector<16x384xf32> to vector<16x256xf32>
    %200 = arith.addf %198, %199 : vector<16x256xf32>
    %201 = arith.negf %200 : vector<16x256xf32>
    %202 = math.exp %201 : vector<16x256xf32>
    %cst_75 = arith.constant 1.000000e+00 : f32
    %203 = vector.broadcast %cst_75 : f32 to vector<16x256xf32>
    %204 = arith.addf %203, %202 : vector<16x256xf32>
    %205 = arith.divf %203, %204 : vector<16x256xf32>
    %206 = vector.extract_strided_slice %205 {offsets = [0, 0], sizes = [16, 128], strides = [1, 1]} : vector<16x256xf32> to vector<16x128xf32>
    %207 = vector.extract_strided_slice %205 {offsets = [0, 128], sizes = [16, 128], strides = [1, 1]} : vector<16x256xf32> to vector<16x128xf32>
    %208 = vector.extract_strided_slice %193 {offsets = [0, 256], sizes = [16, 128], strides = [1, 1]} : vector<16x384xf32> to vector<16x128xf32>
    %209 = vector.extract_strided_slice %197 {offsets = [0, 256], sizes = [16, 128], strides = [1, 1]} : vector<16x384xf32> to vector<16x128xf32>
    %210 = vector.broadcast %22 : vector<1x128xf32> to vector<16x128xf32>
    %211 = arith.addf %209, %210 : vector<16x128xf32>
    %212 = arith.mulf %206, %211 : vector<16x128xf32>
    %213 = arith.addf %208, %212 : vector<16x128xf32>
    %214 = math.tanh %213 : vector<16x128xf32>
    %cst_76 = arith.constant 1.000000e+00 : f32
    %215 = vector.broadcast %cst_76 : f32 to vector<16x128xf32>
    %216 = arith.subf %215, %207 : vector<16x128xf32>
    %217 = arith.mulf %216, %214 : vector<16x128xf32>
    %218 = arith.mulf %207, %153 : vector<16x128xf32>
    %219 = arith.addf %217, %218 : vector<16x128xf32>
    %c2_i32 = arith.constant 2 : i32
    %220 = arith.addi %16, %c2_i32 : i32
    %221 = vector.broadcast %220 : i32 to vector<16x1xi32>
    %222 = arith.cmpi eq, %15, %221 : vector<16x1xi32>
    %223 = vector.shape_cast %222 : vector<16x1xi1> to vector<16x1xi1>
    %224 = vector.broadcast %223 : vector<16x1xi1> to vector<16x128xi1>
    %225 = arith.select %224, %219, %159 : vector<16x128xi1>, vector<16x128xf32>
    %226 = vector.extract_strided_slice %12 {offsets = [3, 0, 0], sizes = [1, 16, 384], strides = [1, 1, 1]} : vector<16x16x384xf32> to vector<1x16x384xf32>
    %227 = vector.shape_cast %226 : vector<1x16x384xf32> to vector<16x384xf32>
    %228 = arith.truncf %187 : vector<16x128xf32> to vector<16x128xbf16>
    %c0_77 = arith.constant 0 : index
    %c0_78 = arith.constant 0 : index
    %c0_79 = arith.constant 0 : index
    %229 = vector.load %arg5[%c0_77, %c0_78, %c0_79] : memref<2x128x384xbf16, #tpu.memory_space<vmem>>, vector<1x128x384xbf16>
    %230 = vector.shape_cast %229 : vector<1x128x384xbf16> to vector<128x384xbf16>
    %cst_80 = arith.constant dense<0.000000e+00> : vector<16x384xf32>
    %231 = tpu.matmul %228, %230, %cst_80 {dimension_numbers = #tpu.dot_dimension_numbers<[1], [0], [0], [1], [0, 0, 1, 1], [], []>} : vector<16x128xbf16>, vector<128x384xbf16>, vector<16x384xf32> -> vector<16x384xf32>
    %232 = vector.extract_strided_slice %227 {offsets = [0, 0], sizes = [16, 256], strides = [1, 1]} : vector<16x384xf32> to vector<16x256xf32>
    %233 = vector.extract_strided_slice %231 {offsets = [0, 0], sizes = [16, 256], strides = [1, 1]} : vector<16x384xf32> to vector<16x256xf32>
    %234 = arith.addf %232, %233 : vector<16x256xf32>
    %235 = arith.negf %234 : vector<16x256xf32>
    %236 = math.exp %235 : vector<16x256xf32>
    %cst_81 = arith.constant 1.000000e+00 : f32
    %237 = vector.broadcast %cst_81 : f32 to vector<16x256xf32>
    %238 = arith.addf %237, %236 : vector<16x256xf32>
    %239 = arith.divf %237, %238 : vector<16x256xf32>
    %240 = vector.extract_strided_slice %239 {offsets = [0, 0], sizes = [16, 128], strides = [1, 1]} : vector<16x256xf32> to vector<16x128xf32>
    %241 = vector.extract_strided_slice %239 {offsets = [0, 128], sizes = [16, 128], strides = [1, 1]} : vector<16x256xf32> to vector<16x128xf32>
    %242 = vector.extract_strided_slice %227 {offsets = [0, 256], sizes = [16, 128], strides = [1, 1]} : vector<16x384xf32> to vector<16x128xf32>
    %243 = vector.extract_strided_slice %231 {offsets = [0, 256], sizes = [16, 128], strides = [1, 1]} : vector<16x384xf32> to vector<16x128xf32>
    %244 = vector.broadcast %20 : vector<1x128xf32> to vector<16x128xf32>
    %245 = arith.addf %243, %244 : vector<16x128xf32>
    %246 = arith.mulf %240, %245 : vector<16x128xf32>
    %247 = arith.addf %242, %246 : vector<16x128xf32>
    %248 = math.tanh %247 : vector<16x128xf32>
    %cst_82 = arith.constant 1.000000e+00 : f32
    %249 = vector.broadcast %cst_82 : f32 to vector<16x128xf32>
    %250 = arith.subf %249, %241 : vector<16x128xf32>
    %251 = arith.mulf %250, %248 : vector<16x128xf32>
    %252 = arith.mulf %241, %187 : vector<16x128xf32>
    %253 = arith.addf %251, %252 : vector<16x128xf32>
    %254 = arith.truncf %253 : vector<16x128xf32> to vector<16x128xbf16>
    %c1_83 = arith.constant 1 : index
    %c0_84 = arith.constant 0 : index
    %c0_85 = arith.constant 0 : index
    %255 = vector.load %arg4[%c1_83, %c0_84, %c0_85] : memref<2x128x384xbf16, #tpu.memory_space<vmem>>, vector<1x128x384xbf16>
    %256 = vector.shape_cast %255 : vector<1x128x384xbf16> to vector<128x384xbf16>
    %cst_86 = arith.constant dense<0.000000e+00> : vector<16x384xf32>
    %257 = tpu.matmul %254, %256, %cst_86 {dimension_numbers = #tpu.dot_dimension_numbers<[1], [0], [0], [1], [0, 0, 1, 1], [], []>} : vector<16x128xbf16>, vector<128x384xbf16>, vector<16x384xf32> -> vector<16x384xf32>
    %258 = vector.broadcast %18 : vector<1x384xf32> to vector<16x384xf32>
    %259 = arith.addf %257, %258 : vector<16x384xf32>
    %260 = arith.truncf %219 : vector<16x128xf32> to vector<16x128xbf16>
    %c1_87 = arith.constant 1 : index
    %c0_88 = arith.constant 0 : index
    %c0_89 = arith.constant 0 : index
    %261 = vector.load %arg5[%c1_87, %c0_88, %c0_89] : memref<2x128x384xbf16, #tpu.memory_space<vmem>>, vector<1x128x384xbf16>
    %262 = vector.shape_cast %261 : vector<1x128x384xbf16> to vector<128x384xbf16>
    %cst_90 = arith.constant dense<0.000000e+00> : vector<16x384xf32>
    %263 = tpu.matmul %260, %262, %cst_90 {dimension_numbers = #tpu.dot_dimension_numbers<[1], [0], [0], [1], [0, 0, 1, 1], [], []>} : vector<16x128xbf16>, vector<128x384xbf16>, vector<16x384xf32> -> vector<16x384xf32>
    %264 = vector.extract_strided_slice %259 {offsets = [0, 0], sizes = [16, 256], strides = [1, 1]} : vector<16x384xf32> to vector<16x256xf32>
    %265 = vector.extract_strided_slice %263 {offsets = [0, 0], sizes = [16, 256], strides = [1, 1]} : vector<16x384xf32> to vector<16x256xf32>
    %266 = arith.addf %264, %265 : vector<16x256xf32>
    %267 = arith.negf %266 : vector<16x256xf32>
    %268 = math.exp %267 : vector<16x256xf32>
    %cst_91 = arith.constant 1.000000e+00 : f32
    %269 = vector.broadcast %cst_91 : f32 to vector<16x256xf32>
    %270 = arith.addf %269, %268 : vector<16x256xf32>
    %271 = arith.divf %269, %270 : vector<16x256xf32>
    %272 = vector.extract_strided_slice %271 {offsets = [0, 0], sizes = [16, 128], strides = [1, 1]} : vector<16x256xf32> to vector<16x128xf32>
    %273 = vector.extract_strided_slice %271 {offsets = [0, 128], sizes = [16, 128], strides = [1, 1]} : vector<16x256xf32> to vector<16x128xf32>
    %274 = vector.extract_strided_slice %259 {offsets = [0, 256], sizes = [16, 128], strides = [1, 1]} : vector<16x384xf32> to vector<16x128xf32>
    %275 = vector.extract_strided_slice %263 {offsets = [0, 256], sizes = [16, 128], strides = [1, 1]} : vector<16x384xf32> to vector<16x128xf32>
    %276 = vector.broadcast %22 : vector<1x128xf32> to vector<16x128xf32>
    %277 = arith.addf %275, %276 : vector<16x128xf32>
    %278 = arith.mulf %272, %277 : vector<16x128xf32>
    %279 = arith.addf %274, %278 : vector<16x128xf32>
    %280 = math.tanh %279 : vector<16x128xf32>
    %cst_92 = arith.constant 1.000000e+00 : f32
    %281 = vector.broadcast %cst_92 : f32 to vector<16x128xf32>
    %282 = arith.subf %281, %273 : vector<16x128xf32>
    %283 = arith.mulf %282, %280 : vector<16x128xf32>
    %284 = arith.mulf %273, %219 : vector<16x128xf32>
    %285 = arith.addf %283, %284 : vector<16x128xf32>
    %c3_i32 = arith.constant 3 : i32
    %286 = arith.addi %16, %c3_i32 : i32
    %287 = vector.broadcast %286 : i32 to vector<16x1xi32>
    %288 = arith.cmpi eq, %15, %287 : vector<16x1xi32>
    %289 = vector.shape_cast %288 : vector<16x1xi1> to vector<16x1xi1>
    %290 = vector.broadcast %289 : vector<16x1xi1> to vector<16x128xi1>
    %291 = arith.select %290, %285, %225 : vector<16x128xi1>, vector<16x128xf32>
    %292 = vector.extract_strided_slice %12 {offsets = [4, 0, 0], sizes = [1, 16, 384], strides = [1, 1, 1]} : vector<16x16x384xf32> to vector<1x16x384xf32>
    %293 = vector.shape_cast %292 : vector<1x16x384xf32> to vector<16x384xf32>
    %294 = arith.truncf %253 : vector<16x128xf32> to vector<16x128xbf16>
    %c0_93 = arith.constant 0 : index
    %c0_94 = arith.constant 0 : index
    %c0_95 = arith.constant 0 : index
    %295 = vector.load %arg5[%c0_93, %c0_94, %c0_95] : memref<2x128x384xbf16, #tpu.memory_space<vmem>>, vector<1x128x384xbf16>
    %296 = vector.shape_cast %295 : vector<1x128x384xbf16> to vector<128x384xbf16>
    %cst_96 = arith.constant dense<0.000000e+00> : vector<16x384xf32>
    %297 = tpu.matmul %294, %296, %cst_96 {dimension_numbers = #tpu.dot_dimension_numbers<[1], [0], [0], [1], [0, 0, 1, 1], [], []>} : vector<16x128xbf16>, vector<128x384xbf16>, vector<16x384xf32> -> vector<16x384xf32>
    %298 = vector.extract_strided_slice %293 {offsets = [0, 0], sizes = [16, 256], strides = [1, 1]} : vector<16x384xf32> to vector<16x256xf32>
    %299 = vector.extract_strided_slice %297 {offsets = [0, 0], sizes = [16, 256], strides = [1, 1]} : vector<16x384xf32> to vector<16x256xf32>
    %300 = arith.addf %298, %299 : vector<16x256xf32>
    %301 = arith.negf %300 : vector<16x256xf32>
    %302 = math.exp %301 : vector<16x256xf32>
    %cst_97 = arith.constant 1.000000e+00 : f32
    %303 = vector.broadcast %cst_97 : f32 to vector<16x256xf32>
    %304 = arith.addf %303, %302 : vector<16x256xf32>
    %305 = arith.divf %303, %304 : vector<16x256xf32>
    %306 = vector.extract_strided_slice %305 {offsets = [0, 0], sizes = [16, 128], strides = [1, 1]} : vector<16x256xf32> to vector<16x128xf32>
    %307 = vector.extract_strided_slice %305 {offsets = [0, 128], sizes = [16, 128], strides = [1, 1]} : vector<16x256xf32> to vector<16x128xf32>
    %308 = vector.extract_strided_slice %293 {offsets = [0, 256], sizes = [16, 128], strides = [1, 1]} : vector<16x384xf32> to vector<16x128xf32>
    %309 = vector.extract_strided_slice %297 {offsets = [0, 256], sizes = [16, 128], strides = [1, 1]} : vector<16x384xf32> to vector<16x128xf32>
    %310 = vector.broadcast %20 : vector<1x128xf32> to vector<16x128xf32>
    %311 = arith.addf %309, %310 : vector<16x128xf32>
    %312 = arith.mulf %306, %311 : vector<16x128xf32>
    %313 = arith.addf %308, %312 : vector<16x128xf32>
    %314 = math.tanh %313 : vector<16x128xf32>
    %cst_98 = arith.constant 1.000000e+00 : f32
    %315 = vector.broadcast %cst_98 : f32 to vector<16x128xf32>
    %316 = arith.subf %315, %307 : vector<16x128xf32>
    %317 = arith.mulf %316, %314 : vector<16x128xf32>
    %318 = arith.mulf %307, %253 : vector<16x128xf32>
    %319 = arith.addf %317, %318 : vector<16x128xf32>
    %320 = arith.truncf %319 : vector<16x128xf32> to vector<16x128xbf16>
    %c1_99 = arith.constant 1 : index
    %c0_100 = arith.constant 0 : index
    %c0_101 = arith.constant 0 : index
    %321 = vector.load %arg4[%c1_99, %c0_100, %c0_101] : memref<2x128x384xbf16, #tpu.memory_space<vmem>>, vector<1x128x384xbf16>
    %322 = vector.shape_cast %321 : vector<1x128x384xbf16> to vector<128x384xbf16>
    %cst_102 = arith.constant dense<0.000000e+00> : vector<16x384xf32>
    %323 = tpu.matmul %320, %322, %cst_102 {dimension_numbers = #tpu.dot_dimension_numbers<[1], [0], [0], [1], [0, 0, 1, 1], [], []>} : vector<16x128xbf16>, vector<128x384xbf16>, vector<16x384xf32> -> vector<16x384xf32>
    %324 = vector.broadcast %18 : vector<1x384xf32> to vector<16x384xf32>
    %325 = arith.addf %323, %324 : vector<16x384xf32>
    %326 = arith.truncf %285 : vector<16x128xf32> to vector<16x128xbf16>
    %c1_103 = arith.constant 1 : index
    %c0_104 = arith.constant 0 : index
    %c0_105 = arith.constant 0 : index
    %327 = vector.load %arg5[%c1_103, %c0_104, %c0_105] : memref<2x128x384xbf16, #tpu.memory_space<vmem>>, vector<1x128x384xbf16>
    %328 = vector.shape_cast %327 : vector<1x128x384xbf16> to vector<128x384xbf16>
    %cst_106 = arith.constant dense<0.000000e+00> : vector<16x384xf32>
    %329 = tpu.matmul %326, %328, %cst_106 {dimension_numbers = #tpu.dot_dimension_numbers<[1], [0], [0], [1], [0, 0, 1, 1], [], []>} : vector<16x128xbf16>, vector<128x384xbf16>, vector<16x384xf32> -> vector<16x384xf32>
    %330 = vector.extract_strided_slice %325 {offsets = [0, 0], sizes = [16, 256], strides = [1, 1]} : vector<16x384xf32> to vector<16x256xf32>
    %331 = vector.extract_strided_slice %329 {offsets = [0, 0], sizes = [16, 256], strides = [1, 1]} : vector<16x384xf32> to vector<16x256xf32>
    %332 = arith.addf %330, %331 : vector<16x256xf32>
    %333 = arith.negf %332 : vector<16x256xf32>
    %334 = math.exp %333 : vector<16x256xf32>
    %cst_107 = arith.constant 1.000000e+00 : f32
    %335 = vector.broadcast %cst_107 : f32 to vector<16x256xf32>
    %336 = arith.addf %335, %334 : vector<16x256xf32>
    %337 = arith.divf %335, %336 : vector<16x256xf32>
    %338 = vector.extract_strided_slice %337 {offsets = [0, 0], sizes = [16, 128], strides = [1, 1]} : vector<16x256xf32> to vector<16x128xf32>
    %339 = vector.extract_strided_slice %337 {offsets = [0, 128], sizes = [16, 128], strides = [1, 1]} : vector<16x256xf32> to vector<16x128xf32>
    %340 = vector.extract_strided_slice %325 {offsets = [0, 256], sizes = [16, 128], strides = [1, 1]} : vector<16x384xf32> to vector<16x128xf32>
    %341 = vector.extract_strided_slice %329 {offsets = [0, 256], sizes = [16, 128], strides = [1, 1]} : vector<16x384xf32> to vector<16x128xf32>
    %342 = vector.broadcast %22 : vector<1x128xf32> to vector<16x128xf32>
    %343 = arith.addf %341, %342 : vector<16x128xf32>
    %344 = arith.mulf %338, %343 : vector<16x128xf32>
    %345 = arith.addf %340, %344 : vector<16x128xf32>
    %346 = math.tanh %345 : vector<16x128xf32>
    %cst_108 = arith.constant 1.000000e+00 : f32
    %347 = vector.broadcast %cst_108 : f32 to vector<16x128xf32>
    %348 = arith.subf %347, %339 : vector<16x128xf32>
    %349 = arith.mulf %348, %346 : vector<16x128xf32>
    %350 = arith.mulf %339, %285 : vector<16x128xf32>
    %351 = arith.addf %349, %350 : vector<16x128xf32>
    %c4_i32 = arith.constant 4 : i32
    %352 = arith.addi %16, %c4_i32 : i32
    %353 = vector.broadcast %352 : i32 to vector<16x1xi32>
    %354 = arith.cmpi eq, %15, %353 : vector<16x1xi32>
    %355 = vector.shape_cast %354 : vector<16x1xi1> to vector<16x1xi1>
    %356 = vector.broadcast %355 : vector<16x1xi1> to vector<16x128xi1>
    %357 = arith.select %356, %351, %291 : vector<16x128xi1>, vector<16x128xf32>
    %358 = vector.extract_strided_slice %12 {offsets = [5, 0, 0], sizes = [1, 16, 384], strides = [1, 1, 1]} : vector<16x16x384xf32> to vector<1x16x384xf32>
    %359 = vector.shape_cast %358 : vector<1x16x384xf32> to vector<16x384xf32>
    %360 = arith.truncf %319 : vector<16x128xf32> to vector<16x128xbf16>
    %c0_109 = arith.constant 0 : index
    %c0_110 = arith.constant 0 : index
    %c0_111 = arith.constant 0 : index
    %361 = vector.load %arg5[%c0_109, %c0_110, %c0_111] : memref<2x128x384xbf16, #tpu.memory_space<vmem>>, vector<1x128x384xbf16>
    %362 = vector.shape_cast %361 : vector<1x128x384xbf16> to vector<128x384xbf16>
    %cst_112 = arith.constant dense<0.000000e+00> : vector<16x384xf32>
    %363 = tpu.matmul %360, %362, %cst_112 {dimension_numbers = #tpu.dot_dimension_numbers<[1], [0], [0], [1], [0, 0, 1, 1], [], []>} : vector<16x128xbf16>, vector<128x384xbf16>, vector<16x384xf32> -> vector<16x384xf32>
    %364 = vector.extract_strided_slice %359 {offsets = [0, 0], sizes = [16, 256], strides = [1, 1]} : vector<16x384xf32> to vector<16x256xf32>
    %365 = vector.extract_strided_slice %363 {offsets = [0, 0], sizes = [16, 256], strides = [1, 1]} : vector<16x384xf32> to vector<16x256xf32>
    %366 = arith.addf %364, %365 : vector<16x256xf32>
    %367 = arith.negf %366 : vector<16x256xf32>
    %368 = math.exp %367 : vector<16x256xf32>
    %cst_113 = arith.constant 1.000000e+00 : f32
    %369 = vector.broadcast %cst_113 : f32 to vector<16x256xf32>
    %370 = arith.addf %369, %368 : vector<16x256xf32>
    %371 = arith.divf %369, %370 : vector<16x256xf32>
    %372 = vector.extract_strided_slice %371 {offsets = [0, 0], sizes = [16, 128], strides = [1, 1]} : vector<16x256xf32> to vector<16x128xf32>
    %373 = vector.extract_strided_slice %371 {offsets = [0, 128], sizes = [16, 128], strides = [1, 1]} : vector<16x256xf32> to vector<16x128xf32>
    %374 = vector.extract_strided_slice %359 {offsets = [0, 256], sizes = [16, 128], strides = [1, 1]} : vector<16x384xf32> to vector<16x128xf32>
    %375 = vector.extract_strided_slice %363 {offsets = [0, 256], sizes = [16, 128], strides = [1, 1]} : vector<16x384xf32> to vector<16x128xf32>
    %376 = vector.broadcast %20 : vector<1x128xf32> to vector<16x128xf32>
    %377 = arith.addf %375, %376 : vector<16x128xf32>
    %378 = arith.mulf %372, %377 : vector<16x128xf32>
    %379 = arith.addf %374, %378 : vector<16x128xf32>
    %380 = math.tanh %379 : vector<16x128xf32>
    %cst_114 = arith.constant 1.000000e+00 : f32
    %381 = vector.broadcast %cst_114 : f32 to vector<16x128xf32>
    %382 = arith.subf %381, %373 : vector<16x128xf32>
    %383 = arith.mulf %382, %380 : vector<16x128xf32>
    %384 = arith.mulf %373, %319 : vector<16x128xf32>
    %385 = arith.addf %383, %384 : vector<16x128xf32>
    %386 = arith.truncf %385 : vector<16x128xf32> to vector<16x128xbf16>
    %c1_115 = arith.constant 1 : index
    %c0_116 = arith.constant 0 : index
    %c0_117 = arith.constant 0 : index
    %387 = vector.load %arg4[%c1_115, %c0_116, %c0_117] : memref<2x128x384xbf16, #tpu.memory_space<vmem>>, vector<1x128x384xbf16>
    %388 = vector.shape_cast %387 : vector<1x128x384xbf16> to vector<128x384xbf16>
    %cst_118 = arith.constant dense<0.000000e+00> : vector<16x384xf32>
    %389 = tpu.matmul %386, %388, %cst_118 {dimension_numbers = #tpu.dot_dimension_numbers<[1], [0], [0], [1], [0, 0, 1, 1], [], []>} : vector<16x128xbf16>, vector<128x384xbf16>, vector<16x384xf32> -> vector<16x384xf32>
    %390 = vector.broadcast %18 : vector<1x384xf32> to vector<16x384xf32>
    %391 = arith.addf %389, %390 : vector<16x384xf32>
    %392 = arith.truncf %351 : vector<16x128xf32> to vector<16x128xbf16>
    %c1_119 = arith.constant 1 : index
    %c0_120 = arith.constant 0 : index
    %c0_121 = arith.constant 0 : index
    %393 = vector.load %arg5[%c1_119, %c0_120, %c0_121] : memref<2x128x384xbf16, #tpu.memory_space<vmem>>, vector<1x128x384xbf16>
    %394 = vector.shape_cast %393 : vector<1x128x384xbf16> to vector<128x384xbf16>
    %cst_122 = arith.constant dense<0.000000e+00> : vector<16x384xf32>
    %395 = tpu.matmul %392, %394, %cst_122 {dimension_numbers = #tpu.dot_dimension_numbers<[1], [0], [0], [1], [0, 0, 1, 1], [], []>} : vector<16x128xbf16>, vector<128x384xbf16>, vector<16x384xf32> -> vector<16x384xf32>
    %396 = vector.extract_strided_slice %391 {offsets = [0, 0], sizes = [16, 256], strides = [1, 1]} : vector<16x384xf32> to vector<16x256xf32>
    %397 = vector.extract_strided_slice %395 {offsets = [0, 0], sizes = [16, 256], strides = [1, 1]} : vector<16x384xf32> to vector<16x256xf32>
    %398 = arith.addf %396, %397 : vector<16x256xf32>
    %399 = arith.negf %398 : vector<16x256xf32>
    %400 = math.exp %399 : vector<16x256xf32>
    %cst_123 = arith.constant 1.000000e+00 : f32
    %401 = vector.broadcast %cst_123 : f32 to vector<16x256xf32>
    %402 = arith.addf %401, %400 : vector<16x256xf32>
    %403 = arith.divf %401, %402 : vector<16x256xf32>
    %404 = vector.extract_strided_slice %403 {offsets = [0, 0], sizes = [16, 128], strides = [1, 1]} : vector<16x256xf32> to vector<16x128xf32>
    %405 = vector.extract_strided_slice %403 {offsets = [0, 128], sizes = [16, 128], strides = [1, 1]} : vector<16x256xf32> to vector<16x128xf32>
    %406 = vector.extract_strided_slice %391 {offsets = [0, 256], sizes = [16, 128], strides = [1, 1]} : vector<16x384xf32> to vector<16x128xf32>
    %407 = vector.extract_strided_slice %395 {offsets = [0, 256], sizes = [16, 128], strides = [1, 1]} : vector<16x384xf32> to vector<16x128xf32>
    %408 = vector.broadcast %22 : vector<1x128xf32> to vector<16x128xf32>
    %409 = arith.addf %407, %408 : vector<16x128xf32>
    %410 = arith.mulf %404, %409 : vector<16x128xf32>
    %411 = arith.addf %406, %410 : vector<16x128xf32>
    %412 = math.tanh %411 : vector<16x128xf32>
    %cst_124 = arith.constant 1.000000e+00 : f32
    %413 = vector.broadcast %cst_124 : f32 to vector<16x128xf32>
    %414 = arith.subf %413, %405 : vector<16x128xf32>
    %415 = arith.mulf %414, %412 : vector<16x128xf32>
    %416 = arith.mulf %405, %351 : vector<16x128xf32>
    %417 = arith.addf %415, %416 : vector<16x128xf32>
    %c5_i32 = arith.constant 5 : i32
    %418 = arith.addi %16, %c5_i32 : i32
    %419 = vector.broadcast %418 : i32 to vector<16x1xi32>
    %420 = arith.cmpi eq, %15, %419 : vector<16x1xi32>
    %421 = vector.shape_cast %420 : vector<16x1xi1> to vector<16x1xi1>
    %422 = vector.broadcast %421 : vector<16x1xi1> to vector<16x128xi1>
    %423 = arith.select %422, %417, %357 : vector<16x128xi1>, vector<16x128xf32>
    %424 = vector.extract_strided_slice %12 {offsets = [6, 0, 0], sizes = [1, 16, 384], strides = [1, 1, 1]} : vector<16x16x384xf32> to vector<1x16x384xf32>
    %425 = vector.shape_cast %424 : vector<1x16x384xf32> to vector<16x384xf32>
    %426 = arith.truncf %385 : vector<16x128xf32> to vector<16x128xbf16>
    %c0_125 = arith.constant 0 : index
    %c0_126 = arith.constant 0 : index
    %c0_127 = arith.constant 0 : index
    %427 = vector.load %arg5[%c0_125, %c0_126, %c0_127] : memref<2x128x384xbf16, #tpu.memory_space<vmem>>, vector<1x128x384xbf16>
    %428 = vector.shape_cast %427 : vector<1x128x384xbf16> to vector<128x384xbf16>
    %cst_128 = arith.constant dense<0.000000e+00> : vector<16x384xf32>
    %429 = tpu.matmul %426, %428, %cst_128 {dimension_numbers = #tpu.dot_dimension_numbers<[1], [0], [0], [1], [0, 0, 1, 1], [], []>} : vector<16x128xbf16>, vector<128x384xbf16>, vector<16x384xf32> -> vector<16x384xf32>
    %430 = vector.extract_strided_slice %425 {offsets = [0, 0], sizes = [16, 256], strides = [1, 1]} : vector<16x384xf32> to vector<16x256xf32>
    %431 = vector.extract_strided_slice %429 {offsets = [0, 0], sizes = [16, 256], strides = [1, 1]} : vector<16x384xf32> to vector<16x256xf32>
    %432 = arith.addf %430, %431 : vector<16x256xf32>
    %433 = arith.negf %432 : vector<16x256xf32>
    %434 = math.exp %433 : vector<16x256xf32>
    %cst_129 = arith.constant 1.000000e+00 : f32
    %435 = vector.broadcast %cst_129 : f32 to vector<16x256xf32>
    %436 = arith.addf %435, %434 : vector<16x256xf32>
    %437 = arith.divf %435, %436 : vector<16x256xf32>
    %438 = vector.extract_strided_slice %437 {offsets = [0, 0], sizes = [16, 128], strides = [1, 1]} : vector<16x256xf32> to vector<16x128xf32>
    %439 = vector.extract_strided_slice %437 {offsets = [0, 128], sizes = [16, 128], strides = [1, 1]} : vector<16x256xf32> to vector<16x128xf32>
    %440 = vector.extract_strided_slice %425 {offsets = [0, 256], sizes = [16, 128], strides = [1, 1]} : vector<16x384xf32> to vector<16x128xf32>
    %441 = vector.extract_strided_slice %429 {offsets = [0, 256], sizes = [16, 128], strides = [1, 1]} : vector<16x384xf32> to vector<16x128xf32>
    %442 = vector.broadcast %20 : vector<1x128xf32> to vector<16x128xf32>
    %443 = arith.addf %441, %442 : vector<16x128xf32>
    %444 = arith.mulf %438, %443 : vector<16x128xf32>
    %445 = arith.addf %440, %444 : vector<16x128xf32>
    %446 = math.tanh %445 : vector<16x128xf32>
    %cst_130 = arith.constant 1.000000e+00 : f32
    %447 = vector.broadcast %cst_130 : f32 to vector<16x128xf32>
    %448 = arith.subf %447, %439 : vector<16x128xf32>
    %449 = arith.mulf %448, %446 : vector<16x128xf32>
    %450 = arith.mulf %439, %385 : vector<16x128xf32>
    %451 = arith.addf %449, %450 : vector<16x128xf32>
    %452 = arith.truncf %451 : vector<16x128xf32> to vector<16x128xbf16>
    %c1_131 = arith.constant 1 : index
    %c0_132 = arith.constant 0 : index
    %c0_133 = arith.constant 0 : index
    %453 = vector.load %arg4[%c1_131, %c0_132, %c0_133] : memref<2x128x384xbf16, #tpu.memory_space<vmem>>, vector<1x128x384xbf16>
    %454 = vector.shape_cast %453 : vector<1x128x384xbf16> to vector<128x384xbf16>
    %cst_134 = arith.constant dense<0.000000e+00> : vector<16x384xf32>
    %455 = tpu.matmul %452, %454, %cst_134 {dimension_numbers = #tpu.dot_dimension_numbers<[1], [0], [0], [1], [0, 0, 1, 1], [], []>} : vector<16x128xbf16>, vector<128x384xbf16>, vector<16x384xf32> -> vector<16x384xf32>
    %456 = vector.broadcast %18 : vector<1x384xf32> to vector<16x384xf32>
    %457 = arith.addf %455, %456 : vector<16x384xf32>
    %458 = arith.truncf %417 : vector<16x128xf32> to vector<16x128xbf16>
    %c1_135 = arith.constant 1 : index
    %c0_136 = arith.constant 0 : index
    %c0_137 = arith.constant 0 : index
    %459 = vector.load %arg5[%c1_135, %c0_136, %c0_137] : memref<2x128x384xbf16, #tpu.memory_space<vmem>>, vector<1x128x384xbf16>
    %460 = vector.shape_cast %459 : vector<1x128x384xbf16> to vector<128x384xbf16>
    %cst_138 = arith.constant dense<0.000000e+00> : vector<16x384xf32>
    %461 = tpu.matmul %458, %460, %cst_138 {dimension_numbers = #tpu.dot_dimension_numbers<[1], [0], [0], [1], [0, 0, 1, 1], [], []>} : vector<16x128xbf16>, vector<128x384xbf16>, vector<16x384xf32> -> vector<16x384xf32>
    %462 = vector.extract_strided_slice %457 {offsets = [0, 0], sizes = [16, 256], strides = [1, 1]} : vector<16x384xf32> to vector<16x256xf32>
    %463 = vector.extract_strided_slice %461 {offsets = [0, 0], sizes = [16, 256], strides = [1, 1]} : vector<16x384xf32> to vector<16x256xf32>
    %464 = arith.addf %462, %463 : vector<16x256xf32>
    %465 = arith.negf %464 : vector<16x256xf32>
    %466 = math.exp %465 : vector<16x256xf32>
    %cst_139 = arith.constant 1.000000e+00 : f32
    %467 = vector.broadcast %cst_139 : f32 to vector<16x256xf32>
    %468 = arith.addf %467, %466 : vector<16x256xf32>
    %469 = arith.divf %467, %468 : vector<16x256xf32>
    %470 = vector.extract_strided_slice %469 {offsets = [0, 0], sizes = [16, 128], strides = [1, 1]} : vector<16x256xf32> to vector<16x128xf32>
    %471 = vector.extract_strided_slice %469 {offsets = [0, 128], sizes = [16, 128], strides = [1, 1]} : vector<16x256xf32> to vector<16x128xf32>
    %472 = vector.extract_strided_slice %457 {offsets = [0, 256], sizes = [16, 128], strides = [1, 1]} : vector<16x384xf32> to vector<16x128xf32>
    %473 = vector.extract_strided_slice %461 {offsets = [0, 256], sizes = [16, 128], strides = [1, 1]} : vector<16x384xf32> to vector<16x128xf32>
    %474 = vector.broadcast %22 : vector<1x128xf32> to vector<16x128xf32>
    %475 = arith.addf %473, %474 : vector<16x128xf32>
    %476 = arith.mulf %470, %475 : vector<16x128xf32>
    %477 = arith.addf %472, %476 : vector<16x128xf32>
    %478 = math.tanh %477 : vector<16x128xf32>
    %cst_140 = arith.constant 1.000000e+00 : f32
    %479 = vector.broadcast %cst_140 : f32 to vector<16x128xf32>
    %480 = arith.subf %479, %471 : vector<16x128xf32>
    %481 = arith.mulf %480, %478 : vector<16x128xf32>
    %482 = arith.mulf %471, %417 : vector<16x128xf32>
    %483 = arith.addf %481, %482 : vector<16x128xf32>
    %c6_i32 = arith.constant 6 : i32
    %484 = arith.addi %16, %c6_i32 : i32
    %485 = vector.broadcast %484 : i32 to vector<16x1xi32>
    %486 = arith.cmpi eq, %15, %485 : vector<16x1xi32>
    %487 = vector.shape_cast %486 : vector<16x1xi1> to vector<16x1xi1>
    %488 = vector.broadcast %487 : vector<16x1xi1> to vector<16x128xi1>
    %489 = arith.select %488, %483, %423 : vector<16x128xi1>, vector<16x128xf32>
    %490 = vector.extract_strided_slice %12 {offsets = [7, 0, 0], sizes = [1, 16, 384], strides = [1, 1, 1]} : vector<16x16x384xf32> to vector<1x16x384xf32>
    %491 = vector.shape_cast %490 : vector<1x16x384xf32> to vector<16x384xf32>
    %492 = arith.truncf %451 : vector<16x128xf32> to vector<16x128xbf16>
    %c0_141 = arith.constant 0 : index
    %c0_142 = arith.constant 0 : index
    %c0_143 = arith.constant 0 : index
    %493 = vector.load %arg5[%c0_141, %c0_142, %c0_143] : memref<2x128x384xbf16, #tpu.memory_space<vmem>>, vector<1x128x384xbf16>
    %494 = vector.shape_cast %493 : vector<1x128x384xbf16> to vector<128x384xbf16>
    %cst_144 = arith.constant dense<0.000000e+00> : vector<16x384xf32>
    %495 = tpu.matmul %492, %494, %cst_144 {dimension_numbers = #tpu.dot_dimension_numbers<[1], [0], [0], [1], [0, 0, 1, 1], [], []>} : vector<16x128xbf16>, vector<128x384xbf16>, vector<16x384xf32> -> vector<16x384xf32>
    %496 = vector.extract_strided_slice %491 {offsets = [0, 0], sizes = [16, 256], strides = [1, 1]} : vector<16x384xf32> to vector<16x256xf32>
    %497 = vector.extract_strided_slice %495 {offsets = [0, 0], sizes = [16, 256], strides = [1, 1]} : vector<16x384xf32> to vector<16x256xf32>
    %498 = arith.addf %496, %497 : vector<16x256xf32>
    %499 = arith.negf %498 : vector<16x256xf32>
    %500 = math.exp %499 : vector<16x256xf32>
    %cst_145 = arith.constant 1.000000e+00 : f32
    %501 = vector.broadcast %cst_145 : f32 to vector<16x256xf32>
    %502 = arith.addf %501, %500 : vector<16x256xf32>
    %503 = arith.divf %501, %502 : vector<16x256xf32>
    %504 = vector.extract_strided_slice %503 {offsets = [0, 0], sizes = [16, 128], strides = [1, 1]} : vector<16x256xf32> to vector<16x128xf32>
    %505 = vector.extract_strided_slice %503 {offsets = [0, 128], sizes = [16, 128], strides = [1, 1]} : vector<16x256xf32> to vector<16x128xf32>
    %506 = vector.extract_strided_slice %491 {offsets = [0, 256], sizes = [16, 128], strides = [1, 1]} : vector<16x384xf32> to vector<16x128xf32>
    %507 = vector.extract_strided_slice %495 {offsets = [0, 256], sizes = [16, 128], strides = [1, 1]} : vector<16x384xf32> to vector<16x128xf32>
    %508 = vector.broadcast %20 : vector<1x128xf32> to vector<16x128xf32>
    %509 = arith.addf %507, %508 : vector<16x128xf32>
    %510 = arith.mulf %504, %509 : vector<16x128xf32>
    %511 = arith.addf %506, %510 : vector<16x128xf32>
    %512 = math.tanh %511 : vector<16x128xf32>
    %cst_146 = arith.constant 1.000000e+00 : f32
    %513 = vector.broadcast %cst_146 : f32 to vector<16x128xf32>
    %514 = arith.subf %513, %505 : vector<16x128xf32>
    %515 = arith.mulf %514, %512 : vector<16x128xf32>
    %516 = arith.mulf %505, %451 : vector<16x128xf32>
    %517 = arith.addf %515, %516 : vector<16x128xf32>
    %518 = arith.truncf %517 : vector<16x128xf32> to vector<16x128xbf16>
    %c1_147 = arith.constant 1 : index
    %c0_148 = arith.constant 0 : index
    %c0_149 = arith.constant 0 : index
    %519 = vector.load %arg4[%c1_147, %c0_148, %c0_149] : memref<2x128x384xbf16, #tpu.memory_space<vmem>>, vector<1x128x384xbf16>
    %520 = vector.shape_cast %519 : vector<1x128x384xbf16> to vector<128x384xbf16>
    %cst_150 = arith.constant dense<0.000000e+00> : vector<16x384xf32>
    %521 = tpu.matmul %518, %520, %cst_150 {dimension_numbers = #tpu.dot_dimension_numbers<[1], [0], [0], [1], [0, 0, 1, 1], [], []>} : vector<16x128xbf16>, vector<128x384xbf16>, vector<16x384xf32> -> vector<16x384xf32>
    %522 = vector.broadcast %18 : vector<1x384xf32> to vector<16x384xf32>
    %523 = arith.addf %521, %522 : vector<16x384xf32>
    %524 = arith.truncf %483 : vector<16x128xf32> to vector<16x128xbf16>
    %c1_151 = arith.constant 1 : index
    %c0_152 = arith.constant 0 : index
    %c0_153 = arith.constant 0 : index
    %525 = vector.load %arg5[%c1_151, %c0_152, %c0_153] : memref<2x128x384xbf16, #tpu.memory_space<vmem>>, vector<1x128x384xbf16>
    %526 = vector.shape_cast %525 : vector<1x128x384xbf16> to vector<128x384xbf16>
    %cst_154 = arith.constant dense<0.000000e+00> : vector<16x384xf32>
    %527 = tpu.matmul %524, %526, %cst_154 {dimension_numbers = #tpu.dot_dimension_numbers<[1], [0], [0], [1], [0, 0, 1, 1], [], []>} : vector<16x128xbf16>, vector<128x384xbf16>, vector<16x384xf32> -> vector<16x384xf32>
    %528 = vector.extract_strided_slice %523 {offsets = [0, 0], sizes = [16, 256], strides = [1, 1]} : vector<16x384xf32> to vector<16x256xf32>
    %529 = vector.extract_strided_slice %527 {offsets = [0, 0], sizes = [16, 256], strides = [1, 1]} : vector<16x384xf32> to vector<16x256xf32>
    %530 = arith.addf %528, %529 : vector<16x256xf32>
    %531 = arith.negf %530 : vector<16x256xf32>
    %532 = math.exp %531 : vector<16x256xf32>
    %cst_155 = arith.constant 1.000000e+00 : f32
    %533 = vector.broadcast %cst_155 : f32 to vector<16x256xf32>
    %534 = arith.addf %533, %532 : vector<16x256xf32>
    %535 = arith.divf %533, %534 : vector<16x256xf32>
    %536 = vector.extract_strided_slice %535 {offsets = [0, 0], sizes = [16, 128], strides = [1, 1]} : vector<16x256xf32> to vector<16x128xf32>
    %537 = vector.extract_strided_slice %535 {offsets = [0, 128], sizes = [16, 128], strides = [1, 1]} : vector<16x256xf32> to vector<16x128xf32>
    %538 = vector.extract_strided_slice %523 {offsets = [0, 256], sizes = [16, 128], strides = [1, 1]} : vector<16x384xf32> to vector<16x128xf32>
    %539 = vector.extract_strided_slice %527 {offsets = [0, 256], sizes = [16, 128], strides = [1, 1]} : vector<16x384xf32> to vector<16x128xf32>
    %540 = vector.broadcast %22 : vector<1x128xf32> to vector<16x128xf32>
    %541 = arith.addf %539, %540 : vector<16x128xf32>
    %542 = arith.mulf %536, %541 : vector<16x128xf32>
    %543 = arith.addf %538, %542 : vector<16x128xf32>
    %544 = math.tanh %543 : vector<16x128xf32>
    %cst_156 = arith.constant 1.000000e+00 : f32
    %545 = vector.broadcast %cst_156 : f32 to vector<16x128xf32>
    %546 = arith.subf %545, %537 : vector<16x128xf32>
    %547 = arith.mulf %546, %544 : vector<16x128xf32>
    %548 = arith.mulf %537, %483 : vector<16x128xf32>
    %549 = arith.addf %547, %548 : vector<16x128xf32>
    %c7_i32 = arith.constant 7 : i32
    %550 = arith.addi %16, %c7_i32 : i32
    %551 = vector.broadcast %550 : i32 to vector<16x1xi32>
    %552 = arith.cmpi eq, %15, %551 : vector<16x1xi32>
    %553 = vector.shape_cast %552 : vector<16x1xi1> to vector<16x1xi1>
    %554 = vector.broadcast %553 : vector<16x1xi1> to vector<16x128xi1>
    %555 = arith.select %554, %549, %489 : vector<16x128xi1>, vector<16x128xf32>
    %556 = vector.extract_strided_slice %12 {offsets = [8, 0, 0], sizes = [1, 16, 384], strides = [1, 1, 1]} : vector<16x16x384xf32> to vector<1x16x384xf32>
    %557 = vector.shape_cast %556 : vector<1x16x384xf32> to vector<16x384xf32>
    %558 = arith.truncf %517 : vector<16x128xf32> to vector<16x128xbf16>
    %c0_157 = arith.constant 0 : index
    %c0_158 = arith.constant 0 : index
    %c0_159 = arith.constant 0 : index
    %559 = vector.load %arg5[%c0_157, %c0_158, %c0_159] : memref<2x128x384xbf16, #tpu.memory_space<vmem>>, vector<1x128x384xbf16>
    %560 = vector.shape_cast %559 : vector<1x128x384xbf16> to vector<128x384xbf16>
    %cst_160 = arith.constant dense<0.000000e+00> : vector<16x384xf32>
    %561 = tpu.matmul %558, %560, %cst_160 {dimension_numbers = #tpu.dot_dimension_numbers<[1], [0], [0], [1], [0, 0, 1, 1], [], []>} : vector<16x128xbf16>, vector<128x384xbf16>, vector<16x384xf32> -> vector<16x384xf32>
    %562 = vector.extract_strided_slice %557 {offsets = [0, 0], sizes = [16, 256], strides = [1, 1]} : vector<16x384xf32> to vector<16x256xf32>
    %563 = vector.extract_strided_slice %561 {offsets = [0, 0], sizes = [16, 256], strides = [1, 1]} : vector<16x384xf32> to vector<16x256xf32>
    %564 = arith.addf %562, %563 : vector<16x256xf32>
    %565 = arith.negf %564 : vector<16x256xf32>
    %566 = math.exp %565 : vector<16x256xf32>
    %cst_161 = arith.constant 1.000000e+00 : f32
    %567 = vector.broadcast %cst_161 : f32 to vector<16x256xf32>
    %568 = arith.addf %567, %566 : vector<16x256xf32>
    %569 = arith.divf %567, %568 : vector<16x256xf32>
    %570 = vector.extract_strided_slice %569 {offsets = [0, 0], sizes = [16, 128], strides = [1, 1]} : vector<16x256xf32> to vector<16x128xf32>
    %571 = vector.extract_strided_slice %569 {offsets = [0, 128], sizes = [16, 128], strides = [1, 1]} : vector<16x256xf32> to vector<16x128xf32>
    %572 = vector.extract_strided_slice %557 {offsets = [0, 256], sizes = [16, 128], strides = [1, 1]} : vector<16x384xf32> to vector<16x128xf32>
    %573 = vector.extract_strided_slice %561 {offsets = [0, 256], sizes = [16, 128], strides = [1, 1]} : vector<16x384xf32> to vector<16x128xf32>
    %574 = vector.broadcast %20 : vector<1x128xf32> to vector<16x128xf32>
    %575 = arith.addf %573, %574 : vector<16x128xf32>
    %576 = arith.mulf %570, %575 : vector<16x128xf32>
    %577 = arith.addf %572, %576 : vector<16x128xf32>
    %578 = math.tanh %577 : vector<16x128xf32>
    %cst_162 = arith.constant 1.000000e+00 : f32
    %579 = vector.broadcast %cst_162 : f32 to vector<16x128xf32>
    %580 = arith.subf %579, %571 : vector<16x128xf32>
    %581 = arith.mulf %580, %578 : vector<16x128xf32>
    %582 = arith.mulf %571, %517 : vector<16x128xf32>
    %583 = arith.addf %581, %582 : vector<16x128xf32>
    %584 = arith.truncf %583 : vector<16x128xf32> to vector<16x128xbf16>
    %c1_163 = arith.constant 1 : index
    %c0_164 = arith.constant 0 : index
    %c0_165 = arith.constant 0 : index
    %585 = vector.load %arg4[%c1_163, %c0_164, %c0_165] : memref<2x128x384xbf16, #tpu.memory_space<vmem>>, vector<1x128x384xbf16>
    %586 = vector.shape_cast %585 : vector<1x128x384xbf16> to vector<128x384xbf16>
    %cst_166 = arith.constant dense<0.000000e+00> : vector<16x384xf32>
    %587 = tpu.matmul %584, %586, %cst_166 {dimension_numbers = #tpu.dot_dimension_numbers<[1], [0], [0], [1], [0, 0, 1, 1], [], []>} : vector<16x128xbf16>, vector<128x384xbf16>, vector<16x384xf32> -> vector<16x384xf32>
    %588 = vector.broadcast %18 : vector<1x384xf32> to vector<16x384xf32>
    %589 = arith.addf %587, %588 : vector<16x384xf32>
    %590 = arith.truncf %549 : vector<16x128xf32> to vector<16x128xbf16>
    %c1_167 = arith.constant 1 : index
    %c0_168 = arith.constant 0 : index
    %c0_169 = arith.constant 0 : index
    %591 = vector.load %arg5[%c1_167, %c0_168, %c0_169] : memref<2x128x384xbf16, #tpu.memory_space<vmem>>, vector<1x128x384xbf16>
    %592 = vector.shape_cast %591 : vector<1x128x384xbf16> to vector<128x384xbf16>
    %cst_170 = arith.constant dense<0.000000e+00> : vector<16x384xf32>
    %593 = tpu.matmul %590, %592, %cst_170 {dimension_numbers = #tpu.dot_dimension_numbers<[1], [0], [0], [1], [0, 0, 1, 1], [], []>} : vector<16x128xbf16>, vector<128x384xbf16>, vector<16x384xf32> -> vector<16x384xf32>
    %594 = vector.extract_strided_slice %589 {offsets = [0, 0], sizes = [16, 256], strides = [1, 1]} : vector<16x384xf32> to vector<16x256xf32>
    %595 = vector.extract_strided_slice %593 {offsets = [0, 0], sizes = [16, 256], strides = [1, 1]} : vector<16x384xf32> to vector<16x256xf32>
    %596 = arith.addf %594, %595 : vector<16x256xf32>
    %597 = arith.negf %596 : vector<16x256xf32>
    %598 = math.exp %597 : vector<16x256xf32>
    %cst_171 = arith.constant 1.000000e+00 : f32
    %599 = vector.broadcast %cst_171 : f32 to vector<16x256xf32>
    %600 = arith.addf %599, %598 : vector<16x256xf32>
    %601 = arith.divf %599, %600 : vector<16x256xf32>
    %602 = vector.extract_strided_slice %601 {offsets = [0, 0], sizes = [16, 128], strides = [1, 1]} : vector<16x256xf32> to vector<16x128xf32>
    %603 = vector.extract_strided_slice %601 {offsets = [0, 128], sizes = [16, 128], strides = [1, 1]} : vector<16x256xf32> to vector<16x128xf32>
    %604 = vector.extract_strided_slice %589 {offsets = [0, 256], sizes = [16, 128], strides = [1, 1]} : vector<16x384xf32> to vector<16x128xf32>
    %605 = vector.extract_strided_slice %593 {offsets = [0, 256], sizes = [16, 128], strides = [1, 1]} : vector<16x384xf32> to vector<16x128xf32>
    %606 = vector.broadcast %22 : vector<1x128xf32> to vector<16x128xf32>
    %607 = arith.addf %605, %606 : vector<16x128xf32>
    %608 = arith.mulf %602, %607 : vector<16x128xf32>
    %609 = arith.addf %604, %608 : vector<16x128xf32>
    %610 = math.tanh %609 : vector<16x128xf32>
    %cst_172 = arith.constant 1.000000e+00 : f32
    %611 = vector.broadcast %cst_172 : f32 to vector<16x128xf32>
    %612 = arith.subf %611, %603 : vector<16x128xf32>
    %613 = arith.mulf %612, %610 : vector<16x128xf32>
    %614 = arith.mulf %603, %549 : vector<16x128xf32>
    %615 = arith.addf %613, %614 : vector<16x128xf32>
    %c8_i32 = arith.constant 8 : i32
    %616 = arith.addi %16, %c8_i32 : i32
    %617 = vector.broadcast %616 : i32 to vector<16x1xi32>
    %618 = arith.cmpi eq, %15, %617 : vector<16x1xi32>
    %619 = vector.shape_cast %618 : vector<16x1xi1> to vector<16x1xi1>
    %620 = vector.broadcast %619 : vector<16x1xi1> to vector<16x128xi1>
    %621 = arith.select %620, %615, %555 : vector<16x128xi1>, vector<16x128xf32>
    %622 = vector.extract_strided_slice %12 {offsets = [9, 0, 0], sizes = [1, 16, 384], strides = [1, 1, 1]} : vector<16x16x384xf32> to vector<1x16x384xf32>
    %623 = vector.shape_cast %622 : vector<1x16x384xf32> to vector<16x384xf32>
    %624 = arith.truncf %583 : vector<16x128xf32> to vector<16x128xbf16>
    %c0_173 = arith.constant 0 : index
    %c0_174 = arith.constant 0 : index
    %c0_175 = arith.constant 0 : index
    %625 = vector.load %arg5[%c0_173, %c0_174, %c0_175] : memref<2x128x384xbf16, #tpu.memory_space<vmem>>, vector<1x128x384xbf16>
    %626 = vector.shape_cast %625 : vector<1x128x384xbf16> to vector<128x384xbf16>
    %cst_176 = arith.constant dense<0.000000e+00> : vector<16x384xf32>
    %627 = tpu.matmul %624, %626, %cst_176 {dimension_numbers = #tpu.dot_dimension_numbers<[1], [0], [0], [1], [0, 0, 1, 1], [], []>} : vector<16x128xbf16>, vector<128x384xbf16>, vector<16x384xf32> -> vector<16x384xf32>
    %628 = vector.extract_strided_slice %623 {offsets = [0, 0], sizes = [16, 256], strides = [1, 1]} : vector<16x384xf32> to vector<16x256xf32>
    %629 = vector.extract_strided_slice %627 {offsets = [0, 0], sizes = [16, 256], strides = [1, 1]} : vector<16x384xf32> to vector<16x256xf32>
    %630 = arith.addf %628, %629 : vector<16x256xf32>
    %631 = arith.negf %630 : vector<16x256xf32>
    %632 = math.exp %631 : vector<16x256xf32>
    %cst_177 = arith.constant 1.000000e+00 : f32
    %633 = vector.broadcast %cst_177 : f32 to vector<16x256xf32>
    %634 = arith.addf %633, %632 : vector<16x256xf32>
    %635 = arith.divf %633, %634 : vector<16x256xf32>
    %636 = vector.extract_strided_slice %635 {offsets = [0, 0], sizes = [16, 128], strides = [1, 1]} : vector<16x256xf32> to vector<16x128xf32>
    %637 = vector.extract_strided_slice %635 {offsets = [0, 128], sizes = [16, 128], strides = [1, 1]} : vector<16x256xf32> to vector<16x128xf32>
    %638 = vector.extract_strided_slice %623 {offsets = [0, 256], sizes = [16, 128], strides = [1, 1]} : vector<16x384xf32> to vector<16x128xf32>
    %639 = vector.extract_strided_slice %627 {offsets = [0, 256], sizes = [16, 128], strides = [1, 1]} : vector<16x384xf32> to vector<16x128xf32>
    %640 = vector.broadcast %20 : vector<1x128xf32> to vector<16x128xf32>
    %641 = arith.addf %639, %640 : vector<16x128xf32>
    %642 = arith.mulf %636, %641 : vector<16x128xf32>
    %643 = arith.addf %638, %642 : vector<16x128xf32>
    %644 = math.tanh %643 : vector<16x128xf32>
    %cst_178 = arith.constant 1.000000e+00 : f32
    %645 = vector.broadcast %cst_178 : f32 to vector<16x128xf32>
    %646 = arith.subf %645, %637 : vector<16x128xf32>
    %647 = arith.mulf %646, %644 : vector<16x128xf32>
    %648 = arith.mulf %637, %583 : vector<16x128xf32>
    %649 = arith.addf %647, %648 : vector<16x128xf32>
    %650 = arith.truncf %649 : vector<16x128xf32> to vector<16x128xbf16>
    %c1_179 = arith.constant 1 : index
    %c0_180 = arith.constant 0 : index
    %c0_181 = arith.constant 0 : index
    %651 = vector.load %arg4[%c1_179, %c0_180, %c0_181] : memref<2x128x384xbf16, #tpu.memory_space<vmem>>, vector<1x128x384xbf16>
    %652 = vector.shape_cast %651 : vector<1x128x384xbf16> to vector<128x384xbf16>
    %cst_182 = arith.constant dense<0.000000e+00> : vector<16x384xf32>
    %653 = tpu.matmul %650, %652, %cst_182 {dimension_numbers = #tpu.dot_dimension_numbers<[1], [0], [0], [1], [0, 0, 1, 1], [], []>} : vector<16x128xbf16>, vector<128x384xbf16>, vector<16x384xf32> -> vector<16x384xf32>
    %654 = vector.broadcast %18 : vector<1x384xf32> to vector<16x384xf32>
    %655 = arith.addf %653, %654 : vector<16x384xf32>
    %656 = arith.truncf %615 : vector<16x128xf32> to vector<16x128xbf16>
    %c1_183 = arith.constant 1 : index
    %c0_184 = arith.constant 0 : index
    %c0_185 = arith.constant 0 : index
    %657 = vector.load %arg5[%c1_183, %c0_184, %c0_185] : memref<2x128x384xbf16, #tpu.memory_space<vmem>>, vector<1x128x384xbf16>
    %658 = vector.shape_cast %657 : vector<1x128x384xbf16> to vector<128x384xbf16>
    %cst_186 = arith.constant dense<0.000000e+00> : vector<16x384xf32>
    %659 = tpu.matmul %656, %658, %cst_186 {dimension_numbers = #tpu.dot_dimension_numbers<[1], [0], [0], [1], [0, 0, 1, 1], [], []>} : vector<16x128xbf16>, vector<128x384xbf16>, vector<16x384xf32> -> vector<16x384xf32>
    %660 = vector.extract_strided_slice %655 {offsets = [0, 0], sizes = [16, 256], strides = [1, 1]} : vector<16x384xf32> to vector<16x256xf32>
    %661 = vector.extract_strided_slice %659 {offsets = [0, 0], sizes = [16, 256], strides = [1, 1]} : vector<16x384xf32> to vector<16x256xf32>
    %662 = arith.addf %660, %661 : vector<16x256xf32>
    %663 = arith.negf %662 : vector<16x256xf32>
    %664 = math.exp %663 : vector<16x256xf32>
    %cst_187 = arith.constant 1.000000e+00 : f32
    %665 = vector.broadcast %cst_187 : f32 to vector<16x256xf32>
    %666 = arith.addf %665, %664 : vector<16x256xf32>
    %667 = arith.divf %665, %666 : vector<16x256xf32>
    %668 = vector.extract_strided_slice %667 {offsets = [0, 0], sizes = [16, 128], strides = [1, 1]} : vector<16x256xf32> to vector<16x128xf32>
    %669 = vector.extract_strided_slice %667 {offsets = [0, 128], sizes = [16, 128], strides = [1, 1]} : vector<16x256xf32> to vector<16x128xf32>
    %670 = vector.extract_strided_slice %655 {offsets = [0, 256], sizes = [16, 128], strides = [1, 1]} : vector<16x384xf32> to vector<16x128xf32>
    %671 = vector.extract_strided_slice %659 {offsets = [0, 256], sizes = [16, 128], strides = [1, 1]} : vector<16x384xf32> to vector<16x128xf32>
    %672 = vector.broadcast %22 : vector<1x128xf32> to vector<16x128xf32>
    %673 = arith.addf %671, %672 : vector<16x128xf32>
    %674 = arith.mulf %668, %673 : vector<16x128xf32>
    %675 = arith.addf %670, %674 : vector<16x128xf32>
    %676 = math.tanh %675 : vector<16x128xf32>
    %cst_188 = arith.constant 1.000000e+00 : f32
    %677 = vector.broadcast %cst_188 : f32 to vector<16x128xf32>
    %678 = arith.subf %677, %669 : vector<16x128xf32>
    %679 = arith.mulf %678, %676 : vector<16x128xf32>
    %680 = arith.mulf %669, %615 : vector<16x128xf32>
    %681 = arith.addf %679, %680 : vector<16x128xf32>
    %c9_i32 = arith.constant 9 : i32
    %682 = arith.addi %16, %c9_i32 : i32
    %683 = vector.broadcast %682 : i32 to vector<16x1xi32>
    %684 = arith.cmpi eq, %15, %683 : vector<16x1xi32>
    %685 = vector.shape_cast %684 : vector<16x1xi1> to vector<16x1xi1>
    %686 = vector.broadcast %685 : vector<16x1xi1> to vector<16x128xi1>
    %687 = arith.select %686, %681, %621 : vector<16x128xi1>, vector<16x128xf32>
    %688 = vector.extract_strided_slice %12 {offsets = [10, 0, 0], sizes = [1, 16, 384], strides = [1, 1, 1]} : vector<16x16x384xf32> to vector<1x16x384xf32>
    %689 = vector.shape_cast %688 : vector<1x16x384xf32> to vector<16x384xf32>
    %690 = arith.truncf %649 : vector<16x128xf32> to vector<16x128xbf16>
    %c0_189 = arith.constant 0 : index
    %c0_190 = arith.constant 0 : index
    %c0_191 = arith.constant 0 : index
    %691 = vector.load %arg5[%c0_189, %c0_190, %c0_191] : memref<2x128x384xbf16, #tpu.memory_space<vmem>>, vector<1x128x384xbf16>
    %692 = vector.shape_cast %691 : vector<1x128x384xbf16> to vector<128x384xbf16>
    %cst_192 = arith.constant dense<0.000000e+00> : vector<16x384xf32>
    %693 = tpu.matmul %690, %692, %cst_192 {dimension_numbers = #tpu.dot_dimension_numbers<[1], [0], [0], [1], [0, 0, 1, 1], [], []>} : vector<16x128xbf16>, vector<128x384xbf16>, vector<16x384xf32> -> vector<16x384xf32>
    %694 = vector.extract_strided_slice %689 {offsets = [0, 0], sizes = [16, 256], strides = [1, 1]} : vector<16x384xf32> to vector<16x256xf32>
    %695 = vector.extract_strided_slice %693 {offsets = [0, 0], sizes = [16, 256], strides = [1, 1]} : vector<16x384xf32> to vector<16x256xf32>
    %696 = arith.addf %694, %695 : vector<16x256xf32>
    %697 = arith.negf %696 : vector<16x256xf32>
    %698 = math.exp %697 : vector<16x256xf32>
    %cst_193 = arith.constant 1.000000e+00 : f32
    %699 = vector.broadcast %cst_193 : f32 to vector<16x256xf32>
    %700 = arith.addf %699, %698 : vector<16x256xf32>
    %701 = arith.divf %699, %700 : vector<16x256xf32>
    %702 = vector.extract_strided_slice %701 {offsets = [0, 0], sizes = [16, 128], strides = [1, 1]} : vector<16x256xf32> to vector<16x128xf32>
    %703 = vector.extract_strided_slice %701 {offsets = [0, 128], sizes = [16, 128], strides = [1, 1]} : vector<16x256xf32> to vector<16x128xf32>
    %704 = vector.extract_strided_slice %689 {offsets = [0, 256], sizes = [16, 128], strides = [1, 1]} : vector<16x384xf32> to vector<16x128xf32>
    %705 = vector.extract_strided_slice %693 {offsets = [0, 256], sizes = [16, 128], strides = [1, 1]} : vector<16x384xf32> to vector<16x128xf32>
    %706 = vector.broadcast %20 : vector<1x128xf32> to vector<16x128xf32>
    %707 = arith.addf %705, %706 : vector<16x128xf32>
    %708 = arith.mulf %702, %707 : vector<16x128xf32>
    %709 = arith.addf %704, %708 : vector<16x128xf32>
    %710 = math.tanh %709 : vector<16x128xf32>
    %cst_194 = arith.constant 1.000000e+00 : f32
    %711 = vector.broadcast %cst_194 : f32 to vector<16x128xf32>
    %712 = arith.subf %711, %703 : vector<16x128xf32>
    %713 = arith.mulf %712, %710 : vector<16x128xf32>
    %714 = arith.mulf %703, %649 : vector<16x128xf32>
    %715 = arith.addf %713, %714 : vector<16x128xf32>
    %716 = arith.truncf %715 : vector<16x128xf32> to vector<16x128xbf16>
    %c1_195 = arith.constant 1 : index
    %c0_196 = arith.constant 0 : index
    %c0_197 = arith.constant 0 : index
    %717 = vector.load %arg4[%c1_195, %c0_196, %c0_197] : memref<2x128x384xbf16, #tpu.memory_space<vmem>>, vector<1x128x384xbf16>
    %718 = vector.shape_cast %717 : vector<1x128x384xbf16> to vector<128x384xbf16>
    %cst_198 = arith.constant dense<0.000000e+00> : vector<16x384xf32>
    %719 = tpu.matmul %716, %718, %cst_198 {dimension_numbers = #tpu.dot_dimension_numbers<[1], [0], [0], [1], [0, 0, 1, 1], [], []>} : vector<16x128xbf16>, vector<128x384xbf16>, vector<16x384xf32> -> vector<16x384xf32>
    %720 = vector.broadcast %18 : vector<1x384xf32> to vector<16x384xf32>
    %721 = arith.addf %719, %720 : vector<16x384xf32>
    %722 = arith.truncf %681 : vector<16x128xf32> to vector<16x128xbf16>
    %c1_199 = arith.constant 1 : index
    %c0_200 = arith.constant 0 : index
    %c0_201 = arith.constant 0 : index
    %723 = vector.load %arg5[%c1_199, %c0_200, %c0_201] : memref<2x128x384xbf16, #tpu.memory_space<vmem>>, vector<1x128x384xbf16>
    %724 = vector.shape_cast %723 : vector<1x128x384xbf16> to vector<128x384xbf16>
    %cst_202 = arith.constant dense<0.000000e+00> : vector<16x384xf32>
    %725 = tpu.matmul %722, %724, %cst_202 {dimension_numbers = #tpu.dot_dimension_numbers<[1], [0], [0], [1], [0, 0, 1, 1], [], []>} : vector<16x128xbf16>, vector<128x384xbf16>, vector<16x384xf32> -> vector<16x384xf32>
    %726 = vector.extract_strided_slice %721 {offsets = [0, 0], sizes = [16, 256], strides = [1, 1]} : vector<16x384xf32> to vector<16x256xf32>
    %727 = vector.extract_strided_slice %725 {offsets = [0, 0], sizes = [16, 256], strides = [1, 1]} : vector<16x384xf32> to vector<16x256xf32>
    %728 = arith.addf %726, %727 : vector<16x256xf32>
    %729 = arith.negf %728 : vector<16x256xf32>
    %730 = math.exp %729 : vector<16x256xf32>
    %cst_203 = arith.constant 1.000000e+00 : f32
    %731 = vector.broadcast %cst_203 : f32 to vector<16x256xf32>
    %732 = arith.addf %731, %730 : vector<16x256xf32>
    %733 = arith.divf %731, %732 : vector<16x256xf32>
    %734 = vector.extract_strided_slice %733 {offsets = [0, 0], sizes = [16, 128], strides = [1, 1]} : vector<16x256xf32> to vector<16x128xf32>
    %735 = vector.extract_strided_slice %733 {offsets = [0, 128], sizes = [16, 128], strides = [1, 1]} : vector<16x256xf32> to vector<16x128xf32>
    %736 = vector.extract_strided_slice %721 {offsets = [0, 256], sizes = [16, 128], strides = [1, 1]} : vector<16x384xf32> to vector<16x128xf32>
    %737 = vector.extract_strided_slice %725 {offsets = [0, 256], sizes = [16, 128], strides = [1, 1]} : vector<16x384xf32> to vector<16x128xf32>
    %738 = vector.broadcast %22 : vector<1x128xf32> to vector<16x128xf32>
    %739 = arith.addf %737, %738 : vector<16x128xf32>
    %740 = arith.mulf %734, %739 : vector<16x128xf32>
    %741 = arith.addf %736, %740 : vector<16x128xf32>
    %742 = math.tanh %741 : vector<16x128xf32>
    %cst_204 = arith.constant 1.000000e+00 : f32
    %743 = vector.broadcast %cst_204 : f32 to vector<16x128xf32>
    %744 = arith.subf %743, %735 : vector<16x128xf32>
    %745 = arith.mulf %744, %742 : vector<16x128xf32>
    %746 = arith.mulf %735, %681 : vector<16x128xf32>
    %747 = arith.addf %745, %746 : vector<16x128xf32>
    %c10_i32 = arith.constant 10 : i32
    %748 = arith.addi %16, %c10_i32 : i32
    %749 = vector.broadcast %748 : i32 to vector<16x1xi32>
    %750 = arith.cmpi eq, %15, %749 : vector<16x1xi32>
    %751 = vector.shape_cast %750 : vector<16x1xi1> to vector<16x1xi1>
    %752 = vector.broadcast %751 : vector<16x1xi1> to vector<16x128xi1>
    %753 = arith.select %752, %747, %687 : vector<16x128xi1>, vector<16x128xf32>
    %754 = vector.extract_strided_slice %12 {offsets = [11, 0, 0], sizes = [1, 16, 384], strides = [1, 1, 1]} : vector<16x16x384xf32> to vector<1x16x384xf32>
    %755 = vector.shape_cast %754 : vector<1x16x384xf32> to vector<16x384xf32>
    %756 = arith.truncf %715 : vector<16x128xf32> to vector<16x128xbf16>
    %c0_205 = arith.constant 0 : index
    %c0_206 = arith.constant 0 : index
    %c0_207 = arith.constant 0 : index
    %757 = vector.load %arg5[%c0_205, %c0_206, %c0_207] : memref<2x128x384xbf16, #tpu.memory_space<vmem>>, vector<1x128x384xbf16>
    %758 = vector.shape_cast %757 : vector<1x128x384xbf16> to vector<128x384xbf16>
    %cst_208 = arith.constant dense<0.000000e+00> : vector<16x384xf32>
    %759 = tpu.matmul %756, %758, %cst_208 {dimension_numbers = #tpu.dot_dimension_numbers<[1], [0], [0], [1], [0, 0, 1, 1], [], []>} : vector<16x128xbf16>, vector<128x384xbf16>, vector<16x384xf32> -> vector<16x384xf32>
    %760 = vector.extract_strided_slice %755 {offsets = [0, 0], sizes = [16, 256], strides = [1, 1]} : vector<16x384xf32> to vector<16x256xf32>
    %761 = vector.extract_strided_slice %759 {offsets = [0, 0], sizes = [16, 256], strides = [1, 1]} : vector<16x384xf32> to vector<16x256xf32>
    %762 = arith.addf %760, %761 : vector<16x256xf32>
    %763 = arith.negf %762 : vector<16x256xf32>
    %764 = math.exp %763 : vector<16x256xf32>
    %cst_209 = arith.constant 1.000000e+00 : f32
    %765 = vector.broadcast %cst_209 : f32 to vector<16x256xf32>
    %766 = arith.addf %765, %764 : vector<16x256xf32>
    %767 = arith.divf %765, %766 : vector<16x256xf32>
    %768 = vector.extract_strided_slice %767 {offsets = [0, 0], sizes = [16, 128], strides = [1, 1]} : vector<16x256xf32> to vector<16x128xf32>
    %769 = vector.extract_strided_slice %767 {offsets = [0, 128], sizes = [16, 128], strides = [1, 1]} : vector<16x256xf32> to vector<16x128xf32>
    %770 = vector.extract_strided_slice %755 {offsets = [0, 256], sizes = [16, 128], strides = [1, 1]} : vector<16x384xf32> to vector<16x128xf32>
    %771 = vector.extract_strided_slice %759 {offsets = [0, 256], sizes = [16, 128], strides = [1, 1]} : vector<16x384xf32> to vector<16x128xf32>
    %772 = vector.broadcast %20 : vector<1x128xf32> to vector<16x128xf32>
    %773 = arith.addf %771, %772 : vector<16x128xf32>
    %774 = arith.mulf %768, %773 : vector<16x128xf32>
    %775 = arith.addf %770, %774 : vector<16x128xf32>
    %776 = math.tanh %775 : vector<16x128xf32>
    %cst_210 = arith.constant 1.000000e+00 : f32
    %777 = vector.broadcast %cst_210 : f32 to vector<16x128xf32>
    %778 = arith.subf %777, %769 : vector<16x128xf32>
    %779 = arith.mulf %778, %776 : vector<16x128xf32>
    %780 = arith.mulf %769, %715 : vector<16x128xf32>
    %781 = arith.addf %779, %780 : vector<16x128xf32>
    %782 = arith.truncf %781 : vector<16x128xf32> to vector<16x128xbf16>
    %c1_211 = arith.constant 1 : index
    %c0_212 = arith.constant 0 : index
    %c0_213 = arith.constant 0 : index
    %783 = vector.load %arg4[%c1_211, %c0_212, %c0_213] : memref<2x128x384xbf16, #tpu.memory_space<vmem>>, vector<1x128x384xbf16>
    %784 = vector.shape_cast %783 : vector<1x128x384xbf16> to vector<128x384xbf16>
    %cst_214 = arith.constant dense<0.000000e+00> : vector<16x384xf32>
    %785 = tpu.matmul %782, %784, %cst_214 {dimension_numbers = #tpu.dot_dimension_numbers<[1], [0], [0], [1], [0, 0, 1, 1], [], []>} : vector<16x128xbf16>, vector<128x384xbf16>, vector<16x384xf32> -> vector<16x384xf32>
    %786 = vector.broadcast %18 : vector<1x384xf32> to vector<16x384xf32>
    %787 = arith.addf %785, %786 : vector<16x384xf32>
    %788 = arith.truncf %747 : vector<16x128xf32> to vector<16x128xbf16>
    %c1_215 = arith.constant 1 : index
    %c0_216 = arith.constant 0 : index
    %c0_217 = arith.constant 0 : index
    %789 = vector.load %arg5[%c1_215, %c0_216, %c0_217] : memref<2x128x384xbf16, #tpu.memory_space<vmem>>, vector<1x128x384xbf16>
    %790 = vector.shape_cast %789 : vector<1x128x384xbf16> to vector<128x384xbf16>
    %cst_218 = arith.constant dense<0.000000e+00> : vector<16x384xf32>
    %791 = tpu.matmul %788, %790, %cst_218 {dimension_numbers = #tpu.dot_dimension_numbers<[1], [0], [0], [1], [0, 0, 1, 1], [], []>} : vector<16x128xbf16>, vector<128x384xbf16>, vector<16x384xf32> -> vector<16x384xf32>
    %792 = vector.extract_strided_slice %787 {offsets = [0, 0], sizes = [16, 256], strides = [1, 1]} : vector<16x384xf32> to vector<16x256xf32>
    %793 = vector.extract_strided_slice %791 {offsets = [0, 0], sizes = [16, 256], strides = [1, 1]} : vector<16x384xf32> to vector<16x256xf32>
    %794 = arith.addf %792, %793 : vector<16x256xf32>
    %795 = arith.negf %794 : vector<16x256xf32>
    %796 = math.exp %795 : vector<16x256xf32>
    %cst_219 = arith.constant 1.000000e+00 : f32
    %797 = vector.broadcast %cst_219 : f32 to vector<16x256xf32>
    %798 = arith.addf %797, %796 : vector<16x256xf32>
    %799 = arith.divf %797, %798 : vector<16x256xf32>
    %800 = vector.extract_strided_slice %799 {offsets = [0, 0], sizes = [16, 128], strides = [1, 1]} : vector<16x256xf32> to vector<16x128xf32>
    %801 = vector.extract_strided_slice %799 {offsets = [0, 128], sizes = [16, 128], strides = [1, 1]} : vector<16x256xf32> to vector<16x128xf32>
    %802 = vector.extract_strided_slice %787 {offsets = [0, 256], sizes = [16, 128], strides = [1, 1]} : vector<16x384xf32> to vector<16x128xf32>
    %803 = vector.extract_strided_slice %791 {offsets = [0, 256], sizes = [16, 128], strides = [1, 1]} : vector<16x384xf32> to vector<16x128xf32>
    %804 = vector.broadcast %22 : vector<1x128xf32> to vector<16x128xf32>
    %805 = arith.addf %803, %804 : vector<16x128xf32>
    %806 = arith.mulf %800, %805 : vector<16x128xf32>
    %807 = arith.addf %802, %806 : vector<16x128xf32>
    %808 = math.tanh %807 : vector<16x128xf32>
    %cst_220 = arith.constant 1.000000e+00 : f32
    %809 = vector.broadcast %cst_220 : f32 to vector<16x128xf32>
    %810 = arith.subf %809, %801 : vector<16x128xf32>
    %811 = arith.mulf %810, %808 : vector<16x128xf32>
    %812 = arith.mulf %801, %747 : vector<16x128xf32>
    %813 = arith.addf %811, %812 : vector<16x128xf32>
    %c11_i32 = arith.constant 11 : i32
    %814 = arith.addi %16, %c11_i32 : i32
    %815 = vector.broadcast %814 : i32 to vector<16x1xi32>
    %816 = arith.cmpi eq, %15, %815 : vector<16x1xi32>
    %817 = vector.shape_cast %816 : vector<16x1xi1> to vector<16x1xi1>
    %818 = vector.broadcast %817 : vector<16x1xi1> to vector<16x128xi1>
    %819 = arith.select %818, %813, %753 : vector<16x128xi1>, vector<16x128xf32>
    %820 = vector.extract_strided_slice %12 {offsets = [12, 0, 0], sizes = [1, 16, 384], strides = [1, 1, 1]} : vector<16x16x384xf32> to vector<1x16x384xf32>
    %821 = vector.shape_cast %820 : vector<1x16x384xf32> to vector<16x384xf32>
    %822 = arith.truncf %781 : vector<16x128xf32> to vector<16x128xbf16>
    %c0_221 = arith.constant 0 : index
    %c0_222 = arith.constant 0 : index
    %c0_223 = arith.constant 0 : index
    %823 = vector.load %arg5[%c0_221, %c0_222, %c0_223] : memref<2x128x384xbf16, #tpu.memory_space<vmem>>, vector<1x128x384xbf16>
    %824 = vector.shape_cast %823 : vector<1x128x384xbf16> to vector<128x384xbf16>
    %cst_224 = arith.constant dense<0.000000e+00> : vector<16x384xf32>
    %825 = tpu.matmul %822, %824, %cst_224 {dimension_numbers = #tpu.dot_dimension_numbers<[1], [0], [0], [1], [0, 0, 1, 1], [], []>} : vector<16x128xbf16>, vector<128x384xbf16>, vector<16x384xf32> -> vector<16x384xf32>
    %826 = vector.extract_strided_slice %821 {offsets = [0, 0], sizes = [16, 256], strides = [1, 1]} : vector<16x384xf32> to vector<16x256xf32>
    %827 = vector.extract_strided_slice %825 {offsets = [0, 0], sizes = [16, 256], strides = [1, 1]} : vector<16x384xf32> to vector<16x256xf32>
    %828 = arith.addf %826, %827 : vector<16x256xf32>
    %829 = arith.negf %828 : vector<16x256xf32>
    %830 = math.exp %829 : vector<16x256xf32>
    %cst_225 = arith.constant 1.000000e+00 : f32
    %831 = vector.broadcast %cst_225 : f32 to vector<16x256xf32>
    %832 = arith.addf %831, %830 : vector<16x256xf32>
    %833 = arith.divf %831, %832 : vector<16x256xf32>
    %834 = vector.extract_strided_slice %833 {offsets = [0, 0], sizes = [16, 128], strides = [1, 1]} : vector<16x256xf32> to vector<16x128xf32>
    %835 = vector.extract_strided_slice %833 {offsets = [0, 128], sizes = [16, 128], strides = [1, 1]} : vector<16x256xf32> to vector<16x128xf32>
    %836 = vector.extract_strided_slice %821 {offsets = [0, 256], sizes = [16, 128], strides = [1, 1]} : vector<16x384xf32> to vector<16x128xf32>
    %837 = vector.extract_strided_slice %825 {offsets = [0, 256], sizes = [16, 128], strides = [1, 1]} : vector<16x384xf32> to vector<16x128xf32>
    %838 = vector.broadcast %20 : vector<1x128xf32> to vector<16x128xf32>
    %839 = arith.addf %837, %838 : vector<16x128xf32>
    %840 = arith.mulf %834, %839 : vector<16x128xf32>
    %841 = arith.addf %836, %840 : vector<16x128xf32>
    %842 = math.tanh %841 : vector<16x128xf32>
    %cst_226 = arith.constant 1.000000e+00 : f32
    %843 = vector.broadcast %cst_226 : f32 to vector<16x128xf32>
    %844 = arith.subf %843, %835 : vector<16x128xf32>
    %845 = arith.mulf %844, %842 : vector<16x128xf32>
    %846 = arith.mulf %835, %781 : vector<16x128xf32>
    %847 = arith.addf %845, %846 : vector<16x128xf32>
    %848 = arith.truncf %847 : vector<16x128xf32> to vector<16x128xbf16>
    %c1_227 = arith.constant 1 : index
    %c0_228 = arith.constant 0 : index
    %c0_229 = arith.constant 0 : index
    %849 = vector.load %arg4[%c1_227, %c0_228, %c0_229] : memref<2x128x384xbf16, #tpu.memory_space<vmem>>, vector<1x128x384xbf16>
    %850 = vector.shape_cast %849 : vector<1x128x384xbf16> to vector<128x384xbf16>
    %cst_230 = arith.constant dense<0.000000e+00> : vector<16x384xf32>
    %851 = tpu.matmul %848, %850, %cst_230 {dimension_numbers = #tpu.dot_dimension_numbers<[1], [0], [0], [1], [0, 0, 1, 1], [], []>} : vector<16x128xbf16>, vector<128x384xbf16>, vector<16x384xf32> -> vector<16x384xf32>
    %852 = vector.broadcast %18 : vector<1x384xf32> to vector<16x384xf32>
    %853 = arith.addf %851, %852 : vector<16x384xf32>
    %854 = arith.truncf %813 : vector<16x128xf32> to vector<16x128xbf16>
    %c1_231 = arith.constant 1 : index
    %c0_232 = arith.constant 0 : index
    %c0_233 = arith.constant 0 : index
    %855 = vector.load %arg5[%c1_231, %c0_232, %c0_233] : memref<2x128x384xbf16, #tpu.memory_space<vmem>>, vector<1x128x384xbf16>
    %856 = vector.shape_cast %855 : vector<1x128x384xbf16> to vector<128x384xbf16>
    %cst_234 = arith.constant dense<0.000000e+00> : vector<16x384xf32>
    %857 = tpu.matmul %854, %856, %cst_234 {dimension_numbers = #tpu.dot_dimension_numbers<[1], [0], [0], [1], [0, 0, 1, 1], [], []>} : vector<16x128xbf16>, vector<128x384xbf16>, vector<16x384xf32> -> vector<16x384xf32>
    %858 = vector.extract_strided_slice %853 {offsets = [0, 0], sizes = [16, 256], strides = [1, 1]} : vector<16x384xf32> to vector<16x256xf32>
    %859 = vector.extract_strided_slice %857 {offsets = [0, 0], sizes = [16, 256], strides = [1, 1]} : vector<16x384xf32> to vector<16x256xf32>
    %860 = arith.addf %858, %859 : vector<16x256xf32>
    %861 = arith.negf %860 : vector<16x256xf32>
    %862 = math.exp %861 : vector<16x256xf32>
    %cst_235 = arith.constant 1.000000e+00 : f32
    %863 = vector.broadcast %cst_235 : f32 to vector<16x256xf32>
    %864 = arith.addf %863, %862 : vector<16x256xf32>
    %865 = arith.divf %863, %864 : vector<16x256xf32>
    %866 = vector.extract_strided_slice %865 {offsets = [0, 0], sizes = [16, 128], strides = [1, 1]} : vector<16x256xf32> to vector<16x128xf32>
    %867 = vector.extract_strided_slice %865 {offsets = [0, 128], sizes = [16, 128], strides = [1, 1]} : vector<16x256xf32> to vector<16x128xf32>
    %868 = vector.extract_strided_slice %853 {offsets = [0, 256], sizes = [16, 128], strides = [1, 1]} : vector<16x384xf32> to vector<16x128xf32>
    %869 = vector.extract_strided_slice %857 {offsets = [0, 256], sizes = [16, 128], strides = [1, 1]} : vector<16x384xf32> to vector<16x128xf32>
    %870 = vector.broadcast %22 : vector<1x128xf32> to vector<16x128xf32>
    %871 = arith.addf %869, %870 : vector<16x128xf32>
    %872 = arith.mulf %866, %871 : vector<16x128xf32>
    %873 = arith.addf %868, %872 : vector<16x128xf32>
    %874 = math.tanh %873 : vector<16x128xf32>
    %cst_236 = arith.constant 1.000000e+00 : f32
    %875 = vector.broadcast %cst_236 : f32 to vector<16x128xf32>
    %876 = arith.subf %875, %867 : vector<16x128xf32>
    %877 = arith.mulf %876, %874 : vector<16x128xf32>
    %878 = arith.mulf %867, %813 : vector<16x128xf32>
    %879 = arith.addf %877, %878 : vector<16x128xf32>
    %c12_i32 = arith.constant 12 : i32
    %880 = arith.addi %16, %c12_i32 : i32
    %881 = vector.broadcast %880 : i32 to vector<16x1xi32>
    %882 = arith.cmpi eq, %15, %881 : vector<16x1xi32>
    %883 = vector.shape_cast %882 : vector<16x1xi1> to vector<16x1xi1>
    %884 = vector.broadcast %883 : vector<16x1xi1> to vector<16x128xi1>
    %885 = arith.select %884, %879, %819 : vector<16x128xi1>, vector<16x128xf32>
    %886 = vector.extract_strided_slice %12 {offsets = [13, 0, 0], sizes = [1, 16, 384], strides = [1, 1, 1]} : vector<16x16x384xf32> to vector<1x16x384xf32>
    %887 = vector.shape_cast %886 : vector<1x16x384xf32> to vector<16x384xf32>
    %888 = arith.truncf %847 : vector<16x128xf32> to vector<16x128xbf16>
    %c0_237 = arith.constant 0 : index
    %c0_238 = arith.constant 0 : index
    %c0_239 = arith.constant 0 : index
    %889 = vector.load %arg5[%c0_237, %c0_238, %c0_239] : memref<2x128x384xbf16, #tpu.memory_space<vmem>>, vector<1x128x384xbf16>
    %890 = vector.shape_cast %889 : vector<1x128x384xbf16> to vector<128x384xbf16>
    %cst_240 = arith.constant dense<0.000000e+00> : vector<16x384xf32>
    %891 = tpu.matmul %888, %890, %cst_240 {dimension_numbers = #tpu.dot_dimension_numbers<[1], [0], [0], [1], [0, 0, 1, 1], [], []>} : vector<16x128xbf16>, vector<128x384xbf16>, vector<16x384xf32> -> vector<16x384xf32>
    %892 = vector.extract_strided_slice %887 {offsets = [0, 0], sizes = [16, 256], strides = [1, 1]} : vector<16x384xf32> to vector<16x256xf32>
    %893 = vector.extract_strided_slice %891 {offsets = [0, 0], sizes = [16, 256], strides = [1, 1]} : vector<16x384xf32> to vector<16x256xf32>
    %894 = arith.addf %892, %893 : vector<16x256xf32>
    %895 = arith.negf %894 : vector<16x256xf32>
    %896 = math.exp %895 : vector<16x256xf32>
    %cst_241 = arith.constant 1.000000e+00 : f32
    %897 = vector.broadcast %cst_241 : f32 to vector<16x256xf32>
    %898 = arith.addf %897, %896 : vector<16x256xf32>
    %899 = arith.divf %897, %898 : vector<16x256xf32>
    %900 = vector.extract_strided_slice %899 {offsets = [0, 0], sizes = [16, 128], strides = [1, 1]} : vector<16x256xf32> to vector<16x128xf32>
    %901 = vector.extract_strided_slice %899 {offsets = [0, 128], sizes = [16, 128], strides = [1, 1]} : vector<16x256xf32> to vector<16x128xf32>
    %902 = vector.extract_strided_slice %887 {offsets = [0, 256], sizes = [16, 128], strides = [1, 1]} : vector<16x384xf32> to vector<16x128xf32>
    %903 = vector.extract_strided_slice %891 {offsets = [0, 256], sizes = [16, 128], strides = [1, 1]} : vector<16x384xf32> to vector<16x128xf32>
    %904 = vector.broadcast %20 : vector<1x128xf32> to vector<16x128xf32>
    %905 = arith.addf %903, %904 : vector<16x128xf32>
    %906 = arith.mulf %900, %905 : vector<16x128xf32>
    %907 = arith.addf %902, %906 : vector<16x128xf32>
    %908 = math.tanh %907 : vector<16x128xf32>
    %cst_242 = arith.constant 1.000000e+00 : f32
    %909 = vector.broadcast %cst_242 : f32 to vector<16x128xf32>
    %910 = arith.subf %909, %901 : vector<16x128xf32>
    %911 = arith.mulf %910, %908 : vector<16x128xf32>
    %912 = arith.mulf %901, %847 : vector<16x128xf32>
    %913 = arith.addf %911, %912 : vector<16x128xf32>
    %914 = arith.truncf %913 : vector<16x128xf32> to vector<16x128xbf16>
    %c1_243 = arith.constant 1 : index
    %c0_244 = arith.constant 0 : index
    %c0_245 = arith.constant 0 : index
    %915 = vector.load %arg4[%c1_243, %c0_244, %c0_245] : memref<2x128x384xbf16, #tpu.memory_space<vmem>>, vector<1x128x384xbf16>
    %916 = vector.shape_cast %915 : vector<1x128x384xbf16> to vector<128x384xbf16>
    %cst_246 = arith.constant dense<0.000000e+00> : vector<16x384xf32>
    %917 = tpu.matmul %914, %916, %cst_246 {dimension_numbers = #tpu.dot_dimension_numbers<[1], [0], [0], [1], [0, 0, 1, 1], [], []>} : vector<16x128xbf16>, vector<128x384xbf16>, vector<16x384xf32> -> vector<16x384xf32>
    %918 = vector.broadcast %18 : vector<1x384xf32> to vector<16x384xf32>
    %919 = arith.addf %917, %918 : vector<16x384xf32>
    %920 = arith.truncf %879 : vector<16x128xf32> to vector<16x128xbf16>
    %c1_247 = arith.constant 1 : index
    %c0_248 = arith.constant 0 : index
    %c0_249 = arith.constant 0 : index
    %921 = vector.load %arg5[%c1_247, %c0_248, %c0_249] : memref<2x128x384xbf16, #tpu.memory_space<vmem>>, vector<1x128x384xbf16>
    %922 = vector.shape_cast %921 : vector<1x128x384xbf16> to vector<128x384xbf16>
    %cst_250 = arith.constant dense<0.000000e+00> : vector<16x384xf32>
    %923 = tpu.matmul %920, %922, %cst_250 {dimension_numbers = #tpu.dot_dimension_numbers<[1], [0], [0], [1], [0, 0, 1, 1], [], []>} : vector<16x128xbf16>, vector<128x384xbf16>, vector<16x384xf32> -> vector<16x384xf32>
    %924 = vector.extract_strided_slice %919 {offsets = [0, 0], sizes = [16, 256], strides = [1, 1]} : vector<16x384xf32> to vector<16x256xf32>
    %925 = vector.extract_strided_slice %923 {offsets = [0, 0], sizes = [16, 256], strides = [1, 1]} : vector<16x384xf32> to vector<16x256xf32>
    %926 = arith.addf %924, %925 : vector<16x256xf32>
    %927 = arith.negf %926 : vector<16x256xf32>
    %928 = math.exp %927 : vector<16x256xf32>
    %cst_251 = arith.constant 1.000000e+00 : f32
    %929 = vector.broadcast %cst_251 : f32 to vector<16x256xf32>
    %930 = arith.addf %929, %928 : vector<16x256xf32>
    %931 = arith.divf %929, %930 : vector<16x256xf32>
    %932 = vector.extract_strided_slice %931 {offsets = [0, 0], sizes = [16, 128], strides = [1, 1]} : vector<16x256xf32> to vector<16x128xf32>
    %933 = vector.extract_strided_slice %931 {offsets = [0, 128], sizes = [16, 128], strides = [1, 1]} : vector<16x256xf32> to vector<16x128xf32>
    %934 = vector.extract_strided_slice %919 {offsets = [0, 256], sizes = [16, 128], strides = [1, 1]} : vector<16x384xf32> to vector<16x128xf32>
    %935 = vector.extract_strided_slice %923 {offsets = [0, 256], sizes = [16, 128], strides = [1, 1]} : vector<16x384xf32> to vector<16x128xf32>
    %936 = vector.broadcast %22 : vector<1x128xf32> to vector<16x128xf32>
    %937 = arith.addf %935, %936 : vector<16x128xf32>
    %938 = arith.mulf %932, %937 : vector<16x128xf32>
    %939 = arith.addf %934, %938 : vector<16x128xf32>
    %940 = math.tanh %939 : vector<16x128xf32>
    %cst_252 = arith.constant 1.000000e+00 : f32
    %941 = vector.broadcast %cst_252 : f32 to vector<16x128xf32>
    %942 = arith.subf %941, %933 : vector<16x128xf32>
    %943 = arith.mulf %942, %940 : vector<16x128xf32>
    %944 = arith.mulf %933, %879 : vector<16x128xf32>
    %945 = arith.addf %943, %944 : vector<16x128xf32>
    %c13_i32 = arith.constant 13 : i32
    %946 = arith.addi %16, %c13_i32 : i32
    %947 = vector.broadcast %946 : i32 to vector<16x1xi32>
    %948 = arith.cmpi eq, %15, %947 : vector<16x1xi32>
    %949 = vector.shape_cast %948 : vector<16x1xi1> to vector<16x1xi1>
    %950 = vector.broadcast %949 : vector<16x1xi1> to vector<16x128xi1>
    %951 = arith.select %950, %945, %885 : vector<16x128xi1>, vector<16x128xf32>
    %952 = vector.extract_strided_slice %12 {offsets = [14, 0, 0], sizes = [1, 16, 384], strides = [1, 1, 1]} : vector<16x16x384xf32> to vector<1x16x384xf32>
    %953 = vector.shape_cast %952 : vector<1x16x384xf32> to vector<16x384xf32>
    %954 = arith.truncf %913 : vector<16x128xf32> to vector<16x128xbf16>
    %c0_253 = arith.constant 0 : index
    %c0_254 = arith.constant 0 : index
    %c0_255 = arith.constant 0 : index
    %955 = vector.load %arg5[%c0_253, %c0_254, %c0_255] : memref<2x128x384xbf16, #tpu.memory_space<vmem>>, vector<1x128x384xbf16>
    %956 = vector.shape_cast %955 : vector<1x128x384xbf16> to vector<128x384xbf16>
    %cst_256 = arith.constant dense<0.000000e+00> : vector<16x384xf32>
    %957 = tpu.matmul %954, %956, %cst_256 {dimension_numbers = #tpu.dot_dimension_numbers<[1], [0], [0], [1], [0, 0, 1, 1], [], []>} : vector<16x128xbf16>, vector<128x384xbf16>, vector<16x384xf32> -> vector<16x384xf32>
    %958 = vector.extract_strided_slice %953 {offsets = [0, 0], sizes = [16, 256], strides = [1, 1]} : vector<16x384xf32> to vector<16x256xf32>
    %959 = vector.extract_strided_slice %957 {offsets = [0, 0], sizes = [16, 256], strides = [1, 1]} : vector<16x384xf32> to vector<16x256xf32>
    %960 = arith.addf %958, %959 : vector<16x256xf32>
    %961 = arith.negf %960 : vector<16x256xf32>
    %962 = math.exp %961 : vector<16x256xf32>
    %cst_257 = arith.constant 1.000000e+00 : f32
    %963 = vector.broadcast %cst_257 : f32 to vector<16x256xf32>
    %964 = arith.addf %963, %962 : vector<16x256xf32>
    %965 = arith.divf %963, %964 : vector<16x256xf32>
    %966 = vector.extract_strided_slice %965 {offsets = [0, 0], sizes = [16, 128], strides = [1, 1]} : vector<16x256xf32> to vector<16x128xf32>
    %967 = vector.extract_strided_slice %965 {offsets = [0, 128], sizes = [16, 128], strides = [1, 1]} : vector<16x256xf32> to vector<16x128xf32>
    %968 = vector.extract_strided_slice %953 {offsets = [0, 256], sizes = [16, 128], strides = [1, 1]} : vector<16x384xf32> to vector<16x128xf32>
    %969 = vector.extract_strided_slice %957 {offsets = [0, 256], sizes = [16, 128], strides = [1, 1]} : vector<16x384xf32> to vector<16x128xf32>
    %970 = vector.broadcast %20 : vector<1x128xf32> to vector<16x128xf32>
    %971 = arith.addf %969, %970 : vector<16x128xf32>
    %972 = arith.mulf %966, %971 : vector<16x128xf32>
    %973 = arith.addf %968, %972 : vector<16x128xf32>
    %974 = math.tanh %973 : vector<16x128xf32>
    %cst_258 = arith.constant 1.000000e+00 : f32
    %975 = vector.broadcast %cst_258 : f32 to vector<16x128xf32>
    %976 = arith.subf %975, %967 : vector<16x128xf32>
    %977 = arith.mulf %976, %974 : vector<16x128xf32>
    %978 = arith.mulf %967, %913 : vector<16x128xf32>
    %979 = arith.addf %977, %978 : vector<16x128xf32>
    %980 = arith.truncf %979 : vector<16x128xf32> to vector<16x128xbf16>
    %c1_259 = arith.constant 1 : index
    %c0_260 = arith.constant 0 : index
    %c0_261 = arith.constant 0 : index
    %981 = vector.load %arg4[%c1_259, %c0_260, %c0_261] : memref<2x128x384xbf16, #tpu.memory_space<vmem>>, vector<1x128x384xbf16>
    %982 = vector.shape_cast %981 : vector<1x128x384xbf16> to vector<128x384xbf16>
    %cst_262 = arith.constant dense<0.000000e+00> : vector<16x384xf32>
    %983 = tpu.matmul %980, %982, %cst_262 {dimension_numbers = #tpu.dot_dimension_numbers<[1], [0], [0], [1], [0, 0, 1, 1], [], []>} : vector<16x128xbf16>, vector<128x384xbf16>, vector<16x384xf32> -> vector<16x384xf32>
    %984 = vector.broadcast %18 : vector<1x384xf32> to vector<16x384xf32>
    %985 = arith.addf %983, %984 : vector<16x384xf32>
    %986 = arith.truncf %945 : vector<16x128xf32> to vector<16x128xbf16>
    %c1_263 = arith.constant 1 : index
    %c0_264 = arith.constant 0 : index
    %c0_265 = arith.constant 0 : index
    %987 = vector.load %arg5[%c1_263, %c0_264, %c0_265] : memref<2x128x384xbf16, #tpu.memory_space<vmem>>, vector<1x128x384xbf16>
    %988 = vector.shape_cast %987 : vector<1x128x384xbf16> to vector<128x384xbf16>
    %cst_266 = arith.constant dense<0.000000e+00> : vector<16x384xf32>
    %989 = tpu.matmul %986, %988, %cst_266 {dimension_numbers = #tpu.dot_dimension_numbers<[1], [0], [0], [1], [0, 0, 1, 1], [], []>} : vector<16x128xbf16>, vector<128x384xbf16>, vector<16x384xf32> -> vector<16x384xf32>
    %990 = vector.extract_strided_slice %985 {offsets = [0, 0], sizes = [16, 256], strides = [1, 1]} : vector<16x384xf32> to vector<16x256xf32>
    %991 = vector.extract_strided_slice %989 {offsets = [0, 0], sizes = [16, 256], strides = [1, 1]} : vector<16x384xf32> to vector<16x256xf32>
    %992 = arith.addf %990, %991 : vector<16x256xf32>
    %993 = arith.negf %992 : vector<16x256xf32>
    %994 = math.exp %993 : vector<16x256xf32>
    %cst_267 = arith.constant 1.000000e+00 : f32
    %995 = vector.broadcast %cst_267 : f32 to vector<16x256xf32>
    %996 = arith.addf %995, %994 : vector<16x256xf32>
    %997 = arith.divf %995, %996 : vector<16x256xf32>
    %998 = vector.extract_strided_slice %997 {offsets = [0, 0], sizes = [16, 128], strides = [1, 1]} : vector<16x256xf32> to vector<16x128xf32>
    %999 = vector.extract_strided_slice %997 {offsets = [0, 128], sizes = [16, 128], strides = [1, 1]} : vector<16x256xf32> to vector<16x128xf32>
    %1000 = vector.extract_strided_slice %985 {offsets = [0, 256], sizes = [16, 128], strides = [1, 1]} : vector<16x384xf32> to vector<16x128xf32>
    %1001 = vector.extract_strided_slice %989 {offsets = [0, 256], sizes = [16, 128], strides = [1, 1]} : vector<16x384xf32> to vector<16x128xf32>
    %1002 = vector.broadcast %22 : vector<1x128xf32> to vector<16x128xf32>
    %1003 = arith.addf %1001, %1002 : vector<16x128xf32>
    %1004 = arith.mulf %998, %1003 : vector<16x128xf32>
    %1005 = arith.addf %1000, %1004 : vector<16x128xf32>
    %1006 = math.tanh %1005 : vector<16x128xf32>
    %cst_268 = arith.constant 1.000000e+00 : f32
    %1007 = vector.broadcast %cst_268 : f32 to vector<16x128xf32>
    %1008 = arith.subf %1007, %999 : vector<16x128xf32>
    %1009 = arith.mulf %1008, %1006 : vector<16x128xf32>
    %1010 = arith.mulf %999, %945 : vector<16x128xf32>
    %1011 = arith.addf %1009, %1010 : vector<16x128xf32>
    %c14_i32 = arith.constant 14 : i32
    %1012 = arith.addi %16, %c14_i32 : i32
    %1013 = vector.broadcast %1012 : i32 to vector<16x1xi32>
    %1014 = arith.cmpi eq, %15, %1013 : vector<16x1xi32>
    %1015 = vector.shape_cast %1014 : vector<16x1xi1> to vector<16x1xi1>
    %1016 = vector.broadcast %1015 : vector<16x1xi1> to vector<16x128xi1>
    %1017 = arith.select %1016, %1011, %951 : vector<16x128xi1>, vector<16x128xf32>
    %1018 = vector.extract_strided_slice %12 {offsets = [15, 0, 0], sizes = [1, 16, 384], strides = [1, 1, 1]} : vector<16x16x384xf32> to vector<1x16x384xf32>
    %1019 = vector.shape_cast %1018 : vector<1x16x384xf32> to vector<16x384xf32>
    %1020 = arith.truncf %979 : vector<16x128xf32> to vector<16x128xbf16>
    %c0_269 = arith.constant 0 : index
    %c0_270 = arith.constant 0 : index
    %c0_271 = arith.constant 0 : index
    %1021 = vector.load %arg5[%c0_269, %c0_270, %c0_271] : memref<2x128x384xbf16, #tpu.memory_space<vmem>>, vector<1x128x384xbf16>
    %1022 = vector.shape_cast %1021 : vector<1x128x384xbf16> to vector<128x384xbf16>
    %cst_272 = arith.constant dense<0.000000e+00> : vector<16x384xf32>
    %1023 = tpu.matmul %1020, %1022, %cst_272 {dimension_numbers = #tpu.dot_dimension_numbers<[1], [0], [0], [1], [0, 0, 1, 1], [], []>} : vector<16x128xbf16>, vector<128x384xbf16>, vector<16x384xf32> -> vector<16x384xf32>
    %1024 = vector.extract_strided_slice %1019 {offsets = [0, 0], sizes = [16, 256], strides = [1, 1]} : vector<16x384xf32> to vector<16x256xf32>
    %1025 = vector.extract_strided_slice %1023 {offsets = [0, 0], sizes = [16, 256], strides = [1, 1]} : vector<16x384xf32> to vector<16x256xf32>
    %1026 = arith.addf %1024, %1025 : vector<16x256xf32>
    %1027 = arith.negf %1026 : vector<16x256xf32>
    %1028 = math.exp %1027 : vector<16x256xf32>
    %cst_273 = arith.constant 1.000000e+00 : f32
    %1029 = vector.broadcast %cst_273 : f32 to vector<16x256xf32>
    %1030 = arith.addf %1029, %1028 : vector<16x256xf32>
    %1031 = arith.divf %1029, %1030 : vector<16x256xf32>
    %1032 = vector.extract_strided_slice %1031 {offsets = [0, 0], sizes = [16, 128], strides = [1, 1]} : vector<16x256xf32> to vector<16x128xf32>
    %1033 = vector.extract_strided_slice %1031 {offsets = [0, 128], sizes = [16, 128], strides = [1, 1]} : vector<16x256xf32> to vector<16x128xf32>
    %1034 = vector.extract_strided_slice %1019 {offsets = [0, 256], sizes = [16, 128], strides = [1, 1]} : vector<16x384xf32> to vector<16x128xf32>
    %1035 = vector.extract_strided_slice %1023 {offsets = [0, 256], sizes = [16, 128], strides = [1, 1]} : vector<16x384xf32> to vector<16x128xf32>
    %1036 = vector.broadcast %20 : vector<1x128xf32> to vector<16x128xf32>
    %1037 = arith.addf %1035, %1036 : vector<16x128xf32>
    %1038 = arith.mulf %1032, %1037 : vector<16x128xf32>
    %1039 = arith.addf %1034, %1038 : vector<16x128xf32>
    %1040 = math.tanh %1039 : vector<16x128xf32>
    %cst_274 = arith.constant 1.000000e+00 : f32
    %1041 = vector.broadcast %cst_274 : f32 to vector<16x128xf32>
    %1042 = arith.subf %1041, %1033 : vector<16x128xf32>
    %1043 = arith.mulf %1042, %1040 : vector<16x128xf32>
    %1044 = arith.mulf %1033, %979 : vector<16x128xf32>
    %1045 = arith.addf %1043, %1044 : vector<16x128xf32>
    %1046 = arith.truncf %1045 : vector<16x128xf32> to vector<16x128xbf16>
    %c1_275 = arith.constant 1 : index
    %c0_276 = arith.constant 0 : index
    %c0_277 = arith.constant 0 : index
    %1047 = vector.load %arg4[%c1_275, %c0_276, %c0_277] : memref<2x128x384xbf16, #tpu.memory_space<vmem>>, vector<1x128x384xbf16>
    %1048 = vector.shape_cast %1047 : vector<1x128x384xbf16> to vector<128x384xbf16>
    %cst_278 = arith.constant dense<0.000000e+00> : vector<16x384xf32>
    %1049 = tpu.matmul %1046, %1048, %cst_278 {dimension_numbers = #tpu.dot_dimension_numbers<[1], [0], [0], [1], [0, 0, 1, 1], [], []>} : vector<16x128xbf16>, vector<128x384xbf16>, vector<16x384xf32> -> vector<16x384xf32>
    %1050 = vector.broadcast %18 : vector<1x384xf32> to vector<16x384xf32>
    %1051 = arith.addf %1049, %1050 : vector<16x384xf32>
    %1052 = arith.truncf %1011 : vector<16x128xf32> to vector<16x128xbf16>
    %c1_279 = arith.constant 1 : index
    %c0_280 = arith.constant 0 : index
    %c0_281 = arith.constant 0 : index
    %1053 = vector.load %arg5[%c1_279, %c0_280, %c0_281] : memref<2x128x384xbf16, #tpu.memory_space<vmem>>, vector<1x128x384xbf16>
    %1054 = vector.shape_cast %1053 : vector<1x128x384xbf16> to vector<128x384xbf16>
    %cst_282 = arith.constant dense<0.000000e+00> : vector<16x384xf32>
    %1055 = tpu.matmul %1052, %1054, %cst_282 {dimension_numbers = #tpu.dot_dimension_numbers<[1], [0], [0], [1], [0, 0, 1, 1], [], []>} : vector<16x128xbf16>, vector<128x384xbf16>, vector<16x384xf32> -> vector<16x384xf32>
    %1056 = vector.extract_strided_slice %1051 {offsets = [0, 0], sizes = [16, 256], strides = [1, 1]} : vector<16x384xf32> to vector<16x256xf32>
    %1057 = vector.extract_strided_slice %1055 {offsets = [0, 0], sizes = [16, 256], strides = [1, 1]} : vector<16x384xf32> to vector<16x256xf32>
    %1058 = arith.addf %1056, %1057 : vector<16x256xf32>
    %1059 = arith.negf %1058 : vector<16x256xf32>
    %1060 = math.exp %1059 : vector<16x256xf32>
    %cst_283 = arith.constant 1.000000e+00 : f32
    %1061 = vector.broadcast %cst_283 : f32 to vector<16x256xf32>
    %1062 = arith.addf %1061, %1060 : vector<16x256xf32>
    %1063 = arith.divf %1061, %1062 : vector<16x256xf32>
    %1064 = vector.extract_strided_slice %1063 {offsets = [0, 0], sizes = [16, 128], strides = [1, 1]} : vector<16x256xf32> to vector<16x128xf32>
    %1065 = vector.extract_strided_slice %1063 {offsets = [0, 128], sizes = [16, 128], strides = [1, 1]} : vector<16x256xf32> to vector<16x128xf32>
    %1066 = vector.extract_strided_slice %1051 {offsets = [0, 256], sizes = [16, 128], strides = [1, 1]} : vector<16x384xf32> to vector<16x128xf32>
    %1067 = vector.extract_strided_slice %1055 {offsets = [0, 256], sizes = [16, 128], strides = [1, 1]} : vector<16x384xf32> to vector<16x128xf32>
    %1068 = vector.broadcast %22 : vector<1x128xf32> to vector<16x128xf32>
    %1069 = arith.addf %1067, %1068 : vector<16x128xf32>
    %1070 = arith.mulf %1064, %1069 : vector<16x128xf32>
    %1071 = arith.addf %1066, %1070 : vector<16x128xf32>
    %1072 = math.tanh %1071 : vector<16x128xf32>
    %cst_284 = arith.constant 1.000000e+00 : f32
    %1073 = vector.broadcast %cst_284 : f32 to vector<16x128xf32>
    %1074 = arith.subf %1073, %1065 : vector<16x128xf32>
    %1075 = arith.mulf %1074, %1072 : vector<16x128xf32>
    %1076 = arith.mulf %1065, %1011 : vector<16x128xf32>
    %1077 = arith.addf %1075, %1076 : vector<16x128xf32>
    %c15_i32 = arith.constant 15 : i32
    %1078 = arith.addi %16, %c15_i32 : i32
    %1079 = vector.broadcast %1078 : i32 to vector<16x1xi32>
    %1080 = arith.cmpi eq, %15, %1079 : vector<16x1xi32>
    %1081 = vector.shape_cast %1080 : vector<16x1xi1> to vector<16x1xi1>
    %1082 = vector.broadcast %1081 : vector<16x1xi1> to vector<16x128xi1>
    %1083 = arith.select %1082, %1077, %1017 : vector<16x128xi1>, vector<16x128xf32>
    %c0_285 = arith.constant 0 : index
    %c0_286 = arith.constant 0 : index
    %c0_287 = arith.constant 0 : index
    %1084 = vector.load %arg9[%c0_285, %c0_286, %c0_287] : memref<2x16x128xf32, #tpu.memory_space<vmem>>, vector<1x16x128xf32>
    %1085 = vector.shape_cast %1084 : vector<1x16x128xf32> to vector<16x128xf32>
    %1086 = vector.shape_cast %1045 : vector<16x128xf32> to vector<1x16x128xf32>
    tpu.vector_store %arg9[%c0_285, %c0_286, %c0_287], %1086 {strides = array<i32>} : memref<2x16x128xf32, #tpu.memory_space<vmem>>, vector<1x16x128xf32>,
    %c1_288 = arith.constant 1 : index
    %c0_289 = arith.constant 0 : index
    %c0_290 = arith.constant 0 : index
    %1087 = vector.load %arg9[%c1_288, %c0_289, %c0_290] : memref<2x16x128xf32, #tpu.memory_space<vmem>>, vector<1x16x128xf32>
    %1088 = vector.shape_cast %1087 : vector<1x16x128xf32> to vector<16x128xf32>
    %1089 = vector.shape_cast %1077 : vector<16x128xf32> to vector<1x16x128xf32>
    tpu.vector_store %arg9[%c1_288, %c0_289, %c0_290], %1089 {strides = array<i32>} : memref<2x16x128xf32, #tpu.memory_space<vmem>>, vector<1x16x128xf32>,
    %c0_291 = arith.constant 0 : index
    %c0_292 = arith.constant 0 : index
    %1090 = vector.load %arg8[%c0_291, %c0_292] : memref<16x128xf32, #tpu.memory_space<vmem>>, vector<16x128xf32>
    tpu.vector_store %arg8[%c0_291, %c0_292], %1083 {strides = array<i32>} : memref<16x128xf32, #tpu.memory_space<vmem>>, vector<16x128xf32>,
    %c1_i32_293 = arith.constant 1 : i32
    %1091 = arith.cmpi eq, %arg1, %c1_i32_293 : i32
    %1092 = arith.extui %1091 : i1 to i32
    %c0_i32_294 = arith.constant 0 : i32
    %1093 = arith.cmpi ne, %1092, %c0_i32_294 : i32
    scf.if %1093 {
      %c0_295 = arith.constant 0 : index
      %c0_296 = arith.constant 0 : index
      %1094 = vector.load %arg8[%c0_295, %c0_296] : memref<16x128xf32, #tpu.memory_space<vmem>>, vector<16x128xf32>
      %1095 = arith.mulf %1094, %1094 : vector<16x128xf32>
      %cst_297 = arith.constant dense<0.000000e+00> : vector<16xf32>
      %1096 = vector.multi_reduction <add>, %1095, %cst_297 [1] : vector<16x128xf32> to vector<16xf32>
      %1097 = vector.shape_cast %1096 : vector<16xf32> to vector<16x1xf32>
      %1098 = math.rsqrt %1097 : vector<16x1xf32>
      %1099 = vector.broadcast %1098 : vector<16x1xf32> to vector<16x128xf32>
      %1100 = arith.mulf %1094, %1099 : vector<16x128xf32>
      %c0_298 = arith.constant 0 : index
      %c0_299 = arith.constant 0 : index
      %1101 = vector.load %arg8[%c0_298, %c0_299] : memref<16x128xf32, #tpu.memory_space<vmem>>, vector<16x128xf32>
      tpu.vector_store %arg8[%c0_298, %c0_299], %1100 {strides = array<i32>} : memref<16x128xf32, #tpu.memory_space<vmem>>, vector<16x128xf32>,
    } else {
    }
    return
  }
  func.func @transform_0(%arg0: i32, %arg1: i32) -> (i32, i32) {
    %c0_i32 = arith.constant 0 : i32
    %c0_i32_0 = arith.constant 0 : i32
    return %arg0, %c0_i32 : i32, i32
  }
  func.func @transform_1(%arg0: i32, %arg1: i32) -> (i32, i32, i32) {
    %c0_i32 = arith.constant 0 : i32
    %c0_i32_0 = arith.constant 0 : i32
    return %arg1, %arg0, %c0_i32 : i32, i32, i32
  }
  func.func @transform_2(%arg0: i32, %arg1: i32) -> (i32, i32, i32) {
    %c0_i32 = arith.constant 0 : i32
    %c0_i32_0 = arith.constant 0 : i32
    %c0_i32_1 = arith.constant 0 : i32
    %c0_i32_2 = arith.constant 0 : i32
    return %c0_i32, %c0_i32_0, %c0_i32_1 : i32, i32, i32
  }
  func.func @transform_3(%arg0: i32, %arg1: i32) -> (i32, i32, i32) {
    %c0_i32 = arith.constant 0 : i32
    %c0_i32_0 = arith.constant 0 : i32
    %c0_i32_1 = arith.constant 0 : i32
    %c0_i32_2 = arith.constant 0 : i32
    return %c0_i32, %c0_i32_0, %c0_i32_1 : i32, i32, i32
  }
  func.func @transform_4(%arg0: i32, %arg1: i32) -> (i32, i32, i32) {
    %c0_i32 = arith.constant 0 : i32
    %c0_i32_0 = arith.constant 0 : i32
    %c0_i32_1 = arith.constant 0 : i32
    %c0_i32_2 = arith.constant 0 : i32
    return %c0_i32, %c0_i32_0, %c0_i32_1 : i32, i32, i32
  }
  func.func @transform_5(%arg0: i32, %arg1: i32) -> (i32, i32, i32) {
    %c0_i32 = arith.constant 0 : i32
    %c0_i32_0 = arith.constant 0 : i32
    %c0_i32_1 = arith.constant 0 : i32
    %c0_i32_2 = arith.constant 0 : i32
    return %c0_i32, %c0_i32_0, %c0_i32_1 : i32, i32, i32
  }
  func.func @transform_6(%arg0: i32, %arg1: i32) -> (i32, i32) {
    %c0_i32 = arith.constant 0 : i32
    %c0_i32_0 = arith.constant 0 : i32
    return %arg0, %c0_i32 : i32, i32
  }
}

</mosaic_0001>

<bundles_post_ra>
// kernel: tpu_custom_call.1
= control target key start
LH: loop header
LB: loop body
LE: loop exit
PB: predicated region body
PF: predicated region fallthrough
CT: control target
= control target key end

     0   :  { %11 = vsyncpa [#allocation4], 0  ;;  %s14726_s0 = inlined_call_operand.vmem [shape: s32[16,1], index: 0, kind: input, shape index: {}]   ;;  %s14727_s1 = inlined_call_operand.hbm [shape: bf16[32,16,128], index: 1, kind: input, shape index: {}]   ;;  %s14728_s2 = inlined_call_operand.hbm [shape: bf16[2,128,384], index: 2, kind: input, shape index: {}]   ;;  %s14729_s3 = inlined_call_operand.hbm [shape: bf16[2,128,384], index: 3, kind: input, shape index: {}]   ;;  %s14730_s4 = inlined_call_operand.vmem [shape: f32[2,1,384], index: 4, kind: input, shape index: {}]   ;;  %s14731_s5 = inlined_call_operand.vmem [shape: f32[2,1,128], index: 5, kind: input, shape index: {}]   ;;  %s14732_s6 = inlined_call_operand.hbm [shape: f32[16,128], index: 6, kind: output, shape index: {}]  }
   0x1   :  { %13 = vsyncpa [#allocation4 + $0x1], 0 }
   0x2   :  { %14 = vsyncpa [#allocation7], 0 }
   0x3   :  { %15 = vsyncpa [#allocation5], 0  ;;  %s10597_s21 = smov 0   ;;  %s10599_s22 = smov 0  }
   0x4   :  { %s10601_s23 = smov 0   ;;  %s10603_s24 = smov 0  }
   0x5   :  { %s10605_s25 = smov 0   ;;  %s10607_s26 = smov 0  }
   0x6 LB: > { %s7393_s27 = sadd.s32 4294967295, %s10546_s26   ;;  %p81_p0 = scmp.ne.s32.totalorder %s10530_s22, %s10526_s21  ;;  %s10546_s26 = sphi %s10607_s26, %s21_s26   ;;  %s10542_s25 = sphi %s10605_s25, %s15929_s25   ;;  %s10538_s24 = sphi %s10603_s24, %s15928_s24   ;;  %s10534_s23 = sphi %s10601_s23, %s15927_s23   ;;  %s10530_s22 = sphi %s10599_s22, %s15926_s22   ;;  %s10526_s21 = sphi %s10597_s21, %s15925_s21  }
   0x7   : > { %p10629_p1 = scmp.eq.s32.totalorder %s7393_s27, 0  ;;  %p7394_p2 = scmp.ge.s32.totalorder %s10546_s26, 1 }
   0x8   : > { %p202_p3 = scmp.lt.s32.totalorder %s10546_s26, 3  ;;  %s10548_s7 = smov [#allocation6]  }
   0x9   : > { %s15107_s28 = scalar_select %p10629_p1, 1, 0 }
   0xa   : > { %p10637_p4 = por %p10629_p1, %p81_p0  ;;  %p10641_p5 = pnand %p7394_p2, %p202_p3 }
   0xb   : > { %s223_s8 = sshll.u32 %s10548_s7, 4  ;;  %s10549_s10 = smov [#allocation8]   ;;  %s224_s8 = int_to_ptr.vmem [resolvable:$true] %s223_s8 }
   0xc   : > { %p9140_p6 = pneg %p10641_p5  ;;  %s236_s11 = sshll.u32 %s10549_s10, 4  ;;  %s237_s11 = int_to_ptr.vmem [resolvable:$true] %s236_s11 }
   0xd   : > { %s10395_s12 = scalar_lea.vmem %s224_s8, 6144  ;;  %p10403_p12 = scmp.lt.s32.totalorder %s224_s8, %s224_s8 }
   0xe   : > { %p10649_p7 = pnand %p9140_p6, %p10629_p1  ;;  %p10396_p9 = scmp.ne.s32.totalorder %s224_s8, %s10395_s12 }
   0xf   : > { %p10404_p13 = scmp.lt.s32.totalorder %s10395_s12, %s10395_s12 }
  0x10   : > { %p10386_p8 = pneg %p10649_p7 }
  0x11   : > { %p10405_p0 = por %p10404_p13, %p10403_p12 }
  0x12   : > { %p10398_p10 = pnand %p10396_p9, %p10386_p8 }
  0x14   : > { %p10399_p11 = pneg %p10398_p10 }
  0x16   : > { %p10406_p2 = pnand %p10405_p0, %p10399_p11 }
  0x18   : > { %10409 = shalt.err (!%p10406_p2)
}
  0x19   : > { %s10550_s13 = smov 192   ;;  %s10551_s14 = smov 12  }
  0x1a   : > { %9143 = dma.hbm_to_vmem [thread:$0]  (!%p10649_p7), %s14728_s2, 6144, %s224_s8, [#allocation7], %s10550_s13, %s10550_s13, %s10551_s14  }
  0x1b   : > { %s10421_s17 = scalar_lea.vmem %s237_s11, 6144  ;;  %p10429_p10 = scmp.lt.s32.totalorder %s237_s11, %s237_s11 }
  0x1c   : > { %p10422_p3 = scmp.ne.s32.totalorder %s237_s11, %s10421_s17  ;;  %p10430_p1 = scmp.lt.s32.totalorder %s10421_s17, %s10421_s17 }
  0x1e   : > { %p10424_p6 = pnand %p10422_p3, %p10386_p8  ;;  %p10431_p12 = por %p10430_p1, %p10429_p10 }
  0x20   : > { %p10425_p9 = pneg %p10424_p6 }
  0x22   : > { %p10432_p11 = pnand %p10431_p12, %p10425_p9 }
  0x24   : > { %10435 = shalt.err (!%p10432_p11)
}
  0x25   : > { %9146 = dma.hbm_to_vmem [thread:$0]  (!%p10649_p7), %s14729_s3, 6144, %s237_s11, [#allocation7], %s10550_s13, %s10550_s13, %s10551_s14  }
  0x26   : > { %s30_s20 = sadd.s32 1, %s10542_s25  ;;  %s68_s21 = sadd.s32 1, %s10534_s23 }
  0x27   : > { %p31_p1 = scmp.ge.s32.totalorder %s30_s20, 2  ;;  %p75_p8 = scmp.ne.s32.totalorder %s10534_s23, %s10530_s22 }
  0x28   : > { %p76_p13 = scmp.eq.s32.totalorder %s10546_s26, 0  ;;  %p9153_p0 = scmp.lt.s32.totalorder %s10546_s26, 2 }
  0x29   : > { %s15931_s20 = smov (%p31_p1, %s30_s20), 0  ;;  %s256_s7 = sand.u32 1, %s10534_s23  }
  0x2a   : > { %p77_p2 = por %p76_p13, %p75_p8  ;;  %s63_s8 = ssub.s32 %s10542_s25, %s15931_s20 }
  0x2b   : > { %p66_p3 = scmp.eq.s32.totalorder %s63_s8, 0  ;;  %s7399_s9 = sshll.u32 %s256_s7, 7 }
  0x2c   : > { %s7661_s10 = sshll.u32 %s10542_s25, 11  ;;  %s260_s14 = scalar_lea.vmem [#allocation3], %s7399_s9 }
  0x2d   : > { %s10684_s12 = scalar_select %p66_p3, %s10534_s23, %s68_s21  }
  0x2e   : > { %s269_s13 = scalar_lea.hbm %s14727_s1, %s7661_s10  ;;  %s270_s16 = sshll.u32 %s260_s14, 4  ;;  %s271_s16 = int_to_ptr.vmem [resolvable:$true] %s270_s16 }
  0x2f   : > { %p10691_p7 = pnand %p9153_p0, %p77_p2  ;;  %s257_s18 = scalar_lea.sflag [#allocation4], %s256_s7 }
  0x30   : > { %s10449_s19 = scalar_lea.vmem %s271_s16, 2048  ;;  %s10552_s21 = smov [#allocation3]  }
  0x31   : > { %p10438_p6 = pneg %p10691_p7  ;;  %p10450_p9 = scmp.ne.s32.totalorder %s271_s16, %s10449_s19 }
  0x32   : > { %s10454_s8 = sshll.u32 %s10552_s21, 4  ;;  %s10455_s8 = int_to_ptr.vmem [resolvable:$false] %s10454_s8 }
  0x33   : > { %p10452_p10 = pnand %p10450_p9, %p10438_p6  ;;  %s10456_s10 = scalar_lea.vmem %s10455_s8, 4096 }
  0x34   : > { %p10457_p11 = scmp.lt.s32.totalorder %s271_s16, %s10455_s8  ;;  %p10458_p1 = scmp.lt.s32.totalorder %s10456_s10, %s10449_s19 }
  0x35   : > { %p10453_p12 = pneg %p10452_p10 }
  0x36   : > { %p10459_p8 = por %p10458_p1, %p10457_p11 }
  0x38   : > { %p10460_p13 = pnand %p10459_p8, %p10453_p12 }
  0x3a   : > { %10463 = shalt.err (!%p10460_p13)
}
  0x3b   : > { %s10553_s9 = smov 64   ;;  %s10554_s15 = smov 4  }
  0x3c   : > { %9150 = dma.hbm_to_vmem [thread:$0]  (!%p10691_p7), %s269_s13, 2048, %s271_s16, %s257_s18, %s10553_s9, %s10553_s9, %s10554_s15  }
  0x3d   : > { %282 = sbr.rel (%p10641_p5) target bundleno = 5688 (0x1638), region = 44 }
  0x42   : > { %s284_s7 = sand.u32 1, %s10530_s22  }
  0x43   : > { %s7404_s11 = sshll.u32 %s284_s7, 7  ;;  %s285_s14 = scalar_lea.sflag [#allocation4], %s284_s7 }
  0x44   : > { %s10702_s21 = scalar_lea.vmem [#allocation3], %s7404_s11 }
  0x45   : > { %10513 = dma.done.wait (%p10637_p4), %s285_s14, 2048  }
  0x46   : > { %10515 = vsyncadd (%p10637_p4), %s285_s14, 4294965248  ;;  %p15112_p0 = scmp.ne.s32.totalorder %s15107_s28, 0 }
  0x48   : > { %10517 = dma.done.wait (%p15112_p0), [#allocation7], 12288  }
  0x49   : > { %10519 = vsyncadd (%p15112_p0), [#allocation7], 4294955008  ;;  %p7407_p5 = scmp.ne.s32.totalorder %s10538_s24, 0 }
  0x4b   : > { %338 = sbr.rel (%p7407_p5) target bundleno = 84 (0x54), region = 60 }
  0x50   : > { %v10555_v0 = vmov 0.0  }
  0x51   : > { %339 = vst [vmem:[#allocation2 + $0x10] sm:$0xff] %v10555_v0  ;;  %340 = vst [vmem:[#allocation2] sm:$0xff] %v10555_v0 }
  0x52   : > { %341 = vst [vmem:[#allocation2 + $0x18] sm:$0xff] %v10555_v0  ;;  %342 = vst [vmem:[#allocation2 + $0x8] sm:$0xff] %v10555_v0 }
  0x53   : > { %343 = vst [vmem:[#allocation9] sm:$0xff] %v10555_v0  ;;  %344 = vst [vmem:[#allocation9 + $0x8] sm:$0xff] %v10555_v0 }
  0x54 PF: > { %v9221_v1 = vld [vmem:[#allocation6 + $0xb0] ss:$12 sps:$4 sm:$0xff]   ;;  %v9222_v2 = vld [vmem:[#allocation6 + $0x98] ss:$12 sps:$4 sm:$0xff]   ;;  %v9223_v3 = vld [vmem:[#allocation6 + $0x80] ss:$12 sps:$4 sm:$0xff]  }
  0x55   : > { %8118 = vmatprep.subr.bf16.mxu1 %v9221_v1  ;;  %v9224_v4 = vld [vmem:[#allocation6 + $0x68] ss:$12 sps:$4 sm:$0xff]   ;;  %v10714_v5 = vld [vmem:[%s10702_s21] sm:$0xff]   ;;  %v14738_v6 = vmov 0   ;;  %v9225_v7 = vld [vmem:[#allocation6 + $0x50] ss:$12 sps:$4 sm:$0xff]  }
  0x56   : > { %8119 = vmatpush3.bf16.msra.mxu1 %v9221_v1  ;;  %682 = vmatprep.mubr.bf16.mxu0 %v14738_v6  ;;  %v9226_v8 = vld [vmem:[#allocation6 + $0x38] ss:$12 sps:$4 sm:$0xff]   ;;  %v9227_v9 = vld [vmem:[#allocation6 + $0x20] ss:$12 sps:$4 sm:$0xff]   ;;  %v9251_v11 = vld [vmem:[#allocation6 + $0xa8] ss:$12 sps:$4 sm:$0xff]  }
  0x57   : > { %8120 = vmatprep.subr.bf16.mxu1 %v9222_v2  ;;  %9219 = vset.pattern.permute.xlu0 %v14738_v6  ;;  %v9248_v10 = vld [vmem:[#allocation6 + $0xac] ss:$12 sps:$4 sm:$0xff]   ;;  %v9228_v12 = vld [vmem:[#allocation6 + $0x8] ss:$12 sps:$4 sm:$0xff]   ;;  %v9254_v14 = vld [vmem:[#allocation6 + $0x90] ss:$12 sps:$4 sm:$0xff]  }
  0x58   : > { %8134 = vmatprep.mubr.bf16.mxu1 %v10714_v5  ;;  %9220 = vset.pattern.permute.xlu1 %v14738_v6  ;;  %v9252_v13 = vld [vmem:[#allocation6 + $0x94] ss:$12 sps:$4 sm:$0xff]   ;;  %v9259_v15 = vld [vmem:[#allocation6 + $0x7c] ss:$12 sps:$4 sm:$0xff]   ;;  %v9231_v17 = vld [vmem:[#allocation8 + $0xac] ss:$12 sps:$4 sm:$0xff]  }
  0x59   : > { %650 = vmatprep.subr.bf16.mxu0 %v9248_v10  ;;  %v10721_v16 = vld [vmem:[%s10702_s21 + $0x8] sm:$0xff]   ;;  %v9262_v18 = vld [vmem:[#allocation6 + $0x78] ss:$12 sps:$4 sm:$0xff]   ;;  %v10724_v21 = vld [vmem:[%s10702_s21 + $0x10] sm:$0xff]   ;;  %v14736_v54 = vmov 0.0   ;;  %vm10558_vm0 = vmmov 0  }
  0x5a   : > { %8121 = vmatpush3.bf16.msra.mxu1 %v9222_v2  ;;  %651 = vmatpush1.bf16.msra.mxu0 %v9251_v11  ;;  %v9233_v19 = vld [vmem:[#allocation8 + $0xa8] ss:$12 sps:$4 sm:$0xff]   ;;  %v9263_v20 = vld [vmem:[#allocation6 + $0x64] ss:$12 sps:$4 sm:$0xff]   ;;  %v9265_v23 = vld [vmem:[#allocation6 + $0x60] ss:$12 sps:$4 sm:$0xff]  }
  0x5b   : > { %8122 = vmatprep.subr.bf16.mxu1 %v9223_v3  ;;  %652 = vmatprep.subr.bf16.mxu0 %v9252_v13  ;;  %v9236_v22 = vld [vmem:[#allocation8 + $0x94] ss:$12 sps:$4 sm:$0xff]   ;;  %v9270_v24 = vld [vmem:[#allocation6 + $0x4c] ss:$12 sps:$4 sm:$0xff]   ;;  %v9238_v25 = vld [vmem:[#allocation8 + $0x90] ss:$12 sps:$4 sm:$0xff]  }
  0x5c   : > { %v9241_v26 = vld [vmem:[#allocation8 + $0x7c] ss:$12 sps:$4 sm:$0xff]   ;;  %v9274_v29 = vld [vmem:[#allocation6 + $0x34] ss:$12 sps:$4 sm:$0xff]   ;;  %v10734_v31 = vld [vmem:[#allocation8 + $0x78] ss:$12 sps:$4 sm:$0xff]  }
  0x5d   : > { %v10729_v27 = vld [vmem:[%s10702_s21 + $0x18] sm:$0xff]   ;;  %v9273_v28 = vld [vmem:[#allocation6 + $0x48] ss:$12 sps:$4 sm:$0xff]   ;;  %v10732_v30 = vld [vmem:[%s10702_s21 + $0x20] sm:$0xff]   ;;  %s11080_s16 = sshll.u32 %s10538_s24, 4  ;;  %p7655_p4 = scmp.ne.s32.totalorder %s10538_s24, 1 }
  0x5e   : > { %8123 = vmatpush3.bf16.msra.mxu1 %v9223_v3  ;;  %653 = vmatpush1.bf16.msra.mxu0 %v9254_v14  ;;  %v10736_v32 = vld [vmem:[#allocation8 + $0x64] ss:$12 sps:$4 sm:$0xff]   ;;  %v9281_v34 = vld [vmem:[#allocation6 + $0x1c] ss:$12 sps:$4 sm:$0xff]   ;;  %v10739_v35 = vld [vmem:[#allocation8 + $0x60] ss:$12 sps:$4 sm:$0xff]  }
  0x5f   : > { %8124 = vmatprep.subr.bf16.mxu1 %v9224_v4  ;;  %654 = vmatprep.subr.bf16.mxu0 %v9259_v15  ;;  %v9276_v33 = vld [vmem:[#allocation6 + $0x30] ss:$12 sps:$4 sm:$0xff]   ;;  %v10743_v36 = vld [vmem:[#allocation8 + $0x4c] ss:$12 sps:$4 sm:$0xff]   ;;  %v10750_v41 = vld [vmem:[#allocation8 + $0x48] ss:$12 sps:$4 sm:$0xff]  }
  0x60   : > { %v9284_v37 = vld [vmem:[#allocation6 + $0x18] ss:$12 sps:$4 sm:$0xff]   ;;  %v9240_v38 = vld [vmem:[%s10702_s21 + $0x28] sm:$0xff]   ;;  %v10748_v39 = vld [vmem:[%s10702_s21 + $0x30] sm:$0xff]   ;;  %s2231_s11 = sadd.s32 1, %s11080_s16  ;;  %s2589_s14 = sadd.s32 2, %s11080_s16 }
  0x61   : > { %v9285_v40 = vld [vmem:[#allocation6 + $0x4] ss:$12 sps:$4 sm:$0xff]   ;;  %v10753_v42 = vld [vmem:[#allocation8 + $0x34] ss:$12 sps:$4 sm:$0xff]   ;;  %v10761_v45 = vld [vmem:[%s10702_s21 + $0x38] sm:$0xff]   ;;  %s2947_s29 = sadd.s32 3, %s11080_s16 }
  0x62   : > { %8125 = vmatpush3.bf16.msra.mxu1 %v9224_v4  ;;  %655 = vmatpush1.bf16.msra.mxu0 %v9262_v18  ;;  %v9287_v43 = vld [vmem:[#allocation6] ss:$12 sps:$4 sm:$0xff]   ;;  %v10758_v44 = vld [vmem:[#allocation8 + $0x30] ss:$12 sps:$4 sm:$0xff]   ;;  %v10769_v48 = vld [vmem:[#allocation8 + $0x18] ss:$12 sps:$4 sm:$0xff]  }
  0x63   : > { %8126 = vmatprep.subr.bf16.mxu1 %v9225_v7  ;;  %656 = vmatprep.subr.bf16.mxu0 %v9263_v20  ;;  %v10764_v46 = vld [vmem:[#allocation8 + $0x1c] ss:$12 sps:$4 sm:$0xff]   ;;  %v10767_v47 = vld [vmem:[%s10702_s21 + $0x40] sm:$0xff]   ;;  %v10771_v49 = vld [vmem:[#allocation6 + $0x16c] ss:$12 sps:$4 sm:$0xff]   ;;  %s3305_s17 = sadd.s32 4, %s11080_s16 }
  0x64   : > { %v10774_v50 = vld [vmem:[#allocation8 + $0x4] ss:$12 sps:$4 sm:$0xff]   ;;  %v10779_v51 = vld [vmem:[#allocation8] ss:$12 sps:$4 sm:$0xff]   ;;  %v10799_v55 = vld [vmem:[%s10702_s21 + $0x58] sm:$0xff]   ;;  %s3663_s18 = sadd.s32 5, %s11080_s16 }
  0x65   : > { %v10786_v52 = vld [vmem:[%s10702_s21 + $0x48] sm:$0xff]   ;;  %v10790_v53 = vld [vmem:[%s10702_s21 + $0x50] sm:$0xff]   ;;  %v10802_v56 = vld [vmem:[%s10702_s21 + $0x60] sm:$0xff]   ;;  %s4021_s10 = sadd.s32 6, %s11080_s16  ;;  %s4379_s7 = sadd.s32 7, %s11080_s16 }
  0x66   : > { %8127 = vmatpush3.bf16.msra.mxu1 %v9225_v7  ;;  %657 = vmatpush1.bf16.msra.mxu0 %v9265_v23  ;;  %v10809_v57 = vld [vmem:[%s10702_s21 + $0x68] sm:$0xff]   ;;  %v10812_v58 = vld [vmem:[%s10702_s21 + $0x70] sm:$0xff]   ;;  %v10819_v59 = vld [vmem:[%s10702_s21 + $0x78] sm:$0xff]   ;;  %s5095_s28 = sadd.s32 9, %s11080_s16  ;;  %s5453_s13 = sadd.s32 10, %s11080_s16 }
  0x67   : > { %8128 = vmatprep.subr.bf16.mxu1 %v9226_v8  ;;  %658 = vmatprep.subr.bf16.mxu0 %v9270_v24  ;;  %v10825_v60 = vld [vmem:[#allocation2 + $0x10] sm:$0xff]  ;;  %v10827_v61 = vld [vmem:[#allocation2] sm:$0xff]  ;;  %v10883_v11 = vld [vmem:[#allocation6 + $0x13c] ss:$12 sps:$4 sm:$0xff]   ;;  %s6169_s8 = sadd.s32 12, %s11080_s16  ;;  %s6527_s15 = sadd.s32 13, %s11080_s16 }
  0x68   : > { %v1021_v62 = vpack.c.bf16 %v10827_v61, %v10825_v60  ;;  %v10831_v63 = vld [vmem:[#allocation8 + $0xb0] ss:$12 sps:$4 sm:$0xff]   ;;  %v10835_v0 = vld [vmem:[#allocation8 + $0x98] ss:$12 sps:$4 sm:$0xff]   ;;  %v10839_v1 = vld [vmem:[#allocation6 + $0x168] ss:$12 sps:$4 sm:$0xff]  }
  0x69   : > { %v10844_v2 = vld [vmem:[#allocation8 + $0x80] ss:$12 sps:$4 sm:$0xff]   ;;  %v10850_v3 = vld [vmem:[#allocation8 + $0x68] ss:$12 sps:$4 sm:$0xff]   ;;  %v10854_v4 = vld [vmem:[#allocation8 + $0x50] ss:$12 sps:$4 sm:$0xff]  }
  0x6a   : > { %8129 = vmatpush3.bf16.msra.mxu1 %v9226_v8  ;;  %659 = vmatpush1.bf16.msra.mxu0 %v9273_v28  ;;  %v10862_v7 = vld [vmem:[#allocation8 + $0x38] ss:$12 sps:$4 sm:$0xff]   ;;  %v10865_v8 = vld [vmem:[#allocation6 + $0x150] ss:$12 sps:$4 sm:$0xff]   ;;  %v10876_v10 = vld [vmem:[#allocation8 + $0x8] ss:$12 sps:$4 sm:$0xff]  }
  0x6b   : > { %8130 = vmatprep.subr.bf16.mxu1 %v9227_v9  ;;  %660 = vmatprep.subr.bf16.mxu0 %v9274_v29  ;;  %v10895_v13 = vld [vmem:[#allocation6 + $0x124] ss:$12 sps:$4 sm:$0xff]   ;;  %v10898_v14 = vld [vmem:[#allocation6 + $0x120] ss:$12 sps:$4 sm:$0xff]   ;;  %v10939_v24 = vld [vmem:[#allocation6 + $0x128] ss:$12 sps:$4 sm:$0xff]  }
  0x6c   : > { %v10905_v15 = vld [vmem:[#allocation6 + $0x10c] ss:$12 sps:$4 sm:$0xff]   ;;  %v10917_v18 = vld [vmem:[#allocation6 + $0xf0] ss:$12 sps:$4 sm:$0xff]   ;;  %s7243_s21 = sadd.s32 15, %s11080_s16 }
  0x6d   : > { %v10925_v20 = vld [vmem:[#allocation6 + $0x158] ss:$12 sps:$4 sm:$0xff]  }
  0x6e   : > { %8131 = vmatpush3.bf16.msra.mxu1 %v9227_v9  ;;  %661 = vmatpush1.bf16.msra.mxu0 %v9276_v33  ;;  %v10870_v9 = vld [vmem:[#allocation8 + $0x20] ss:$12 sps:$4 sm:$0xff]   ;;  %v10933_v23 = vld [vmem:[#allocation6 + $0xd8] ss:$12 sps:$4 sm:$0xff]  }
  0x6f   : > { %8132 = vmatprep.subr.bf16.mxu1 %v9228_v12  ;;  %662 = vmatprep.subr.bf16.mxu0 %v9281_v34  ;;  %v10950_v28 = vld [vmem:[#allocation8 + $0x16c] ss:$12 sps:$4 sm:$0xff]  }
  0x70   : > { %15115 = vst [vmem:[#allocation15_spill] sm:$0xff] %v10950_v28  ;;  %v10955_v29 = vld [vmem:[#allocation6 + $0xf8] ss:$12 sps:$4 sm:$0xff]   ;;  %v10959_v33 = vld [vmem:[#allocation6 + $0xe0] ss:$12 sps:$4 sm:$0xff]  }
  0x71   : > { %15116 = vst [vmem:[#allocation16_spill] sm:$0xff] %v10959_v33 }
  0x72   : > { %8133 = vmatpush3.bf16.msra.mxu1 %v9228_v12  ;;  %663 = vmatpush1.bf16.msra.mxu0 %v9284_v37  ;;  %v10886_v12 = vld [vmem:[#allocation6 + $0x138] ss:$12 sps:$4 sm:$0xff]   ;;  %v10965_v37 = vld [vmem:[#allocation6 + $0xc8] ss:$12 sps:$4 sm:$0xff]  }
  0x73   : > { %1182 = vmatprep.subr.bf16.mxu1 %v9231_v17  ;;  %664 = vmatprep.subr.bf16.mxu0 %v9285_v40  ;;  %v10915_v17 = vld [vmem:[#allocation6 + $0xf4] ss:$12 sps:$4 sm:$0xff]   ;;  %15118 = vst [vmem:[#allocation18_spill] sm:$0xff] %v10965_v37 }
  0x75   : > { %8135 = vmatmul.mubr.bf16.vlgmr.msra.gmra.mxu1 %v10721_v16 }
  0x76   : > { %1183 = vmatpush1.bf16.msra.mxu1 %v9233_v19  ;;  %8138 = vmatprep.mubr.bf16.mxu1 %v10724_v21  ;;  %v10921_v19 = vld [vmem:[#allocation6 + $0x170] ss:$12 sps:$4 sm:$0xff]  }
  0x77   : > { %1184 = vmatprep.subr.bf16.mxu1 %v9236_v22  ;;  %665 = vmatpush1.bf16.msra.mxu0 %v9287_v43  ;;  %v10931_v22 = vld [vmem:[#allocation6 + $0xdc] ss:$12 sps:$4 sm:$0xff]  }
  0x78   : > { %1494 = vmatprep.subr.bf16.mxu0 %v10771_v49 }
  0x7a   : > { %1185 = vmatpush1.bf16.msra.mxu1 %v9238_v25  ;;  %683 = vmatmul.mubr.bf16.vlgmr.msra.gmra.mxu0 %v10714_v5  ;;  %v10859_v5 = vld [vmem:[#allocation6 + $0x154] ss:$12 sps:$4 sm:$0xff]   ;;  %v10941_v25 = vld [vmem:[#allocation6 + $0xc4] ss:$12 sps:$4 sm:$0xff]  }
  0x7b   : > { %1186 = vmatprep.subr.bf16.mxu1 %v9241_v26  ;;  %692 = vmatprep.mubr.bf16.mxu0 %v14738_v6  ;;  %15113 = vst [vmem:[#allocation13_spill] sm:$0xff] %v10941_v25  ;;  %v10943_v26 = vld [vmem:[#allocation6 + $0xc0] ss:$12 sps:$4 sm:$0xff]  }
  0x7c   : > { %1495 = vmatpush1.bf16.msra.mxu0 %v10839_v1  ;;  %15114 = vst [vmem:[#allocation14_spill] sm:$0xff] %v10943_v26 }
  0x7d   : > { %8139 = vmatmul.mubr.bf16.gmra.mxu1 %v10729_v27  ;;  %1496 = vmatprep.subr.bf16.mxu0 %v10859_v5 }
  0x7e   : > { %8142 = vmatprep.mubr.bf16.mxu1 %v10732_v30  ;;  %1187 = vmatpush1.bf16.msra.mxu1 %v10734_v31 }
  0x7f   : > { %1188 = vmatprep.subr.bf16.mxu1 %v10736_v32 }
  0x80   : > { %1497 = vmatpush1.bf16.msra.mxu0 %v10865_v8 }
  0x81   : > { %1498 = vmatprep.subr.bf16.mxu0 %v10883_v11 }
  0x82   : > { %1189 = vmatpush1.bf16.msra.mxu1 %v10739_v35  ;;  %693 = vmatmul.mubr.bf16.gmra.mxu0 %v10721_v16  ;;  %v10912_v16 = vld [vmem:[#allocation6 + $0x108] ss:$12 sps:$4 sm:$0xff]  }
  0x83   : > { %1190 = vmatprep.subr.bf16.mxu1 %v10743_v36  ;;  %702 = vmatprep.mubr.bf16.mxu0 %v14738_v6 }
  0x84   : > { %1499 = vmatpush1.bf16.msra.mxu0 %v10886_v12 }
  0x85   : > { %8143 = vmatmul.mubr.bf16.gmra.mxu1 %v9240_v38  ;;  %1500 = vmatprep.subr.bf16.mxu0 %v10895_v13 }
  0x86   : > { %8146 = vmatprep.mubr.bf16.mxu1 %v10748_v39  ;;  %1191 = vmatpush1.bf16.msra.mxu1 %v10750_v41 }
  0x87   : > { %1192 = vmatprep.subr.bf16.mxu1 %v10753_v42 }
  0x88   : > { %1501 = vmatpush1.bf16.msra.mxu0 %v10898_v14 }
  0x89   : > { %1502 = vmatprep.subr.bf16.mxu0 %v10905_v15 }
  0x8a   : > { %1193 = vmatpush1.bf16.msra.mxu1 %v10758_v44  ;;  %703 = vmatmul.mubr.bf16.gmra.mxu0 %v10724_v21  ;;  %v10929_v21 = vld [vmem:[#allocation6 + $0x140] ss:$12 sps:$4 sm:$0xff]  }
  0x8b   : > { %1194 = vmatprep.subr.bf16.mxu1 %v10764_v46  ;;  %712 = vmatprep.mubr.bf16.mxu0 %v14738_v6 }
  0x8c   : > { %1503 = vmatpush1.bf16.msra.mxu0 %v10912_v16 }
  0x8d   : > { %8147 = vmatmul.mubr.bf16.gmra.mxu1 %v10761_v45  ;;  %1504 = vmatprep.subr.bf16.mxu0 %v10915_v17 }
  0x8e   : > { %8150 = vmatprep.mubr.bf16.mxu1 %v10767_v47  ;;  %1195 = vmatpush1.bf16.msra.mxu1 %v10769_v48 }
  0x8f   : > { %1196 = vmatprep.subr.bf16.mxu1 %v10774_v50 }
  0x90   : > { %1505 = vmatpush1.bf16.msra.mxu0 %v10917_v18 }
  0x91   : > { %1506 = vmatprep.subr.bf16.mxu0 %v10931_v22 }
  0x92   : > { %1197 = vmatpush1.bf16.msra.mxu1 %v10779_v51  ;;  %713 = vmatmul.mubr.bf16.gmra.mxu0 %v10729_v27  ;;  %v10946_v27 = vld [vmem:[#allocation6 + $0x110] ss:$12 sps:$4 sm:$0xff]  }
  0x93   : > { %8166 = vmatprep.subr.bf16.mxu1 %v14736_v54  ;;  %722 = vmatprep.mubr.bf16.mxu0 %v14738_v6 }
  0x94   : > { %1507 = vmatpush1.bf16.msra.mxu0 %v10933_v23 }
  0x95   : > { %8151 = vmatmul.mubr.bf16.gmra.mxu1 %v10786_v52  ;;  %1508 = vmatprep.subr.bf16.mxu0 %v10941_v25 }
  0x96   : > { %8154 = vmatprep.mubr.bf16.mxu1 %v10790_v53 }
  0x98   : > { %1509 = vmatpush1.bf16.msra.mxu0 %v10943_v26 }
  0x99   : > { %1740 = vmatprep.subr.bf16.mxu0 %v10950_v28 }
  0x9a   : > { %723 = vmatmul.mubr.bf16.gmra.mxu0 %v10732_v30  ;;  %v411_v30 = vlaneseq }
  0x9b   : > { %732 = vmatprep.mubr.bf16.mxu0 %v14738_v6 }
  0x9c   : > { %v10961_v34 = vshrl.u32 %v411_v30, 7 }
  0x9d   : > { %8155 = vmatmul.mubr.bf16.gmra.mxu1 %v10799_v55 }
  0x9e   : > { %8158 = vmatprep.mubr.bf16.mxu1 %v10802_v56  ;;  %15117 = vst [vmem:[#allocation17_spill] sm:$0xff] %v10961_v34 }
  0xa2   : > { %733 = vmatmul.mubr.bf16.gmra.mxu0 %v9240_v38  ;;  %v14735_v38 = vsub.s32 2, %v10961_v34 }
  0xa3   : > { %742 = vmatprep.mubr.bf16.mxu0 %v14738_v6 }
  0xa5   : > { %8159 = vmatmul.mubr.bf16.gmra.mxu1 %v10809_v57 }
  0xa6   : > { %8162 = vmatprep.mubr.bf16.mxu1 %v10812_v58 }
  0xaa   : > { %743 = vmatmul.mubr.bf16.gmra.mxu0 %v10748_v39  ;;  %v10972_v39 = vld [vmem:[%s14730_s4] sm:$0x7] }
  0xab   : > { %752 = vmatprep.mubr.bf16.mxu0 %v14738_v6  ;;  %v10978_v40 = vrot.slane %v10972_v39, %v14735_v38 }
  0xad   : > { %8163 = vmatmul.mubr.bf16.gmra.mxu1 %v10819_v59  ;;  %15119 = vst [vmem:[#allocation19_spill] sm:$0xff] %v10978_v40 }
  0xae   : > { %1214 = vmatprep.mubr.bf16.mxu1 %v14738_v6 }
  0xb2   : > { %753 = vmatmul.mubr.bf16.gmra.mxu0 %v10761_v45 }
  0xb3   : > { %762 = vmatprep.mubr.bf16.mxu0 %v14738_v6 }
  0xb5   : > { %1215 = vmatmul.mubr.bf16.vlgmr.msra.gmra.mxu1 %v1021_v62 }
  0xb6   : > { %8167 = vmatpush3.bf16.msra.mxu1 %v10831_v63  ;;  %8182 = vmatprep.mubr.msk.bf16.mxu1 %vm10558_vm0, %v14736_v54 }
  0xb7   : > { %8168 = vmatprep.subr.bf16.mxu1 %v14736_v54 }
  0xba   : > { %8169 = vmatpush3.bf16.msra.mxu1 %v10835_v0  ;;  %763 = vmatmul.mubr.bf16.gmra.mxu0 %v10767_v47 }
  0xbb   : > { %8170 = vmatprep.subr.bf16.mxu1 %v14736_v54  ;;  %772 = vmatprep.mubr.bf16.mxu0 %v14738_v6 }
  0xbe   : > { %8171 = vmatpush3.bf16.msra.mxu1 %v10844_v2 }
  0xbf   : > { %8172 = vmatprep.subr.bf16.mxu1 %v14736_v54 }
  0xc2   : > { %8173 = vmatpush3.bf16.msra.mxu1 %v10850_v3  ;;  %773 = vmatmul.mubr.bf16.gmra.mxu0 %v10786_v52 }
  0xc3   : > { %8174 = vmatprep.subr.bf16.mxu1 %v14736_v54  ;;  %782 = vmatprep.mubr.bf16.mxu0 %v14738_v6 }
  0xc6   : > { %8175 = vmatpush3.bf16.msra.mxu1 %v10854_v4 }
  0xc7   : > { %8176 = vmatprep.subr.bf16.mxu1 %v14736_v54 }
  0xca   : > { %8177 = vmatpush3.bf16.msra.mxu1 %v10862_v7  ;;  %783 = vmatmul.mubr.bf16.gmra.mxu0 %v10790_v53 }
  0xcb   : > { %8178 = vmatprep.subr.bf16.mxu1 %v14736_v54  ;;  %792 = vmatprep.mubr.bf16.mxu0 %v14738_v6 }
  0xce   : > { %8179 = vmatpush3.bf16.msra.mxu1 %v10870_v9 }
  0xcf   : > { %8180 = vmatprep.subr.bf16.mxu1 %v14736_v54 }
  0xd2   : > { %8181 = vmatpush3.bf16.msra.mxu1 %v10876_v10  ;;  %793 = vmatmul.mubr.bf16.gmra.mxu0 %v10799_v55 }
  0xd3   : > { %8186 = vmatprep.subr.bf16.mxu1 %v14736_v54  ;;  %802 = vmatprep.mubr.bf16.mxu0 %v14738_v6 }
  0xd5   : > { %8183 = vmatmul.mubr.bf16.vlgmr.msra.gmra.mxu1 %v1021_v62 }
  0xd6   : > { %8202 = vmatprep.mubr.msk.bf16.mxu1 %vm10558_vm0, %v14736_v54  ;;  %8187 = vmatpush3.bf16.msra.mxu1 %v10921_v19 }
  0xd7   : > { %8188 = vmatprep.subr.bf16.mxu1 %v14736_v54 }
  0xda   : > { %803 = vmatmul.mubr.bf16.gmra.mxu0 %v10802_v56  ;;  %8189 = vmatpush3.bf16.msra.mxu1 %v10925_v20 }
  0xdb   : > { %812 = vmatprep.mubr.bf16.mxu0 %v14738_v6  ;;  %8190 = vmatprep.subr.bf16.mxu1 %v14736_v54 }
  0xde   : > { %8191 = vmatpush3.bf16.msra.mxu1 %v10929_v21 }
  0xdf   : > { %8192 = vmatprep.subr.bf16.mxu1 %v14736_v54 }
  0xe2   : > { %813 = vmatmul.mubr.bf16.gmra.mxu0 %v10809_v57  ;;  %8193 = vmatpush3.bf16.msra.mxu1 %v10939_v24 }
  0xe3   : > { %822 = vmatprep.mubr.bf16.mxu0 %v14738_v6  ;;  %8194 = vmatprep.subr.bf16.mxu1 %v14736_v54 }
  0xe6   : > { %8195 = vmatpush3.bf16.msra.mxu1 %v10946_v27 }
  0xe7   : > { %8196 = vmatprep.subr.bf16.mxu1 %v14736_v54 }
  0xea   : > { %823 = vmatmul.mubr.bf16.gmra.mxu0 %v10812_v58  ;;  %8197 = vmatpush3.bf16.msra.mxu1 %v10955_v29 }
  0xeb   : > { %832 = vmatprep.mubr.bf16.mxu0 %v14738_v6  ;;  %8198 = vmatprep.subr.bf16.mxu1 %v14736_v54 }
  0xee   : > { %8199 = vmatpush3.bf16.msra.mxu1 %v10959_v33 }
  0xef   : > { %8200 = vmatprep.subr.bf16.mxu1 %v14736_v54 }
  0xf2   : > { %833 = vmatmul.mubr.bf16.gmra.mxu0 %v10819_v59  ;;  %8201 = vmatpush3.bf16.msra.mxu1 %v10965_v37 }
  0xf3   : > { %1526 = vmatprep.mubr.bf16.mxu0 %v14738_v6  ;;  %8206 = vmatprep.subr.bf16.mxu1 %v14736_v54 }
 0x135   : > { %v8136_v43 = vpop.f32.mrf.mxu1 }
 0x136   : > { %v10982_v45 = vadd.f32 %v8136_v43, %v10978_v40 }
 0x137   : > { %v10984_v47 = vpop.f32.mrf.mxu1 }
 0x138   : > { %15120 = vst [vmem:[#allocation20_spill] sm:$0xff] %v10982_v45  ;;  %v15153_v45 = vsub.s32 1, %v10961_v34 }
 0x139   : > { %v8137_v52 = vpop.f32.mrf.mxu1 }
 0x13a   : > { %v10987_v53 = vadd.f32 %v8137_v52, %v10978_v40  ;;  %v11095_v28 = vrot.slane %v10972_v39, %v15153_v45 }
 0x13b   : > { %v10989_v55 = vpop.f32.mrf.mxu1 }
 0x13c   : > { %15121 = vst [vmem:[#allocation21_spill] sm:$0xff] %v10987_v53 }
 0x13d   : > { %v8140_v56 = vpop.f32.mrf.mxu1 }
 0x13e   : > { %v10992_v57 = vadd.f32 %v8140_v56, %v10978_v40 }
 0x13f   : > { %v893_v58 = vpop.f32.mrf.mxu1 }
 0x140   : > { %15122 = vst [vmem:[#allocation22_spill] sm:$0xff] %v10992_v57  ;;  %v10995_v59 = vadd.f32 %v893_v58, %v10978_v40 }
 0x141   : > { %v8141_v62 = vpop.f32.mrf.mxu1 }
 0x142   : > { %15123 = vst [vmem:[#allocation23_spill] sm:$0xff] %v10995_v59  ;;  %v10998_v30 = vadd.f32 %v8141_v62, %v10978_v40 }
 0x143   : > { %v11000_v43 = vpop.f32.mrf.mxu1 }
 0x144   : > { %15124 = vst [vmem:[#allocation24_spill] sm:$0xff] %v10998_v30  ;;  %15125 = vst [vmem:[#allocation25_spill] sm:$0xff] %v11000_v43 }
 0x145   : > { %v8144_v38 = vpop.f32.mrf.mxu1 }
 0x146   : > { %v11003_v52 = vadd.f32 %v8144_v38, %v10978_v40 }
 0x147   : > { %v909_v54 = vpop.f32.mrf.mxu1 }
 0x148   : > { %15126 = vst [vmem:[#allocation26_spill] sm:$0xff] %v11003_v52  ;;  %v11006_v6 = vadd.f32 %v909_v54, %v10978_v40 }
 0x149   : > { %v8145_v56 = vpop.f32.mrf.mxu1 }
 0x14a   : > { %15127 = vst [vmem:[#allocation27_spill] sm:$0xff] %v11006_v6  ;;  %v11009_v57 = vadd.f32 %v8145_v56, %v10978_v40 }
 0x14b   : > { %v11011_v58 = vpop.f32.mrf.mxu1 }
 0x14c   : > { %15128 = vst [vmem:[#allocation28_spill] sm:$0xff] %v11009_v57  ;;  %15129 = vst [vmem:[#allocation29_spill] sm:$0xff] %v11011_v58 }
 0x14d   : > { %v8148_v59 = vpop.f32.mrf.mxu1 }
 0x14e   : > { %v11014_v62 = vadd.f32 %v8148_v59, %v10978_v40 }
 0x14f   : > { %v925_v30 = vpop.f32.mrf.mxu1 }
 0x150   : > { %15130 = vst [vmem:[#allocation30_spill] sm:$0xff] %v11014_v62  ;;  %v11017_v43 = vadd.f32 %v925_v30, %v10978_v40 }
 0x151   : > { %v8149_v38 = vpop.f32.mrf.mxu1 }
 0x152   : > { %15131 = vst [vmem:[#allocation31_spill] sm:$0xff] %v11017_v43  ;;  %v11020_v52 = vadd.f32 %v8149_v38, %v10978_v40 }
 0x153   : > { %v11022_v54 = vpop.f32.mrf.mxu1 }
 0x154   : > { %15132 = vst [vmem:[#allocation32_spill] sm:$0xff] %v11020_v52  ;;  %15133 = vst [vmem:[#allocation33_spill] sm:$0xff] %v11022_v54 }
 0x155   : > { %v8152_v6 = vpop.f32.mrf.mxu1 }
 0x156   : > { %v11025_v56 = vadd.f32 %v8152_v6, %v10978_v40 }
 0x157   : > { %v941_v57 = vpop.f32.mrf.mxu1 }
 0x158   : > { %15134 = vst [vmem:[#allocation34_spill] sm:$0xff] %v11025_v56  ;;  %v11028_v58 = vadd.f32 %v941_v57, %v10978_v40 }
 0x159   : > { %v8153_v59 = vpop.f32.mrf.mxu1 }
 0x15a   : > { %15135 = vst [vmem:[#allocation35_spill] sm:$0xff] %v11028_v58  ;;  %v11031_v62 = vadd.f32 %v8153_v59, %v10978_v40 }
 0x15b   : > { %v11033_v30 = vpop.f32.mrf.mxu1 }
 0x15c   : > { %15136 = vst [vmem:[#allocation36_spill] sm:$0xff] %v11031_v62  ;;  %15137 = vst [vmem:[#allocation37_spill] sm:$0xff] %v11033_v30 }
 0x15d   : > { %v8156_v43 = vpop.f32.mrf.mxu1 }
 0x15e   : > { %v11036_v38 = vadd.f32 %v8156_v43, %v10978_v40 }
 0x15f   : > { %v957_v52 = vpop.f32.mrf.mxu1 }
 0x160   : > { %15138 = vst [vmem:[#allocation38_spill] sm:$0xff] %v11036_v38  ;;  %v11039_v54 = vadd.f32 %v957_v52, %v10978_v40  ;;  %v14740_v52 = vsub.s32 0, %v10961_v34 }
 0x161   : > { %v8157_v6 = vpop.f32.mrf.mxu1 }
 0x162   : > { %15139 = vst [vmem:[#allocation39_spill] sm:$0xff] %v11039_v54  ;;  %v11042_v56 = vadd.f32 %v8157_v6, %v10978_v40 }
 0x163   : > { %v11044_v57 = vpop.f32.mrf.mxu1 }
 0x164   : > { %15140 = vst [vmem:[#allocation40_spill] sm:$0xff] %v11042_v56  ;;  %15141 = vst [vmem:[#allocation41_spill] sm:$0xff] %v11044_v57 }
 0x165   : > { %v8160_v58 = vpop.f32.mrf.mxu1 }
 0x166   : > { %v11047_v59 = vadd.f32 %v8160_v58, %v10978_v40  ;;  %v11064_v58 = vrot.slane %v10972_v39, %v14740_v52  ;;  %v1004_v52 = vld [vmem:[%s14726_s0] sm:$0xff] }
 0x167   : > { %v973_v62 = vpop.f32.mrf.mxu1 }
 0x168   : > { %15142 = vst [vmem:[#allocation42_spill] sm:$0xff] %v11047_v59  ;;  %v11050_v30 = vadd.f32 %v973_v62, %v10978_v40  ;;  %15147 = vst [vmem:[#allocation47_spill] sm:$0xff] %v11064_v58  ;;  %v684_v62 = vpop.f32.mrf.mxu0 }
 0x169   : > { %v8161_v43 = vpop.f32.mrf.mxu1 }
 0x16a   : > { %15143 = vst [vmem:[#allocation43_spill] sm:$0xff] %v11050_v30  ;;  %v11053_v38 = vadd.f32 %v8161_v43, %v10978_v40  ;;  %v686_v57 = vpop.f32.mrf.mxu0 }
 0x16b   : > { %v11056_v54 = vpop.f32.mrf.mxu1 }
 0x16c   : > { %15144 = vst [vmem:[#allocation44_spill] sm:$0xff] %v11053_v38  ;;  %15145 = vst [vmem:[#allocation45_spill] sm:$0xff] %v11056_v54  ;;  %v685_v38 = vadd.f32 %v684_v62, %v11064_v58 }
 0x16d   : > { %v8164_v6 = vpop.f32.mrf.mxu1 }
 0x16e   : > { %v11059_v56 = vadd.f32 %v8164_v6, %v10978_v40 }
 0x16f   : > { %v989_v59 = vpop.f32.mrf.mxu1 }
 0x170   : > { %15146 = vst [vmem:[#allocation46_spill] sm:$0xff] %v11059_v56  ;;  %v11067_v30 = vadd.f32 %v989_v59, %v10978_v40  ;;  %v1005_v59 = vld [vmem:[%s14726_s0 + $0x8] sm:$0xff]  ;;  %v11085_v56 = vadd.s32 4294967295, %v1004_v52  ;;  %v15154_v52 = vmov 0  }
 0x171   : > { %v8165_v43 = vpop.f32.mrf.mxu1 }
 0x172   : > { %15148 = vst [vmem:[#allocation48_spill] sm:$0xff] %v11067_v30  ;;  %v11071_v54 = vadd.f32 %v8165_v43, %v10978_v40  ;;  %15151 = vst [vmem:[#allocation51_spill] sm:$0xff] %v11085_v56  ;;  %v1874_v43 = vstv %s11080_s16 }
 0x173   : > { %v11073_v53 = vpop.f32.mrf.mxu1  ;;  %vm1875_vm1 = vcmp.eq.s32.totalorder %v11085_v56, %v1874_v43  ;;  %v687_v56 = vadd.f32 %v686_v57, %v11095_v28  ;;  %v11105_v57 = vld [vmem:[%s14731_s5] ss:$0 sm:$0xff] }
 0x174   : > { %15149 = vst [vmem:[#allocation49_spill] sm:$0xff] %v11071_v54  ;;  %15150 = vst [vmem:[#allocation50_spill] sm:$0xff] %v11073_v53  ;;  %v11088_v54 = vadd.s32 4294967295, %v1005_v59  ;;  %v688_v53 = vpop.f32.mrf.mxu0  ;;  %v1877_v25 = vsel %vm1875_vm1, 1, %v15154_v52 }
 0x175   : > { %v1216_v62 = vpop.f32.mrf.mxu1  ;;  %v689_v37 = vadd.f32 %v688_v53, %v11064_v58  ;;  %1880 = vperm.xlu0 %9219, %v1877_v25  }
 0x176   : > { %15152 = vst [vmem:[#allocation52_spill] sm:$0xff] %v11088_v54  ;;  %v1266_v30 = vadd.f32 %v1216_v62, %v685_v38  ;;  %vm1876_vm2 = vcmp.eq.s32.totalorder %v11088_v54, %v1874_v43  ;;  %v690_v59 = vpop.f32.mrf.mxu0 }
 0x177   : > { %v1218_v6 = vpop.f32.mrf.mxu1  ;;  %v1878_v62 = vsel %vm1876_vm2, 1, %v15154_v52  ;;  %v691_v34 = vadd.f32 %v690_v59, %v11095_v28 }
 0x178   : > { %v7477_v26 = vmul.f32 -1.442695, %v1266_v30  ;;  %v1267_v39 = vadd.f32 %v1218_v6, %v687_v56 }
 0x179   : > { %v1220_v33 = vpop.f32.mrf.mxu1  ;;  %1883 = vperm.xlu0 %9219, %v1878_v62  }
 0x17a   : > { %9365 = vpow2.f32 %v7477_v26  ;;  %v1268_v38 = vadd.f32 %v1220_v33, %v689_v37  ;;  %v7478_v53 = vmul.f32 -1.442695, %v1267_v39  ;;  %v11110_v39 = vpop.f32.mrf.mxu0 }
 0x17b   : > { %v1222_v54 = vpop.f32.mrf.mxu1 }
 0x17c   : > { %v7479_v43 = vmul.f32 -1.442695, %v1268_v38  ;;  %v1269_v45 = vadd.f32 %v1222_v54, %v691_v34 }
 0x17e   : > { %9367 = vpow2.f32 %v7479_v43  ;;  %v7480_v30 = vmul.f32 -1.442695, %v1269_v45 }
 0x17f   : > { %9369 = vpow2.f32 %v7478_v53 }
 0x180   : > { %9371 = vpow2.f32 %v7480_v30 }
 0x187   : > { %v9366_v58 = vpop.eup %9365 }
 0x188   : > { %v1282_v25 = vadd.f32 1.0, %v9366_v58  ;;  %v878_v58 = vadd.f32 %v10984_v47, %v10978_v40 }
 0x18a   : > { %9373 = vrcp.f32 %v1282_v25 }
 0x18b   : > { %v9368_v26 = vpop.eup %9367 }
 0x18c   : > { %v1284_v33 = vadd.f32 1.0, %v9368_v26  ;;  %v9370_v37 = vpop.eup %9369 }
 0x18d   : > { %v9372_v59 = vpop.eup %9371  ;;  %v1283_v6 = vadd.f32 1.0, %v9370_v37 }
 0x18e   : > { %9375 = vrcp.f32 %v1284_v33  ;;  %v1285_v38 = vadd.f32 1.0, %v9372_v59  ;;  %v881_v33 = vadd.f32 %v10989_v55, %v10978_v40  ;;  %v11115_v59 = vpop.f32.mrf.mxu0  ;;  %v11133_v40 = vld [vmem:[#allocation8 + $0x168] ss:$12 sps:$4 sm:$0xff]  }
 0x18f   : > { %9377 = vrcp.f32 %v1283_v6 }
 0x190   : > { %9379 = vrcp.f32 %v1285_v38  ;;  %v11117_v47 = vpop.f32.mrf.mxu0 }
 0x195   : > { %v1259_v56 = vpop.f32.mrf.mxu1 }
 0x196   : > { %v1300_v34 = vadd.f32 %v11105_v57, %v1259_v56 }
 0x197   : > { %v9374_v54 = vpop.eup %9373  ;;  %v8184_v62 = vpop.f32.mrf.mxu1 }
 0x198   : > { %v1302_v43 = vmul.f32 %v9374_v54, %v1300_v34  ;;  %v11119_v34 = vpop.f32.mrf.mxu0 }
 0x199   : > { %v1262_v45 = vpop.f32.mrf.mxu1 }
 0x19a   : > { %v1304_v53 = vadd.f32 %v1302_v43, %v878_v58  ;;  %v1301_v30 = vadd.f32 %v11105_v57, %v1262_v45  ;;  %v11121_v62 = vpop.f32.mrf.mxu0 }
 0x19b   : > { %v9376_v25 = vpop.eup %9375  ;;  %v8185_v26 = vpop.f32.mrf.mxu1  ;;  %15155 = vst [vmem:[#allocation53_spill] sm:$0xff] %v11121_v62  ;;  %v11135_v62 = vld [vmem:[#allocation8 + $0x170] ss:$12 sps:$4 sm:$0xff]  }
 0x19c   : > { %9381 = vtanh.f32 %v1304_v53  ;;  %v1303_v37 = vmul.f32 %v9376_v25, %v1301_v30  ;;  %v9378_v6 = vpop.eup %9377  ;;  %v11123_v26 = vpop.f32.mrf.mxu0 }
 0x19d   : > { %v9380_v54 = vpop.eup %9379  ;;  %v1308_v38 = vsub.f32 1.0, %v9378_v6  ;;  %15156 = vst [vmem:[#allocation54_spill] sm:$0xff] %v11123_v26  ;;  %v1312_v30 = vmul.f32 %v9378_v6, %v10825_v60  ;;  %v11151_v6 = vld [vmem:[#allocation8 + $0x158] ss:$12 sps:$4 sm:$0xff]  }
 0x19e   : > { %v1305_v56 = vadd.f32 %v1303_v37, %v881_v33  ;;  %v1309_v43 = vsub.f32 1.0, %v9380_v54  ;;  %v1313_v25 = vmul.f32 %v9380_v54, %v10827_v61  ;;  %v11149_v61 = vld [vmem:[#allocation8 + $0x150] ss:$12 sps:$4 sm:$0xff]   ;;  %15159 = vst [vmem:[#allocation57_spill] sm:$0xff] %v11151_v6  ;;  %v15160_v54 = vmov 0.0  }
 0x19f   : > { %v11182_v26 = vld [vmem:[#allocation8 + $0x10c] ss:$12 sps:$4 sm:$0xff]  }
 0x1a0   : > { %9383 = vtanh.f32 %v1305_v56  ;;  %v11131_v56 = vpop.f32.mrf.mxu0  ;;  %15169 = vst [vmem:[#allocation66_spill] sm:$0xff] %v11182_v26 }
 0x1a1   : > { %15157 = vst [vmem:[#allocation55_spill] sm:$0xff] %v11131_v56 }
 0x1a2   : > { %v11145_v60 = vpop.f32.mrf.mxu0 }
 0x1a3   : > { %15158 = vst [vmem:[#allocation56_spill] sm:$0xff] %v11145_v60  ;;  %v11178_v60 = vld [vmem:[#allocation8 + $0x128] ss:$12 sps:$4 sm:$0xff]  }
 0x1a4   : > { %15168 = vst [vmem:[#allocation65_spill] sm:$0xff] %v11178_v60 }
 0x1a9   : > { %v9382_v58 = vpop.eup %9381 }
 0x1aa   : > { %v1310_v45 = vmul.f32 %v9382_v58, %v1308_v38  ;;  %v11141_v38 = vld [vmem:[#allocation8 + $0x154] ss:$12 sps:$4 sm:$0xff]  }
 0x1ac   : > { %v11127_v33 = vadd.f32 %v1312_v30, %v1310_v45  ;;  %v11160_v45 = vpop.f32.mrf.mxu0  ;;  %v11170_v30 = vld [vmem:[#allocation8 + $0x124] ss:$12 sps:$4 sm:$0xff]  }
 0x1ad   : > { %v9384_v55 = vpop.eup %9383  ;;  %15162 = vst [vmem:[#allocation59_spill] sm:$0xff] %v11160_v45  ;;  %15165 = vst [vmem:[#allocation62_spill] sm:$0xff] %v11170_v30  ;;  %v11176_v45 = vld [vmem:[#allocation8 + $0x120] ss:$12 sps:$4 sm:$0xff]  }
 0x1ae   : > { %v1311_v53 = vmul.f32 %v9384_v55, %v1309_v43  ;;  %v11155_v43 = vld [vmem:[#allocation8 + $0x13c] ss:$12 sps:$4 sm:$0xff]   ;;  %v11164_v55 = vld [vmem:[#allocation8 + $0x138] ss:$12 sps:$4 sm:$0xff]   ;;  %15167 = vst [vmem:[#allocation64_spill] sm:$0xff] %v11176_v45 }
 0x1af   : > { %15161 = vst [vmem:[#allocation58_spill] sm:$0xff] %v11155_v43  ;;  %15163 = vst [vmem:[#allocation60_spill] sm:$0xff] %v11164_v55 }
 0x1b0   : > { %v11129_v37 = vadd.f32 %v1313_v25, %v1311_v53  ;;  %v11166_v53 = vld [vmem:[#allocation8 + $0x140] ss:$12 sps:$4 sm:$0xff]   ;;  %v11172_v25 = vpop.f32.mrf.mxu0 }
 0x1b1   : > { %15164 = vst [vmem:[#allocation61_spill] sm:$0xff] %v11166_v53  ;;  %15166 = vst [vmem:[#allocation63_spill] sm:$0xff] %v11172_v25  ;;  %v11188_v25 = vld [vmem:[#allocation8 + $0x108] ss:$12 sps:$4 sm:$0xff]  }
 0x1b2   : > { %v11139_v58 = vpack.c.bf16 %v11129_v37, %v11127_v33  ;;  %v11184_v56 = vpop.f32.mrf.mxu0  ;;  %15171 = vst [vmem:[#allocation68_spill] sm:$0xff] %v11188_v25 }
 0x1b3   : > { %15170 = vst [vmem:[#allocation67_spill] sm:$0xff] %v11184_v56  ;;  %v11200_v56 = vld [vmem:[#allocation8 + $0xf0] ss:$12 sps:$4 sm:$0xff]  }
 0x1b4   : > { %1527 = vmatmul.mubr.bf16.vlgmr.msra.gmra.mxu0 %v11139_v58  ;;  %8203 = vmatmul.mubr.bf16.vlgmr.msra.gmra.mxu1 %v11139_v58  ;;  %15175 = vst [vmem:[#allocation72_spill] sm:$0xff] %v11200_v56 }
 0x1b5   : > { %1741 = vmatpush1.bf16.msra.mxu0 %v11133_v40  ;;  %8207 = vmatpush3.bf16.msra.mxu1 %v11135_v62 }
 0x1b6   : > { %1742 = vmatprep.subr.bf16.mxu0 %v11141_v38  ;;  %8208 = vmatprep.subr.bf16.mxu1 %v15160_v54 }
 0x1b7   : > { %1772 = vmatprep.mubr.bf16.mxu0 %v15154_v52  ;;  %8222 = vmatprep.mubr.msk.bf16.mxu1 %vm10558_vm0, %v15160_v54 }
 0x1b9   : > { %1743 = vmatpush1.bf16.msra.mxu0 %v11149_v61  ;;  %8209 = vmatpush3.bf16.msra.mxu1 %v11151_v6 }
 0x1ba   : > { %1744 = vmatprep.subr.bf16.mxu0 %v11155_v43  ;;  %8210 = vmatprep.subr.bf16.mxu1 %v15160_v54 }
 0x1bd   : > { %1745 = vmatpush1.bf16.msra.mxu0 %v11164_v55  ;;  %8211 = vmatpush3.bf16.msra.mxu1 %v11166_v53  ;;  %v11190_v55 = vld [vmem:[#allocation8 + $0x110] ss:$12 sps:$4 sm:$0xff]   ;;  %v11194_v53 = vld [vmem:[#allocation8 + $0xf4] ss:$12 sps:$4 sm:$0xff]  }
 0x1be   : > { %1746 = vmatprep.subr.bf16.mxu0 %v11170_v30  ;;  %8212 = vmatprep.subr.bf16.mxu1 %v15160_v54  ;;  %15172 = vst [vmem:[#allocation69_spill] sm:$0xff] %v11190_v55  ;;  %15173 = vst [vmem:[#allocation70_spill] sm:$0xff] %v11194_v53  ;;  %v11196_v30 = vpop.f32.mrf.mxu0 }
 0x1bf   : > { %15174 = vst [vmem:[#allocation71_spill] sm:$0xff] %v11196_v30  ;;  %v11212_v30 = vld [vmem:[#allocation8 + $0xd8] ss:$12 sps:$4 sm:$0xff]  }
 0x1c1   : > { %1747 = vmatpush1.bf16.msra.mxu0 %v11176_v45  ;;  %8213 = vmatpush3.bf16.msra.mxu1 %v11178_v60  ;;  %v11202_v45 = vld [vmem:[#allocation8 + $0xf8] ss:$12 sps:$4 sm:$0xff]   ;;  %v11206_v60 = vld [vmem:[#allocation8 + $0xdc] ss:$12 sps:$4 sm:$0xff]  }
 0x1c2   : > { %1748 = vmatprep.subr.bf16.mxu0 %v11182_v26  ;;  %8214 = vmatprep.subr.bf16.mxu1 %v15160_v54  ;;  %15176 = vst [vmem:[#allocation73_spill] sm:$0xff] %v11202_v45  ;;  %15177 = vst [vmem:[#allocation74_spill] sm:$0xff] %v11206_v60  ;;  %v11208_v26 = vpop.f32.mrf.mxu0 }
 0x1c3   : > { %15178 = vst [vmem:[#allocation75_spill] sm:$0xff] %v11208_v26  ;;  %v11226_v26 = vld [vmem:[#allocation8 + $0xc8] ss:$12 sps:$4 sm:$0xff]  }
 0x1c4   : > { %v11222_v43 = vpop.f32.mrf.mxu0 }
 0x1c5   : > { %1749 = vmatpush1.bf16.msra.mxu0 %v11188_v25  ;;  %8215 = vmatpush3.bf16.msra.mxu1 %v11190_v55  ;;  %v11214_v25 = vld [vmem:[#allocation8 + $0xe0] ss:$12 sps:$4 sm:$0xff]   ;;  %v11218_v55 = vld [vmem:[#allocation8 + $0xc4] ss:$12 sps:$4 sm:$0xff]   ;;  %15181 = vst [vmem:[#allocation78_spill] sm:$0xff] %v11222_v43 }
 0x1c6   : > { %1750 = vmatprep.subr.bf16.mxu0 %v11194_v53  ;;  %8216 = vmatprep.subr.bf16.mxu1 %v15160_v54  ;;  %15179 = vst [vmem:[#allocation76_spill] sm:$0xff] %v11214_v25  ;;  %15180 = vst [vmem:[#allocation77_spill] sm:$0xff] %v11218_v55  ;;  %v11220_v53 = vld [vmem:[#allocation8 + $0xc0] ss:$12 sps:$4 sm:$0xff]   ;;  %v11236_v6 = vpop.f32.mrf.mxu0 }
 0x1c7   : > { %15182 = vst [vmem:[#allocation79_spill] sm:$0xff] %v11236_v6  ;;  %v11240_v43 = vld [vmem:[#allocation8 + $0xac] ss:$12 sps:$4 sm:$0xff]   ;;  %v11250_v6 = vld [vmem:[#allocation8 + $0x94] ss:$12 sps:$4 sm:$0xff]  }
 0x1c8   : > { %15184 = vst [vmem:[#allocation81_spill] sm:$0xff] %v11250_v6 }
 0x1c9   : > { %1751 = vmatpush1.bf16.msra.mxu0 %v11200_v56  ;;  %8217 = vmatpush3.bf16.msra.mxu1 %v11202_v45  ;;  %v11228_v45 = vld [vmem:[#allocation2 + $0x18] sm:$0xff]  ;;  %v11230_v56 = vld [vmem:[#allocation2 + $0x8] sm:$0xff] }
 0x1ca   : > { %1752 = vmatprep.subr.bf16.mxu0 %v11206_v60  ;;  %8218 = vmatprep.subr.bf16.mxu1 %v15160_v54  ;;  %v1578_v60 = vpack.c.bf16 %v11230_v56, %v11228_v45 }
 0x1cd   : > { %1753 = vmatpush1.bf16.msra.mxu0 %v11212_v30  ;;  %8219 = vmatpush3.bf16.msra.mxu1 %v11214_v25  ;;  %v11246_v25 = vld [vmem:[#allocation8 + $0xa8] ss:$12 sps:$4 sm:$0xff]  }
 0x1ce   : > { %1754 = vmatprep.subr.bf16.mxu0 %v11218_v55  ;;  %8220 = vmatprep.subr.bf16.mxu1 %v15160_v54  ;;  %v11244_v55 = vpop.f32.mrf.mxu0 }
 0x1cf   : > { %15183 = vst [vmem:[#allocation80_spill] sm:$0xff] %v11244_v55  ;;  %v11259_v55 = vld [vmem:[#allocation8 + $0x90] ss:$12 sps:$4 sm:$0xff]  }
 0x1d1   : > { %1755 = vmatpush1.bf16.msra.mxu0 %v11220_v53  ;;  %8221 = vmatpush3.bf16.msra.mxu1 %v11226_v26 }
 0x1d2   : > { %1889 = vmatprep.subr.bf16.mxu0 %v11240_v43  ;;  %8226 = vmatprep.subr.bf16.mxu1 %v15160_v54 }
 0x1d4   : > { %1773 = vmatmul.mubr.bf16.vlgmr.msra.gmra.mxu0 %v1578_v60  ;;  %8223 = vmatmul.mubr.bf16.vlgmr.msra.gmra.mxu1 %v1578_v60  ;;  %v11257_v60 = vpop.f32.mrf.mxu0 }
 0x1d5   : > { %1890 = vmatpush1.bf16.msra.mxu0 %v11246_v25  ;;  %8227 = vmatpush3.bf16.msra.mxu1 %v10831_v63  ;;  %15185 = vst [vmem:[#allocation82_spill] sm:$0xff] %v11257_v60  ;;  %v11263_v63 = vld [vmem:[#allocation8 + $0x7c] ss:$12 sps:$4 sm:$0xff]  }
 0x1d6   : > { %1891 = vmatprep.subr.bf16.mxu0 %v11250_v6  ;;  %8228 = vmatprep.subr.bf16.mxu1 %v15160_v54  ;;  %v11267_v6 = vpop.f32.mrf.mxu0 }
 0x1d7   : > { %1921 = vmatprep.mubr.bf16.mxu0 %v15154_v52  ;;  %8242 = vmatprep.mubr.msk.bf16.mxu1 %vm10558_vm0, %v15160_v54  ;;  %15186 = vst [vmem:[#allocation83_spill] sm:$0xff] %v11267_v6 }
 0x1d8   : > { %v11273_v60 = vpop.f32.mrf.mxu0 }
 0x1d9   : > { %1892 = vmatpush1.bf16.msra.mxu0 %v11259_v55  ;;  %8229 = vmatpush3.bf16.msra.mxu1 %v10835_v0  ;;  %15187 = vst [vmem:[#allocation84_spill] sm:$0xff] %v11273_v60 }
 0x1da   : > { %1893 = vmatprep.subr.bf16.mxu0 %v11263_v63  ;;  %8230 = vmatprep.subr.bf16.mxu1 %v15160_v54  ;;  %v11279_v0 = vpop.f32.mrf.mxu0 }
 0x1db   : > { %15188 = vst [vmem:[#allocation85_spill] sm:$0xff] %v11279_v0 }
 0x1dd   : > { %1894 = vmatpush1.bf16.msra.mxu0 %v10734_v31  ;;  %8231 = vmatpush3.bf16.msra.mxu1 %v10844_v2  ;;  %v11285_v31 = vpop.f32.mrf.mxu0  ;;  %v15202_v2 = vld [vmem:[#allocation14_spill] sm:$0xff] }
 0x1de   : > { %1895 = vmatprep.subr.bf16.mxu0 %v10736_v32  ;;  %8232 = vmatprep.subr.bf16.mxu1 %v15160_v54  ;;  %15189 = vst [vmem:[#allocation86_spill] sm:$0xff] %v11285_v31 }
 0x1df   : > { %v11291_v32 = vpop.f32.mrf.mxu0 }
 0x1e0   : > { %15190 = vst [vmem:[#allocation87_spill] sm:$0xff] %v11291_v32 }
 0x1e1   : > { %1896 = vmatpush1.bf16.msra.mxu0 %v10739_v35  ;;  %8233 = vmatpush3.bf16.msra.mxu1 %v10850_v3  ;;  %v11297_v35 = vpop.f32.mrf.mxu0  ;;  %v15203_v3 = vld [vmem:[#allocation18_spill] sm:$0xff] }
 0x1e2   : > { %1897 = vmatprep.subr.bf16.mxu0 %v10743_v36  ;;  %8234 = vmatprep.subr.bf16.mxu1 %v15160_v54  ;;  %15191 = vst [vmem:[#allocation88_spill] sm:$0xff] %v11297_v35 }
 0x1e3   : > { %v11305_v36 = vpop.f32.mrf.mxu0 }
 0x1e4   : > { %15192 = vst [vmem:[#allocation89_spill] sm:$0xff] %v11305_v36  ;;  %v11682_v36 = vld [vmem:[#allocation8 + $0x16c] ss:$12 sps:$4 sm:$0xff]  }
 0x1e5   : > { %1898 = vmatpush1.bf16.msra.mxu0 %v10750_v41  ;;  %8235 = vmatpush3.bf16.msra.mxu1 %v10854_v4  ;;  %v11314_v41 = vpop.f32.mrf.mxu0  ;;  %v15204_v4 = vld [vmem:[#allocation15_spill] sm:$0xff]  ;;  %15302 = vst [vmem:[#allocation143_spill] sm:$0xff] %v11682_v36 }
 0x1e6   : > { %1899 = vmatprep.subr.bf16.mxu0 %v10753_v42  ;;  %8236 = vmatprep.subr.bf16.mxu1 %v15160_v54  ;;  %15193 = vst [vmem:[#allocation90_spill] sm:$0xff] %v11314_v41  ;;  %v11679_v41 = vld [vmem:[#allocation6 + $0xc8] ss:$12 sps:$4 sm:$0xff]  }
 0x1e7   : > { %v11320_v42 = vpop.f32.mrf.mxu0  ;;  %15301 = vst [vmem:[#allocation142_spill] sm:$0xff] %v11679_v41 }
 0x1e8   : > { %15194 = vst [vmem:[#allocation91_spill] sm:$0xff] %v11320_v42  ;;  %v11672_v42 = vld [vmem:[#allocation6 + $0xc4] ss:$12 sps:$4 sm:$0xff]  }
 0x1e9   : > { %1900 = vmatpush1.bf16.msra.mxu0 %v10758_v44  ;;  %8237 = vmatpush3.bf16.msra.mxu1 %v10862_v7  ;;  %v11326_v44 = vpop.f32.mrf.mxu0  ;;  %15299 = vst [vmem:[#allocation140_spill] sm:$0xff] %v11672_v42 }
 0x1ea   : > { %1901 = vmatprep.subr.bf16.mxu0 %v10764_v46  ;;  %8238 = vmatprep.subr.bf16.mxu1 %v15160_v54  ;;  %15195 = vst [vmem:[#allocation92_spill] sm:$0xff] %v11326_v44  ;;  %v11676_v44 = vld [vmem:[#allocation6 + $0xc0] ss:$12 sps:$4 sm:$0xff]  }
 0x1eb   : > { %v11332_v46 = vpop.f32.mrf.mxu0  ;;  %15300 = vst [vmem:[#allocation141_spill] sm:$0xff] %v11676_v44 }
 0x1ec   : > { %15196 = vst [vmem:[#allocation93_spill] sm:$0xff] %v11332_v46  ;;  %v11669_v46 = vld [vmem:[#allocation6 + $0xe0] ss:$12 sps:$4 sm:$0xff]  }
 0x1ed   : > { %1902 = vmatpush1.bf16.msra.mxu0 %v10769_v48  ;;  %8239 = vmatpush3.bf16.msra.mxu1 %v10870_v9  ;;  %v11338_v48 = vpop.f32.mrf.mxu0  ;;  %15298 = vst [vmem:[#allocation139_spill] sm:$0xff] %v11669_v46 }
 0x1ee   : > { %1903 = vmatprep.subr.bf16.mxu0 %v10774_v50  ;;  %8240 = vmatprep.subr.bf16.mxu1 %v15160_v54  ;;  %15197 = vst [vmem:[#allocation94_spill] sm:$0xff] %v11338_v48  ;;  %v15199_v50 = vld [vmem:[#allocation16_spill] sm:$0xff] }
 0x1f1   : > { %1904 = vmatpush1.bf16.msra.mxu0 %v10779_v51  ;;  %8241 = vmatpush3.bf16.msra.mxu1 %v10876_v10  ;;  %v15200_v51 = vld [vmem:[#allocation13_spill] sm:$0xff] }
 0x1f2   : > { %2018 = vmatprep.subr.bf16.mxu0 %v10771_v49  ;;  %8246 = vmatprep.subr.bf16.mxu1 %v15160_v54  ;;  %v11344_v49 = vpop.f32.mrf.mxu0 }
 0x1f3   : > { %15198 = vst [vmem:[#allocation95_spill] sm:$0xff] %v11344_v49 }
 0x1f4   : > { %1922 = vmatmul.mubr.bf16.vlgmr.msra.gmra.mxu0 %v11139_v58  ;;  %8243 = vmatmul.mubr.bf16.vlgmr.msra.gmra.mxu1 %v11139_v58 }
 0x1f5   : > { %2019 = vmatpush1.bf16.msra.mxu0 %v10839_v1  ;;  %8247 = vmatpush3.bf16.msra.mxu1 %v10921_v19  ;;  %v11350_v1 = vpop.f32.mrf.mxu0 }
 0x1f6   : > { %2020 = vmatprep.subr.bf16.mxu0 %v10859_v5  ;;  %8248 = vmatprep.subr.bf16.mxu1 %v15160_v54  ;;  %15201 = vst [vmem:[#allocation16_spill] sm:$0xff] %v11350_v1 }
 0x1f7   : > { %2050 = vmatprep.mubr.bf16.mxu0 %v15154_v52  ;;  %8262 = vmatprep.mubr.msk.bf16.mxu1 %vm10558_vm0, %v15160_v54  ;;  %v11356_v5 = vpop.f32.mrf.mxu0 }
 0x1f8   : > { %15205 = vst [vmem:[#allocation13_spill] sm:$0xff] %v11356_v5 }
 0x1f9   : > { %2021 = vmatpush1.bf16.msra.mxu0 %v10865_v8  ;;  %8249 = vmatpush3.bf16.msra.mxu1 %v10925_v20  ;;  %v11358_v7 = vpop.f32.mrf.mxu0 }
 0x1fa   : > { %2022 = vmatprep.subr.bf16.mxu0 %v10883_v11  ;;  %8250 = vmatprep.subr.bf16.mxu1 %v15160_v54  ;;  %15206 = vst [vmem:[#allocation14_spill] sm:$0xff] %v11358_v7 }
 0x1fb   : > { %v11360_v8 = vpop.f32.mrf.mxu0 }
 0x1fc   : > { %15207 = vst [vmem:[#allocation18_spill] sm:$0xff] %v11360_v8 }
 0x1fd   : > { %2023 = vmatpush1.bf16.msra.mxu0 %v10886_v12  ;;  %8251 = vmatpush3.bf16.msra.mxu1 %v10929_v21  ;;  %v11362_v9 = vpop.f32.mrf.mxu0 }
 0x1fe   : > { %2024 = vmatprep.subr.bf16.mxu0 %v10895_v13  ;;  %8252 = vmatprep.subr.bf16.mxu1 %v15160_v54  ;;  %15208 = vst [vmem:[#allocation15_spill] sm:$0xff] %v11362_v9 }
 0x1ff   : > { %v11364_v10 = vpop.f32.mrf.mxu0 }
 0x200   : > { %15209 = vst [vmem:[#allocation96_spill] sm:$0xff] %v11364_v10 }
 0x201   : > { %2025 = vmatpush1.bf16.msra.mxu0 %v10898_v14  ;;  %8253 = vmatpush3.bf16.msra.mxu1 %v10939_v24  ;;  %v11366_v11 = vpop.f32.mrf.mxu0 }
 0x202   : > { %2026 = vmatprep.subr.bf16.mxu0 %v10905_v15  ;;  %8254 = vmatprep.subr.bf16.mxu1 %v15160_v54  ;;  %15210 = vst [vmem:[#allocation97_spill] sm:$0xff] %v11366_v11 }
 0x203   : > { %v11368_v12 = vpop.f32.mrf.mxu0 }
 0x204   : > { %15211 = vst [vmem:[#allocation98_spill] sm:$0xff] %v11368_v12 }
 0x205   : > { %2027 = vmatpush1.bf16.msra.mxu0 %v10912_v16  ;;  %8255 = vmatpush3.bf16.msra.mxu1 %v10946_v27  ;;  %v11370_v13 = vpop.f32.mrf.mxu0 }
 0x206   : > { %2028 = vmatprep.subr.bf16.mxu0 %v10915_v17  ;;  %8256 = vmatprep.subr.bf16.mxu1 %v15160_v54  ;;  %15212 = vst [vmem:[#allocation99_spill] sm:$0xff] %v11370_v13 }
 0x207   : > { %v11372_v14 = vpop.f32.mrf.mxu0 }
 0x208   : > { %15213 = vst [vmem:[#allocation100_spill] sm:$0xff] %v11372_v14 }
 0x209   : > { %2029 = vmatpush1.bf16.msra.mxu0 %v10917_v18  ;;  %8257 = vmatpush3.bf16.msra.mxu1 %v10955_v29  ;;  %v11374_v15 = vpop.f32.mrf.mxu0 }
 0x20a   : > { %2030 = vmatprep.subr.bf16.mxu0 %v10931_v22  ;;  %8258 = vmatprep.subr.bf16.mxu1 %v15160_v54  ;;  %15214 = vst [vmem:[#allocation101_spill] sm:$0xff] %v11374_v15 }
 0x20b   : > { %v11376_v16 = vpop.f32.mrf.mxu0 }
 0x20c   : > { %15215 = vst [vmem:[#allocation102_spill] sm:$0xff] %v11376_v16 }
 0x20d   : > { %2031 = vmatpush1.bf16.msra.mxu0 %v10933_v23  ;;  %8259 = vmatpush3.bf16.msra.mxu1 %v15199_v50  ;;  %v11378_v17 = vpop.f32.mrf.mxu0 }
 0x20e   : > { %2032 = vmatprep.subr.bf16.mxu0 %v15200_v51  ;;  %8260 = vmatprep.subr.bf16.mxu1 %v15160_v54  ;;  %15216 = vst [vmem:[#allocation103_spill] sm:$0xff] %v11378_v17 }
 0x20f   : > { %v11380_v18 = vpop.f32.mrf.mxu0 }
 0x210   : > { %15217 = vst [vmem:[#allocation104_spill] sm:$0xff] %v11380_v18 }
 0x211   : > { %2033 = vmatpush1.bf16.msra.mxu0 %v15202_v2  ;;  %8261 = vmatpush3.bf16.msra.mxu1 %v15203_v3  ;;  %v11382_v19 = vpop.f32.mrf.mxu0 }
 0x212   : > { %2103 = vmatprep.subr.bf16.mxu0 %v15204_v4  ;;  %8266 = vmatprep.subr.bf16.mxu1 %v15160_v54  ;;  %15218 = vst [vmem:[#allocation105_spill] sm:$0xff] %v11382_v19 }
 0x213   : > { %v11384_v20 = vpop.f32.mrf.mxu0 }
 0x214   : > { %15219 = vst [vmem:[#allocation106_spill] sm:$0xff] %v11384_v20 }
 0x215   : > { %v11386_v21 = vpop.f32.mrf.mxu0 }
 0x216   : > { %15220 = vst [vmem:[#allocation107_spill] sm:$0xff] %v11386_v21 }
 0x217   : > { %v11388_v22 = vpop.f32.mrf.mxu0 }
 0x218   : > { %15221 = vst [vmem:[#allocation108_spill] sm:$0xff] %v11388_v22 }
 0x219   : > { %v11390_v23 = vpop.f32.mrf.mxu0 }
 0x21a   : > { %15222 = vst [vmem:[#allocation109_spill] sm:$0xff] %v11390_v23 }
 0x21b   : > { %v11392_v24 = vpop.f32.mrf.mxu0 }
 0x21c   : > { %15223 = vst [vmem:[#allocation110_spill] sm:$0xff] %v11392_v24 }
 0x21d   : > { %v11394_v27 = vpop.f32.mrf.mxu0 }
 0x21e   : > { %15224 = vst [vmem:[#allocation111_spill] sm:$0xff] %v11394_v27 }
 0x21f   : > { %v11396_v29 = vpop.f32.mrf.mxu0 }
 0x220   : > { %15225 = vst [vmem:[#allocation112_spill] sm:$0xff] %v11396_v29 }
 0x221   : > { %v11398_v58 = vpop.f32.mrf.mxu0 }
 0x222   : > { %15226 = vst [vmem:[#allocation113_spill] sm:$0xff] %v11398_v58 }
 0x223   : > { %v11400_v50 = vpop.f32.mrf.mxu0 }
 0x224   : > { %15227 = vst [vmem:[#allocation114_spill] sm:$0xff] %v11400_v50  ;;  %v7451_v50 = vld [vmem:[%s14730_s4 + $0x3] sm:$0x7] }
 0x225   : > { %v11402_v51 = vpop.f32.mrf.mxu0 }
 0x226   : > { %15228 = vst [vmem:[#allocation115_spill] sm:$0xff] %v11402_v51  ;;  %v15234_v51 = vld [vmem:[#allocation17_spill] sm:$0xff] }
 0x227   : > { %v11404_v2 = vpop.f32.mrf.mxu0 }
 0x228   : > { %15229 = vst [vmem:[#allocation116_spill] sm:$0xff] %v11404_v2 }
 0x229   : > { %v11406_v20 = vpop.f32.mrf.mxu0 }
 0x22a   : > { %15230 = vst [vmem:[#allocation117_spill] sm:$0xff] %v11406_v20 }
 0x22b   : > { %v11410_v24 = vpop.f32.mrf.mxu0 }
 0x22c   : > { %15231 = vst [vmem:[#allocation118_spill] sm:$0xff] %v11410_v24 }
 0x22d   : > { %v11412_v27 = vpop.f32.mrf.mxu0 }
 0x22e   : > { %15232 = vst [vmem:[#allocation119_spill] sm:$0xff] %v11412_v27  ;;  %v15237_v27 = vsub.s32 1, %v15234_v51 }
 0x22f   : > { %v11414_v29 = vpop.f32.mrf.mxu0 }
 0x230   : > { %15233 = vst [vmem:[#allocation120_spill] sm:$0xff] %v11414_v29  ;;  %v11428_v29 = vrot.slane %v7451_v50, %v15237_v27 }
 0x274   : > { %v1571_v3 = vpop.f32.mrf.mxu1  ;;  %v1528_v58 = vpop.f32.mrf.mxu0 }
 0x276   : > { %v8204_v4 = vpop.f32.mrf.mxu1  ;;  %v1530_v21 = vpop.f32.mrf.mxu0 }
 0x277   : > { %v15235_v4 = vsub.s32 0, %v15234_v51 }
 0x278   : > { %v11408_v22 = vpop.f32.mrf.mxu1  ;;  %v1532_v2 = vpop.f32.mrf.mxu0 }
 0x279   : > { %v11421_v19 = vrot.slane %v7451_v50, %v15235_v4  ;;  %v1531_v4 = vadd.f32 %v1530_v21, %v11428_v29  ;;  %v11435_v21 = vld [vmem:[%s14731_s5 + $0x1] ss:$0 sm:$0xff] }
 0x27a   : > { %v8205_v23 = vpop.f32.mrf.mxu1  ;;  %v11423_v20 = vpop.f32.mrf.mxu0 }
 0x27b   : > { %15236 = vst [vmem:[#allocation17_spill] sm:$0xff] %v11421_v19  ;;  %v1529_v23 = vadd.f32 %v1528_v58, %v11421_v19  ;;  %v1533_v14 = vadd.f32 %v1532_v2, %v11421_v19 }
 0x294   : > { %v1774_v24 = vpop.f32.mrf.mxu0  ;;  %v1817_v18 = vpop.f32.mrf.mxu1 }
 0x295   : > { %v1824_v16 = vadd.f32 %v1774_v24, %v1529_v23 }
 0x296   : > { %v1776_v17 = vpop.f32.mrf.mxu0  ;;  %v8224_v15 = vpop.f32.mrf.mxu1 }
 0x297   : > { %v7530_v12 = vmul.f32 -1.442695, %v1824_v16  ;;  %v1825_v58 = vadd.f32 %v1776_v17, %v1531_v4  ;;  %v2232_v4 = vstv %s2231_s11  ;;  %s4737_s11 = sadd.s32 8, %s11080_s16 }
 0x298   : > { %v1778_v13 = vpop.f32.mrf.mxu0  ;;  %v1820_v11 = vpop.f32.mrf.mxu1 }
 0x299   : > { %9385 = vpow2.f32 %v7530_v12  ;;  %v1826_v10 = vadd.f32 %v1778_v13, %v1533_v14  ;;  %v7531_v7 = vmul.f32 -1.442695, %v1825_v58  ;;  %v1858_v14 = vadd.f32 %v11435_v21, %v1817_v18 }
 0x29a   : > { %v8225_v8 = vpop.f32.mrf.mxu1  ;;  %v11437_v12 = vpop.f32.mrf.mxu0 }
 0x29b   : > { %v7532_v9 = vmul.f32 -1.442695, %v1826_v10  ;;  %v15238_v8 = vld [vmem:[#allocation47_spill] sm:$0xff]  ;;  %v15239_v10 = vsub.s32 2, %v15234_v51 }
 0x29d   : > { %9387 = vpow2.f32 %v7532_v9  ;;  %v695_v9 = vadd.f32 %v11110_v39, %v15238_v8  ;;  %v699_v39 = vadd.f32 %v11117_v47, %v15238_v8  ;;  %v1859_v47 = vadd.f32 %v11435_v21, %v1820_v11 }
 0x29e   : > { %9389 = vpow2.f32 %v7531_v7  ;;  %v11443_v7 = vrot.slane %v7451_v50, %v15239_v10 }
 0x2a6   : > { %v9386_v27 = vpop.eup %9385 }
 0x2a7   : > { %v1840_v24 = vadd.f32 1.0, %v9386_v27  ;;  %v15240_v27 = vld [vmem:[#allocation51_spill] sm:$0xff] }
 0x2a8   : > { %vm2233_vm3 = vcmp.eq.s32.totalorder %v15240_v27, %v2232_v4 }
 0x2a9   : > { %9391 = vrcp.f32 %v1840_v24  ;;  %v15241_v24 = vld [vmem:[#allocation52_spill] sm:$0xff]  ;;  %v2235_v50 = vsel %vm2233_vm3, 1, %v15154_v52 }
 0x2aa   : > { %v9388_v15 = vpop.eup %9387  ;;  %vm2234_vm4 = vcmp.eq.s32.totalorder %v15241_v24, %v2232_v4  ;;  %2238 = vperm.xlu1 %9220, %v2235_v50  }
 0x2ab   : > { %v1842_v23 = vadd.f32 1.0, %v9388_v15  ;;  %v9390_v16 = vpop.eup %9389  ;;  %v2236_v4 = vsel %vm2234_vm4, 1, %v15154_v52 }
 0x2ac   : > { %v1841_v13 = vadd.f32 1.0, %v9390_v16  ;;  %v1572_v16 = vadd.f32 %v1571_v3, %v11443_v7  ;;  %v1575_v3 = vadd.f32 %v11408_v22, %v11443_v7 }
 0x2ad   : > { %9393 = vrcp.f32 %v1842_v23 }
 0x2ae   : > { %9395 = vrcp.f32 %v1841_v13  ;;  %2241 = vperm.xlu1 %9220, %v2236_v4  }
 0x2b4   : > { %v1923_v17 = vpop.f32.mrf.mxu0  ;;  %v1966_v2 = vpop.f32.mrf.mxu1 }
 0x2b5   : > { %v1973_v58 = vadd.f32 %v1923_v17, %v695_v9  ;;  %v697_v9 = vadd.f32 %v11115_v59, %v11095_v28  ;;  %v701_v59 = vadd.f32 %v11119_v34, %v11095_v28 }
 0x2b6   : > { %v9392_v15 = vpop.eup %9391  ;;  %v1925_v23 = vpop.f32.mrf.mxu0 }
 0x2b7   : > { %v8244_v51 = vpop.f32.mrf.mxu1  ;;  %v1860_v18 = vmul.f32 %v9392_v15, %v1858_v14  ;;  %v7535_v10 = vmul.f32 -1.442695, %v1973_v58  ;;  %v1974_v58 = vadd.f32 %v1925_v23, %v697_v9 }
 0x2b8   : > { %v1927_v17 = vpop.f32.mrf.mxu0 }
 0x2b9   : > { %v1969_v5 = vpop.f32.mrf.mxu1  ;;  %v1862_v49 = vadd.f32 %v1860_v18, %v1572_v16  ;;  %9397 = vpow2.f32 %v7535_v10  ;;  %v1975_v51 = vadd.f32 %v1927_v17, %v699_v39  ;;  %v7536_v16 = vmul.f32 -1.442695, %v1974_v58 }
 0x2ba   : > { %v9394_v1 = vpop.eup %9393  ;;  %v1929_v50 = vpop.f32.mrf.mxu0 }
 0x2bb   : > { %v8245_v13 = vpop.f32.mrf.mxu1  ;;  %9399 = vtanh.f32 %v1862_v49  ;;  %v1861_v14 = vmul.f32 %v9394_v1, %v1859_v47  ;;  %v7537_v15 = vmul.f32 -1.442695, %v1975_v51  ;;  %v1976_v11 = vadd.f32 %v1929_v50, %v701_v59  ;;  %v9396_v18 = vpop.eup %9395  ;;  %v15243_v59 = vld [vmem:[#allocation20_spill] sm:$0xff] }
 0x2bc   : > { %v1866_v49 = vsub.f32 1.0, %v9396_v18  ;;  %v1870_v9 = vmul.f32 %v9396_v18, %v11228_v45  ;;  %v2001_v13 = vadd.f32 %v11105_v57, %v1966_v2  ;;  %v1535_v50 = vadd.f32 %v11423_v20, %v11428_v29 }
 0x2bd   : > { %v11461_v48 = vadd.f32 %v1861_v14, %v1575_v3  ;;  %9401 = vpow2.f32 %v7537_v15  ;;  %v7538_v39 = vmul.f32 -1.442695, %v1976_v11  ;;  %v2002_v45 = vadd.f32 %v11105_v57, %v1969_v5 }
 0x2be   : > { %9403 = vpow2.f32 %v7536_v16 }
 0x2bf   : > { %9405 = vpow2.f32 %v7538_v39  ;;  %v1827_v39 = vadd.f32 %v11437_v12, %v1535_v50  ;;  %v15253_v50 = vld [vmem:[#allocation68_spill] sm:$0xff] }
 0x2c1   : > { %v7533_v2 = vmul.f32 -1.442695, %v1827_v39  ;;  %v15256_v39 = vld [vmem:[#allocation72_spill] sm:$0xff] }
 0x2c6   : > { %v9398_v10 = vpop.eup %9397 }
 0x2c7   : > { %v1989_v22 = vadd.f32 1.0, %v9398_v10  ;;  %v15244_v10 = vld [vmem:[#allocation21_spill] sm:$0xff] }
 0x2c8   : > { %v9400_v1 = vpop.eup %9399 }
 0x2c9   : > { %9407 = vrcp.f32 %v1989_v22  ;;  %v1868_v23 = vmul.f32 %v9400_v1, %v1866_v49 }
 0x2ca   : > { %v9402_v17 = vpop.eup %9401 }
 0x2cb   : > { %v1991_v4 = vadd.f32 1.0, %v9402_v17  ;;  %v11464_v34 = vadd.f32 %v1870_v9, %v1868_v23  ;;  %v9404_v47 = vpop.eup %9403 }
 0x2cc   : > { %v9406_v51 = vpop.eup %9405  ;;  %v1990_v3 = vadd.f32 1.0, %v9404_v47 }
 0x2cd   : > { %15242 = vst [vmem:[#allocation121_spill] sm:$0xff] %v11464_v34  ;;  %9409 = vrcp.f32 %v1991_v4  ;;  %v1992_v58 = vadd.f32 1.0, %v9406_v51 }
 0x2ce   : > { %9411 = vrcp.f32 %v1990_v3 }
 0x2cf   : > { %9413 = vrcp.f32 %v1992_v58  ;;  %v15250_v58 = vld [vmem:[#allocation64_spill] sm:$0xff] }
 0x2d6   : > { %v9408_v14 = vpop.eup %9407 }
 0x2d7   : > { %v2003_v15 = vmul.f32 %v9408_v14, %v2001_v13 }
 0x2d9   : > { %v2005_v11 = vadd.f32 %v2003_v15, %v15243_v59  ;;  %v15251_v15 = vld [vmem:[#allocation65_spill] sm:$0xff] }
 0x2da   : > { %v9410_v16 = vpop.eup %9409  ;;  %v15254_v59 = vld [vmem:[#allocation69_spill] sm:$0xff] }
 0x2db   : > { %9415 = vtanh.f32 %v2005_v11  ;;  %v2004_v18 = vmul.f32 %v9410_v16, %v2002_v45  ;;  %v9412_v49 = vpop.eup %9411  ;;  %v15255_v11 = vld [vmem:[#allocation70_spill] sm:$0xff] }
 0x2dc   : > { %v9414_v1 = vpop.eup %9413  ;;  %v2009_v23 = vsub.f32 1.0, %v9412_v49  ;;  %v2013_v17 = vmul.f32 %v9412_v49, %v11127_v33  ;;  %v15245_v33 = vld [vmem:[#allocation57_spill] sm:$0xff]  ;;  %v15259_v49 = vld [vmem:[#allocation76_spill] sm:$0xff] }
 0x2dd   : > { %v2006_v22 = vadd.f32 %v2004_v18, %v15244_v10  ;;  %v2010_v4 = vsub.f32 1.0, %v9414_v1  ;;  %v2014_v12 = vmul.f32 %v9414_v1, %v11129_v37  ;;  %v15246_v37 = vld [vmem:[#allocation58_spill] sm:$0xff]  ;;  %v15257_v18 = vld [vmem:[#allocation73_spill] sm:$0xff] }
 0x2df   : > { %9417 = vtanh.f32 %v2006_v22  ;;  %v15258_v22 = vld [vmem:[#allocation74_spill] sm:$0xff] }
 0x2e0   : > { %9419 = vpow2.f32 %v7533_v2 }
 0x2e8   : > { %v9416_v9 = vpop.eup %9415 }
 0x2e9   : > { %v2011_v20 = vmul.f32 %v9416_v9, %v2009_v23  ;;  %v15261_v23 = vld [vmem:[#allocation77_spill] sm:$0xff] }
 0x2eb   : > { %v11474_v57 = vadd.f32 %v2013_v17, %v2011_v20  ;;  %v11557_v20 = vld [vmem:[#allocation8 + $0x4c] ss:$12 sps:$4 sm:$0xff]   ;;  %v11561_v17 = vld [vmem:[#allocation8 + $0x48] ss:$12 sps:$4 sm:$0xff]  }
 0x2ec   : > { %v9418_v5 = vpop.eup %9417 }
 0x2ed   : > { %v2012_v47 = vmul.f32 %v9418_v5, %v2010_v4  ;;  %v9420_v3 = vpop.eup %9419  ;;  %v11564_v4 = vld [vmem:[#allocation8 + $0x50] ss:$12 sps:$4 sm:$0xff]   ;;  %v11567_v5 = vld [vmem:[#allocation8 + $0x34] ss:$12 sps:$4 sm:$0xff]  }
 0x2ee   : > { %v1843_v14 = vadd.f32 1.0, %v9420_v3  ;;  %15269 = vst [vmem:[#allocation64_spill] sm:$0xff] %v11567_v5  ;;  %v11577_v3 = vld [vmem:[#allocation8 + $0x1c] ss:$12 sps:$4 sm:$0xff]  }
 0x2ef   : > { %v11477_v51 = vadd.f32 %v2014_v12, %v2012_v47  ;;  %v11571_v47 = vld [vmem:[#allocation8 + $0x30] ss:$12 sps:$4 sm:$0xff]   ;;  %v11574_v12 = vld [vmem:[#allocation8 + $0x38] ss:$12 sps:$4 sm:$0xff]   ;;  %15272 = vst [vmem:[#allocation68_spill] sm:$0xff] %v11577_v3 }
 0x2f0   : > { %9421 = vrcp.f32 %v1843_v14  ;;  %15270 = vst [vmem:[#allocation65_spill] sm:$0xff] %v11571_v47  ;;  %v11581_v14 = vld [vmem:[#allocation8 + $0x18] ss:$12 sps:$4 sm:$0xff]  }
 0x2f1   : > { %v11481_v13 = vpack.c.bf16 %v11477_v51, %v11474_v57  ;;  %9423 = vtanh.f32 %v11461_v48  ;;  %15273 = vst [vmem:[#allocation69_spill] sm:$0xff] %v11581_v14 }
 0x2f3   : > { %2051 = vmatmul.mubr.bf16.vlgmr.msra.gmra.mxu0 %v11481_v13  ;;  %8263 = vmatmul.mubr.bf16.vlgmr.msra.gmra.mxu1 %v11481_v13 }
 0x2f4   : > { %2104 = vmatpush1.bf16.msra.mxu0 %v11133_v40  ;;  %8267 = vmatpush3.bf16.msra.mxu1 %v11135_v62  ;;  %v15247_v40 = vld [vmem:[#allocation60_spill] sm:$0xff]  ;;  %v15248_v62 = vld [vmem:[#allocation61_spill] sm:$0xff] }
 0x2f5   : > { %2105 = vmatprep.subr.bf16.mxu0 %v11141_v38  ;;  %8268 = vmatprep.subr.bf16.mxu1 %v15160_v54  ;;  %v15249_v38 = vld [vmem:[#allocation62_spill] sm:$0xff]  ;;  %15266 = vst [vmem:[#allocation60_spill] sm:$0xff] %v11557_v20  ;;  %15267 = vst [vmem:[#allocation61_spill] sm:$0xff] %v11561_v17 }
 0x2f6   : > { %2135 = vmatprep.mubr.bf16.mxu0 %v15154_v52  ;;  %8282 = vmatprep.mubr.msk.bf16.mxu1 %vm10558_vm0, %v15160_v54  ;;  %15268 = vst [vmem:[#allocation62_spill] sm:$0xff] %v11564_v4 }
 0x2f8   : > { %2106 = vmatpush1.bf16.msra.mxu0 %v11149_v61  ;;  %8269 = vmatpush3.bf16.msra.mxu1 %v15245_v33  ;;  %v15252_v61 = vld [vmem:[#allocation66_spill] sm:$0xff]  ;;  %v11584_v33 = vld [vmem:[#allocation8 + $0x20] ss:$12 sps:$4 sm:$0xff]  }
 0x2f9   : > { %2107 = vmatprep.subr.bf16.mxu0 %v15246_v37  ;;  %8270 = vmatprep.subr.bf16.mxu1 %v15160_v54  ;;  %15271 = vst [vmem:[#allocation66_spill] sm:$0xff] %v11574_v12  ;;  %15274 = vst [vmem:[#allocation70_spill] sm:$0xff] %v11584_v33  ;;  %v11587_v37 = vld [vmem:[#allocation8 + $0x4] ss:$12 sps:$4 sm:$0xff]  }
 0x2fa   : > { %15275 = vst [vmem:[#allocation72_spill] sm:$0xff] %v11587_v37 }
 0x2fc   : > { %2108 = vmatpush1.bf16.msra.mxu0 %v15247_v40  ;;  %8271 = vmatpush3.bf16.msra.mxu1 %v15248_v62  ;;  %v11591_v40 = vld [vmem:[#allocation8] ss:$12 sps:$4 sm:$0xff]   ;;  %v11594_v62 = vld [vmem:[#allocation8 + $0x8] ss:$12 sps:$4 sm:$0xff]  }
 0x2fd   : > { %2109 = vmatprep.subr.bf16.mxu0 %v15249_v38  ;;  %8272 = vmatprep.subr.bf16.mxu1 %v15160_v54  ;;  %v9422_v48 = vpop.eup %9421  ;;  %15276 = vst [vmem:[#allocation73_spill] sm:$0xff] %v11591_v40  ;;  %15277 = vst [vmem:[#allocation74_spill] sm:$0xff] %v11594_v62  ;;  %v11597_v38 = vld [vmem:[#allocation6 + $0x16c] ss:$12 sps:$4 sm:$0xff]  }
 0x2fe   : > { %v9424_v45 = vpop.eup %9423  ;;  %v1867_v16 = vsub.f32 1.0, %v9422_v48  ;;  %v1871_v2 = vmul.f32 %v9422_v48, %v11230_v56  ;;  %v11527_v56 = vld [vmem:[#allocation8 + $0xb0] ss:$12 sps:$4 sm:$0xff]   ;;  %15278 = vst [vmem:[#allocation76_spill] sm:$0xff] %v11597_v38  ;;  %v11619_v48 = vld [vmem:[#allocation6 + $0x158] ss:$12 sps:$4 sm:$0xff]  }
 0x2ff   : > { %15283 = vst [vmem:[#allocation124_spill] sm:$0xff] %v11619_v48 }
 0x300   : > { %2110 = vmatpush1.bf16.msra.mxu0 %v15250_v58  ;;  %8273 = vmatpush3.bf16.msra.mxu1 %v15251_v15  ;;  %v1869_v10 = vmul.f32 %v9424_v45, %v1867_v16  ;;  %v11603_v58 = vld [vmem:[#allocation6 + $0x168] ss:$12 sps:$4 sm:$0xff]   ;;  %v11606_v15 = vld [vmem:[#allocation6 + $0x170] ss:$12 sps:$4 sm:$0xff]   ;;  %v11636_v16 = vld [vmem:[#allocation6 + $0x120] ss:$12 sps:$4 sm:$0xff]  }
 0x301   : > { %2111 = vmatprep.subr.bf16.mxu0 %v15252_v61  ;;  %8274 = vmatprep.subr.bf16.mxu1 %v15160_v54  ;;  %15279 = vst [vmem:[#allocation77_spill] sm:$0xff] %v11603_v58  ;;  %v11609_v61 = vld [vmem:[#allocation6 + $0x154] ss:$12 sps:$4 sm:$0xff]   ;;  %v11632_v45 = vld [vmem:[#allocation6 + $0x124] ss:$12 sps:$4 sm:$0xff]   ;;  %15288 = vst [vmem:[#allocation129_spill] sm:$0xff] %v11636_v16 }
 0x302   : > { %v11516_v1 = vadd.f32 %v1871_v2, %v1869_v10  ;;  %15281 = vst [vmem:[#allocation122_spill] sm:$0xff] %v11609_v61  ;;  %15287 = vst [vmem:[#allocation128_spill] sm:$0xff] %v11632_v45  ;;  %v11646_v10 = vld [vmem:[#allocation6 + $0x108] ss:$12 sps:$4 sm:$0xff]  }
 0x303   : > { %15291 = vst [vmem:[#allocation132_spill] sm:$0xff] %v11646_v10  ;;  %v11652_v2 = vld [vmem:[#allocation6 + $0xf4] ss:$12 sps:$4 sm:$0xff]  }
 0x304   : > { %2112 = vmatpush1.bf16.msra.mxu0 %v15253_v50  ;;  %8275 = vmatpush3.bf16.msra.mxu1 %v15254_v59  ;;  %15260 = vst [vmem:[#allocation20_spill] sm:$0xff] %v11516_v1  ;;  %v2102_v9 = vpack.c.bf16 %v11516_v1, %v11464_v34  ;;  %v11622_v50 = vld [vmem:[#allocation6 + $0x13c] ss:$12 sps:$4 sm:$0xff]   ;;  %v11626_v59 = vld [vmem:[#allocation6 + $0x138] ss:$12 sps:$4 sm:$0xff]   ;;  %15293 = vst [vmem:[#allocation134_spill] sm:$0xff] %v11652_v2 }
 0x305   : > { %2113 = vmatprep.subr.bf16.mxu0 %v15255_v11  ;;  %8276 = vmatprep.subr.bf16.mxu1 %v15160_v54  ;;  %15284 = vst [vmem:[#allocation125_spill] sm:$0xff] %v11622_v50  ;;  %15285 = vst [vmem:[#allocation126_spill] sm:$0xff] %v11626_v59  ;;  %v11629_v11 = vld [vmem:[#allocation6 + $0x140] ss:$12 sps:$4 sm:$0xff]  }
 0x306   : > { %15286 = vst [vmem:[#allocation127_spill] sm:$0xff] %v11629_v11 }
 0x308   : > { %2114 = vmatpush1.bf16.msra.mxu0 %v15256_v39  ;;  %8277 = vmatpush3.bf16.msra.mxu1 %v15257_v18  ;;  %v11639_v39 = vld [vmem:[#allocation6 + $0x128] ss:$12 sps:$4 sm:$0xff]   ;;  %v11642_v18 = vld [vmem:[#allocation6 + $0x10c] ss:$12 sps:$4 sm:$0xff]  }
 0x309   : > { %2115 = vmatprep.subr.bf16.mxu0 %v15258_v22  ;;  %8278 = vmatprep.subr.bf16.mxu1 %v15160_v54  ;;  %15289 = vst [vmem:[#allocation130_spill] sm:$0xff] %v11639_v39  ;;  %15290 = vst [vmem:[#allocation131_spill] sm:$0xff] %v11642_v18  ;;  %v11649_v22 = vld [vmem:[#allocation6 + $0x110] ss:$12 sps:$4 sm:$0xff]  }
 0x30a   : > { %15292 = vst [vmem:[#allocation133_spill] sm:$0xff] %v11649_v22 }
 0x30c   : > { %2116 = vmatpush1.bf16.msra.mxu0 %v11212_v30  ;;  %8279 = vmatpush3.bf16.msra.mxu1 %v15259_v49  ;;  %v15262_v30 = vld [vmem:[#allocation81_spill] sm:$0xff] }
 0x30d   : > { %2117 = vmatprep.subr.bf16.mxu0 %v15261_v23  ;;  %8280 = vmatprep.subr.bf16.mxu1 %v15160_v54  ;;  %15280 = vst [vmem:[#allocation81_spill] sm:$0xff] %v11606_v15  ;;  %v11656_v49 = vld [vmem:[#allocation6 + $0xf0] ss:$12 sps:$4 sm:$0xff]   ;;  %v11659_v23 = vld [vmem:[#allocation6 + $0xf8] ss:$12 sps:$4 sm:$0xff]  }
 0x30e   : > { %15294 = vst [vmem:[#allocation135_spill] sm:$0xff] %v11656_v49  ;;  %15295 = vst [vmem:[#allocation136_spill] sm:$0xff] %v11659_v23 }
 0x310   : > { %2118 = vmatpush1.bf16.msra.mxu0 %v11220_v53  ;;  %8281 = vmatpush3.bf16.msra.mxu1 %v11226_v26  ;;  %v11536_v26 = vld [vmem:[#allocation8 + $0x98] ss:$12 sps:$4 sm:$0xff]   ;;  %v11544_v53 = vld [vmem:[#allocation8 + $0x80] ss:$12 sps:$4 sm:$0xff]  }
 0x311   : > { %2247 = vmatprep.subr.bf16.mxu0 %v11240_v43  ;;  %8286 = vmatprep.subr.bf16.mxu1 %v15160_v54  ;;  %v11541_v43 = vld [vmem:[#allocation8 + $0x78] ss:$12 sps:$4 sm:$0xff]  }
 0x313   : > { %2136 = vmatmul.mubr.bf16.vlgmr.msra.gmra.mxu0 %v2102_v9  ;;  %8283 = vmatmul.mubr.bf16.vlgmr.msra.gmra.mxu1 %v2102_v9  ;;  %v11662_v9 = vld [vmem:[#allocation6 + $0xdc] ss:$12 sps:$4 sm:$0xff]  }
 0x314   : > { %2248 = vmatpush1.bf16.msra.mxu0 %v11246_v25  ;;  %8287 = vmatpush3.bf16.msra.mxu1 %v11527_v56  ;;  %v11547_v25 = vld [vmem:[#allocation8 + $0x64] ss:$12 sps:$4 sm:$0xff]   ;;  %15296 = vst [vmem:[#allocation137_spill] sm:$0xff] %v11662_v9 }
 0x315   : > { %2249 = vmatprep.subr.bf16.mxu0 %v15262_v30  ;;  %8288 = vmatprep.subr.bf16.mxu1 %v15160_v54  ;;  %15263 = vst [vmem:[#allocation21_spill] sm:$0xff] %v11547_v25  ;;  %v11666_v30 = vld [vmem:[#allocation6 + $0xd8] ss:$12 sps:$4 sm:$0xff]  }
 0x316   : > { %2279 = vmatprep.mubr.bf16.mxu0 %v15154_v52  ;;  %8302 = vmatprep.mubr.msk.bf16.mxu1 %vm10558_vm0, %v15160_v54  ;;  %15297 = vst [vmem:[#allocation138_spill] sm:$0xff] %v11666_v30 }
 0x318   : > { %2250 = vmatpush1.bf16.msra.mxu0 %v11259_v55  ;;  %8289 = vmatpush3.bf16.msra.mxu1 %v11536_v26  ;;  %v11551_v55 = vld [vmem:[#allocation8 + $0x60] ss:$12 sps:$4 sm:$0xff]  }
 0x319   : > { %2251 = vmatprep.subr.bf16.mxu0 %v11263_v63  ;;  %8290 = vmatprep.subr.bf16.mxu1 %v15160_v54  ;;  %15264 = vst [vmem:[#allocation57_spill] sm:$0xff] %v11551_v55  ;;  %v11554_v63 = vld [vmem:[#allocation8 + $0x68] ss:$12 sps:$4 sm:$0xff]  }
 0x31a   : > { %15265 = vst [vmem:[#allocation58_spill] sm:$0xff] %v11554_v63 }
 0x31c   : > { %2252 = vmatpush1.bf16.msra.mxu0 %v11541_v43  ;;  %8291 = vmatpush3.bf16.msra.mxu1 %v11544_v53 }
 0x31d   : > { %2253 = vmatprep.subr.bf16.mxu0 %v11547_v25  ;;  %8292 = vmatprep.subr.bf16.mxu1 %v15160_v54 }
 0x320   : > { %2254 = vmatpush1.bf16.msra.mxu0 %v11551_v55  ;;  %8293 = vmatpush3.bf16.msra.mxu1 %v11554_v63 }
 0x321   : > { %2255 = vmatprep.subr.bf16.mxu0 %v11557_v20  ;;  %8294 = vmatprep.subr.bf16.mxu1 %v15160_v54 }
 0x324   : > { %2256 = vmatpush1.bf16.msra.mxu0 %v11561_v17  ;;  %8295 = vmatpush3.bf16.msra.mxu1 %v11564_v4 }
 0x325   : > { %2257 = vmatprep.subr.bf16.mxu0 %v11567_v5  ;;  %8296 = vmatprep.subr.bf16.mxu1 %v15160_v54 }
 0x328   : > { %2258 = vmatpush1.bf16.msra.mxu0 %v11571_v47  ;;  %8297 = vmatpush3.bf16.msra.mxu1 %v11574_v12 }
 0x329   : > { %2259 = vmatprep.subr.bf16.mxu0 %v11577_v3  ;;  %8298 = vmatprep.subr.bf16.mxu1 %v15160_v54 }
 0x32c   : > { %2260 = vmatpush1.bf16.msra.mxu0 %v11581_v14  ;;  %8299 = vmatpush3.bf16.msra.mxu1 %v11584_v33 }
 0x32d   : > { %2261 = vmatprep.subr.bf16.mxu0 %v11587_v37  ;;  %8300 = vmatprep.subr.bf16.mxu1 %v15160_v54 }
 0x330   : > { %2262 = vmatpush1.bf16.msra.mxu0 %v11591_v40  ;;  %8301 = vmatpush3.bf16.msra.mxu1 %v11594_v62 }
 0x331   : > { %2376 = vmatprep.subr.bf16.mxu0 %v11597_v38  ;;  %8306 = vmatprep.subr.bf16.mxu1 %v15160_v54 }
 0x333   : > { %2280 = vmatmul.mubr.bf16.vlgmr.msra.gmra.mxu0 %v11481_v13  ;;  %8303 = vmatmul.mubr.bf16.vlgmr.msra.gmra.mxu1 %v11481_v13  ;;  %v11616_v13 = vld [vmem:[#allocation6 + $0x150] ss:$12 sps:$4 sm:$0xff]  }
 0x334   : > { %2377 = vmatpush1.bf16.msra.mxu0 %v11603_v58  ;;  %8307 = vmatpush3.bf16.msra.mxu1 %v11606_v15  ;;  %15282 = vst [vmem:[#allocation123_spill] sm:$0xff] %v11616_v13 }
 0x335   : > { %2378 = vmatprep.subr.bf16.mxu0 %v11609_v61  ;;  %8308 = vmatprep.subr.bf16.mxu1 %v15160_v54 }
 0x336   : > { %2408 = vmatprep.mubr.bf16.mxu0 %v15154_v52  ;;  %8322 = vmatprep.mubr.msk.bf16.mxu1 %vm10558_vm0, %v15160_v54 }
 0x338   : > { %2379 = vmatpush1.bf16.msra.mxu0 %v11616_v13  ;;  %8309 = vmatpush3.bf16.msra.mxu1 %v11619_v48 }
 0x339   : > { %2380 = vmatprep.subr.bf16.mxu0 %v11622_v50  ;;  %8310 = vmatprep.subr.bf16.mxu1 %v15160_v54 }
 0x33c   : > { %2381 = vmatpush1.bf16.msra.mxu0 %v11626_v59  ;;  %8311 = vmatpush3.bf16.msra.mxu1 %v11629_v11 }
 0x33d   : > { %2382 = vmatprep.subr.bf16.mxu0 %v11632_v45  ;;  %8312 = vmatprep.subr.bf16.mxu1 %v15160_v54 }
 0x340   : > { %2383 = vmatpush1.bf16.msra.mxu0 %v11636_v16  ;;  %8313 = vmatpush3.bf16.msra.mxu1 %v11639_v39 }
 0x341   : > { %2384 = vmatprep.subr.bf16.mxu0 %v11642_v18  ;;  %8314 = vmatprep.subr.bf16.mxu1 %v15160_v54 }
 0x344   : > { %2385 = vmatpush1.bf16.msra.mxu0 %v11646_v10  ;;  %8315 = vmatpush3.bf16.msra.mxu1 %v11649_v22 }
 0x345   : > { %2386 = vmatprep.subr.bf16.mxu0 %v11652_v2  ;;  %8316 = vmatprep.subr.bf16.mxu1 %v15160_v54 }
 0x348   : > { %2387 = vmatpush1.bf16.msra.mxu0 %v11656_v49  ;;  %8317 = vmatpush3.bf16.msra.mxu1 %v11659_v23 }
 0x349   : > { %2388 = vmatprep.subr.bf16.mxu0 %v11662_v9  ;;  %8318 = vmatprep.subr.bf16.mxu1 %v15160_v54 }
 0x34c   : > { %2389 = vmatpush1.bf16.msra.mxu0 %v11666_v30  ;;  %8319 = vmatpush3.bf16.msra.mxu1 %v11669_v46 }
 0x34d   : > { %2390 = vmatprep.subr.bf16.mxu0 %v11672_v42  ;;  %8320 = vmatprep.subr.bf16.mxu1 %v15160_v54 }
 0x350   : > { %2391 = vmatpush1.bf16.msra.mxu0 %v11676_v44  ;;  %8321 = vmatpush3.bf16.msra.mxu1 %v11679_v41 }
 0x351   : > { %2461 = vmatprep.subr.bf16.mxu0 %v11682_v36  ;;  %8326 = vmatprep.subr.bf16.mxu1 %v15160_v54 }
 0x3b3   : > { %v2095_v32 = vpop.f32.mrf.mxu1  ;;  %v2052_v6 = vpop.f32.mrf.mxu0 }
 0x3b4   : > { %v2053_v44 = vadd.f32 %v2052_v6, %v11421_v19 }
 0x3b5   : > { %v8264_v35 = vpop.f32.mrf.mxu1  ;;  %v2054_v60 = vpop.f32.mrf.mxu0 }
 0x3b6   : > { %v2055_v10 = vadd.f32 %v2054_v60, %v11428_v29  ;;  %v15303_v60 = vld [vmem:[#allocation53_spill] sm:$0xff] }
 0x3b7   : > { %v11686_v31 = vpop.f32.mrf.mxu1  ;;  %v2056_v42 = vpop.f32.mrf.mxu0 }
 0x3b8   : > { %v2057_v36 = vadd.f32 %v2056_v42, %v11421_v19  ;;  %v2099_v19 = vadd.f32 %v11686_v31, %v11443_v7 }
 0x3b9   : > { %v8265_v0 = vpop.f32.mrf.mxu1  ;;  %v11688_v46 = vpop.f32.mrf.mxu0 }
 0x3d3   : > { %v2137_v30 = vpop.f32.mrf.mxu0  ;;  %v2180_v41 = vpop.f32.mrf.mxu1 }
 0x3d4   : > { %v2187_v9 = vadd.f32 %v2137_v30, %v2053_v44 }
 0x3d5   : > { %v2139_v23 = vpop.f32.mrf.mxu0  ;;  %v8284_v49 = vpop.f32.mrf.mxu1 }
 0x3d6   : > { %v7539_v2 = vmul.f32 -1.442695, %v2187_v9  ;;  %v2188_v39 = vadd.f32 %v2139_v23, %v2055_v10  ;;  %v15304_v23 = vld [vmem:[#allocation55_spill] sm:$0xff] }
 0x3d7   : > { %v2141_v22 = vpop.f32.mrf.mxu0  ;;  %v2183_v35 = vpop.f32.mrf.mxu1 }
 0x3d8   : > { %9425 = vpow2.f32 %v7539_v2  ;;  %v2189_v0 = vadd.f32 %v2141_v22, %v2057_v36  ;;  %v7540_v6 = vmul.f32 -1.442695, %v2188_v39  ;;  %v705_v2 = vadd.f32 %v15303_v60, %v15238_v8 }
 0x3d9   : > { %v8285_v18 = vpop.f32.mrf.mxu1  ;;  %v11693_v9 = vpop.f32.mrf.mxu0  ;;  %v2590_v22 = vstv %s2589_s14 }
 0x3da   : > { %v7541_v16 = vmul.f32 -1.442695, %v2189_v0  ;;  %vm2591_vm5 = vcmp.eq.s32.totalorder %v15240_v27, %v2590_v22  ;;  %vm2592_vm6 = vcmp.eq.s32.totalorder %v15241_v24, %v2590_v22  ;;  %v709_v0 = vadd.f32 %v15304_v23, %v15238_v8 }
 0x3db   : > { %v2216_v23 = vadd.f32 %v11435_v21, %v2183_v35 }
 0x3dc   : > { %9427 = vpow2.f32 %v7541_v16  ;;  %v2215_v16 = vadd.f32 %v11435_v21, %v2180_v41 }
 0x3dd   : > { %9429 = vpow2.f32 %v7540_v6 }
 0x3e5   : > { %v9426_v45 = vpop.eup %9425 }
 0x3e6   : > { %v2203_v44 = vadd.f32 1.0, %v9426_v45 }
 0x3e8   : > { %9431 = vrcp.f32 %v2203_v44 }
 0x3e9   : > { %v9428_v49 = vpop.eup %9427 }
 0x3ea   : > { %v2205_v30 = vadd.f32 1.0, %v9428_v49  ;;  %v9430_v42 = vpop.eup %9429  ;;  %v2593_v49 = vsel %vm2591_vm5, 1, %v15154_v52 }
 0x3eb   : > { %v2204_v36 = vadd.f32 1.0, %v9430_v42  ;;  %v2096_v42 = vadd.f32 %v2095_v32, %v11443_v7  ;;  %2596 = vperm.xlu0 %9219, %v2593_v49   ;;  %v15306_v49 = vld [vmem:[#allocation56_spill] sm:$0xff] }
 0x3ec   : > { %9433 = vrcp.f32 %v2205_v30  ;;  %v2594_v30 = vsel %vm2592_vm6, 1, %v15154_v52 }
 0x3ed   : > { %9435 = vrcp.f32 %v2204_v36  ;;  %2599 = vperm.xlu1 %9220, %v2594_v30   ;;  %v711_v30 = vadd.f32 %v15306_v49, %v11095_v28 }
 0x3f3   : > { %v2281_v18 = vpop.f32.mrf.mxu0  ;;  %v2324_v10 = vpop.f32.mrf.mxu1 }
 0x3f4   : > { %v2331_v39 = vadd.f32 %v2281_v18, %v705_v2  ;;  %v15305_v2 = vld [vmem:[#allocation54_spill] sm:$0xff] }
 0x3f5   : > { %v9432_v45 = vpop.eup %9431  ;;  %v2283_v6 = vpop.f32.mrf.mxu0  ;;  %v707_v18 = vadd.f32 %v15305_v2, %v11095_v28 }
 0x3f6   : > { %v8304_v44 = vpop.f32.mrf.mxu1  ;;  %v2217_v60 = vmul.f32 %v9432_v45, %v2215_v16  ;;  %v7543_v41 = vmul.f32 -1.442695, %v2331_v39 }
 0x3f7   : > { %v2285_v22 = vpop.f32.mrf.mxu0  ;;  %v2332_v16 = vadd.f32 %v2283_v6, %v707_v18 }
 0x3f8   : > { %v2327_v24 = vpop.f32.mrf.mxu1  ;;  %v2219_v27 = vadd.f32 %v2217_v60, %v2096_v42  ;;  %9437 = vpow2.f32 %v7543_v41  ;;  %v2333_v44 = vadd.f32 %v2285_v22, %v709_v0 }
 0x3f9   : > { %v9434_v8 = vpop.eup %9433  ;;  %v2287_v45 = vpop.f32.mrf.mxu0  ;;  %v7544_v35 = vmul.f32 -1.442695, %v2332_v16  ;;  %v11721_v16 = vld [vmem:[%s14731_s5] ss:$0 sm:$0xff] }
 0x3fa   : > { %v8305_v32 = vpop.f32.mrf.mxu1  ;;  %9439 = vtanh.f32 %v2219_v27  ;;  %v2218_v36 = vmul.f32 %v9434_v8, %v2216_v23  ;;  %v7545_v39 = vmul.f32 -1.442695, %v2333_v44  ;;  %v2334_v42 = vadd.f32 %v2287_v45, %v711_v30  ;;  %v9436_v0 = vpop.eup %9435 }
 0x3fb   : > { %v2223_v22 = vsub.f32 1.0, %v9436_v0  ;;  %v2227_v6 = vmul.f32 %v9436_v0, %v11464_v34  ;;  %v2360_v0 = vadd.f32 %v11721_v16, %v2327_v24 }
 0x3fc   : > { %v11713_v2 = vadd.f32 %v2218_v36, %v2099_v19  ;;  %9441 = vpow2.f32 %v7545_v39  ;;  %v7546_v60 = vmul.f32 -1.442695, %v2334_v42  ;;  %v2359_v39 = vadd.f32 %v11721_v16, %v2324_v10 }
 0x3fd   : > { %9443 = vpow2.f32 %v7544_v35  ;;  %v2059_v42 = vadd.f32 %v11688_v46, %v11428_v29  ;;  %v15308_v35 = vld [vmem:[#allocation23_spill] sm:$0xff] }
 0x3fe   : > { %9445 = vpow2.f32 %v7546_v60 }
 0x405   : > { %v9438_v41 = vpop.eup %9437 }
 0x406   : > { %v2347_v31 = vadd.f32 1.0, %v9438_v41 }
 0x407   : > { %v9440_v27 = vpop.eup %9439 }
 0x408   : > { %9447 = vrcp.f32 %v2347_v31  ;;  %v2225_v8 = vmul.f32 %v9440_v27, %v2223_v22  ;;  %v15309_v31 = vld [vmem:[#allocation19_spill] sm:$0xff]  ;;  %v15310_v22 = vld [vmem:[#allocation25_spill] sm:$0xff] }
 0x409   : > { %v9442_v18 = vpop.eup %9441  ;;  %v897_v27 = vadd.f32 %v15310_v22, %v15309_v31  ;;  %v11756_v22 = vld [vmem:[#allocation8 + $0x150] ss:$12 sps:$4 sm:$0xff]   ;;  %v11808_v31 = vld [vmem:[#allocation8 + $0xd8] ss:$12 sps:$4 sm:$0xff]  }
 0x40a   : > { %v2349_v23 = vadd.f32 1.0, %v9442_v18  ;;  %v11716_v44 = vadd.f32 %v2227_v6, %v2225_v8  ;;  %v9444_v19 = vpop.eup %9443  ;;  %v2190_v8 = vadd.f32 %v11693_v9, %v2059_v42 }
 0x40b   : > { %v9446_v32 = vpop.eup %9445  ;;  %v2348_v36 = vadd.f32 1.0, %v9444_v19 }
 0x40c   : > { %15307 = vst [vmem:[#allocation53_spill] sm:$0xff] %v11716_v44  ;;  %9449 = vrcp.f32 %v2349_v23  ;;  %v2350_v49 = vadd.f32 1.0, %v9446_v32  ;;  %v7542_v18 = vmul.f32 -1.442695, %v2190_v8  ;;  %v11763_v8 = vld [vmem:[#allocation8 + $0x13c] ss:$12 sps:$4 sm:$0xff]  }
 0x40d   : > { %9451 = vrcp.f32 %v2348_v36 }
 0x40e   : > { %9453 = vrcp.f32 %v2350_v49 }
 0x415   : > { %v9448_v45 = vpop.eup %9447 }
 0x416   : > { %v2361_v30 = vmul.f32 %v9448_v45, %v2359_v39 }
 0x418   : > { %v2363_v60 = vadd.f32 %v2361_v30, %v15308_v35 }
 0x419   : > { %v9450_v41 = vpop.eup %9449 }
 0x41a   : > { %9455 = vtanh.f32 %v2363_v60  ;;  %v2362_v10 = vmul.f32 %v9450_v41, %v2360_v0  ;;  %v9452_v23 = vpop.eup %9451  ;;  %v11746_v41 = vld [vmem:[#allocation8 + $0x170] ss:$12 sps:$4 sm:$0xff]  }
 0x41b   : > { %v9454_v19 = vpop.eup %9453  ;;  %v2367_v46 = vsub.f32 1.0, %v9452_v23  ;;  %v2371_v24 = vmul.f32 %v9452_v23, %v11474_v57  ;;  %v11743_v57 = vld [vmem:[#allocation8 + $0x168] ss:$12 sps:$4 sm:$0xff]  }
 0x41c   : > { %v2364_v6 = vadd.f32 %v2362_v10, %v897_v27  ;;  %v2368_v39 = vsub.f32 1.0, %v9454_v19  ;;  %v2372_v9 = vmul.f32 %v9454_v19, %v11477_v51  ;;  %v11749_v51 = vld [vmem:[#allocation8 + $0x154] ss:$12 sps:$4 sm:$0xff]   ;;  %v11759_v27 = vld [vmem:[#allocation8 + $0x158] ss:$12 sps:$4 sm:$0xff]  }
 0x41d   : > { %v11767_v10 = vld [vmem:[#allocation8 + $0x138] ss:$12 sps:$4 sm:$0xff]   ;;  %v11780_v23 = vld [vmem:[#allocation8 + $0x128] ss:$12 sps:$4 sm:$0xff]  }
 0x41e   : > { %9457 = vtanh.f32 %v2364_v6  ;;  %v11770_v6 = vld [vmem:[#allocation8 + $0x140] ss:$12 sps:$4 sm:$0xff]  }
 0x41f   : > { %9459 = vpow2.f32 %v7542_v18  ;;  %v11773_v18 = vld [vmem:[#allocation8 + $0x124] ss:$12 sps:$4 sm:$0xff]   ;;  %v11783_v19 = vld [vmem:[#allocation8 + $0x10c] ss:$12 sps:$4 sm:$0xff]  }
 0x427   : > { %v9456_v32 = vpop.eup %9455 }
 0x428   : > { %v2369_v36 = vmul.f32 %v9456_v32, %v2367_v46  ;;  %v11787_v32 = vld [vmem:[#allocation8 + $0x108] ss:$12 sps:$4 sm:$0xff]  }
 0x42a   : > { %v11732_v45 = vadd.f32 %v2371_v24, %v2369_v36  ;;  %v11790_v36 = vld [vmem:[#allocation8 + $0x110] ss:$12 sps:$4 sm:$0xff]   ;;  %v11793_v24 = vld [vmem:[#allocation8 + $0xf4] ss:$12 sps:$4 sm:$0xff]  }
 0x42b   : > { %v9458_v49 = vpop.eup %9457  ;;  %15311 = vst [vmem:[#allocation55_spill] sm:$0xff] %v11793_v24 }
 0x42c   : > { %v2370_v30 = vmul.f32 %v9458_v49, %v2368_v39  ;;  %v9460_v35 = vpop.eup %9459 }
 0x42d   : > { %v2206_v0 = vadd.f32 1.0, %v9460_v35 }
 0x42e   : > { %v11735_v42 = vadd.f32 %v2372_v9, %v2370_v30  ;;  %v11797_v30 = vld [vmem:[#allocation8 + $0xf0] ss:$12 sps:$4 sm:$0xff]   ;;  %v11800_v9 = vld [vmem:[#allocation8 + $0xf8] ss:$12 sps:$4 sm:$0xff]  }
 0x42f   : > { %9461 = vrcp.f32 %v2206_v0  ;;  %15312 = vst [vmem:[#allocation54_spill] sm:$0xff] %v11797_v30  ;;  %15313 = vst [vmem:[#allocation56_spill] sm:$0xff] %v11800_v9  ;;  %v11803_v0 = vld [vmem:[#allocation8 + $0xdc] ss:$12 sps:$4 sm:$0xff]  }
 0x430   : > { %v11739_v60 = vpack.c.bf16 %v11735_v42, %v11732_v45  ;;  %9463 = vtanh.f32 %v11713_v2  ;;  %v11777_v2 = vld [vmem:[#allocation8 + $0x120] ss:$12 sps:$4 sm:$0xff]  }
 0x432   : > { %2409 = vmatmul.mubr.bf16.vlgmr.msra.gmra.mxu0 %v11739_v60  ;;  %8323 = vmatmul.mubr.bf16.vlgmr.msra.gmra.mxu1 %v11739_v60 }
 0x433   : > { %2462 = vmatpush1.bf16.msra.mxu0 %v11743_v57  ;;  %8327 = vmatpush3.bf16.msra.mxu1 %v11746_v41 }
 0x434   : > { %2463 = vmatprep.subr.bf16.mxu0 %v11749_v51  ;;  %8328 = vmatprep.subr.bf16.mxu1 %v15160_v54 }
 0x435   : > { %2493 = vmatprep.mubr.bf16.mxu0 %v15154_v52  ;;  %8342 = vmatprep.mubr.msk.bf16.mxu1 %vm10558_vm0, %v15160_v54 }
 0x437   : > { %2464 = vmatpush1.bf16.msra.mxu0 %v11756_v22  ;;  %8329 = vmatpush3.bf16.msra.mxu1 %v11759_v27 }
 0x438   : > { %2465 = vmatprep.subr.bf16.mxu0 %v11763_v8  ;;  %8330 = vmatprep.subr.bf16.mxu1 %v15160_v54 }
 0x43b   : > { %2466 = vmatpush1.bf16.msra.mxu0 %v11767_v10  ;;  %8331 = vmatpush3.bf16.msra.mxu1 %v11770_v6 }
 0x43c   : > { %2467 = vmatprep.subr.bf16.mxu0 %v11773_v18  ;;  %8332 = vmatprep.subr.bf16.mxu1 %v15160_v54  ;;  %v9462_v46 = vpop.eup %9461 }
 0x43d   : > { %v9464_v39 = vpop.eup %9463  ;;  %v2224_v49 = vsub.f32 1.0, %v9462_v46  ;;  %v2228_v34 = vmul.f32 %v9462_v46, %v11516_v1  ;;  %v11823_v46 = vld [vmem:[#allocation8 + $0xc8] ss:$12 sps:$4 sm:$0xff]   ;;  %v11828_v1 = vld [vmem:[#allocation8 + $0xac] ss:$12 sps:$4 sm:$0xff]  }
 0x43e   : > { %15315 = vst [vmem:[#allocation25_spill] sm:$0xff] %v11828_v1 }
 0x43f   : > { %2468 = vmatpush1.bf16.msra.mxu0 %v11777_v2  ;;  %8333 = vmatpush3.bf16.msra.mxu1 %v11780_v23  ;;  %v2226_v35 = vmul.f32 %v9464_v39, %v2224_v49  ;;  %v11820_v39 = vld [vmem:[#allocation8 + $0xc0] ss:$12 sps:$4 sm:$0xff]  }
 0x440   : > { %2469 = vmatprep.subr.bf16.mxu0 %v11783_v19  ;;  %8334 = vmatprep.subr.bf16.mxu1 %v15160_v54 }
 0x443   : > { %2470 = vmatpush1.bf16.msra.mxu0 %v11787_v32  ;;  %8335 = vmatpush3.bf16.msra.mxu1 %v11790_v36 }
 0x444   : > { %2471 = vmatprep.subr.bf16.mxu0 %v11793_v24  ;;  %8336 = vmatprep.subr.bf16.mxu1 %v15160_v54  ;;  %v11811_v24 = vld [vmem:[#allocation8 + $0xe0] ss:$12 sps:$4 sm:$0xff]  }
 0x447   : > { %2472 = vmatpush1.bf16.msra.mxu0 %v11797_v30  ;;  %8337 = vmatpush3.bf16.msra.mxu1 %v11800_v9  ;;  %v11814_v30 = vadd.f32 %v2228_v34, %v2226_v35  ;;  %v11816_v9 = vld [vmem:[#allocation8 + $0xc4] ss:$12 sps:$4 sm:$0xff]   ;;  %v11832_v34 = vld [vmem:[#allocation8 + $0xa8] ss:$12 sps:$4 sm:$0xff]  }
 0x448   : > { %2473 = vmatprep.subr.bf16.mxu0 %v11803_v0  ;;  %8338 = vmatprep.subr.bf16.mxu1 %v15160_v54  ;;  %v11836_v35 = vld [vmem:[#allocation8 + $0x94] ss:$12 sps:$4 sm:$0xff]  }
 0x449   : > { %15314 = vst [vmem:[#allocation23_spill] sm:$0xff] %v11814_v30  ;;  %v2460_v49 = vpack.c.bf16 %v11814_v30, %v11716_v44 }
 0x44b   : > { %2474 = vmatpush1.bf16.msra.mxu0 %v11808_v31  ;;  %8339 = vmatpush3.bf16.msra.mxu1 %v11811_v24 }
 0x44c   : > { %2475 = vmatprep.subr.bf16.mxu0 %v11816_v9  ;;  %8340 = vmatprep.subr.bf16.mxu1 %v15160_v54 }
 0x44f   : > { %2476 = vmatpush1.bf16.msra.mxu0 %v11820_v39  ;;  %8341 = vmatpush3.bf16.msra.mxu1 %v11823_v46 }
 0x450   : > { %2605 = vmatprep.subr.bf16.mxu0 %v11828_v1  ;;  %8346 = vmatprep.subr.bf16.mxu1 %v15160_v54  ;;  %v11843_v1 = vld [vmem:[#allocation8 + $0x90] ss:$12 sps:$4 sm:$0xff]  }
 0x452   : > { %2494 = vmatmul.mubr.bf16.vlgmr.msra.gmra.mxu0 %v2460_v49  ;;  %8343 = vmatmul.mubr.bf16.vlgmr.msra.gmra.mxu1 %v2460_v49  ;;  %v11847_v49 = vld [vmem:[#allocation8 + $0x7c] ss:$12 sps:$4 sm:$0xff]  }
 0x453   : > { %2606 = vmatpush1.bf16.msra.mxu0 %v11832_v34  ;;  %8347 = vmatpush3.bf16.msra.mxu1 %v11527_v56  ;;  %15316 = vst [vmem:[#allocation144_spill] sm:$0xff] %v11847_v49 }
 0x454   : > { %2607 = vmatprep.subr.bf16.mxu0 %v11836_v35  ;;  %8348 = vmatprep.subr.bf16.mxu1 %v15160_v54 }
 0x455   : > { %2637 = vmatprep.mubr.bf16.mxu0 %v15154_v52  ;;  %8362 = vmatprep.mubr.msk.bf16.mxu1 %vm10558_vm0, %v15160_v54 }
 0x457   : > { %2608 = vmatpush1.bf16.msra.mxu0 %v11843_v1  ;;  %8349 = vmatpush3.bf16.msra.mxu1 %v11536_v26 }
 0x458   : > { %2609 = vmatprep.subr.bf16.mxu0 %v11847_v49  ;;  %8350 = vmatprep.subr.bf16.mxu1 %v15160_v54 }
 0x45b   : > { %2610 = vmatpush1.bf16.msra.mxu0 %v11541_v43  ;;  %8351 = vmatpush3.bf16.msra.mxu1 %v11544_v53 }
 0x45c   : > { %2611 = vmatprep.subr.bf16.mxu0 %v11547_v25  ;;  %8352 = vmatprep.subr.bf16.mxu1 %v15160_v54 }
 0x45f   : > { %2612 = vmatpush1.bf16.msra.mxu0 %v11551_v55  ;;  %8353 = vmatpush3.bf16.msra.mxu1 %v11554_v63 }
 0x460   : > { %2613 = vmatprep.subr.bf16.mxu0 %v11557_v20  ;;  %8354 = vmatprep.subr.bf16.mxu1 %v15160_v54 }
 0x463   : > { %2614 = vmatpush1.bf16.msra.mxu0 %v11561_v17  ;;  %8355 = vmatpush3.bf16.msra.mxu1 %v11564_v4 }
 0x464   : > { %2615 = vmatprep.subr.bf16.mxu0 %v11567_v5  ;;  %8356 = vmatprep.subr.bf16.mxu1 %v15160_v54 }
 0x467   : > { %2616 = vmatpush1.bf16.msra.mxu0 %v11571_v47  ;;  %8357 = vmatpush3.bf16.msra.mxu1 %v11574_v12 }
 0x468   : > { %2617 = vmatprep.subr.bf16.mxu0 %v11577_v3  ;;  %8358 = vmatprep.subr.bf16.mxu1 %v15160_v54 }
 0x46b   : > { %2618 = vmatpush1.bf16.msra.mxu0 %v11581_v14  ;;  %8359 = vmatpush3.bf16.msra.mxu1 %v11584_v33 }
 0x46c   : > { %2619 = vmatprep.subr.bf16.mxu0 %v11587_v37  ;;  %8360 = vmatprep.subr.bf16.mxu1 %v15160_v54 }
 0x46f   : > { %2620 = vmatpush1.bf16.msra.mxu0 %v11591_v40  ;;  %8361 = vmatpush3.bf16.msra.mxu1 %v11594_v62 }
 0x470   : > { %2734 = vmatprep.subr.bf16.mxu0 %v11597_v38  ;;  %8366 = vmatprep.subr.bf16.mxu1 %v15160_v54 }
 0x472   : > { %2638 = vmatmul.mubr.bf16.vlgmr.msra.gmra.mxu0 %v11739_v60  ;;  %8363 = vmatmul.mubr.bf16.vlgmr.msra.gmra.mxu1 %v11739_v60  ;;  %v15317_v60 = vld [vmem:[#allocation128_spill] sm:$0xff] }
 0x473   : > { %2735 = vmatpush1.bf16.msra.mxu0 %v11603_v58  ;;  %8367 = vmatpush3.bf16.msra.mxu1 %v11606_v15  ;;  %v15319_v15 = vld [vmem:[#allocation130_spill] sm:$0xff]  ;;  %v15320_v58 = vld [vmem:[#allocation131_spill] sm:$0xff] }
 0x474   : > { %2736 = vmatprep.subr.bf16.mxu0 %v11609_v61  ;;  %8368 = vmatprep.subr.bf16.mxu1 %v15160_v54  ;;  %v15318_v61 = vld [vmem:[#allocation129_spill] sm:$0xff] }
 0x475   : > { %2766 = vmatprep.mubr.bf16.mxu0 %v15154_v52  ;;  %8382 = vmatprep.mubr.msk.bf16.mxu1 %vm10558_vm0, %v15160_v54 }
 0x477   : > { %2737 = vmatpush1.bf16.msra.mxu0 %v11616_v13  ;;  %8369 = vmatpush3.bf16.msra.mxu1 %v11619_v48  ;;  %v15321_v48 = vld [vmem:[#allocation132_spill] sm:$0xff]  ;;  %v15323_v13 = vld [vmem:[#allocation134_spill] sm:$0xff] }
 0x478   : > { %2738 = vmatprep.subr.bf16.mxu0 %v11622_v50  ;;  %8370 = vmatprep.subr.bf16.mxu1 %v15160_v54  ;;  %v15322_v50 = vld [vmem:[#allocation133_spill] sm:$0xff] }
 0x47b   : > { %2739 = vmatpush1.bf16.msra.mxu0 %v11626_v59  ;;  %8371 = vmatpush3.bf16.msra.mxu1 %v11629_v11  ;;  %v15324_v11 = vld [vmem:[#allocation135_spill] sm:$0xff]  ;;  %v15326_v59 = vld [vmem:[#allocation137_spill] sm:$0xff] }
 0x47c   : > { %2740 = vmatprep.subr.bf16.mxu0 %v15317_v60  ;;  %8372 = vmatprep.subr.bf16.mxu1 %v15160_v54  ;;  %v15325_v60 = vld [vmem:[#allocation136_spill] sm:$0xff] }
 0x47f   : > { %2741 = vmatpush1.bf16.msra.mxu0 %v15318_v61  ;;  %8373 = vmatpush3.bf16.msra.mxu1 %v15319_v15  ;;  %v15327_v15 = vld [vmem:[#allocation138_spill] sm:$0xff]  ;;  %v15329_v61 = vld [vmem:[#allocation140_spill] sm:$0xff] }
 0x480   : > { %2742 = vmatprep.subr.bf16.mxu0 %v15320_v58  ;;  %8374 = vmatprep.subr.bf16.mxu1 %v15160_v54  ;;  %v15328_v58 = vld [vmem:[#allocation139_spill] sm:$0xff] }
 0x483   : > { %2743 = vmatpush1.bf16.msra.mxu0 %v15321_v48  ;;  %8375 = vmatpush3.bf16.msra.mxu1 %v15322_v50  ;;  %v15330_v50 = vld [vmem:[#allocation141_spill] sm:$0xff]  ;;  %v15332_v48 = vld [vmem:[#allocation143_spill] sm:$0xff] }
 0x484   : > { %2744 = vmatprep.subr.bf16.mxu0 %v15323_v13  ;;  %8376 = vmatprep.subr.bf16.mxu1 %v15160_v54  ;;  %v15331_v13 = vld [vmem:[#allocation142_spill] sm:$0xff] }
 0x487   : > { %2745 = vmatpush1.bf16.msra.mxu0 %v15324_v11  ;;  %8377 = vmatpush3.bf16.msra.mxu1 %v15325_v60 }
 0x488   : > { %2746 = vmatprep.subr.bf16.mxu0 %v15326_v59  ;;  %8378 = vmatprep.subr.bf16.mxu1 %v15160_v54 }
 0x48b   : > { %2747 = vmatpush1.bf16.msra.mxu0 %v15327_v15  ;;  %8379 = vmatpush3.bf16.msra.mxu1 %v15328_v58 }
 0x48c   : > { %2748 = vmatprep.subr.bf16.mxu0 %v15329_v61  ;;  %8380 = vmatprep.subr.bf16.mxu1 %v15160_v54  ;;  %v15333_v61 = vld [vmem:[#allocation17_spill] sm:$0xff] }
 0x48f   : > { %2749 = vmatpush1.bf16.msra.mxu0 %v15330_v50  ;;  %8381 = vmatpush3.bf16.msra.mxu1 %v15331_v13 }
 0x490   : > { %2819 = vmatprep.subr.bf16.mxu0 %v15332_v48  ;;  %8386 = vmatprep.subr.bf16.mxu1 %v15160_v54 }
 0x4f2   : > { %v2453_v60 = vpop.f32.mrf.mxu1  ;;  %v2410_v15 = vpop.f32.mrf.mxu0 }
 0x4f3   : > { %v2411_v37 = vadd.f32 %v2410_v15, %v15333_v61  ;;  %v2454_v55 = vadd.f32 %v2453_v60, %v11443_v7 }
 0x4f4   : > { %v8324_v59 = vpop.f32.mrf.mxu1  ;;  %v2412_v62 = vpop.f32.mrf.mxu0 }
 0x4f5   : > { %v2413_v5 = vadd.f32 %v2412_v62, %v11428_v29  ;;  %v15335_v62 = vld [vmem:[#allocation59_spill] sm:$0xff] }
 0x4f6   : > { %v11912_v11 = vpop.f32.mrf.mxu1  ;;  %v2414_v58 = vpop.f32.mrf.mxu0 }
 0x4f7   : > { %v2415_v48 = vadd.f32 %v2414_v58, %v15333_v61  ;;  %v15334_v61 = vld [vmem:[#allocation47_spill] sm:$0xff] }
 0x4f8   : > { %v8325_v38 = vpop.f32.mrf.mxu1  ;;  %v11914_v40 = vpop.f32.mrf.mxu0 }
 0x512   : > { %v2495_v33 = vpop.f32.mrf.mxu0  ;;  %v2538_v50 = vpop.f32.mrf.mxu1 }
 0x513   : > { %v2545_v14 = vadd.f32 %v2495_v33, %v2411_v37 }
 0x514   : > { %v2497_v13 = vpop.f32.mrf.mxu0  ;;  %v8344_v3 = vpop.f32.mrf.mxu1 }
 0x515   : > { %v7547_v12 = vmul.f32 -1.442695, %v2545_v14  ;;  %v2546_v17 = vadd.f32 %v2497_v13, %v2413_v5  ;;  %v2948_v13 = vstv %s2947_s29 }
 0x516   : > { %v2499_v47 = vpop.f32.mrf.mxu0  ;;  %v2541_v59 = vpop.f32.mrf.mxu1 }
 0x517   : > { %9465 = vpow2.f32 %v7547_v12  ;;  %v2547_v38 = vadd.f32 %v2499_v47, %v2415_v48  ;;  %v7548_v15 = vmul.f32 -1.442695, %v2546_v17  ;;  %v715_v12 = vadd.f32 %v15335_v62, %v15334_v61  ;;  %v15336_v48 = vld [vmem:[#allocation51_spill] sm:$0xff] }
 0x518   : > { %v8345_v4 = vpop.f32.mrf.mxu1  ;;  %v11919_v58 = vpop.f32.mrf.mxu0  ;;  %vm2949_vm7 = vcmp.eq.s32.totalorder %v15336_v48, %v2948_v13 }
 0x519   : > { %v7549_v20 = vmul.f32 -1.442695, %v2547_v38  ;;  %v2951_v62 = vsel %vm2949_vm7, 1, %v15154_v52 }
 0x51a   : > { %2954 = vperm.xlu0 %9219, %v2951_v62  }
 0x51b   : > { %9467 = vpow2.f32 %v7549_v20  ;;  %v2573_v20 = vadd.f32 %v11435_v21, %v2538_v50  ;;  %v15339_v50 = vld [vmem:[#allocation63_spill] sm:$0xff] }
 0x51c   : > { %9469 = vpow2.f32 %v7548_v15  ;;  %v15338_v15 = vld [vmem:[#allocation67_spill] sm:$0xff] }
 0x524   : > { %v9466_v63 = vpop.eup %9465 }
 0x525   : > { %v2561_v33 = vadd.f32 1.0, %v9466_v63  ;;  %v15337_v63 = vld [vmem:[#allocation52_spill] sm:$0xff] }
 0x526   : > { %vm2950_vm8 = vcmp.eq.s32.totalorder %v15337_v63, %v2948_v13 }
 0x527   : > { %9471 = vrcp.f32 %v2561_v33  ;;  %v719_v33 = vadd.f32 %v15338_v15, %v15334_v61  ;;  %v11937_v15 = vld [vmem:[%s14731_s5 + $0x1] ss:$0 sm:$0xff] }
 0x528   : > { %v9468_v3 = vpop.eup %9467 }
 0x529   : > { %v2563_v37 = vadd.f32 1.0, %v9468_v3  ;;  %v9470_v14 = vpop.eup %9469 }
 0x52a   : > { %v2562_v47 = vadd.f32 1.0, %v9470_v14  ;;  %v2952_v14 = vsel %vm2950_vm8, 1, %v15154_v52 }
 0x52b   : > { %9473 = vrcp.f32 %v2563_v37  ;;  %2957 = vperm.xlu1 %9220, %v2952_v14  }
 0x52c   : > { %9475 = vrcp.f32 %v2562_v47  ;;  %v2457_v47 = vadd.f32 %v11912_v11, %v11443_v7 }
 0x532   : > { %v2639_v4 = vpop.f32.mrf.mxu0  ;;  %v2682_v5 = vpop.f32.mrf.mxu1 }
 0x533   : > { %v2689_v17 = vadd.f32 %v2639_v4, %v715_v12  ;;  %v717_v12 = vadd.f32 %v15339_v50, %v11095_v28 }
 0x534   : > { %v9472_v38 = vpop.eup %9471  ;;  %v2641_v3 = vpop.f32.mrf.mxu0 }
 0x535   : > { %v8364_v37 = vpop.f32.mrf.mxu1  ;;  %v2575_v25 = vmul.f32 %v9472_v38, %v2573_v20  ;;  %v7551_v21 = vmul.f32 -1.442695, %v2689_v17  ;;  %v2690_v62 = vadd.f32 %v2641_v3, %v717_v12 }
 0x536   : > { %v2643_v4 = vpop.f32.mrf.mxu0  ;;  %v2574_v37 = vadd.f32 %v11937_v15, %v2541_v59 }
 0x537   : > { %v2685_v13 = vpop.f32.mrf.mxu1  ;;  %v2577_v63 = vadd.f32 %v2575_v25, %v2454_v55  ;;  %9477 = vpow2.f32 %v7551_v21  ;;  %v2691_v60 = vadd.f32 %v2643_v4, %v719_v33  ;;  %v15340_v25 = vld [vmem:[#allocation71_spill] sm:$0xff]  ;;  %v7552_v59 = vmul.f32 -1.442695, %v2690_v62 }
 0x538   : > { %v9474_v20 = vpop.eup %9473  ;;  %v2645_v50 = vpop.f32.mrf.mxu0  ;;  %v721_v55 = vadd.f32 %v15340_v25, %v11095_v28 }
 0x539   : > { %v8365_v17 = vpop.f32.mrf.mxu1  ;;  %9479 = vtanh.f32 %v2577_v63  ;;  %v2576_v38 = vmul.f32 %v9474_v20, %v2574_v37  ;;  %v7553_v14 = vmul.f32 -1.442695, %v2691_v60  ;;  %v9476_v33 = vpop.eup %9475 }
 0x53a   : > { %v2692_v61 = vadd.f32 %v2645_v50, %v721_v55  ;;  %v2581_v17 = vsub.f32 1.0, %v9476_v33  ;;  %v2585_v12 = vmul.f32 %v9476_v33, %v11716_v44  ;;  %v2417_v55 = vadd.f32 %v11914_v40, %v11428_v29 }
 0x53b   : > { %v11944_v48 = vadd.f32 %v2576_v38, %v2457_v47  ;;  %9481 = vpow2.f32 %v7553_v14  ;;  %v2718_v33 = vadd.f32 %v11721_v16, %v2685_v13 }
 0x53c   : > { %v7554_v21 = vmul.f32 -1.442695, %v2692_v61  ;;  %9483 = vpow2.f32 %v7552_v59  ;;  %v2717_v61 = vadd.f32 %v11721_v16, %v2682_v5  ;;  %v15342_v59 = vld [vmem:[#allocation22_spill] sm:$0xff] }
 0x53e   : > { %9485 = vpow2.f32 %v7554_v21 }
 0x544   : > { %v9478_v4 = vpop.eup %9477 }
 0x545   : > { %v2705_v11 = vadd.f32 1.0, %v9478_v4 }
 0x546   : > { %v9480_v63 = vpop.eup %9479 }
 0x547   : > { %9487 = vrcp.f32 %v2705_v11  ;;  %v2583_v3 = vmul.f32 %v9480_v63, %v2581_v17  ;;  %v2548_v11 = vadd.f32 %v11919_v58, %v2417_v55  ;;  %v15343_v63 = vld [vmem:[#allocation24_spill] sm:$0xff] }
 0x548   : > { %v9482_v37 = vpop.eup %9481 }
 0x549   : > { %v2707_v60 = vadd.f32 1.0, %v9482_v37  ;;  %v11947_v20 = vadd.f32 %v2585_v12, %v2583_v3  ;;  %v9484_v47 = vpop.eup %9483  ;;  %v7550_v5 = vmul.f32 -1.442695, %v2548_v11 }
 0x54a   : > { %v2706_v62 = vadd.f32 1.0, %v9484_v47 }
 0x54b   : > { %15341 = vst [vmem:[#allocation59_spill] sm:$0xff] %v11947_v20  ;;  %9489 = vrcp.f32 %v2707_v60  ;;  %v9486_v38 = vpop.eup %9485 }
 0x54c   : > { %v2708_v50 = vadd.f32 1.0, %v9486_v38  ;;  %9491 = vrcp.f32 %v2706_v62 }
 0x54e   : > { %9493 = vrcp.f32 %v2708_v50 }
 0x554   : > { %v9488_v14 = vpop.eup %9487 }
 0x555   : > { %v2719_v25 = vmul.f32 %v9488_v14, %v2717_v61 }
 0x557   : > { %v2721_v21 = vadd.f32 %v2719_v25, %v15342_v59 }
 0x558   : > { %v9490_v4 = vpop.eup %9489 }
 0x559   : > { %9495 = vtanh.f32 %v2721_v21  ;;  %v2720_v17 = vmul.f32 %v9490_v4, %v2718_v33  ;;  %v9492_v12 = vpop.eup %9491  ;;  %v15345_v33 = vld [vmem:[#allocation54_spill] sm:$0xff]  ;;  %v15346_v4 = vld [vmem:[#allocation56_spill] sm:$0xff] }
 0x55a   : > { %v2725_v60 = vsub.f32 1.0, %v9492_v12  ;;  %v2729_v38 = vmul.f32 %v9492_v12, %v11732_v45  ;;  %v15350_v12 = vld [vmem:[#allocation57_spill] sm:$0xff] }
 0x55b   : > { %v2722_v3 = vadd.f32 %v2720_v17, %v15343_v63  ;;  %v9494_v37 = vpop.eup %9493 }
 0x55c   : > { %v2726_v62 = vsub.f32 1.0, %v9494_v37  ;;  %v2730_v58 = vmul.f32 %v9494_v37, %v11735_v42  ;;  %v15344_v42 = vld [vmem:[#allocation55_spill] sm:$0xff]  ;;  %v15351_v37 = vld [vmem:[#allocation58_spill] sm:$0xff] }
 0x55d   : > { %9497 = vtanh.f32 %v2722_v3 }
 0x55e   : > { %9499 = vpow2.f32 %v7550_v5  ;;  %v15348_v5 = vld [vmem:[#allocation25_spill] sm:$0xff] }
 0x566   : > { %v9496_v47 = vpop.eup %9495 }
 0x567   : > { %v2727_v40 = vmul.f32 %v9496_v47, %v2725_v60  ;;  %v15352_v60 = vld [vmem:[#allocation60_spill] sm:$0xff]  ;;  %v15354_v47 = vld [vmem:[#allocation62_spill] sm:$0xff] }
 0x569   : > { %v11957_v13 = vadd.f32 %v2729_v38, %v2727_v40  ;;  %v15355_v40 = vld [vmem:[#allocation64_spill] sm:$0xff] }
 0x56a   : > { %v9498_v61 = vpop.eup %9497  ;;  %v15358_v38 = vld [vmem:[#allocation68_spill] sm:$0xff] }
 0x56b   : > { %v2728_v14 = vmul.f32 %v9498_v61, %v2726_v62  ;;  %v9500_v25 = vpop.eup %9499  ;;  %v15359_v62 = vld [vmem:[#allocation69_spill] sm:$0xff]  ;;  %v15360_v61 = vld [vmem:[#allocation70_spill] sm:$0xff] }
 0x56c   : > { %v2564_v59 = vadd.f32 1.0, %v9500_v25  ;;  %v15363_v25 = vld [vmem:[#allocation74_spill] sm:$0xff] }
 0x56d   : > { %v11960_v50 = vadd.f32 %v2730_v58, %v2728_v14  ;;  %v15361_v14 = vld [vmem:[#allocation72_spill] sm:$0xff]  ;;  %v15362_v58 = vld [vmem:[#allocation73_spill] sm:$0xff] }
 0x56e   : > { %9501 = vrcp.f32 %v2564_v59  ;;  %v15364_v59 = vld [vmem:[#allocation76_spill] sm:$0xff] }
 0x56f   : > { %v11964_v55 = vpack.c.bf16 %v11960_v50, %v11957_v13  ;;  %9503 = vtanh.f32 %v11944_v48 }
 0x571   : > { %2767 = vmatmul.mubr.bf16.vlgmr.msra.gmra.mxu0 %v11964_v55  ;;  %8383 = vmatmul.mubr.bf16.vlgmr.msra.gmra.mxu1 %v11964_v55 }
 0x572   : > { %2820 = vmatpush1.bf16.msra.mxu0 %v11743_v57  ;;  %8387 = vmatpush3.bf16.msra.mxu1 %v11746_v41 }
 0x573   : > { %2821 = vmatprep.subr.bf16.mxu0 %v11749_v51  ;;  %8388 = vmatprep.subr.bf16.mxu1 %v15160_v54 }
 0x574   : > { %2851 = vmatprep.mubr.bf16.mxu0 %v15154_v52  ;;  %8402 = vmatprep.mubr.msk.bf16.mxu1 %vm10558_vm0, %v15160_v54 }
 0x576   : > { %2822 = vmatpush1.bf16.msra.mxu0 %v11756_v22  ;;  %8389 = vmatpush3.bf16.msra.mxu1 %v11759_v27 }
 0x577   : > { %2823 = vmatprep.subr.bf16.mxu0 %v11763_v8  ;;  %8390 = vmatprep.subr.bf16.mxu1 %v15160_v54 }
 0x57a   : > { %2824 = vmatpush1.bf16.msra.mxu0 %v11767_v10  ;;  %8391 = vmatpush3.bf16.msra.mxu1 %v11770_v6 }
 0x57b   : > { %2825 = vmatprep.subr.bf16.mxu0 %v11773_v18  ;;  %8392 = vmatprep.subr.bf16.mxu1 %v15160_v54  ;;  %v9502_v45 = vpop.eup %9501 }
 0x57c   : > { %v9504_v48 = vpop.eup %9503  ;;  %v2582_v21 = vsub.f32 1.0, %v9502_v45  ;;  %v2586_v17 = vmul.f32 %v9502_v45, %v11814_v30  ;;  %v15365_v45 = vld [vmem:[#allocation77_spill] sm:$0xff]  ;;  %v15390_v30 = vld [vmem:[#allocation47_spill] sm:$0xff] }
 0x57e   : > { %2826 = vmatpush1.bf16.msra.mxu0 %v11777_v2  ;;  %8393 = vmatpush3.bf16.msra.mxu1 %v11780_v23  ;;  %v2584_v11 = vmul.f32 %v9504_v48, %v2582_v21  ;;  %v15366_v48 = vld [vmem:[#allocation81_spill] sm:$0xff]  ;;  %v15367_v21 = vld [vmem:[#allocation122_spill] sm:$0xff] }
 0x57f   : > { %2827 = vmatprep.subr.bf16.mxu0 %v11783_v19  ;;  %8394 = vmatprep.subr.bf16.mxu1 %v15160_v54 }
 0x580   : > { %v11999_v63 = vadd.f32 %v2586_v17, %v2584_v11  ;;  %v15368_v11 = vld [vmem:[#allocation123_spill] sm:$0xff]  ;;  %v15369_v17 = vld [vmem:[#allocation124_spill] sm:$0xff] }
 0x582   : > { %2828 = vmatpush1.bf16.msra.mxu0 %v11787_v32  ;;  %8395 = vmatpush3.bf16.msra.mxu1 %v11790_v36  ;;  %15347 = vst [vmem:[#allocation67_spill] sm:$0xff] %v11999_v63  ;;  %v2818_v3 = vpack.c.bf16 %v11999_v63, %v11947_v20 }
 0x583   : > { %2829 = vmatprep.subr.bf16.mxu0 %v15344_v42  ;;  %8396 = vmatprep.subr.bf16.mxu1 %v15160_v54 }
 0x586   : > { %2830 = vmatpush1.bf16.msra.mxu0 %v15345_v33  ;;  %8397 = vmatpush3.bf16.msra.mxu1 %v15346_v4 }
 0x587   : > { %2831 = vmatprep.subr.bf16.mxu0 %v11803_v0  ;;  %8398 = vmatprep.subr.bf16.mxu1 %v15160_v54 }
 0x58a   : > { %2832 = vmatpush1.bf16.msra.mxu0 %v11808_v31  ;;  %8399 = vmatpush3.bf16.msra.mxu1 %v11811_v24 }
 0x58b   : > { %2833 = vmatprep.subr.bf16.mxu0 %v11816_v9  ;;  %8400 = vmatprep.subr.bf16.mxu1 %v15160_v54 }
 0x58e   : > { %2834 = vmatpush1.bf16.msra.mxu0 %v11820_v39  ;;  %8401 = vmatpush3.bf16.msra.mxu1 %v11823_v46 }
 0x58f   : > { %2963 = vmatprep.subr.bf16.mxu0 %v15348_v5  ;;  %8406 = vmatprep.subr.bf16.mxu1 %v15160_v54 }
 0x591   : > { %2852 = vmatmul.mubr.bf16.vlgmr.msra.gmra.mxu0 %v2818_v3  ;;  %8403 = vmatmul.mubr.bf16.vlgmr.msra.gmra.mxu1 %v2818_v3  ;;  %v15370_v3 = vld [vmem:[#allocation125_spill] sm:$0xff] }
 0x592   : > { %2964 = vmatpush1.bf16.msra.mxu0 %v11832_v34  ;;  %8407 = vmatpush3.bf16.msra.mxu1 %v11527_v56  ;;  %v15349_v56 = vld [vmem:[#allocation21_spill] sm:$0xff] }
 0x593   : > { %2965 = vmatprep.subr.bf16.mxu0 %v11836_v35  ;;  %8408 = vmatprep.subr.bf16.mxu1 %v15160_v54 }
 0x594   : > { %2995 = vmatprep.mubr.bf16.mxu0 %v15154_v52  ;;  %8422 = vmatprep.mubr.msk.bf16.mxu1 %vm10558_vm0, %v15160_v54 }
 0x596   : > { %2966 = vmatpush1.bf16.msra.mxu0 %v11843_v1  ;;  %8409 = vmatpush3.bf16.msra.mxu1 %v11536_v26  ;;  %v15353_v26 = vld [vmem:[#allocation61_spill] sm:$0xff] }
 0x597   : > { %2967 = vmatprep.subr.bf16.mxu0 %v11847_v49  ;;  %8410 = vmatprep.subr.bf16.mxu1 %v15160_v54 }
 0x59a   : > { %2968 = vmatpush1.bf16.msra.mxu0 %v11541_v43  ;;  %8411 = vmatpush3.bf16.msra.mxu1 %v11544_v53  ;;  %v15356_v43 = vld [vmem:[#allocation65_spill] sm:$0xff]  ;;  %v15357_v53 = vld [vmem:[#allocation66_spill] sm:$0xff] }
 0x59b   : > { %2969 = vmatprep.subr.bf16.mxu0 %v15349_v56  ;;  %8412 = vmatprep.subr.bf16.mxu1 %v15160_v54  ;;  %v15372_v56 = vld [vmem:[#allocation127_spill] sm:$0xff] }
 0x59e   : > { %2970 = vmatpush1.bf16.msra.mxu0 %v15350_v12  ;;  %8413 = vmatpush3.bf16.msra.mxu1 %v15351_v37  ;;  %v15373_v12 = vld [vmem:[#allocation128_spill] sm:$0xff]  ;;  %v15374_v37 = vld [vmem:[#allocation129_spill] sm:$0xff] }
 0x59f   : > { %2971 = vmatprep.subr.bf16.mxu0 %v15352_v60  ;;  %8414 = vmatprep.subr.bf16.mxu1 %v15160_v54  ;;  %v15375_v60 = vld [vmem:[#allocation130_spill] sm:$0xff] }
 0x5a2   : > { %2972 = vmatpush1.bf16.msra.mxu0 %v15353_v26  ;;  %8415 = vmatpush3.bf16.msra.mxu1 %v15354_v47  ;;  %v15376_v26 = vld [vmem:[#allocation131_spill] sm:$0xff]  ;;  %v15377_v47 = vld [vmem:[#allocation132_spill] sm:$0xff] }
 0x5a3   : > { %2973 = vmatprep.subr.bf16.mxu0 %v15355_v40  ;;  %8416 = vmatprep.subr.bf16.mxu1 %v15160_v54  ;;  %v15378_v40 = vld [vmem:[#allocation133_spill] sm:$0xff] }
 0x5a6   : > { %2974 = vmatpush1.bf16.msra.mxu0 %v15356_v43  ;;  %8417 = vmatpush3.bf16.msra.mxu1 %v15357_v53  ;;  %v15379_v43 = vld [vmem:[#allocation134_spill] sm:$0xff]  ;;  %v15380_v53 = vld [vmem:[#allocation135_spill] sm:$0xff] }
 0x5a7   : > { %2975 = vmatprep.subr.bf16.mxu0 %v15358_v38  ;;  %8418 = vmatprep.subr.bf16.mxu1 %v15160_v54  ;;  %v15381_v38 = vld [vmem:[#allocation136_spill] sm:$0xff] }
 0x5aa   : > { %2976 = vmatpush1.bf16.msra.mxu0 %v15359_v62  ;;  %8419 = vmatpush3.bf16.msra.mxu1 %v15360_v61  ;;  %v15382_v62 = vld [vmem:[#allocation137_spill] sm:$0xff]  ;;  %v15383_v61 = vld [vmem:[#allocation138_spill] sm:$0xff] }
 0x5ab   : > { %2977 = vmatprep.subr.bf16.mxu0 %v15361_v14  ;;  %8420 = vmatprep.subr.bf16.mxu1 %v15160_v54  ;;  %v15384_v14 = vld [vmem:[#allocation139_spill] sm:$0xff] }
 0x5ae   : > { %2978 = vmatpush1.bf16.msra.mxu0 %v15362_v58  ;;  %8421 = vmatpush3.bf16.msra.mxu1 %v15363_v25  ;;  %v15385_v58 = vld [vmem:[#allocation140_spill] sm:$0xff]  ;;  %v15386_v25 = vld [vmem:[#allocation141_spill] sm:$0xff] }
 0x5af   : > { %3092 = vmatprep.subr.bf16.mxu0 %v15364_v59  ;;  %8426 = vmatprep.subr.bf16.mxu1 %v15160_v54  ;;  %v15387_v59 = vld [vmem:[#allocation142_spill] sm:$0xff] }
 0x5b1   : > { %2996 = vmatmul.mubr.bf16.vlgmr.msra.gmra.mxu0 %v11964_v55  ;;  %8423 = vmatmul.mubr.bf16.vlgmr.msra.gmra.mxu1 %v11964_v55  ;;  %v15371_v55 = vld [vmem:[#allocation126_spill] sm:$0xff] }
 0x5b2   : > { %3093 = vmatpush1.bf16.msra.mxu0 %v15365_v45  ;;  %8427 = vmatpush3.bf16.msra.mxu1 %v15366_v48  ;;  %v15388_v45 = vld [vmem:[#allocation143_spill] sm:$0xff] }
 0x5b3   : > { %3094 = vmatprep.subr.bf16.mxu0 %v15367_v21  ;;  %8428 = vmatprep.subr.bf16.mxu1 %v15160_v54 }
 0x5b4   : > { %3124 = vmatprep.mubr.bf16.mxu0 %v15154_v52  ;;  %8442 = vmatprep.mubr.msk.bf16.mxu1 %vm10558_vm0, %v15160_v54 }
 0x5b6   : > { %3095 = vmatpush1.bf16.msra.mxu0 %v15368_v11  ;;  %8429 = vmatpush3.bf16.msra.mxu1 %v15369_v17 }
 0x5b7   : > { %3096 = vmatprep.subr.bf16.mxu0 %v15370_v3  ;;  %8430 = vmatprep.subr.bf16.mxu1 %v15160_v54 }
 0x5ba   : > { %3097 = vmatpush1.bf16.msra.mxu0 %v15371_v55  ;;  %8431 = vmatpush3.bf16.msra.mxu1 %v15372_v56 }
 0x5bb   : > { %3098 = vmatprep.subr.bf16.mxu0 %v15373_v12  ;;  %8432 = vmatprep.subr.bf16.mxu1 %v15160_v54 }
 0x5be   : > { %3099 = vmatpush1.bf16.msra.mxu0 %v15374_v37  ;;  %8433 = vmatpush3.bf16.msra.mxu1 %v15375_v60  ;;  %v15389_v37 = vld [vmem:[#allocation17_spill] sm:$0xff] }
 0x5bf   : > { %3100 = vmatprep.subr.bf16.mxu0 %v15376_v26  ;;  %8434 = vmatprep.subr.bf16.mxu1 %v15160_v54 }
 0x5c2   : > { %3101 = vmatpush1.bf16.msra.mxu0 %v15377_v47  ;;  %8435 = vmatpush3.bf16.msra.mxu1 %v15378_v40 }
 0x5c3   : > { %3102 = vmatprep.subr.bf16.mxu0 %v15379_v43  ;;  %8436 = vmatprep.subr.bf16.mxu1 %v15160_v54 }
 0x5c6   : > { %3103 = vmatpush1.bf16.msra.mxu0 %v15380_v53  ;;  %8437 = vmatpush3.bf16.msra.mxu1 %v15381_v38 }
 0x5c7   : > { %3104 = vmatprep.subr.bf16.mxu0 %v15382_v62  ;;  %8438 = vmatprep.subr.bf16.mxu1 %v15160_v54 }
 0x5ca   : > { %3105 = vmatpush1.bf16.msra.mxu0 %v15383_v61  ;;  %8439 = vmatpush3.bf16.msra.mxu1 %v15384_v14 }
 0x5cb   : > { %3106 = vmatprep.subr.bf16.mxu0 %v15385_v58  ;;  %8440 = vmatprep.subr.bf16.mxu1 %v15160_v54 }
 0x5ce   : > { %3107 = vmatpush1.bf16.msra.mxu0 %v15386_v25  ;;  %8441 = vmatpush3.bf16.msra.mxu1 %v15387_v59 }
 0x5cf   : > { %3177 = vmatprep.subr.bf16.mxu0 %v15388_v45  ;;  %8446 = vmatprep.subr.bf16.mxu1 %v15160_v54 }
 0x631   : > { %v2811_v48 = vpop.f32.mrf.mxu1  ;;  %v2768_v3 = vpop.f32.mrf.mxu0 }
 0x632   : > { %v2769_v60 = vadd.f32 %v2768_v3, %v15389_v37  ;;  %v2812_v44 = vadd.f32 %v2811_v48, %v11443_v7 }
 0x633   : > { %v8384_v21 = vpop.f32.mrf.mxu1  ;;  %v2770_v55 = vpop.f32.mrf.mxu0 }
 0x634   : > { %v2771_v58 = vadd.f32 %v2770_v55, %v11428_v29  ;;  %v15391_v55 = vld [vmem:[#allocation75_spill] sm:$0xff] }
 0x635   : > { %v12081_v11 = vpop.f32.mrf.mxu1  ;;  %v2772_v56 = vpop.f32.mrf.mxu0 }
 0x636   : > { %v2773_v38 = vadd.f32 %v2772_v56, %v15389_v37  ;;  %v2815_v49 = vadd.f32 %v12081_v11, %v11443_v7 }
 0x637   : > { %v8385_v17 = vpop.f32.mrf.mxu1  ;;  %v12083_v12 = vpop.f32.mrf.mxu0 }
 0x651   : > { %v2853_v26 = vpop.f32.mrf.mxu0  ;;  %v2896_v47 = vpop.f32.mrf.mxu1 }
 0x652   : > { %v2903_v40 = vadd.f32 %v2853_v26, %v2769_v60 }
 0x653   : > { %v2855_v43 = vpop.f32.mrf.mxu0  ;;  %v8404_v53 = vpop.f32.mrf.mxu1 }
 0x654   : > { %v7555_v62 = vmul.f32 -1.442695, %v2903_v40  ;;  %v2904_v45 = vadd.f32 %v2855_v43, %v2771_v58  ;;  %v3306_v58 = vstv %s3305_s17  ;;  %s5811_s17 = sadd.s32 11, %s11080_s16 }
 0x655   : > { %v2857_v61 = vpop.f32.mrf.mxu0  ;;  %v2899_v14 = vpop.f32.mrf.mxu1 }
 0x656   : > { %9505 = vpow2.f32 %v7555_v62  ;;  %v2905_v25 = vadd.f32 %v2857_v61, %v2773_v38  ;;  %v7556_v17 = vmul.f32 -1.442695, %v2904_v45  ;;  %v725_v62 = vadd.f32 %v15391_v55, %v15390_v30  ;;  %v15392_v45 = vld [vmem:[#allocation51_spill] sm:$0xff] }
 0x657   : > { %v8405_v59 = vpop.f32.mrf.mxu1  ;;  %v12088_v40 = vpop.f32.mrf.mxu0  ;;  %vm3307_vm9 = vcmp.eq.s32.totalorder %v15392_v45, %v3306_v58 }
 0x658   : > { %v7557_v21 = vmul.f32 -1.442695, %v2905_v25  ;;  %v2931_v25 = vadd.f32 %v11937_v15, %v2896_v47  ;;  %v3309_v55 = vsel %vm3307_vm9, 1, %v15154_v52 }
 0x659   : > { %3312 = vperm.xlu0 %9219, %v3309_v55   ;;  %v15396_v55 = vld [vmem:[#allocation80_spill] sm:$0xff] }
 0x65a   : > { %9507 = vpow2.f32 %v7557_v21  ;;  %v15393_v21 = vld [vmem:[#allocation52_spill] sm:$0xff] }
 0x65b   : > { %9509 = vpow2.f32 %v7556_v17  ;;  %vm3308_vm10 = vcmp.eq.s32.totalorder %v15393_v21, %v3306_v58 }
 0x663   : > { %v9506_v3 = vpop.eup %9505 }
 0x664   : > { %v2919_v60 = vadd.f32 1.0, %v9506_v3  ;;  %v15394_v3 = vld [vmem:[#allocation79_spill] sm:$0xff] }
 0x666   : > { %9511 = vrcp.f32 %v2919_v60  ;;  %v729_v60 = vadd.f32 %v15394_v3, %v15390_v30  ;;  %v2932_v3 = vadd.f32 %v11937_v15, %v2899_v14 }
 0x667   : > { %v9508_v26 = vpop.eup %9507 }
 0x668   : > { %v2921_v53 = vadd.f32 1.0, %v9508_v26  ;;  %v9510_v56 = vpop.eup %9509 }
 0x669   : > { %v2920_v38 = vadd.f32 1.0, %v9510_v56  ;;  %v3310_v56 = vsel %vm3308_vm10, 1, %v15154_v52 }
 0x66a   : > { %9513 = vrcp.f32 %v2921_v53  ;;  %3315 = vperm.xlu1 %9220, %v3310_v56   ;;  %v731_v56 = vadd.f32 %v15396_v55, %v11095_v28 }
 0x66b   : > { %9515 = vrcp.f32 %v2920_v38 }
 0x671   : > { %v2997_v61 = vpop.f32.mrf.mxu0  ;;  %v3040_v43 = vpop.f32.mrf.mxu1 }
 0x672   : > { %v3047_v59 = vadd.f32 %v2997_v61, %v725_v62  ;;  %v15395_v62 = vld [vmem:[#allocation78_spill] sm:$0xff] }
 0x673   : > { %v9512_v17 = vpop.eup %9511  ;;  %v2999_v26 = vpop.f32.mrf.mxu0  ;;  %v727_v61 = vadd.f32 %v15395_v62, %v11095_v28 }
 0x674   : > { %v8424_v53 = vpop.f32.mrf.mxu1  ;;  %v2933_v37 = vmul.f32 %v9512_v17, %v2931_v25  ;;  %v7559_v47 = vmul.f32 -1.442695, %v3047_v59 }
 0x675   : > { %v3001_v58 = vpop.f32.mrf.mxu0  ;;  %v3048_v25 = vadd.f32 %v2999_v26, %v727_v61 }
 0x676   : > { %v3043_v21 = vpop.f32.mrf.mxu1  ;;  %v2935_v45 = vadd.f32 %v2933_v37, %v2812_v44  ;;  %9517 = vpow2.f32 %v7559_v47  ;;  %v3049_v53 = vadd.f32 %v3001_v58, %v729_v60 }
 0x677   : > { %v9514_v30 = vpop.eup %9513  ;;  %v3003_v17 = vpop.f32.mrf.mxu0  ;;  %v7560_v37 = vmul.f32 -1.442695, %v3048_v25  ;;  %v3075_v25 = vadd.f32 %v11721_v16, %v3040_v43 }
 0x678   : > { %v8425_v48 = vpop.f32.mrf.mxu1  ;;  %9519 = vtanh.f32 %v2935_v45  ;;  %v2934_v38 = vmul.f32 %v9514_v30, %v2932_v3  ;;  %v7561_v59 = vmul.f32 -1.442695, %v3049_v53  ;;  %v3050_v44 = vadd.f32 %v3003_v17, %v731_v56  ;;  %v9516_v60 = vpop.eup %9515 }
 0x679   : > { %v2939_v58 = vsub.f32 1.0, %v9516_v60  ;;  %v2943_v26 = vmul.f32 %v9516_v60, %v11947_v20  ;;  %v2775_v56 = vadd.f32 %v12083_v12, %v11428_v29  ;;  %v15445_v20 = vld [vmem:[#allocation17_spill] sm:$0xff] }
 0x67a   : > { %v12108_v62 = vadd.f32 %v2934_v38, %v2815_v49  ;;  %9521 = vpow2.f32 %v7561_v59  ;;  %v7562_v14 = vmul.f32 -1.442695, %v3050_v44  ;;  %v15398_v44 = vld [vmem:[#allocation27_spill] sm:$0xff] }
 0x67b   : > { %9523 = vpow2.f32 %v7560_v37 }
 0x67c   : > { %9525 = vpow2.f32 %v7562_v14  ;;  %v3076_v14 = vadd.f32 %v11721_v16, %v3043_v21 }
 0x683   : > { %v9518_v47 = vpop.eup %9517 }
 0x684   : > { %v3063_v11 = vadd.f32 1.0, %v9518_v47  ;;  %v15399_v47 = vld [vmem:[#allocation19_spill] sm:$0xff] }
 0x685   : > { %v9520_v45 = vpop.eup %9519 }
 0x686   : > { %9527 = vrcp.f32 %v3063_v11  ;;  %v2941_v30 = vmul.f32 %v9520_v45, %v2939_v58  ;;  %v15400_v11 = vld [vmem:[#allocation29_spill] sm:$0xff]  ;;  %v2906_v45 = vadd.f32 %v12088_v40, %v2775_v56 }
 0x687   : > { %v9522_v61 = vpop.eup %9521  ;;  %v913_v58 = vadd.f32 %v15400_v11, %v15399_v47  ;;  %v12270_v11 = vld [vmem:[#allocation6 + $0x13c] ss:$12 sps:$4 sm:$0xff]  }
 0x688   : > { %v3065_v3 = vadd.f32 1.0, %v9522_v61  ;;  %v12111_v53 = vadd.f32 %v2943_v26, %v2941_v30  ;;  %v9524_v49 = vpop.eup %9523  ;;  %v7558_v26 = vmul.f32 -1.442695, %v2906_v45  ;;  %15426 = vst [vmem:[#allocation81_spill] sm:$0xff] %v12270_v11  ;;  %v12277_v45 = vld [vmem:[#allocation6 + $0x140] ss:$12 sps:$4 sm:$0xff]  }
 0x689   : > { %v9526_v48 = vpop.eup %9525  ;;  %v3064_v38 = vadd.f32 1.0, %v9524_v49  ;;  %15428 = vst [vmem:[#allocation123_spill] sm:$0xff] %v12277_v45 }
 0x68a   : > { %15397 = vst [vmem:[#allocation63_spill] sm:$0xff] %v12111_v53  ;;  %9529 = vrcp.f32 %v3065_v3  ;;  %v3066_v17 = vadd.f32 1.0, %v9526_v48 }
 0x68b   : > { %9531 = vrcp.f32 %v3064_v38 }
 0x68c   : > { %9533 = vrcp.f32 %v3066_v17 }
 0x693   : > { %v9528_v59 = vpop.eup %9527 }
 0x694   : > { %v3077_v55 = vmul.f32 %v9528_v59, %v3075_v25 }
 0x696   : > { %v3079_v37 = vadd.f32 %v3077_v55, %v15398_v44 }
 0x697   : > { %v9530_v60 = vpop.eup %9529 }
 0x698   : > { %9535 = vtanh.f32 %v3079_v37  ;;  %v3078_v43 = vmul.f32 %v9530_v60, %v3076_v14  ;;  %v9532_v61 = vpop.eup %9531  ;;  %v12257_v37 = vld [vmem:[#allocation6 + $0x154] ss:$12 sps:$4 sm:$0xff]   ;;  %v12264_v14 = vld [vmem:[#allocation6 + $0x150] ss:$12 sps:$4 sm:$0xff]   ;;  %v12267_v60 = vld [vmem:[#allocation6 + $0x158] ss:$12 sps:$4 sm:$0xff]  }
 0x699   : > { %v9534_v3 = vpop.eup %9533  ;;  %v3083_v12 = vsub.f32 1.0, %v9532_v61  ;;  %v3087_v16 = vmul.f32 %v9532_v61, %v11957_v13  ;;  %v12232_v13 = vld [vmem:[#allocation8 + $0x20] ss:$12 sps:$4 sm:$0xff]   ;;  %15423 = vst [vmem:[#allocation74_spill] sm:$0xff] %v12257_v37  ;;  %15424 = vst [vmem:[#allocation76_spill] sm:$0xff] %v12264_v14 }
 0x69a   : > { %v3080_v30 = vadd.f32 %v3078_v43, %v913_v58  ;;  %v3084_v21 = vsub.f32 1.0, %v9534_v3  ;;  %v3088_v40 = vmul.f32 %v9534_v3, %v11960_v50  ;;  %15416 = vst [vmem:[#allocation65_spill] sm:$0xff] %v12232_v13  ;;  %v12235_v50 = vld [vmem:[#allocation8 + $0x4] ss:$12 sps:$4 sm:$0xff]   ;;  %15425 = vst [vmem:[#allocation77_spill] sm:$0xff] %v12267_v60 }
 0x69b   : > { %15417 = vst [vmem:[#allocation66_spill] sm:$0xff] %v12235_v50  ;;  %v12274_v58 = vld [vmem:[#allocation6 + $0x138] ss:$12 sps:$4 sm:$0xff]   ;;  %v12294_v3 = vld [vmem:[#allocation6 + $0x108] ss:$12 sps:$4 sm:$0xff]  }
 0x69c   : > { %9537 = vtanh.f32 %v3080_v30  ;;  %15427 = vst [vmem:[#allocation122_spill] sm:$0xff] %v12274_v58  ;;  %v12280_v43 = vld [vmem:[#allocation6 + $0x124] ss:$12 sps:$4 sm:$0xff]   ;;  %v12284_v30 = vld [vmem:[#allocation6 + $0x120] ss:$12 sps:$4 sm:$0xff]   ;;  %15433 = vst [vmem:[#allocation128_spill] sm:$0xff] %v12294_v3 }
 0x69d   : > { %9539 = vpow2.f32 %v7558_v26  ;;  %15429 = vst [vmem:[#allocation124_spill] sm:$0xff] %v12280_v43  ;;  %15430 = vst [vmem:[#allocation125_spill] sm:$0xff] %v12284_v30  ;;  %v12287_v26 = vld [vmem:[#allocation6 + $0x128] ss:$12 sps:$4 sm:$0xff]   ;;  %v12290_v61 = vld [vmem:[#allocation6 + $0x10c] ss:$12 sps:$4 sm:$0xff]  }
 0x69e   : > { %15431 = vst [vmem:[#allocation126_spill] sm:$0xff] %v12287_v26  ;;  %15432 = vst [vmem:[#allocation127_spill] sm:$0xff] %v12290_v61 }
 0x6a5   : > { %v9536_v49 = vpop.eup %9535 }
 0x6a6   : > { %v3085_v48 = vmul.f32 %v9536_v49, %v3083_v12  ;;  %v12297_v12 = vld [vmem:[#allocation6 + $0x110] ss:$12 sps:$4 sm:$0xff]   ;;  %v12300_v49 = vld [vmem:[#allocation6 + $0xf4] ss:$12 sps:$4 sm:$0xff]  }
 0x6a7   : > { %15434 = vst [vmem:[#allocation129_spill] sm:$0xff] %v12297_v12  ;;  %15435 = vst [vmem:[#allocation130_spill] sm:$0xff] %v12300_v49 }
 0x6a8   : > { %v12122_v38 = vadd.f32 %v3087_v16, %v3085_v48  ;;  %v12304_v48 = vld [vmem:[#allocation6 + $0xf0] ss:$12 sps:$4 sm:$0xff]   ;;  %v12307_v16 = vld [vmem:[#allocation6 + $0xf8] ss:$12 sps:$4 sm:$0xff]  }
 0x6a9   : > { %v9538_v25 = vpop.eup %9537  ;;  %15436 = vst [vmem:[#allocation131_spill] sm:$0xff] %v12304_v48  ;;  %15437 = vst [vmem:[#allocation132_spill] sm:$0xff] %v12307_v16 }
 0x6aa   : > { %v3086_v59 = vmul.f32 %v9538_v25, %v3084_v21  ;;  %v9540_v55 = vpop.eup %9539  ;;  %v12310_v21 = vld [vmem:[#allocation6 + $0xdc] ss:$12 sps:$4 sm:$0xff]   ;;  %v12314_v25 = vld [vmem:[#allocation6 + $0xd8] ss:$12 sps:$4 sm:$0xff]  }
 0x6ab   : > { %v2922_v44 = vadd.f32 1.0, %v9540_v55  ;;  %15438 = vst [vmem:[#allocation133_spill] sm:$0xff] %v12310_v21  ;;  %15439 = vst [vmem:[#allocation134_spill] sm:$0xff] %v12314_v25  ;;  %v12324_v55 = vld [vmem:[#allocation6 + $0xc0] ss:$12 sps:$4 sm:$0xff]  }
 0x6ac   : > { %v12125_v17 = vadd.f32 %v3088_v40, %v3086_v59  ;;  %v12317_v59 = vld [vmem:[#allocation6 + $0xe0] ss:$12 sps:$4 sm:$0xff]   ;;  %v12320_v40 = vld [vmem:[#allocation6 + $0xc4] ss:$12 sps:$4 sm:$0xff]   ;;  %15442 = vst [vmem:[#allocation137_spill] sm:$0xff] %v12324_v55 }
 0x6ad   : > { %9541 = vrcp.f32 %v2922_v44  ;;  %15440 = vst [vmem:[#allocation135_spill] sm:$0xff] %v12317_v59  ;;  %15441 = vst [vmem:[#allocation136_spill] sm:$0xff] %v12320_v40  ;;  %v12330_v44 = vld [vmem:[#allocation8 + $0x16c] ss:$12 sps:$4 sm:$0xff]  }
 0x6ae   : > { %v12129_v56 = vpack.c.bf16 %v12125_v17, %v12122_v38  ;;  %9543 = vtanh.f32 %v12108_v62  ;;  %v12254_v62 = vld [vmem:[#allocation6 + $0x170] ss:$12 sps:$4 sm:$0xff]   ;;  %15444 = vst [vmem:[#allocation139_spill] sm:$0xff] %v12330_v44 }
 0x6af   : > { %15422 = vst [vmem:[#allocation73_spill] sm:$0xff] %v12254_v62 }
 0x6b0   : > { %3125 = vmatmul.mubr.bf16.vlgmr.msra.gmra.mxu0 %v12129_v56  ;;  %8443 = vmatmul.mubr.bf16.vlgmr.msra.gmra.mxu1 %v12129_v56 }
 0x6b1   : > { %3178 = vmatpush1.bf16.msra.mxu0 %v11743_v57  ;;  %8447 = vmatpush3.bf16.msra.mxu1 %v11746_v41 }
 0x6b2   : > { %3179 = vmatprep.subr.bf16.mxu0 %v11749_v51  ;;  %8448 = vmatprep.subr.bf16.mxu1 %v15160_v54 }
 0x6b3   : > { %3209 = vmatprep.mubr.bf16.mxu0 %v15154_v52  ;;  %8462 = vmatprep.mubr.msk.bf16.mxu1 %vm10558_vm0, %v15160_v54 }
 0x6b5   : > { %3180 = vmatpush1.bf16.msra.mxu0 %v11756_v22  ;;  %8449 = vmatpush3.bf16.msra.mxu1 %v11759_v27 }
 0x6b6   : > { %3181 = vmatprep.subr.bf16.mxu0 %v11763_v8  ;;  %8450 = vmatprep.subr.bf16.mxu1 %v15160_v54 }
 0x6b9   : > { %3182 = vmatpush1.bf16.msra.mxu0 %v11767_v10  ;;  %8451 = vmatpush3.bf16.msra.mxu1 %v11770_v6  ;;  %v12184_v6 = vld [vmem:[#allocation8 + $0x98] ss:$12 sps:$4 sm:$0xff]  }
 0x6ba   : > { %3183 = vmatprep.subr.bf16.mxu0 %v11773_v18  ;;  %8452 = vmatprep.subr.bf16.mxu1 %v15160_v54  ;;  %v9542_v57 = vpop.eup %9541  ;;  %v15402_v18 = vld [vmem:[#allocation144_spill] sm:$0xff] }
 0x6bb   : > { %v9544_v41 = vpop.eup %9543  ;;  %v2940_v51 = vsub.f32 1.0, %v9542_v57  ;;  %v2944_v27 = vmul.f32 %v9542_v57, %v11999_v63 }
 0x6bd   : > { %3184 = vmatpush1.bf16.msra.mxu0 %v11777_v2  ;;  %8453 = vmatpush3.bf16.msra.mxu1 %v11780_v23  ;;  %v2942_v22 = vmul.f32 %v9544_v41, %v2940_v51  ;;  %v12189_v2 = vld [vmem:[#allocation8 + $0x78] ss:$12 sps:$4 sm:$0xff]   ;;  %v12192_v23 = vld [vmem:[#allocation8 + $0x80] ss:$12 sps:$4 sm:$0xff]  }
 0x6be   : > { %3185 = vmatprep.subr.bf16.mxu0 %v11783_v19  ;;  %8454 = vmatprep.subr.bf16.mxu1 %v15160_v54  ;;  %15403 = vst [vmem:[#allocation22_spill] sm:$0xff] %v12189_v2  ;;  %15404 = vst [vmem:[#allocation24_spill] sm:$0xff] %v12192_v23  ;;  %v12195_v19 = vld [vmem:[#allocation8 + $0x64] ss:$12 sps:$4 sm:$0xff]  }
 0x6bf   : > { %v12164_v8 = vadd.f32 %v2944_v27, %v2942_v22  ;;  %15405 = vst [vmem:[#allocation55_spill] sm:$0xff] %v12195_v19 }
 0x6c1   : > { %3186 = vmatpush1.bf16.msra.mxu0 %v11787_v32  ;;  %8455 = vmatpush3.bf16.msra.mxu1 %v11790_v36  ;;  %15401 = vst [vmem:[#allocation71_spill] sm:$0xff] %v12164_v8  ;;  %v3176_v10 = vpack.c.bf16 %v12164_v8, %v12111_v53  ;;  %v12202_v32 = vld [vmem:[#allocation8 + $0x68] ss:$12 sps:$4 sm:$0xff]   ;;  %v12205_v36 = vld [vmem:[#allocation8 + $0x4c] ss:$12 sps:$4 sm:$0xff]  }
 0x6c2   : > { %3187 = vmatprep.subr.bf16.mxu0 %v15344_v42  ;;  %8456 = vmatprep.subr.bf16.mxu1 %v15160_v54  ;;  %15407 = vst [vmem:[#allocation56_spill] sm:$0xff] %v12202_v32  ;;  %15408 = vst [vmem:[#allocation25_spill] sm:$0xff] %v12205_v36  ;;  %v12239_v42 = vld [vmem:[#allocation8] ss:$12 sps:$4 sm:$0xff]  }
 0x6c3   : > { %15418 = vst [vmem:[#allocation68_spill] sm:$0xff] %v12239_v42 }
 0x6c5   : > { %3188 = vmatpush1.bf16.msra.mxu0 %v15345_v33  ;;  %8457 = vmatpush3.bf16.msra.mxu1 %v15346_v4  ;;  %v12242_v33 = vld [vmem:[#allocation8 + $0x8] ss:$12 sps:$4 sm:$0xff]   ;;  %v12245_v4 = vld [vmem:[#allocation6 + $0x16c] ss:$12 sps:$4 sm:$0xff]  }
 0x6c6   : > { %3189 = vmatprep.subr.bf16.mxu0 %v11803_v0  ;;  %8458 = vmatprep.subr.bf16.mxu1 %v15160_v54  ;;  %v12215_v0 = vld [vmem:[#allocation8 + $0x34] ss:$12 sps:$4 sm:$0xff]   ;;  %15419 = vst [vmem:[#allocation69_spill] sm:$0xff] %v12242_v33  ;;  %15420 = vst [vmem:[#allocation70_spill] sm:$0xff] %v12245_v4 }
 0x6c7   : > { %15411 = vst [vmem:[#allocation58_spill] sm:$0xff] %v12215_v0 }
 0x6c9   : > { %3190 = vmatpush1.bf16.msra.mxu0 %v11808_v31  ;;  %8459 = vmatpush3.bf16.msra.mxu1 %v11811_v24  ;;  %v12175_v31 = vld [vmem:[#allocation8 + $0xb0] ss:$12 sps:$4 sm:$0xff]   ;;  %v12209_v24 = vld [vmem:[#allocation8 + $0x48] ss:$12 sps:$4 sm:$0xff]  }
 0x6ca   : > { %3191 = vmatprep.subr.bf16.mxu0 %v11816_v9  ;;  %8460 = vmatprep.subr.bf16.mxu1 %v15160_v54  ;;  %15409 = vst [vmem:[#allocation21_spill] sm:$0xff] %v12209_v24  ;;  %v12212_v9 = vld [vmem:[#allocation8 + $0x50] ss:$12 sps:$4 sm:$0xff]  }
 0x6cb   : > { %15410 = vst [vmem:[#allocation57_spill] sm:$0xff] %v12212_v9 }
 0x6cd   : > { %3192 = vmatpush1.bf16.msra.mxu0 %v11820_v39  ;;  %8461 = vmatpush3.bf16.msra.mxu1 %v11823_v46  ;;  %v12219_v39 = vld [vmem:[#allocation8 + $0x30] ss:$12 sps:$4 sm:$0xff]   ;;  %v12222_v46 = vld [vmem:[#allocation8 + $0x38] ss:$12 sps:$4 sm:$0xff]  }
 0x6ce   : > { %3321 = vmatprep.subr.bf16.mxu0 %v15348_v5  ;;  %8466 = vmatprep.subr.bf16.mxu1 %v15160_v54  ;;  %15412 = vst [vmem:[#allocation60_spill] sm:$0xff] %v12219_v39  ;;  %15413 = vst [vmem:[#allocation61_spill] sm:$0xff] %v12222_v46  ;;  %v12251_v5 = vld [vmem:[#allocation6 + $0x168] ss:$12 sps:$4 sm:$0xff]  }
 0x6cf   : > { %15421 = vst [vmem:[#allocation72_spill] sm:$0xff] %v12251_v5 }
 0x6d0   : > { %3210 = vmatmul.mubr.bf16.vlgmr.msra.gmra.mxu0 %v3176_v10  ;;  %8463 = vmatmul.mubr.bf16.vlgmr.msra.gmra.mxu1 %v3176_v10 }
 0x6d1   : > { %3322 = vmatpush1.bf16.msra.mxu0 %v11832_v34  ;;  %8467 = vmatpush3.bf16.msra.mxu1 %v12175_v31  ;;  %v12225_v34 = vld [vmem:[#allocation8 + $0x1c] ss:$12 sps:$4 sm:$0xff]  }
 0x6d2   : > { %3323 = vmatprep.subr.bf16.mxu0 %v11836_v35  ;;  %8468 = vmatprep.subr.bf16.mxu1 %v15160_v54  ;;  %15414 = vst [vmem:[#allocation62_spill] sm:$0xff] %v12225_v34  ;;  %v12229_v35 = vld [vmem:[#allocation8 + $0x18] ss:$12 sps:$4 sm:$0xff]  }
 0x6d3   : > { %3353 = vmatprep.mubr.bf16.mxu0 %v15154_v52  ;;  %8482 = vmatprep.mubr.msk.bf16.mxu1 %vm10558_vm0, %v15160_v54  ;;  %15415 = vst [vmem:[#allocation64_spill] sm:$0xff] %v12229_v35 }
 0x6d5   : > { %3324 = vmatpush1.bf16.msra.mxu0 %v11843_v1  ;;  %8469 = vmatpush3.bf16.msra.mxu1 %v12184_v6  ;;  %v12199_v1 = vld [vmem:[#allocation8 + $0x60] ss:$12 sps:$4 sm:$0xff]  }
 0x6d6   : > { %3325 = vmatprep.subr.bf16.mxu0 %v15402_v18  ;;  %8470 = vmatprep.subr.bf16.mxu1 %v15160_v54  ;;  %15406 = vst [vmem:[#allocation54_spill] sm:$0xff] %v12199_v1 }
 0x6d9   : > { %3326 = vmatpush1.bf16.msra.mxu0 %v12189_v2  ;;  %8471 = vmatpush3.bf16.msra.mxu1 %v12192_v23 }
 0x6da   : > { %3327 = vmatprep.subr.bf16.mxu0 %v12195_v19  ;;  %8472 = vmatprep.subr.bf16.mxu1 %v15160_v54 }
 0x6dd   : > { %3328 = vmatpush1.bf16.msra.mxu0 %v12199_v1  ;;  %8473 = vmatpush3.bf16.msra.mxu1 %v12202_v32 }
 0x6de   : > { %3329 = vmatprep.subr.bf16.mxu0 %v12205_v36  ;;  %8474 = vmatprep.subr.bf16.mxu1 %v15160_v54 }
 0x6e1   : > { %3330 = vmatpush1.bf16.msra.mxu0 %v12209_v24  ;;  %8475 = vmatpush3.bf16.msra.mxu1 %v12212_v9 }
 0x6e2   : > { %3331 = vmatprep.subr.bf16.mxu0 %v12215_v0  ;;  %8476 = vmatprep.subr.bf16.mxu1 %v15160_v54 }
 0x6e5   : > { %3332 = vmatpush1.bf16.msra.mxu0 %v12219_v39  ;;  %8477 = vmatpush3.bf16.msra.mxu1 %v12222_v46 }
 0x6e6   : > { %3333 = vmatprep.subr.bf16.mxu0 %v12225_v34  ;;  %8478 = vmatprep.subr.bf16.mxu1 %v15160_v54 }
 0x6e9   : > { %3334 = vmatpush1.bf16.msra.mxu0 %v12229_v35  ;;  %8479 = vmatpush3.bf16.msra.mxu1 %v12232_v13 }
 0x6ea   : > { %3335 = vmatprep.subr.bf16.mxu0 %v12235_v50  ;;  %8480 = vmatprep.subr.bf16.mxu1 %v15160_v54 }
 0x6ed   : > { %3336 = vmatpush1.bf16.msra.mxu0 %v12239_v42  ;;  %8481 = vmatpush3.bf16.msra.mxu1 %v12242_v33 }
 0x6ee   : > { %3450 = vmatprep.subr.bf16.mxu0 %v12245_v4  ;;  %8486 = vmatprep.subr.bf16.mxu1 %v15160_v54 }
 0x6f0   : > { %3354 = vmatmul.mubr.bf16.vlgmr.msra.gmra.mxu0 %v12129_v56  ;;  %8483 = vmatmul.mubr.bf16.vlgmr.msra.gmra.mxu1 %v12129_v56  ;;  %v12327_v56 = vld [vmem:[#allocation6 + $0xc8] ss:$12 sps:$4 sm:$0xff]  }
 0x6f1   : > { %3451 = vmatpush1.bf16.msra.mxu0 %v12251_v5  ;;  %8487 = vmatpush3.bf16.msra.mxu1 %v12254_v62  ;;  %15443 = vst [vmem:[#allocation138_spill] sm:$0xff] %v12327_v56 }
 0x6f2   : > { %3452 = vmatprep.subr.bf16.mxu0 %v12257_v37  ;;  %8488 = vmatprep.subr.bf16.mxu1 %v15160_v54 }
 0x6f3   : > { %3482 = vmatprep.mubr.bf16.mxu0 %v15154_v52  ;;  %8502 = vmatprep.mubr.msk.bf16.mxu1 %vm10558_vm0, %v15160_v54 }
 0x6f5   : > { %3453 = vmatpush1.bf16.msra.mxu0 %v12264_v14  ;;  %8489 = vmatpush3.bf16.msra.mxu1 %v12267_v60 }
 0x6f6   : > { %3454 = vmatprep.subr.bf16.mxu0 %v12270_v11  ;;  %8490 = vmatprep.subr.bf16.mxu1 %v15160_v54 }
 0x6f9   : > { %3455 = vmatpush1.bf16.msra.mxu0 %v12274_v58  ;;  %8491 = vmatpush3.bf16.msra.mxu1 %v12277_v45 }
 0x6fa   : > { %3456 = vmatprep.subr.bf16.mxu0 %v12280_v43  ;;  %8492 = vmatprep.subr.bf16.mxu1 %v15160_v54 }
 0x6fd   : > { %3457 = vmatpush1.bf16.msra.mxu0 %v12284_v30  ;;  %8493 = vmatpush3.bf16.msra.mxu1 %v12287_v26 }
 0x6fe   : > { %3458 = vmatprep.subr.bf16.mxu0 %v12290_v61  ;;  %8494 = vmatprep.subr.bf16.mxu1 %v15160_v54 }
 0x701   : > { %3459 = vmatpush1.bf16.msra.mxu0 %v12294_v3  ;;  %8495 = vmatpush3.bf16.msra.mxu1 %v12297_v12 }
 0x702   : > { %3460 = vmatprep.subr.bf16.mxu0 %v12300_v49  ;;  %8496 = vmatprep.subr.bf16.mxu1 %v15160_v54 }
 0x705   : > { %3461 = vmatpush1.bf16.msra.mxu0 %v12304_v48  ;;  %8497 = vmatpush3.bf16.msra.mxu1 %v12307_v16 }
 0x706   : > { %3462 = vmatprep.subr.bf16.mxu0 %v12310_v21  ;;  %8498 = vmatprep.subr.bf16.mxu1 %v15160_v54 }
 0x709   : > { %3463 = vmatpush1.bf16.msra.mxu0 %v12314_v25  ;;  %8499 = vmatpush3.bf16.msra.mxu1 %v12317_v59 }
 0x70a   : > { %3464 = vmatprep.subr.bf16.mxu0 %v12320_v40  ;;  %8500 = vmatprep.subr.bf16.mxu1 %v15160_v54 }
 0x70d   : > { %3465 = vmatpush1.bf16.msra.mxu0 %v12324_v55  ;;  %8501 = vmatpush3.bf16.msra.mxu1 %v12327_v56 }
 0x70e   : > { %3535 = vmatprep.subr.bf16.mxu0 %v12330_v44  ;;  %8506 = vmatprep.subr.bf16.mxu1 %v15160_v54 }
 0x770   : > { %v3169_v57 = vpop.f32.mrf.mxu1  ;;  %v3126_v27 = vpop.f32.mrf.mxu0 }
 0x771   : > { %v3127_v47 = vadd.f32 %v3126_v27, %v15445_v20  ;;  %v3170_v26 = vadd.f32 %v3169_v57, %v11443_v7 }
 0x772   : > { %v8444_v41 = vpop.f32.mrf.mxu1  ;;  %v3128_v10 = vpop.f32.mrf.mxu0 }
 0x773   : > { %v3129_v48 = vadd.f32 %v3128_v10, %v11428_v29  ;;  %v15447_v10 = vld [vmem:[#allocation82_spill] sm:$0xff] }
 0x774   : > { %v12334_v51 = vpop.f32.mrf.mxu1  ;;  %v3130_v18 = vpop.f32.mrf.mxu0 }
 0x775   : > { %v3131_v44 = vadd.f32 %v3130_v18, %v15445_v20  ;;  %v15446_v20 = vld [vmem:[#allocation47_spill] sm:$0xff]  ;;  %v3173_v43 = vadd.f32 %v12334_v51, %v11443_v7 }
 0x776   : > { %v8445_v22 = vpop.f32.mrf.mxu1  ;;  %v12336_v63 = vpop.f32.mrf.mxu0 }
 0x790   : > { %v3211_v55 = vpop.f32.mrf.mxu0  ;;  %v3254_v56 = vpop.f32.mrf.mxu1 }
 0x791   : > { %v3261_v40 = vadd.f32 %v3211_v55, %v3127_v47 }
 0x792   : > { %v3213_v59 = vpop.f32.mrf.mxu0  ;;  %v8464_v25 = vpop.f32.mrf.mxu1 }
 0x793   : > { %v7563_v21 = vmul.f32 -1.442695, %v3261_v40  ;;  %v3262_v12 = vadd.f32 %v3213_v59, %v3129_v48  ;;  %v3664_v59 = vstv %s3663_s18 }
 0x794   : > { %v3215_v16 = vpop.f32.mrf.mxu0  ;;  %v3257_v41 = vpop.f32.mrf.mxu1 }
 0x795   : > { %9545 = vpow2.f32 %v7563_v21  ;;  %v3263_v22 = vadd.f32 %v3215_v16, %v3131_v44  ;;  %v7564_v27 = vmul.f32 -1.442695, %v3262_v12  ;;  %v735_v21 = vadd.f32 %v15447_v10, %v15446_v20  ;;  %v15448_v44 = vld [vmem:[#allocation51_spill] sm:$0xff] }
 0x796   : > { %v8465_v49 = vpop.f32.mrf.mxu1  ;;  %v12341_v18 = vpop.f32.mrf.mxu0  ;;  %vm3665_vm11 = vcmp.eq.s32.totalorder %v15448_v44, %v3664_v59 }
 0x797   : > { %v7565_v3 = vmul.f32 -1.442695, %v3263_v22  ;;  %v3667_v10 = vsel %vm3665_vm11, 1, %v15154_v52 }
 0x798   : > { %3670 = vperm.xlu0 %9219, %v3667_v10   ;;  %v15452_v10 = vld [vmem:[#allocation85_spill] sm:$0xff] }
 0x799   : > { %9547 = vpow2.f32 %v7565_v3  ;;  %v3289_v3 = vadd.f32 %v11937_v15, %v3254_v56 }
 0x79a   : > { %9549 = vpow2.f32 %v7564_v27  ;;  %v15450_v27 = vld [vmem:[#allocation84_spill] sm:$0xff] }
 0x7a2   : > { %v9546_v61 = vpop.eup %9545 }
 0x7a3   : > { %v3277_v47 = vadd.f32 1.0, %v9546_v61  ;;  %v15449_v61 = vld [vmem:[#allocation52_spill] sm:$0xff] }
 0x7a4   : > { %vm3666_vm12 = vcmp.eq.s32.totalorder %v15449_v61, %v3664_v59 }
 0x7a5   : > { %9551 = vrcp.f32 %v3277_v47  ;;  %v739_v47 = vadd.f32 %v15450_v27, %v15446_v20  ;;  %v3290_v27 = vadd.f32 %v11937_v15, %v3257_v41 }
 0x7a6   : > { %v9548_v25 = vpop.eup %9547 }
 0x7a7   : > { %v3279_v55 = vadd.f32 1.0, %v9548_v25  ;;  %v9550_v40 = vpop.eup %9549 }
 0x7a8   : > { %v3278_v16 = vadd.f32 1.0, %v9550_v40  ;;  %v3668_v40 = vsel %vm3666_vm12, 1, %v15154_v52 }
 0x7a9   : > { %9553 = vrcp.f32 %v3279_v55  ;;  %3673 = vperm.xlu1 %9220, %v3668_v40   ;;  %v741_v40 = vadd.f32 %v15452_v10, %v11095_v28 }
 0x7aa   : > { %9555 = vrcp.f32 %v3278_v16 }
 0x7b0   : > { %v3355_v49 = vpop.f32.mrf.mxu0  ;;  %v3398_v48 = vpop.f32.mrf.mxu1 }
 0x7b1   : > { %v3405_v12 = vadd.f32 %v3355_v49, %v735_v21  ;;  %v15451_v21 = vld [vmem:[#allocation83_spill] sm:$0xff] }
 0x7b2   : > { %v9552_v22 = vpop.eup %9551  ;;  %v3357_v25 = vpop.f32.mrf.mxu0  ;;  %v737_v49 = vadd.f32 %v15451_v21, %v11095_v28 }
 0x7b3   : > { %v8484_v55 = vpop.f32.mrf.mxu1  ;;  %v3291_v30 = vmul.f32 %v9552_v22, %v3289_v3  ;;  %v7567_v56 = vmul.f32 -1.442695, %v3405_v12 }
 0x7b4   : > { %v3359_v59 = vpop.f32.mrf.mxu0  ;;  %v3406_v3 = vadd.f32 %v3357_v25, %v737_v49 }
 0x7b5   : > { %v3401_v61 = vpop.f32.mrf.mxu1  ;;  %v3293_v44 = vadd.f32 %v3291_v30, %v3170_v26  ;;  %9557 = vpow2.f32 %v7567_v56  ;;  %v3407_v55 = vadd.f32 %v3359_v59, %v739_v47 }
 0x7b6   : > { %v9554_v20 = vpop.eup %9553  ;;  %v3361_v22 = vpop.f32.mrf.mxu0  ;;  %v7568_v15 = vmul.f32 -1.442695, %v3406_v3 }
 0x7b7   : > { %v8485_v57 = vpop.f32.mrf.mxu1  ;;  %9559 = vtanh.f32 %v3293_v44  ;;  %v3292_v16 = vmul.f32 %v9554_v20, %v3290_v27  ;;  %v7569_v12 = vmul.f32 -1.442695, %v3407_v55  ;;  %v3408_v30 = vadd.f32 %v3361_v22, %v741_v40  ;;  %v9556_v41 = vpop.eup %9555 }
 0x7b8   : > { %v3297_v56 = vsub.f32 1.0, %v9556_v41  ;;  %v3301_v25 = vmul.f32 %v9556_v41, %v12111_v53  ;;  %v3133_v40 = vadd.f32 %v12336_v63, %v11428_v29  ;;  %v12458_v53 = vld [vmem:[#allocation8 + $0xe0] ss:$12 sps:$4 sm:$0xff]  }
 0x7b9   : > { %v12361_v21 = vadd.f32 %v3292_v16, %v3173_v43  ;;  %9561 = vpow2.f32 %v7569_v12  ;;  %v7570_v26 = vmul.f32 -1.442695, %v3408_v30  ;;  %v12369_v16 = vld [vmem:[%s14731_s5] ss:$0 sm:$0xff]  ;;  %v15454_v30 = vld [vmem:[#allocation26_spill] sm:$0xff] }
 0x7ba   : > { %9563 = vpow2.f32 %v7568_v15  ;;  %v3433_v3 = vadd.f32 %v12369_v16, %v3398_v48 }
 0x7bb   : > { %9565 = vpow2.f32 %v7570_v26  ;;  %v3434_v26 = vadd.f32 %v12369_v16, %v3401_v61 }
 0x7c2   : > { %v9558_v47 = vpop.eup %9557 }
 0x7c3   : > { %v3421_v51 = vadd.f32 1.0, %v9558_v47  ;;  %v3264_v47 = vadd.f32 %v12341_v18, %v3133_v40 }
 0x7c4   : > { %v9560_v44 = vpop.eup %9559 }
 0x7c5   : > { %9567 = vrcp.f32 %v3421_v51  ;;  %v3299_v20 = vmul.f32 %v9560_v44, %v3297_v56  ;;  %v15455_v56 = vld [vmem:[#allocation28_spill] sm:$0xff]  ;;  %v7566_v48 = vmul.f32 -1.442695, %v3264_v47  ;;  %v12414_v47 = vld [vmem:[#allocation8 + $0x138] ss:$12 sps:$4 sm:$0xff]  }
 0x7c6   : > { %v9562_v49 = vpop.eup %9561 }
 0x7c7   : > { %v3423_v59 = vadd.f32 1.0, %v9562_v49  ;;  %v12364_v27 = vadd.f32 %v3301_v25, %v3299_v20  ;;  %v9564_v43 = vpop.eup %9563 }
 0x7c8   : > { %v9566_v55 = vpop.eup %9565  ;;  %v3422_v57 = vadd.f32 1.0, %v9564_v43 }
 0x7c9   : > { %15453 = vst [vmem:[#allocation140_spill] sm:$0xff] %v12364_v27  ;;  %9569 = vrcp.f32 %v3423_v59  ;;  %v3424_v22 = vadd.f32 1.0, %v9566_v55 }
 0x7ca   : > { %9571 = vrcp.f32 %v3422_v57 }
 0x7cb   : > { %9573 = vrcp.f32 %v3424_v22 }
 0x7d2   : > { %v9568_v12 = vpop.eup %9567 }
 0x7d3   : > { %v3435_v10 = vmul.f32 %v9568_v12, %v3433_v3 }
 0x7d5   : > { %v3437_v15 = vadd.f32 %v3435_v10, %v15454_v30  ;;  %v12393_v30 = vld [vmem:[#allocation8 + $0x170] ss:$12 sps:$4 sm:$0xff]  }
 0x7d6   : > { %v9570_v41 = vpop.eup %9569 }
 0x7d7   : > { %9575 = vtanh.f32 %v3437_v15  ;;  %v3436_v51 = vmul.f32 %v9570_v41, %v3434_v26  ;;  %v9572_v20 = vpop.eup %9571  ;;  %v12403_v15 = vld [vmem:[#allocation8 + $0x150] ss:$12 sps:$4 sm:$0xff]   ;;  %v12406_v26 = vld [vmem:[#allocation8 + $0x158] ss:$12 sps:$4 sm:$0xff]  }
 0x7d8   : > { %v9574_v25 = vpop.eup %9573  ;;  %v3441_v49 = vsub.f32 1.0, %v9572_v20  ;;  %v3445_v43 = vmul.f32 %v9572_v20, %v12122_v38  ;;  %v12390_v38 = vld [vmem:[#allocation8 + $0x168] ss:$12 sps:$4 sm:$0xff]  }
 0x7d9   : > { %v3438_v44 = vadd.f32 %v3436_v51, %v15455_v56  ;;  %v3442_v55 = vsub.f32 1.0, %v9574_v25  ;;  %v3446_v18 = vmul.f32 %v9574_v25, %v12125_v17  ;;  %v12396_v17 = vld [vmem:[#allocation8 + $0x154] ss:$12 sps:$4 sm:$0xff]   ;;  %v12410_v41 = vld [vmem:[#allocation8 + $0x13c] ss:$12 sps:$4 sm:$0xff]  }
 0x7da   : > { %v12417_v51 = vld [vmem:[#allocation8 + $0x140] ss:$12 sps:$4 sm:$0xff]   ;;  %v12420_v56 = vld [vmem:[#allocation8 + $0x124] ss:$12 sps:$4 sm:$0xff]   ;;  %v12434_v25 = vld [vmem:[#allocation8 + $0x108] ss:$12 sps:$4 sm:$0xff]  }
 0x7db   : > { %9577 = vtanh.f32 %v3438_v44  ;;  %v12427_v44 = vld [vmem:[#allocation8 + $0x128] ss:$12 sps:$4 sm:$0xff]  }
 0x7dc   : > { %9579 = vpow2.f32 %v7566_v48  ;;  %v12430_v48 = vld [vmem:[#allocation8 + $0x10c] ss:$12 sps:$4 sm:$0xff]  }
 0x7e4   : > { %v9576_v59 = vpop.eup %9575 }
 0x7e5   : > { %v3443_v63 = vmul.f32 %v9576_v59, %v3441_v49  ;;  %v12437_v49 = vld [vmem:[#allocation8 + $0x110] ss:$12 sps:$4 sm:$0xff]   ;;  %v12440_v59 = vld [vmem:[#allocation8 + $0xf4] ss:$12 sps:$4 sm:$0xff]  }
 0x7e7   : > { %v12379_v61 = vadd.f32 %v3445_v43, %v3443_v63 }
 0x7e8   : > { %v9578_v57 = vpop.eup %9577 }
 0x7e9   : > { %v3444_v3 = vmul.f32 %v9578_v57, %v3442_v55  ;;  %v9580_v22 = vpop.eup %9579  ;;  %v12444_v55 = vld [vmem:[#allocation8 + $0xf0] ss:$12 sps:$4 sm:$0xff]   ;;  %v12447_v57 = vld [vmem:[#allocation8 + $0xf8] ss:$12 sps:$4 sm:$0xff]  }
 0x7ea   : > { %v3280_v40 = vadd.f32 1.0, %v9580_v22  ;;  %15456 = vst [vmem:[#allocation141_spill] sm:$0xff] %v12444_v55  ;;  %15457 = vst [vmem:[#allocation142_spill] sm:$0xff] %v12447_v57 }
 0x7eb   : > { %v12382_v12 = vadd.f32 %v3446_v18, %v3444_v3  ;;  %v12450_v18 = vld [vmem:[#allocation8 + $0xdc] ss:$12 sps:$4 sm:$0xff]  }
 0x7ec   : > { %9581 = vrcp.f32 %v3280_v40  ;;  %v12455_v40 = vld [vmem:[#allocation8 + $0xd8] ss:$12 sps:$4 sm:$0xff]  }
 0x7ed   : > { %v12386_v10 = vpack.c.bf16 %v12382_v12, %v12379_v61  ;;  %9583 = vtanh.f32 %v12361_v21  ;;  %v12424_v21 = vld [vmem:[#allocation8 + $0x120] ss:$12 sps:$4 sm:$0xff]  }
 0x7ef   : > { %3483 = vmatmul.mubr.bf16.vlgmr.msra.gmra.mxu0 %v12386_v10  ;;  %8503 = vmatmul.mubr.bf16.vlgmr.msra.gmra.mxu1 %v12386_v10 }
 0x7f0   : > { %3536 = vmatpush1.bf16.msra.mxu0 %v12390_v38  ;;  %8507 = vmatpush3.bf16.msra.mxu1 %v12393_v30 }
 0x7f1   : > { %3537 = vmatprep.subr.bf16.mxu0 %v12396_v17  ;;  %8508 = vmatprep.subr.bf16.mxu1 %v15160_v54 }
 0x7f2   : > { %3567 = vmatprep.mubr.bf16.mxu0 %v15154_v52  ;;  %8522 = vmatprep.mubr.msk.bf16.mxu1 %vm10558_vm0, %v15160_v54 }
 0x7f4   : > { %3538 = vmatpush1.bf16.msra.mxu0 %v12403_v15  ;;  %8509 = vmatpush3.bf16.msra.mxu1 %v12406_v26 }
 0x7f5   : > { %3539 = vmatprep.subr.bf16.mxu0 %v12410_v41  ;;  %8510 = vmatprep.subr.bf16.mxu1 %v15160_v54 }
 0x7f8   : > { %3540 = vmatpush1.bf16.msra.mxu0 %v12414_v47  ;;  %8511 = vmatpush3.bf16.msra.mxu1 %v12417_v51 }
 0x7f9   : > { %3541 = vmatprep.subr.bf16.mxu0 %v12420_v56  ;;  %8512 = vmatprep.subr.bf16.mxu1 %v15160_v54  ;;  %v9582_v20 = vpop.eup %9581 }
 0x7fa   : > { %v9584_v63 = vpop.eup %9583  ;;  %v3298_v43 = vsub.f32 1.0, %v9582_v20  ;;  %v3302_v22 = vmul.f32 %v9582_v20, %v12164_v8  ;;  %v12470_v20 = vld [vmem:[#allocation8 + $0xc8] ss:$12 sps:$4 sm:$0xff]   ;;  %v12475_v8 = vld [vmem:[#allocation8 + $0xac] ss:$12 sps:$4 sm:$0xff]  }
 0x7fb   : > { %15459 = vst [vmem:[#allocation75_spill] sm:$0xff] %v12475_v8 }
 0x7fc   : > { %3542 = vmatpush1.bf16.msra.mxu0 %v12424_v21  ;;  %8513 = vmatpush3.bf16.msra.mxu1 %v12427_v44  ;;  %v3300_v3 = vmul.f32 %v9584_v63, %v3298_v43  ;;  %v12467_v63 = vld [vmem:[#allocation8 + $0xc0] ss:$12 sps:$4 sm:$0xff]  }
 0x7fd   : > { %3543 = vmatprep.subr.bf16.mxu0 %v12430_v48  ;;  %8514 = vmatprep.subr.bf16.mxu1 %v15160_v54 }
 0x800   : > { %3544 = vmatpush1.bf16.msra.mxu0 %v12434_v25  ;;  %8515 = vmatpush3.bf16.msra.mxu1 %v12437_v49 }
 0x801   : > { %3545 = vmatprep.subr.bf16.mxu0 %v12440_v59  ;;  %8516 = vmatprep.subr.bf16.mxu1 %v15160_v54 }
 0x804   : > { %3546 = vmatpush1.bf16.msra.mxu0 %v12444_v55  ;;  %8517 = vmatpush3.bf16.msra.mxu1 %v12447_v57  ;;  %v12461_v55 = vadd.f32 %v3302_v22, %v3300_v3  ;;  %v12463_v57 = vld [vmem:[#allocation8 + $0xc4] ss:$12 sps:$4 sm:$0xff]   ;;  %v12479_v3 = vld [vmem:[#allocation8 + $0xa8] ss:$12 sps:$4 sm:$0xff]  }
 0x805   : > { %3547 = vmatprep.subr.bf16.mxu0 %v12450_v18  ;;  %8518 = vmatprep.subr.bf16.mxu1 %v15160_v54  ;;  %v12483_v22 = vld [vmem:[#allocation8 + $0x94] ss:$12 sps:$4 sm:$0xff]  }
 0x806   : > { %15458 = vst [vmem:[#allocation143_spill] sm:$0xff] %v12461_v55  ;;  %v3534_v43 = vpack.c.bf16 %v12461_v55, %v12364_v27 }
 0x808   : > { %3548 = vmatpush1.bf16.msra.mxu0 %v12455_v40  ;;  %8519 = vmatpush3.bf16.msra.mxu1 %v12458_v53 }
 0x809   : > { %3549 = vmatprep.subr.bf16.mxu0 %v12463_v57  ;;  %8520 = vmatprep.subr.bf16.mxu1 %v15160_v54 }
 0x80c   : > { %3550 = vmatpush1.bf16.msra.mxu0 %v12467_v63  ;;  %8521 = vmatpush3.bf16.msra.mxu1 %v12470_v20 }
 0x80d   : > { %3679 = vmatprep.subr.bf16.mxu0 %v12475_v8  ;;  %8526 = vmatprep.subr.bf16.mxu1 %v15160_v54  ;;  %v12490_v8 = vld [vmem:[#allocation8 + $0x90] ss:$12 sps:$4 sm:$0xff]  }
 0x80f   : > { %3568 = vmatmul.mubr.bf16.vlgmr.msra.gmra.mxu0 %v3534_v43  ;;  %8523 = vmatmul.mubr.bf16.vlgmr.msra.gmra.mxu1 %v3534_v43  ;;  %v12494_v43 = vld [vmem:[#allocation8 + $0x7c] ss:$12 sps:$4 sm:$0xff]  }
 0x810   : > { %3680 = vmatpush1.bf16.msra.mxu0 %v12479_v3  ;;  %8527 = vmatpush3.bf16.msra.mxu1 %v12175_v31  ;;  %15460 = vst [vmem:[#allocation79_spill] sm:$0xff] %v12494_v43 }
 0x811   : > { %3681 = vmatprep.subr.bf16.mxu0 %v12483_v22  ;;  %8528 = vmatprep.subr.bf16.mxu1 %v15160_v54 }
 0x812   : > { %3711 = vmatprep.mubr.bf16.mxu0 %v15154_v52  ;;  %8542 = vmatprep.mubr.msk.bf16.mxu1 %vm10558_vm0, %v15160_v54 }
 0x814   : > { %3682 = vmatpush1.bf16.msra.mxu0 %v12490_v8  ;;  %8529 = vmatpush3.bf16.msra.mxu1 %v12184_v6 }
 0x815   : > { %3683 = vmatprep.subr.bf16.mxu0 %v12494_v43  ;;  %8530 = vmatprep.subr.bf16.mxu1 %v15160_v54 }
 0x818   : > { %3684 = vmatpush1.bf16.msra.mxu0 %v12189_v2  ;;  %8531 = vmatpush3.bf16.msra.mxu1 %v12192_v23 }
 0x819   : > { %3685 = vmatprep.subr.bf16.mxu0 %v12195_v19  ;;  %8532 = vmatprep.subr.bf16.mxu1 %v15160_v54 }
 0x81c   : > { %3686 = vmatpush1.bf16.msra.mxu0 %v12199_v1  ;;  %8533 = vmatpush3.bf16.msra.mxu1 %v12202_v32 }
 0x81d   : > { %3687 = vmatprep.subr.bf16.mxu0 %v12205_v36  ;;  %8534 = vmatprep.subr.bf16.mxu1 %v15160_v54 }
 0x820   : > { %3688 = vmatpush1.bf16.msra.mxu0 %v12209_v24  ;;  %8535 = vmatpush3.bf16.msra.mxu1 %v12212_v9 }
 0x821   : > { %3689 = vmatprep.subr.bf16.mxu0 %v12215_v0  ;;  %8536 = vmatprep.subr.bf16.mxu1 %v15160_v54 }
 0x824   : > { %3690 = vmatpush1.bf16.msra.mxu0 %v12219_v39  ;;  %8537 = vmatpush3.bf16.msra.mxu1 %v12222_v46 }
 0x825   : > { %3691 = vmatprep.subr.bf16.mxu0 %v12225_v34  ;;  %8538 = vmatprep.subr.bf16.mxu1 %v15160_v54 }
 0x828   : > { %3692 = vmatpush1.bf16.msra.mxu0 %v12229_v35  ;;  %8539 = vmatpush3.bf16.msra.mxu1 %v12232_v13 }
 0x829   : > { %3693 = vmatprep.subr.bf16.mxu0 %v12235_v50  ;;  %8540 = vmatprep.subr.bf16.mxu1 %v15160_v54 }
 0x82c   : > { %3694 = vmatpush1.bf16.msra.mxu0 %v12239_v42  ;;  %8541 = vmatpush3.bf16.msra.mxu1 %v12242_v33 }
 0x82d   : > { %3808 = vmatprep.subr.bf16.mxu0 %v12245_v4  ;;  %8546 = vmatprep.subr.bf16.mxu1 %v15160_v54 }
 0x82f   : > { %3712 = vmatmul.mubr.bf16.vlgmr.msra.gmra.mxu0 %v12386_v10  ;;  %8543 = vmatmul.mubr.bf16.vlgmr.msra.gmra.mxu1 %v12386_v10  ;;  %v15461_v10 = vld [vmem:[#allocation124_spill] sm:$0xff] }
 0x830   : > { %3809 = vmatpush1.bf16.msra.mxu0 %v12251_v5  ;;  %8547 = vmatpush3.bf16.msra.mxu1 %v12254_v62  ;;  %v15463_v62 = vld [vmem:[#allocation126_spill] sm:$0xff]  ;;  %v15464_v5 = vld [vmem:[#allocation127_spill] sm:$0xff] }
 0x831   : > { %3810 = vmatprep.subr.bf16.mxu0 %v12257_v37  ;;  %8548 = vmatprep.subr.bf16.mxu1 %v15160_v54  ;;  %v15462_v37 = vld [vmem:[#allocation125_spill] sm:$0xff] }
 0x832   : > { %3840 = vmatprep.mubr.bf16.mxu0 %v15154_v52  ;;  %8562 = vmatprep.mubr.msk.bf16.mxu1 %vm10558_vm0, %v15160_v54 }
 0x834   : > { %3811 = vmatpush1.bf16.msra.mxu0 %v12264_v14  ;;  %8549 = vmatpush3.bf16.msra.mxu1 %v12267_v60  ;;  %v15465_v60 = vld [vmem:[#allocation128_spill] sm:$0xff]  ;;  %v15467_v14 = vld [vmem:[#allocation130_spill] sm:$0xff] }
 0x835   : > { %3812 = vmatprep.subr.bf16.mxu0 %v12270_v11  ;;  %8550 = vmatprep.subr.bf16.mxu1 %v15160_v54  ;;  %v15466_v11 = vld [vmem:[#allocation129_spill] sm:$0xff] }
 0x838   : > { %3813 = vmatpush1.bf16.msra.mxu0 %v12274_v58  ;;  %8551 = vmatpush3.bf16.msra.mxu1 %v12277_v45  ;;  %v15468_v45 = vld [vmem:[#allocation131_spill] sm:$0xff]  ;;  %v15470_v58 = vld [vmem:[#allocation133_spill] sm:$0xff] }
 0x839   : > { %3814 = vmatprep.subr.bf16.mxu0 %v15461_v10  ;;  %8552 = vmatprep.subr.bf16.mxu1 %v15160_v54  ;;  %v15469_v10 = vld [vmem:[#allocation132_spill] sm:$0xff] }
 0x83c   : > { %3815 = vmatpush1.bf16.msra.mxu0 %v15462_v37  ;;  %8553 = vmatpush3.bf16.msra.mxu1 %v15463_v62  ;;  %v15471_v62 = vld [vmem:[#allocation134_spill] sm:$0xff]  ;;  %v15473_v37 = vld [vmem:[#allocation136_spill] sm:$0xff] }
 0x83d   : > { %3816 = vmatprep.subr.bf16.mxu0 %v15464_v5  ;;  %8554 = vmatprep.subr.bf16.mxu1 %v15160_v54  ;;  %v15472_v5 = vld [vmem:[#allocation135_spill] sm:$0xff] }
 0x840   : > { %3817 = vmatpush1.bf16.msra.mxu0 %v15465_v60  ;;  %8555 = vmatpush3.bf16.msra.mxu1 %v15466_v11  ;;  %v15474_v11 = vld [vmem:[#allocation137_spill] sm:$0xff]  ;;  %v15476_v60 = vld [vmem:[#allocation139_spill] sm:$0xff] }
 0x841   : > { %3818 = vmatprep.subr.bf16.mxu0 %v15467_v14  ;;  %8556 = vmatprep.subr.bf16.mxu1 %v15160_v54  ;;  %v15475_v14 = vld [vmem:[#allocation138_spill] sm:$0xff] }
 0x844   : > { %3819 = vmatpush1.bf16.msra.mxu0 %v15468_v45  ;;  %8557 = vmatpush3.bf16.msra.mxu1 %v15469_v10 }
 0x845   : > { %3820 = vmatprep.subr.bf16.mxu0 %v15470_v58  ;;  %8558 = vmatprep.subr.bf16.mxu1 %v15160_v54 }
 0x848   : > { %3821 = vmatpush1.bf16.msra.mxu0 %v15471_v62  ;;  %8559 = vmatpush3.bf16.msra.mxu1 %v15472_v5 }
 0x849   : > { %3822 = vmatprep.subr.bf16.mxu0 %v15473_v37  ;;  %8560 = vmatprep.subr.bf16.mxu1 %v15160_v54  ;;  %v15477_v37 = vld [vmem:[#allocation17_spill] sm:$0xff] }
 0x84c   : > { %3823 = vmatpush1.bf16.msra.mxu0 %v15474_v11  ;;  %8561 = vmatpush3.bf16.msra.mxu1 %v15475_v14 }
 0x84d   : > { %3893 = vmatprep.subr.bf16.mxu0 %v15476_v60  ;;  %8566 = vmatprep.subr.bf16.mxu1 %v15160_v54 }
 0x8af   : > { %v3527_v10 = vpop.f32.mrf.mxu1  ;;  %v3484_v62 = vpop.f32.mrf.mxu0 }
 0x8b0   : > { %v3485_v50 = vadd.f32 %v3484_v62, %v15477_v37  ;;  %v3528_v19 = vadd.f32 %v3527_v10, %v11443_v7 }
 0x8b1   : > { %v8504_v58 = vpop.f32.mrf.mxu1  ;;  %v3486_v33 = vpop.f32.mrf.mxu0 }
 0x8b2   : > { %v3487_v0 = vadd.f32 %v3486_v33, %v11428_v29  ;;  %v15479_v33 = vld [vmem:[#allocation86_spill] sm:$0xff] }
 0x8b3   : > { %v12559_v45 = vpop.f32.mrf.mxu1  ;;  %v3488_v5 = vpop.f32.mrf.mxu0 }
 0x8b4   : > { %v3489_v60 = vadd.f32 %v3488_v5, %v15477_v37  ;;  %v15478_v37 = vld [vmem:[#allocation47_spill] sm:$0xff]  ;;  %v3531_v2 = vadd.f32 %v12559_v45, %v11443_v7 }
 0x8b5   : > { %v8505_v4 = vpop.f32.mrf.mxu1  ;;  %v12561_v42 = vpop.f32.mrf.mxu0 }
 0x8cf   : > { %v3569_v13 = vpop.f32.mrf.mxu0  ;;  %v3612_v11 = vpop.f32.mrf.mxu1 }
 0x8d0   : > { %v3619_v35 = vadd.f32 %v3569_v13, %v3485_v50 }
 0x8d1   : > { %v3571_v14 = vpop.f32.mrf.mxu0  ;;  %v8524_v34 = vpop.f32.mrf.mxu1 }
 0x8d2   : > { %v7571_v46 = vmul.f32 -1.442695, %v3619_v35  ;;  %v3620_v24 = vadd.f32 %v3571_v14, %v3487_v0  ;;  %v4022_v14 = vstv %s4021_s10 }
 0x8d3   : > { %v3573_v39 = vpop.f32.mrf.mxu0  ;;  %v3615_v58 = vpop.f32.mrf.mxu1 }
 0x8d4   : > { %9585 = vpow2.f32 %v7571_v46  ;;  %v3621_v4 = vadd.f32 %v3573_v39, %v3489_v60  ;;  %v7572_v62 = vmul.f32 -1.442695, %v3620_v24  ;;  %v745_v46 = vadd.f32 %v15479_v33, %v15478_v37  ;;  %v15480_v60 = vld [vmem:[#allocation51_spill] sm:$0xff] }
 0x8d5   : > { %v8525_v9 = vpop.f32.mrf.mxu1  ;;  %v12566_v5 = vpop.f32.mrf.mxu0  ;;  %vm4023_vm13 = vcmp.eq.s32.totalorder %v15480_v60, %v4022_v14 }
 0x8d6   : > { %v7573_v36 = vmul.f32 -1.442695, %v3621_v4  ;;  %v15481_v4 = vld [vmem:[#allocation52_spill] sm:$0xff]  ;;  %v4025_v33 = vsel %vm4023_vm13, 1, %v15154_v52 }
 0x8d7   : > { %vm4024_vm14 = vcmp.eq.s32.totalorder %v15481_v4, %v4022_v14  ;;  %4028 = vperm.xlu0 %9219, %v4025_v33  }
 0x8d8   : > { %9587 = vpow2.f32 %v7573_v36  ;;  %v12574_v36 = vld [vmem:[%s14731_s5 + $0x1] ss:$0 sm:$0xff]  ;;  %v4026_v1 = vsel %vm4024_vm14, 1, %v15154_v52 }
 0x8d9   : > { %9589 = vpow2.f32 %v7572_v62  ;;  %4031 = vperm.xlu1 %9220, %v4026_v1  }
 0x8e1   : > { %v9586_v32 = vpop.eup %9585 }
 0x8e2   : > { %v3635_v13 = vadd.f32 1.0, %v9586_v32  ;;  %v3647_v32 = vadd.f32 %v12574_v36, %v3612_v11 }
 0x8e4   : > { %9591 = vrcp.f32 %v3635_v13  ;;  %v15482_v13 = vld [vmem:[#allocation88_spill] sm:$0xff] }
 0x8e5   : > { %v9588_v34 = vpop.eup %9587 }
 0x8e6   : > { %v3637_v50 = vadd.f32 1.0, %v9588_v34  ;;  %v9590_v35 = vpop.eup %9589  ;;  %v749_v34 = vadd.f32 %v15482_v13, %v15478_v37  ;;  %v3648_v13 = vadd.f32 %v12574_v36, %v3615_v58 }
 0x8e7   : > { %v3636_v39 = vadd.f32 1.0, %v9590_v35 }
 0x8e8   : > { %9593 = vrcp.f32 %v3637_v50 }
 0x8e9   : > { %9595 = vrcp.f32 %v3636_v39 }
 0x8ef   : > { %v3713_v9 = vpop.f32.mrf.mxu0  ;;  %v3756_v0 = vpop.f32.mrf.mxu1 }
 0x8f0   : > { %v3763_v24 = vadd.f32 %v3713_v9, %v745_v46  ;;  %v15483_v46 = vld [vmem:[#allocation87_spill] sm:$0xff] }
 0x8f1   : > { %v9592_v62 = vpop.eup %9591  ;;  %v3715_v50 = vpop.f32.mrf.mxu0  ;;  %v747_v9 = vadd.f32 %v15483_v46, %v11095_v28 }
 0x8f2   : > { %v8544_v35 = vpop.f32.mrf.mxu1  ;;  %v3649_v23 = vmul.f32 %v9592_v62, %v3647_v32  ;;  %v7575_v11 = vmul.f32 -1.442695, %v3763_v24  ;;  %v15484_v62 = vld [vmem:[#allocation89_spill] sm:$0xff] }
 0x8f3   : > { %v3717_v14 = vpop.f32.mrf.mxu0  ;;  %v3764_v32 = vadd.f32 %v3715_v50, %v747_v9  ;;  %v751_v33 = vadd.f32 %v15484_v62, %v11095_v28 }
 0x8f4   : > { %v3759_v4 = vpop.f32.mrf.mxu1  ;;  %v3651_v60 = vadd.f32 %v3649_v23, %v3528_v19  ;;  %9597 = vpow2.f32 %v7575_v11  ;;  %v3765_v35 = vadd.f32 %v3717_v14, %v749_v34 }
 0x8f5   : > { %v9594_v37 = vpop.eup %9593  ;;  %v3719_v1 = vpop.f32.mrf.mxu0  ;;  %v7576_v19 = vmul.f32 -1.442695, %v3764_v32  ;;  %v3791_v32 = vadd.f32 %v12369_v16, %v3756_v0 }
 0x8f6   : > { %v8545_v10 = vpop.f32.mrf.mxu1  ;;  %9599 = vtanh.f32 %v3651_v60  ;;  %v3650_v39 = vmul.f32 %v9594_v37, %v3648_v13  ;;  %v7577_v24 = vmul.f32 -1.442695, %v3765_v35  ;;  %v3766_v23 = vadd.f32 %v3719_v1, %v751_v33  ;;  %v9596_v34 = vpop.eup %9595 }
 0x8f7   : > { %v3655_v14 = vsub.f32 1.0, %v9596_v34  ;;  %v3659_v50 = vmul.f32 %v9596_v34, %v12364_v27  ;;  %v3491_v33 = vadd.f32 %v12561_v42, %v11428_v29  ;;  %v15536_v27 = vld [vmem:[#allocation47_spill] sm:$0xff] }
 0x8f8   : > { %v12591_v46 = vadd.f32 %v3650_v39, %v3531_v2  ;;  %9601 = vpow2.f32 %v7577_v24  ;;  %v7578_v58 = vmul.f32 -1.442695, %v3766_v23  ;;  %v15486_v23 = vld [vmem:[#allocation31_spill] sm:$0xff] }
 0x8f9   : > { %9603 = vpow2.f32 %v7576_v19 }
 0x8fa   : > { %9605 = vpow2.f32 %v7578_v58  ;;  %v3792_v58 = vadd.f32 %v12369_v16, %v3759_v4 }
 0x901   : > { %v9598_v11 = vpop.eup %9597 }
 0x902   : > { %v3779_v45 = vadd.f32 1.0, %v9598_v11  ;;  %v15487_v11 = vld [vmem:[#allocation19_spill] sm:$0xff] }
 0x903   : > { %v9600_v60 = vpop.eup %9599 }
 0x904   : > { %9607 = vrcp.f32 %v3779_v45  ;;  %v3657_v37 = vmul.f32 %v9600_v60, %v3655_v14  ;;  %v15488_v45 = vld [vmem:[#allocation33_spill] sm:$0xff]  ;;  %v3622_v60 = vadd.f32 %v12566_v5, %v3491_v33 }
 0x905   : > { %v9602_v9 = vpop.eup %9601  ;;  %v929_v14 = vadd.f32 %v15488_v45, %v15487_v11 }
 0x906   : > { %v3781_v13 = vadd.f32 1.0, %v9602_v9  ;;  %v12594_v35 = vadd.f32 %v3659_v50, %v3657_v37  ;;  %v9604_v2 = vpop.eup %9603  ;;  %v7574_v50 = vmul.f32 -1.442695, %v3622_v60 }
 0x907   : > { %v9606_v10 = vpop.eup %9605  ;;  %v3780_v39 = vadd.f32 1.0, %v9604_v2 }
 0x908   : > { %15485 = vst [vmem:[#allocation78_spill] sm:$0xff] %v12594_v35  ;;  %9609 = vrcp.f32 %v3781_v13  ;;  %v3782_v1 = vadd.f32 1.0, %v9606_v10 }
 0x909   : > { %9611 = vrcp.f32 %v3780_v39 }
 0x90a   : > { %9613 = vrcp.f32 %v3782_v1 }
 0x911   : > { %v9608_v24 = vpop.eup %9607 }
 0x912   : > { %v3793_v62 = vmul.f32 %v9608_v24, %v3791_v32 }
 0x914   : > { %v3795_v19 = vadd.f32 %v3793_v62, %v15486_v23 }
 0x915   : > { %v9610_v34 = vpop.eup %9609 }
 0x916   : > { %9615 = vtanh.f32 %v3795_v19  ;;  %v3794_v0 = vmul.f32 %v9610_v34, %v3792_v58  ;;  %v9612_v9 = vpop.eup %9611  ;;  %v15489_v58 = vld [vmem:[#allocation141_spill] sm:$0xff]  ;;  %v15490_v34 = vld [vmem:[#allocation142_spill] sm:$0xff] }
 0x917   : > { %v9614_v13 = vpop.eup %9613  ;;  %v3799_v42 = vsub.f32 1.0, %v9612_v9  ;;  %v3803_v4 = vmul.f32 %v9612_v9, %v12379_v61  ;;  %v15495_v9 = vld [vmem:[#allocation55_spill] sm:$0xff] }
 0x918   : > { %v3796_v37 = vadd.f32 %v3794_v0, %v929_v14  ;;  %v3800_v39 = vsub.f32 1.0, %v9614_v13  ;;  %v3804_v5 = vmul.f32 %v9614_v13, %v12382_v12  ;;  %v15496_v13 = vld [vmem:[#allocation54_spill] sm:$0xff] }
 0x91a   : > { %9617 = vtanh.f32 %v3796_v37  ;;  %v15492_v37 = vld [vmem:[#allocation75_spill] sm:$0xff] }
 0x91b   : > { %9619 = vpow2.f32 %v7574_v50  ;;  %v15493_v50 = vld [vmem:[#allocation22_spill] sm:$0xff] }
 0x923   : > { %v9616_v2 = vpop.eup %9615 }
 0x924   : > { %v3801_v10 = vmul.f32 %v9616_v2, %v3799_v42  ;;  %v15497_v42 = vld [vmem:[#allocation56_spill] sm:$0xff]  ;;  %v15498_v2 = vld [vmem:[#allocation25_spill] sm:$0xff] }
 0x926   : > { %v12605_v32 = vadd.f32 %v3803_v4, %v3801_v10  ;;  %v15500_v10 = vld [vmem:[#allocation57_spill] sm:$0xff]  ;;  %v15501_v4 = vld [vmem:[#allocation58_spill] sm:$0xff] }
 0x927   : > { %v9618_v24 = vpop.eup %9617 }
 0x928   : > { %v3802_v1 = vmul.f32 %v9618_v24, %v3800_v39  ;;  %v9620_v33 = vpop.eup %9619  ;;  %v15502_v39 = vld [vmem:[#allocation60_spill] sm:$0xff]  ;;  %v15503_v24 = vld [vmem:[#allocation61_spill] sm:$0xff] }
 0x929   : > { %v3638_v19 = vadd.f32 1.0, %v9620_v33  ;;  %v15506_v33 = vld [vmem:[#allocation65_spill] sm:$0xff] }
 0x92a   : > { %v12608_v62 = vadd.f32 %v3804_v5, %v3802_v1  ;;  %v15504_v1 = vld [vmem:[#allocation62_spill] sm:$0xff]  ;;  %v15505_v5 = vld [vmem:[#allocation64_spill] sm:$0xff] }
 0x92b   : > { %9621 = vrcp.f32 %v3638_v19  ;;  %v15507_v19 = vld [vmem:[#allocation66_spill] sm:$0xff] }
 0x92c   : > { %v12612_v23 = vpack.c.bf16 %v12608_v62, %v12605_v32  ;;  %9623 = vtanh.f32 %v12591_v46 }
 0x92e   : > { %3841 = vmatmul.mubr.bf16.vlgmr.msra.gmra.mxu0 %v12612_v23  ;;  %8563 = vmatmul.mubr.bf16.vlgmr.msra.gmra.mxu1 %v12612_v23 }
 0x92f   : > { %3894 = vmatpush1.bf16.msra.mxu0 %v12390_v38  ;;  %8567 = vmatpush3.bf16.msra.mxu1 %v12393_v30 }
 0x930   : > { %3895 = vmatprep.subr.bf16.mxu0 %v12396_v17  ;;  %8568 = vmatprep.subr.bf16.mxu1 %v15160_v54 }
 0x931   : > { %3925 = vmatprep.mubr.bf16.mxu0 %v15154_v52  ;;  %8582 = vmatprep.mubr.msk.bf16.mxu1 %vm10558_vm0, %v15160_v54 }
 0x933   : > { %3896 = vmatpush1.bf16.msra.mxu0 %v12403_v15  ;;  %8569 = vmatpush3.bf16.msra.mxu1 %v12406_v26 }
 0x934   : > { %3897 = vmatprep.subr.bf16.mxu0 %v12410_v41  ;;  %8570 = vmatprep.subr.bf16.mxu1 %v15160_v54 }
 0x937   : > { %3898 = vmatpush1.bf16.msra.mxu0 %v12414_v47  ;;  %8571 = vmatpush3.bf16.msra.mxu1 %v12417_v51 }
 0x938   : > { %3899 = vmatprep.subr.bf16.mxu0 %v12420_v56  ;;  %8572 = vmatprep.subr.bf16.mxu1 %v15160_v54  ;;  %v9622_v61 = vpop.eup %9621 }
 0x939   : > { %v9624_v12 = vpop.eup %9623  ;;  %v3656_v46 = vsub.f32 1.0, %v9622_v61  ;;  %v3660_v14 = vmul.f32 %v9622_v61, %v12461_v55  ;;  %v15508_v61 = vld [vmem:[#allocation68_spill] sm:$0xff] }
 0x93b   : > { %3900 = vmatpush1.bf16.msra.mxu0 %v12424_v21  ;;  %8573 = vmatpush3.bf16.msra.mxu1 %v12427_v44  ;;  %v3658_v45 = vmul.f32 %v9624_v12, %v3656_v46  ;;  %v15509_v12 = vld [vmem:[#allocation69_spill] sm:$0xff]  ;;  %v15510_v46 = vld [vmem:[#allocation70_spill] sm:$0xff] }
 0x93c   : > { %3901 = vmatprep.subr.bf16.mxu0 %v12430_v48  ;;  %8574 = vmatprep.subr.bf16.mxu1 %v15160_v54 }
 0x93d   : > { %v12647_v60 = vadd.f32 %v3660_v14, %v3658_v45  ;;  %v15511_v45 = vld [vmem:[#allocation72_spill] sm:$0xff]  ;;  %v15512_v14 = vld [vmem:[#allocation73_spill] sm:$0xff] }
 0x93f   : > { %3902 = vmatpush1.bf16.msra.mxu0 %v12434_v25  ;;  %8575 = vmatpush3.bf16.msra.mxu1 %v12437_v49  ;;  %15491 = vst [vmem:[#allocation80_spill] sm:$0xff] %v12647_v60  ;;  %v3892_v0 = vpack.c.bf16 %v12647_v60, %v12594_v35 }
 0x940   : > { %3903 = vmatprep.subr.bf16.mxu0 %v12440_v59  ;;  %8576 = vmatprep.subr.bf16.mxu1 %v15160_v54 }
 0x943   : > { %3904 = vmatpush1.bf16.msra.mxu0 %v15489_v58  ;;  %8577 = vmatpush3.bf16.msra.mxu1 %v15490_v34 }
 0x944   : > { %3905 = vmatprep.subr.bf16.mxu0 %v12450_v18  ;;  %8578 = vmatprep.subr.bf16.mxu1 %v15160_v54 }
 0x947   : > { %3906 = vmatpush1.bf16.msra.mxu0 %v12455_v40  ;;  %8579 = vmatpush3.bf16.msra.mxu1 %v12458_v53 }
 0x948   : > { %3907 = vmatprep.subr.bf16.mxu0 %v12463_v57  ;;  %8580 = vmatprep.subr.bf16.mxu1 %v15160_v54 }
 0x94b   : > { %3908 = vmatpush1.bf16.msra.mxu0 %v12467_v63  ;;  %8581 = vmatpush3.bf16.msra.mxu1 %v12470_v20 }
 0x94c   : > { %4037 = vmatprep.subr.bf16.mxu0 %v15492_v37  ;;  %8586 = vmatprep.subr.bf16.mxu1 %v15160_v54 }
 0x94e   : > { %3926 = vmatmul.mubr.bf16.vlgmr.msra.gmra.mxu0 %v3892_v0  ;;  %8583 = vmatmul.mubr.bf16.vlgmr.msra.gmra.mxu1 %v3892_v0  ;;  %v15513_v0 = vld [vmem:[#allocation74_spill] sm:$0xff] }
 0x94f   : > { %4038 = vmatpush1.bf16.msra.mxu0 %v12479_v3  ;;  %8587 = vmatpush3.bf16.msra.mxu1 %v12175_v31  ;;  %v15494_v31 = vld [vmem:[#allocation24_spill] sm:$0xff] }
 0x950   : > { %4039 = vmatprep.subr.bf16.mxu0 %v12483_v22  ;;  %8588 = vmatprep.subr.bf16.mxu1 %v15160_v54 }
 0x951   : > { %4069 = vmatprep.mubr.bf16.mxu0 %v15154_v52  ;;  %8602 = vmatprep.mubr.msk.bf16.mxu1 %vm10558_vm0, %v15160_v54 }
 0x953   : > { %4040 = vmatpush1.bf16.msra.mxu0 %v12490_v8  ;;  %8589 = vmatpush3.bf16.msra.mxu1 %v12184_v6  ;;  %v15499_v6 = vld [vmem:[#allocation21_spill] sm:$0xff] }
 0x954   : > { %4041 = vmatprep.subr.bf16.mxu0 %v12494_v43  ;;  %8590 = vmatprep.subr.bf16.mxu1 %v15160_v54 }
 0x957   : > { %4042 = vmatpush1.bf16.msra.mxu0 %v15493_v50  ;;  %8591 = vmatpush3.bf16.msra.mxu1 %v15494_v31  ;;  %v15514_v50 = vld [vmem:[#allocation76_spill] sm:$0xff]  ;;  %v15515_v31 = vld [vmem:[#allocation77_spill] sm:$0xff] }
 0x958   : > { %4043 = vmatprep.subr.bf16.mxu0 %v15495_v9  ;;  %8592 = vmatprep.subr.bf16.mxu1 %v15160_v54  ;;  %v15516_v9 = vld [vmem:[#allocation81_spill] sm:$0xff] }
 0x95b   : > { %4044 = vmatpush1.bf16.msra.mxu0 %v15496_v13  ;;  %8593 = vmatpush3.bf16.msra.mxu1 %v15497_v42  ;;  %v15518_v13 = vld [vmem:[#allocation123_spill] sm:$0xff]  ;;  %v15519_v42 = vld [vmem:[#allocation124_spill] sm:$0xff] }
 0x95c   : > { %4045 = vmatprep.subr.bf16.mxu0 %v15498_v2  ;;  %8594 = vmatprep.subr.bf16.mxu1 %v15160_v54  ;;  %v15520_v2 = vld [vmem:[#allocation125_spill] sm:$0xff] }
 0x95f   : > { %4046 = vmatpush1.bf16.msra.mxu0 %v15499_v6  ;;  %8595 = vmatpush3.bf16.msra.mxu1 %v15500_v10  ;;  %v15521_v6 = vld [vmem:[#allocation126_spill] sm:$0xff]  ;;  %v15522_v10 = vld [vmem:[#allocation127_spill] sm:$0xff] }
 0x960   : > { %4047 = vmatprep.subr.bf16.mxu0 %v15501_v4  ;;  %8596 = vmatprep.subr.bf16.mxu1 %v15160_v54  ;;  %v15523_v4 = vld [vmem:[#allocation128_spill] sm:$0xff] }
 0x963   : > { %4048 = vmatpush1.bf16.msra.mxu0 %v15502_v39  ;;  %8597 = vmatpush3.bf16.msra.mxu1 %v15503_v24  ;;  %v15524_v39 = vld [vmem:[#allocation129_spill] sm:$0xff]  ;;  %v15525_v24 = vld [vmem:[#allocation130_spill] sm:$0xff] }
 0x964   : > { %4049 = vmatprep.subr.bf16.mxu0 %v15504_v1  ;;  %8598 = vmatprep.subr.bf16.mxu1 %v15160_v54  ;;  %v15526_v1 = vld [vmem:[#allocation131_spill] sm:$0xff] }
 0x967   : > { %4050 = vmatpush1.bf16.msra.mxu0 %v15505_v5  ;;  %8599 = vmatpush3.bf16.msra.mxu1 %v15506_v33  ;;  %v15527_v5 = vld [vmem:[#allocation132_spill] sm:$0xff]  ;;  %v15528_v33 = vld [vmem:[#allocation133_spill] sm:$0xff] }
 0x968   : > { %4051 = vmatprep.subr.bf16.mxu0 %v15507_v19  ;;  %8600 = vmatprep.subr.bf16.mxu1 %v15160_v54  ;;  %v15529_v19 = vld [vmem:[#allocation134_spill] sm:$0xff] }
 0x96b   : > { %4052 = vmatpush1.bf16.msra.mxu0 %v15508_v61  ;;  %8601 = vmatpush3.bf16.msra.mxu1 %v15509_v12  ;;  %v15530_v61 = vld [vmem:[#allocation135_spill] sm:$0xff]  ;;  %v15531_v12 = vld [vmem:[#allocation136_spill] sm:$0xff] }
 0x96c   : > { %4166 = vmatprep.subr.bf16.mxu0 %v15510_v46  ;;  %8606 = vmatprep.subr.bf16.mxu1 %v15160_v54  ;;  %v15532_v46 = vld [vmem:[#allocation137_spill] sm:$0xff] }
 0x96e   : > { %4070 = vmatmul.mubr.bf16.vlgmr.msra.gmra.mxu0 %v12612_v23  ;;  %8603 = vmatmul.mubr.bf16.vlgmr.msra.gmra.mxu1 %v12612_v23  ;;  %v15517_v23 = vld [vmem:[#allocation122_spill] sm:$0xff] }
 0x96f   : > { %4167 = vmatpush1.bf16.msra.mxu0 %v15511_v45  ;;  %8607 = vmatpush3.bf16.msra.mxu1 %v15512_v14  ;;  %v15533_v45 = vld [vmem:[#allocation138_spill] sm:$0xff]  ;;  %v15534_v14 = vld [vmem:[#allocation139_spill] sm:$0xff] }
 0x970   : > { %4168 = vmatprep.subr.bf16.mxu0 %v15513_v0  ;;  %8608 = vmatprep.subr.bf16.mxu1 %v15160_v54 }
 0x971   : > { %4198 = vmatprep.mubr.bf16.mxu0 %v15154_v52  ;;  %8622 = vmatprep.mubr.msk.bf16.mxu1 %vm10558_vm0, %v15160_v54 }
 0x973   : > { %4169 = vmatpush1.bf16.msra.mxu0 %v15514_v50  ;;  %8609 = vmatpush3.bf16.msra.mxu1 %v15515_v31 }
 0x974   : > { %4170 = vmatprep.subr.bf16.mxu0 %v15516_v9  ;;  %8610 = vmatprep.subr.bf16.mxu1 %v15160_v54 }
 0x977   : > { %4171 = vmatpush1.bf16.msra.mxu0 %v15517_v23  ;;  %8611 = vmatpush3.bf16.msra.mxu1 %v15518_v13 }
 0x978   : > { %4172 = vmatprep.subr.bf16.mxu0 %v15519_v42  ;;  %8612 = vmatprep.subr.bf16.mxu1 %v15160_v54 }
 0x97b   : > { %4173 = vmatpush1.bf16.msra.mxu0 %v15520_v2  ;;  %8613 = vmatpush3.bf16.msra.mxu1 %v15521_v6  ;;  %v15535_v6 = vld [vmem:[#allocation17_spill] sm:$0xff] }
 0x97c   : > { %4174 = vmatprep.subr.bf16.mxu0 %v15522_v10  ;;  %8614 = vmatprep.subr.bf16.mxu1 %v15160_v54 }
 0x97f   : > { %4175 = vmatpush1.bf16.msra.mxu0 %v15523_v4  ;;  %8615 = vmatpush3.bf16.msra.mxu1 %v15524_v39 }
 0x980   : > { %4176 = vmatprep.subr.bf16.mxu0 %v15525_v24  ;;  %8616 = vmatprep.subr.bf16.mxu1 %v15160_v54 }
 0x983   : > { %4177 = vmatpush1.bf16.msra.mxu0 %v15526_v1  ;;  %8617 = vmatpush3.bf16.msra.mxu1 %v15527_v5 }
 0x984   : > { %4178 = vmatprep.subr.bf16.mxu0 %v15528_v33  ;;  %8618 = vmatprep.subr.bf16.mxu1 %v15160_v54 }
 0x987   : > { %4179 = vmatpush1.bf16.msra.mxu0 %v15529_v19  ;;  %8619 = vmatpush3.bf16.msra.mxu1 %v15530_v61 }
 0x988   : > { %4180 = vmatprep.subr.bf16.mxu0 %v15531_v12  ;;  %8620 = vmatprep.subr.bf16.mxu1 %v15160_v54 }
 0x98b   : > { %4181 = vmatpush1.bf16.msra.mxu0 %v15532_v46  ;;  %8621 = vmatpush3.bf16.msra.mxu1 %v15533_v45 }
 0x98c   : > { %4251 = vmatprep.subr.bf16.mxu0 %v15534_v14  ;;  %8626 = vmatprep.subr.bf16.mxu1 %v15160_v54 }
 0x9ee   : > { %v3885_v0 = vpop.f32.mrf.mxu1  ;;  %v3842_v23 = vpop.f32.mrf.mxu0 }
 0x9ef   : > { %v3843_v10 = vadd.f32 %v3842_v23, %v15535_v6  ;;  %v3886_v11 = vadd.f32 %v3885_v0, %v11443_v7 }
 0x9f0   : > { %v8564_v50 = vpop.f32.mrf.mxu1  ;;  %v3844_v13 = vpop.f32.mrf.mxu0 }
 0x9f1   : > { %v3845_v46 = vadd.f32 %v3844_v13, %v11428_v29  ;;  %v15537_v13 = vld [vmem:[#allocation90_spill] sm:$0xff] }
 0x9f2   : > { %v12729_v31 = vpop.f32.mrf.mxu1  ;;  %v3846_v42 = vpop.f32.mrf.mxu0 }
 0x9f3   : > { %v3847_v33 = vadd.f32 %v3846_v42, %v15535_v6  ;;  %v3889_v43 = vadd.f32 %v12729_v31, %v11443_v7 }
 0x9f4   : > { %v8565_v9 = vpop.f32.mrf.mxu1  ;;  %v12731_v2 = vpop.f32.mrf.mxu0 }
 0xa0e   : > { %v3927_v4 = vpop.f32.mrf.mxu0  ;;  %v3970_v39 = vpop.f32.mrf.mxu1 }
 0xa0f   : > { %v3977_v24 = vadd.f32 %v3927_v4, %v3843_v10 }
 0xa10   : > { %v3929_v1 = vpop.f32.mrf.mxu0  ;;  %v8584_v5 = vpop.f32.mrf.mxu1 }
 0xa11   : > { %v7579_v19 = vmul.f32 -1.442695, %v3977_v24  ;;  %v3978_v50 = vadd.f32 %v3929_v1, %v3845_v46  ;;  %v4380_v46 = vstv %s4379_s7  ;;  %s6885_s7 = sadd.s32 14, %s11080_s16 }
 0xa12   : > { %v3931_v61 = vpop.f32.mrf.mxu0  ;;  %v3973_v12 = vpop.f32.mrf.mxu1 }
 0xa13   : > { %9625 = vpow2.f32 %v7579_v19  ;;  %v3979_v45 = vadd.f32 %v3931_v61, %v3847_v33  ;;  %v7580_v23 = vmul.f32 -1.442695, %v3978_v50  ;;  %v755_v19 = vadd.f32 %v15537_v13, %v15536_v27  ;;  %v15538_v50 = vld [vmem:[#allocation51_spill] sm:$0xff] }
 0xa14   : > { %v8585_v14 = vpop.f32.mrf.mxu1  ;;  %v12736_v24 = vpop.f32.mrf.mxu0  ;;  %vm4381_vm15 = vcmp.eq.s32.totalorder %v15538_v50, %v4380_v46 }
 0xa15   : > { %v7581_v9 = vmul.f32 -1.442695, %v3979_v45  ;;  %v4005_v45 = vadd.f32 %v12574_v36, %v3970_v39  ;;  %v4383_v13 = vsel %vm4381_vm15, 1, %v15154_v52 }
 0xa16   : > { %4386 = vperm.xlu0 %9219, %v4383_v13   ;;  %v15542_v13 = vld [vmem:[#allocation93_spill] sm:$0xff] }
 0xa17   : > { %9627 = vpow2.f32 %v7581_v9 }
 0xa18   : > { %9629 = vpow2.f32 %v7580_v23  ;;  %v15540_v23 = vld [vmem:[#allocation92_spill] sm:$0xff] }
 0xa20   : > { %v9626_v55 = vpop.eup %9625 }
 0xa21   : > { %v3993_v10 = vadd.f32 1.0, %v9626_v55  ;;  %v15539_v55 = vld [vmem:[#allocation52_spill] sm:$0xff] }
 0xa22   : > { %vm4382_vm1 = vcmp.eq.s32.totalorder %v15539_v55, %v4380_v46 }
 0xa23   : > { %9631 = vrcp.f32 %v3993_v10  ;;  %v759_v10 = vadd.f32 %v15540_v23, %v15536_v27  ;;  %v4006_v23 = vadd.f32 %v12574_v36, %v3973_v12 }
 0xa24   : > { %v9628_v4 = vpop.eup %9627 }
 0xa25   : > { %v3995_v5 = vadd.f32 1.0, %v9628_v4  ;;  %v9630_v42 = vpop.eup %9629 }
 0xa26   : > { %v3994_v33 = vadd.f32 1.0, %v9630_v42  ;;  %v4384_v42 = vsel %vm4382_vm1, 1, %v15154_v52 }
 0xa27   : > { %9633 = vrcp.f32 %v3995_v5  ;;  %4389 = vperm.xlu1 %9220, %v4384_v42   ;;  %v761_v42 = vadd.f32 %v15542_v13, %v11095_v28 }
 0xa28   : > { %9635 = vrcp.f32 %v3994_v33 }
 0xa2e   : > { %v4071_v61 = vpop.f32.mrf.mxu0  ;;  %v4114_v1 = vpop.f32.mrf.mxu1 }
 0xa2f   : > { %v4121_v14 = vadd.f32 %v4071_v61, %v755_v19  ;;  %v15541_v19 = vld [vmem:[#allocation91_spill] sm:$0xff] }
 0xa30   : > { %v9632_v9 = vpop.eup %9631  ;;  %v4073_v4 = vpop.f32.mrf.mxu0  ;;  %v757_v61 = vadd.f32 %v15541_v19, %v11095_v28 }
 0xa31   : > { %v8604_v5 = vpop.f32.mrf.mxu1  ;;  %v4007_v6 = vmul.f32 %v9632_v9, %v4005_v45  ;;  %v7583_v39 = vmul.f32 -1.442695, %v4121_v14 }
 0xa32   : > { %v4075_v46 = vpop.f32.mrf.mxu0  ;;  %v4122_v45 = vadd.f32 %v4073_v4, %v757_v61 }
 0xa33   : > { %v4117_v55 = vpop.f32.mrf.mxu1  ;;  %v4009_v50 = vadd.f32 %v4007_v6, %v3886_v11  ;;  %9637 = vpow2.f32 %v7583_v39  ;;  %v4123_v5 = vadd.f32 %v4075_v46, %v759_v10 }
 0xa34   : > { %v9634_v27 = vpop.eup %9633  ;;  %v4077_v9 = vpop.f32.mrf.mxu0  ;;  %v7584_v6 = vmul.f32 -1.442695, %v4122_v45  ;;  %v4149_v45 = vadd.f32 %v12369_v16, %v4114_v1 }
 0xa35   : > { %v8605_v0 = vpop.f32.mrf.mxu1  ;;  %9639 = vtanh.f32 %v4009_v50  ;;  %v4008_v33 = vmul.f32 %v9634_v27, %v4006_v23  ;;  %v7585_v14 = vmul.f32 -1.442695, %v4123_v5  ;;  %v4124_v11 = vadd.f32 %v4077_v9, %v761_v42  ;;  %v9636_v10 = vpop.eup %9635 }
 0xa36   : > { %v4013_v46 = vsub.f32 1.0, %v9636_v10  ;;  %v4017_v4 = vmul.f32 %v9636_v10, %v12594_v35  ;;  %v3849_v42 = vadd.f32 %v12731_v2, %v11428_v29 }
 0xa37   : > { %v12756_v19 = vadd.f32 %v4008_v33, %v3889_v43  ;;  %9641 = vpow2.f32 %v7585_v14  ;;  %v7586_v12 = vmul.f32 -1.442695, %v4124_v11  ;;  %v15544_v11 = vld [vmem:[#allocation30_spill] sm:$0xff] }
 0xa38   : > { %9643 = vpow2.f32 %v7584_v6 }
 0xa39   : > { %9645 = vpow2.f32 %v7586_v12  ;;  %v4150_v12 = vadd.f32 %v12369_v16, %v4117_v55 }
 0xa40   : > { %v9638_v39 = vpop.eup %9637 }
 0xa41   : > { %v4137_v31 = vadd.f32 1.0, %v9638_v39  ;;  %v3980_v39 = vadd.f32 %v12736_v24, %v3849_v42  ;;  %v12904_v42 = vld [vmem:[#allocation6 + $0x154] ss:$12 sps:$4 sm:$0xff]  }
 0xa42   : > { %v9640_v50 = vpop.eup %9639  ;;  %15568 = vst [vmem:[#allocation56_spill] sm:$0xff] %v12904_v42 }
 0xa43   : > { %9647 = vrcp.f32 %v4137_v31  ;;  %v4015_v27 = vmul.f32 %v9640_v50, %v4013_v46  ;;  %v15545_v46 = vld [vmem:[#allocation32_spill] sm:$0xff]  ;;  %v7582_v1 = vmul.f32 -1.442695, %v3980_v39 }
 0xa44   : > { %v9642_v61 = vpop.eup %9641  ;;  %v12924_v39 = vld [vmem:[#allocation6 + $0x140] ss:$12 sps:$4 sm:$0xff]  }
 0xa45   : > { %v4139_v23 = vadd.f32 1.0, %v9642_v61  ;;  %v12759_v5 = vadd.f32 %v4017_v4, %v4015_v27  ;;  %v9644_v43 = vpop.eup %9643  ;;  %15573 = vst [vmem:[#allocation60_spill] sm:$0xff] %v12924_v39 }
 0xa46   : > { %v9646_v0 = vpop.eup %9645  ;;  %v4138_v33 = vadd.f32 1.0, %v9644_v43 }
 0xa47   : > { %15543 = vst [vmem:[#allocation27_spill] sm:$0xff] %v12759_v5  ;;  %9649 = vrcp.f32 %v4139_v23  ;;  %v4140_v9 = vadd.f32 1.0, %v9646_v0 }
 0xa48   : > { %9651 = vrcp.f32 %v4138_v33 }
 0xa49   : > { %9653 = vrcp.f32 %v4140_v9 }
 0xa50   : > { %v9648_v14 = vpop.eup %9647 }
 0xa51   : > { %v4151_v13 = vmul.f32 %v9648_v14, %v4149_v45 }
 0xa53   : > { %v4153_v6 = vadd.f32 %v4151_v13, %v15544_v11  ;;  %v12911_v11 = vld [vmem:[#allocation6 + $0x150] ss:$12 sps:$4 sm:$0xff]  }
 0xa54   : > { %v9650_v10 = vpop.eup %9649  ;;  %15569 = vst [vmem:[#allocation25_spill] sm:$0xff] %v12911_v11 }
 0xa55   : > { %9655 = vtanh.f32 %v4153_v6  ;;  %v4152_v31 = vmul.f32 %v9650_v10, %v4150_v12  ;;  %v9652_v27 = vpop.eup %9651  ;;  %v12914_v6 = vld [vmem:[#allocation6 + $0x158] ss:$12 sps:$4 sm:$0xff]   ;;  %v12917_v12 = vld [vmem:[#allocation6 + $0x13c] ss:$12 sps:$4 sm:$0xff]  }
 0xa56   : > { %v9654_v4 = vpop.eup %9653  ;;  %v4157_v61 = vsub.f32 1.0, %v9652_v27  ;;  %v4161_v43 = vmul.f32 %v9652_v27, %v12605_v32  ;;  %v12882_v32 = vld [vmem:[#allocation8 + $0x4] ss:$12 sps:$4 sm:$0xff]   ;;  %15570 = vst [vmem:[#allocation21_spill] sm:$0xff] %v12914_v6  ;;  %15571 = vst [vmem:[#allocation57_spill] sm:$0xff] %v12917_v12 }
 0xa57   : > { %v4154_v50 = vadd.f32 %v4152_v31, %v15545_v46  ;;  %v4158_v0 = vsub.f32 1.0, %v9654_v4  ;;  %v4162_v24 = vmul.f32 %v9654_v4, %v12608_v62  ;;  %15562 = vst [vmem:[#allocation142_spill] sm:$0xff] %v12882_v32  ;;  %v12886_v62 = vld [vmem:[#allocation8] ss:$12 sps:$4 sm:$0xff]   ;;  %v12921_v10 = vld [vmem:[#allocation6 + $0x138] ss:$12 sps:$4 sm:$0xff]  }
 0xa58   : > { %15563 = vst [vmem:[#allocation75_spill] sm:$0xff] %v12886_v62  ;;  %15572 = vst [vmem:[#allocation58_spill] sm:$0xff] %v12921_v10  ;;  %v12927_v31 = vld [vmem:[#allocation6 + $0x124] ss:$12 sps:$4 sm:$0xff]   ;;  %v12931_v46 = vld [vmem:[#allocation6 + $0x120] ss:$12 sps:$4 sm:$0xff]  }
 0xa59   : > { %9657 = vtanh.f32 %v4154_v50  ;;  %15574 = vst [vmem:[#allocation61_spill] sm:$0xff] %v12927_v31  ;;  %15575 = vst [vmem:[#allocation62_spill] sm:$0xff] %v12931_v46  ;;  %v12934_v50 = vld [vmem:[#allocation6 + $0x128] ss:$12 sps:$4 sm:$0xff]   ;;  %v12944_v4 = vld [vmem:[#allocation6 + $0x110] ss:$12 sps:$4 sm:$0xff]  }
 0xa5a   : > { %9659 = vpow2.f32 %v7582_v1  ;;  %15576 = vst [vmem:[#allocation64_spill] sm:$0xff] %v12934_v50  ;;  %v12937_v1 = vld [vmem:[#allocation6 + $0x10c] ss:$12 sps:$4 sm:$0xff]   ;;  %v12941_v27 = vld [vmem:[#allocation6 + $0x108] ss:$12 sps:$4 sm:$0xff]   ;;  %15579 = vst [vmem:[#allocation68_spill] sm:$0xff] %v12944_v4 }
 0xa5b   : > { %15577 = vst [vmem:[#allocation65_spill] sm:$0xff] %v12937_v1  ;;  %15578 = vst [vmem:[#allocation66_spill] sm:$0xff] %v12941_v27 }
 0xa62   : > { %v9656_v23 = vpop.eup %9655 }
 0xa63   : > { %v4159_v2 = vmul.f32 %v9656_v23, %v4157_v61  ;;  %v12947_v61 = vld [vmem:[#allocation6 + $0xf4] ss:$12 sps:$4 sm:$0xff]   ;;  %v12951_v23 = vld [vmem:[#allocation6 + $0xf0] ss:$12 sps:$4 sm:$0xff]  }
 0xa64   : > { %15580 = vst [vmem:[#allocation69_spill] sm:$0xff] %v12947_v61  ;;  %15581 = vst [vmem:[#allocation70_spill] sm:$0xff] %v12951_v23 }
 0xa65   : > { %v12769_v16 = vadd.f32 %v4161_v43, %v4159_v2  ;;  %v12954_v2 = vld [vmem:[#allocation6 + $0xf8] ss:$12 sps:$4 sm:$0xff]   ;;  %v12957_v43 = vld [vmem:[#allocation6 + $0xdc] ss:$12 sps:$4 sm:$0xff]  }
 0xa66   : > { %v9658_v55 = vpop.eup %9657  ;;  %15582 = vst [vmem:[#allocation72_spill] sm:$0xff] %v12954_v2  ;;  %15583 = vst [vmem:[#allocation73_spill] sm:$0xff] %v12957_v43 }
 0xa67   : > { %v4160_v33 = vmul.f32 %v9658_v55, %v4158_v0  ;;  %v9660_v14 = vpop.eup %9659  ;;  %v12961_v0 = vld [vmem:[#allocation6 + $0xd8] ss:$12 sps:$4 sm:$0xff]   ;;  %v12964_v55 = vld [vmem:[#allocation6 + $0xe0] ss:$12 sps:$4 sm:$0xff]  }
 0xa68   : > { %v3996_v13 = vadd.f32 1.0, %v9660_v14  ;;  %15584 = vst [vmem:[#allocation74_spill] sm:$0xff] %v12961_v0  ;;  %15585 = vst [vmem:[#allocation76_spill] sm:$0xff] %v12964_v55  ;;  %v12974_v14 = vld [vmem:[#allocation6 + $0xc8] ss:$12 sps:$4 sm:$0xff]  }
 0xa69   : > { %v12772_v45 = vadd.f32 %v4162_v24, %v4160_v33  ;;  %v12967_v33 = vld [vmem:[#allocation6 + $0xc4] ss:$12 sps:$4 sm:$0xff]   ;;  %v12971_v24 = vld [vmem:[#allocation6 + $0xc0] ss:$12 sps:$4 sm:$0xff]   ;;  %15588 = vst [vmem:[#allocation122_spill] sm:$0xff] %v12974_v14 }
 0xa6a   : > { %9661 = vrcp.f32 %v3996_v13  ;;  %15586 = vst [vmem:[#allocation77_spill] sm:$0xff] %v12967_v33  ;;  %15587 = vst [vmem:[#allocation81_spill] sm:$0xff] %v12971_v24 }
 0xa6b   : > { %v12776_v9 = vpack.c.bf16 %v12772_v45, %v12769_v16  ;;  %9663 = vtanh.f32 %v12756_v19  ;;  %v12901_v19 = vld [vmem:[#allocation6 + $0x170] ss:$12 sps:$4 sm:$0xff]  }
 0xa6c   : > { %15567 = vst [vmem:[#allocation54_spill] sm:$0xff] %v12901_v19 }
 0xa6d   : > { %4199 = vmatmul.mubr.bf16.vlgmr.msra.gmra.mxu0 %v12776_v9  ;;  %8623 = vmatmul.mubr.bf16.vlgmr.msra.gmra.mxu1 %v12776_v9 }
 0xa6e   : > { %4252 = vmatpush1.bf16.msra.mxu0 %v12390_v38  ;;  %8627 = vmatpush3.bf16.msra.mxu1 %v12393_v30 }
 0xa6f   : > { %4253 = vmatprep.subr.bf16.mxu0 %v12396_v17  ;;  %8628 = vmatprep.subr.bf16.mxu1 %v15160_v54 }
 0xa70   : > { %4283 = vmatprep.mubr.bf16.mxu0 %v15154_v52  ;;  %8642 = vmatprep.mubr.msk.bf16.mxu1 %vm10558_vm0, %v15160_v54 }
 0xa72   : > { %4254 = vmatpush1.bf16.msra.mxu0 %v12403_v15  ;;  %8629 = vmatpush3.bf16.msra.mxu1 %v12406_v26 }
 0xa73   : > { %4255 = vmatprep.subr.bf16.mxu0 %v12410_v41  ;;  %8630 = vmatprep.subr.bf16.mxu1 %v15160_v54 }
 0xa76   : > { %4256 = vmatpush1.bf16.msra.mxu0 %v12414_v47  ;;  %8631 = vmatpush3.bf16.msra.mxu1 %v12417_v51  ;;  %v12831_v51 = vld [vmem:[#allocation8 + $0x98] ss:$12 sps:$4 sm:$0xff]  }
 0xa77   : > { %4257 = vmatprep.subr.bf16.mxu0 %v12420_v56  ;;  %8632 = vmatprep.subr.bf16.mxu1 %v15160_v54  ;;  %v9662_v38 = vpop.eup %9661  ;;  %v15547_v56 = vld [vmem:[#allocation79_spill] sm:$0xff] }
 0xa78   : > { %v9664_v30 = vpop.eup %9663  ;;  %v4014_v17 = vsub.f32 1.0, %v9662_v38  ;;  %v4018_v26 = vmul.f32 %v9662_v38, %v12647_v60  ;;  %v15590_v60 = vld [vmem:[#allocation17_spill] sm:$0xff] }
 0xa7a   : > { %4258 = vmatpush1.bf16.msra.mxu0 %v12424_v21  ;;  %8633 = vmatpush3.bf16.msra.mxu1 %v12427_v44  ;;  %v4016_v15 = vmul.f32 %v9664_v30, %v4014_v17  ;;  %v12836_v21 = vld [vmem:[#allocation8 + $0x78] ss:$12 sps:$4 sm:$0xff]   ;;  %v12839_v44 = vld [vmem:[#allocation8 + $0x80] ss:$12 sps:$4 sm:$0xff]  }
 0xa7b   : > { %4259 = vmatprep.subr.bf16.mxu0 %v12430_v48  ;;  %8634 = vmatprep.subr.bf16.mxu1 %v15160_v54  ;;  %15548 = vst [vmem:[#allocation144_spill] sm:$0xff] %v12836_v21  ;;  %15549 = vst [vmem:[#allocation82_spill] sm:$0xff] %v12839_v44  ;;  %v12842_v48 = vld [vmem:[#allocation8 + $0x64] ss:$12 sps:$4 sm:$0xff]  }
 0xa7c   : > { %v12811_v41 = vadd.f32 %v4018_v26, %v4016_v15  ;;  %15550 = vst [vmem:[#allocation84_spill] sm:$0xff] %v12842_v48 }
 0xa7e   : > { %4260 = vmatpush1.bf16.msra.mxu0 %v12434_v25  ;;  %8635 = vmatpush3.bf16.msra.mxu1 %v12437_v49  ;;  %15546 = vst [vmem:[#allocation29_spill] sm:$0xff] %v12811_v41  ;;  %v4250_v47 = vpack.c.bf16 %v12811_v41, %v12759_v5  ;;  %v12849_v25 = vld [vmem:[#allocation8 + $0x68] ss:$12 sps:$4 sm:$0xff]   ;;  %v12852_v49 = vld [vmem:[#allocation8 + $0x4c] ss:$12 sps:$4 sm:$0xff]  }
 0xa7f   : > { %4261 = vmatprep.subr.bf16.mxu0 %v12440_v59  ;;  %8636 = vmatprep.subr.bf16.mxu1 %v15160_v54  ;;  %15552 = vst [vmem:[#allocation85_spill] sm:$0xff] %v12849_v25  ;;  %15553 = vst [vmem:[#allocation26_spill] sm:$0xff] %v12852_v49  ;;  %v12856_v59 = vld [vmem:[#allocation8 + $0x48] ss:$12 sps:$4 sm:$0xff]  }
 0xa80   : > { %15554 = vst [vmem:[#allocation28_spill] sm:$0xff] %v12856_v59 }
 0xa82   : > { %4262 = vmatpush1.bf16.msra.mxu0 %v15489_v58  ;;  %8637 = vmatpush3.bf16.msra.mxu1 %v15490_v34  ;;  %v12889_v58 = vld [vmem:[#allocation8 + $0x8] ss:$12 sps:$4 sm:$0xff]   ;;  %v12892_v34 = vld [vmem:[#allocation6 + $0x16c] ss:$12 sps:$4 sm:$0xff]  }
 0xa83   : > { %4263 = vmatprep.subr.bf16.mxu0 %v12450_v18  ;;  %8638 = vmatprep.subr.bf16.mxu1 %v15160_v54  ;;  %v12862_v18 = vld [vmem:[#allocation8 + $0x34] ss:$12 sps:$4 sm:$0xff]   ;;  %15564 = vst [vmem:[#allocation22_spill] sm:$0xff] %v12889_v58  ;;  %15565 = vst [vmem:[#allocation24_spill] sm:$0xff] %v12892_v34 }
 0xa84   : > { %15556 = vst [vmem:[#allocation88_spill] sm:$0xff] %v12862_v18 }
 0xa86   : > { %4264 = vmatpush1.bf16.msra.mxu0 %v12455_v40  ;;  %8639 = vmatpush3.bf16.msra.mxu1 %v12458_v53  ;;  %v12822_v53 = vld [vmem:[#allocation8 + $0xb0] ss:$12 sps:$4 sm:$0xff]  }
 0xa87   : > { %4265 = vmatprep.subr.bf16.mxu0 %v12463_v57  ;;  %8640 = vmatprep.subr.bf16.mxu1 %v15160_v54  ;;  %v12859_v57 = vld [vmem:[#allocation8 + $0x50] ss:$12 sps:$4 sm:$0xff]  }
 0xa88   : > { %15555 = vst [vmem:[#allocation86_spill] sm:$0xff] %v12859_v57  ;;  %v12866_v40 = vld [vmem:[#allocation8 + $0x30] ss:$12 sps:$4 sm:$0xff]  }
 0xa89   : > { %15557 = vst [vmem:[#allocation87_spill] sm:$0xff] %v12866_v40 }
 0xa8a   : > { %4266 = vmatpush1.bf16.msra.mxu0 %v12467_v63  ;;  %8641 = vmatpush3.bf16.msra.mxu1 %v12470_v20  ;;  %v12869_v63 = vld [vmem:[#allocation8 + $0x38] ss:$12 sps:$4 sm:$0xff]   ;;  %v12872_v20 = vld [vmem:[#allocation8 + $0x1c] ss:$12 sps:$4 sm:$0xff]  }
 0xa8b   : > { %4395 = vmatprep.subr.bf16.mxu0 %v15492_v37  ;;  %8646 = vmatprep.subr.bf16.mxu1 %v15160_v54  ;;  %15558 = vst [vmem:[#allocation89_spill] sm:$0xff] %v12869_v63  ;;  %15559 = vst [vmem:[#allocation31_spill] sm:$0xff] %v12872_v20  ;;  %v12898_v37 = vld [vmem:[#allocation6 + $0x168] ss:$12 sps:$4 sm:$0xff]  }
 0xa8c   : > { %15566 = vst [vmem:[#allocation55_spill] sm:$0xff] %v12898_v37 }
 0xa8d   : > { %4284 = vmatmul.mubr.bf16.vlgmr.msra.gmra.mxu0 %v4250_v47  ;;  %8643 = vmatmul.mubr.bf16.vlgmr.msra.gmra.mxu1 %v4250_v47 }
 0xa8e   : > { %4396 = vmatpush1.bf16.msra.mxu0 %v12479_v3  ;;  %8647 = vmatpush3.bf16.msra.mxu1 %v12822_v53  ;;  %v12876_v3 = vld [vmem:[#allocation8 + $0x18] ss:$12 sps:$4 sm:$0xff]  }
 0xa8f   : > { %4397 = vmatprep.subr.bf16.mxu0 %v12483_v22  ;;  %8648 = vmatprep.subr.bf16.mxu1 %v15160_v54  ;;  %15560 = vst [vmem:[#allocation33_spill] sm:$0xff] %v12876_v3  ;;  %v12879_v22 = vld [vmem:[#allocation8 + $0x20] ss:$12 sps:$4 sm:$0xff]  }
 0xa90   : > { %4427 = vmatprep.mubr.bf16.mxu0 %v15154_v52  ;;  %8662 = vmatprep.mubr.msk.bf16.mxu1 %vm10558_vm0, %v15160_v54  ;;  %15561 = vst [vmem:[#allocation141_spill] sm:$0xff] %v12879_v22 }
 0xa92   : > { %4398 = vmatpush1.bf16.msra.mxu0 %v12490_v8  ;;  %8649 = vmatpush3.bf16.msra.mxu1 %v12831_v51  ;;  %v12846_v8 = vld [vmem:[#allocation8 + $0x60] ss:$12 sps:$4 sm:$0xff]  }
 0xa93   : > { %4399 = vmatprep.subr.bf16.mxu0 %v15547_v56  ;;  %8650 = vmatprep.subr.bf16.mxu1 %v15160_v54  ;;  %15551 = vst [vmem:[#allocation83_spill] sm:$0xff] %v12846_v8 }
 0xa96   : > { %4400 = vmatpush1.bf16.msra.mxu0 %v12836_v21  ;;  %8651 = vmatpush3.bf16.msra.mxu1 %v12839_v44 }
 0xa97   : > { %4401 = vmatprep.subr.bf16.mxu0 %v12842_v48  ;;  %8652 = vmatprep.subr.bf16.mxu1 %v15160_v54 }
 0xa9a   : > { %4402 = vmatpush1.bf16.msra.mxu0 %v12846_v8  ;;  %8653 = vmatpush3.bf16.msra.mxu1 %v12849_v25 }
 0xa9b   : > { %4403 = vmatprep.subr.bf16.mxu0 %v12852_v49  ;;  %8654 = vmatprep.subr.bf16.mxu1 %v15160_v54 }
 0xa9e   : > { %4404 = vmatpush1.bf16.msra.mxu0 %v12856_v59  ;;  %8655 = vmatpush3.bf16.msra.mxu1 %v12859_v57 }
 0xa9f   : > { %4405 = vmatprep.subr.bf16.mxu0 %v12862_v18  ;;  %8656 = vmatprep.subr.bf16.mxu1 %v15160_v54 }
 0xaa2   : > { %4406 = vmatpush1.bf16.msra.mxu0 %v12866_v40  ;;  %8657 = vmatpush3.bf16.msra.mxu1 %v12869_v63 }
 0xaa3   : > { %4407 = vmatprep.subr.bf16.mxu0 %v12872_v20  ;;  %8658 = vmatprep.subr.bf16.mxu1 %v15160_v54 }
 0xaa6   : > { %4408 = vmatpush1.bf16.msra.mxu0 %v12876_v3  ;;  %8659 = vmatpush3.bf16.msra.mxu1 %v12879_v22 }
 0xaa7   : > { %4409 = vmatprep.subr.bf16.mxu0 %v12882_v32  ;;  %8660 = vmatprep.subr.bf16.mxu1 %v15160_v54 }
 0xaaa   : > { %4410 = vmatpush1.bf16.msra.mxu0 %v12886_v62  ;;  %8661 = vmatpush3.bf16.msra.mxu1 %v12889_v58 }
 0xaab   : > { %4524 = vmatprep.subr.bf16.mxu0 %v12892_v34  ;;  %8666 = vmatprep.subr.bf16.mxu1 %v15160_v54 }
 0xaad   : > { %4428 = vmatmul.mubr.bf16.vlgmr.msra.gmra.mxu0 %v12776_v9  ;;  %8663 = vmatmul.mubr.bf16.vlgmr.msra.gmra.mxu1 %v12776_v9  ;;  %v12977_v9 = vld [vmem:[#allocation8 + $0x16c] ss:$12 sps:$4 sm:$0xff]  }
 0xaae   : > { %4525 = vmatpush1.bf16.msra.mxu0 %v12898_v37  ;;  %8667 = vmatpush3.bf16.msra.mxu1 %v12901_v19  ;;  %15589 = vst [vmem:[#allocation123_spill] sm:$0xff] %v12977_v9 }
 0xaaf   : > { %4526 = vmatprep.subr.bf16.mxu0 %v12904_v42  ;;  %8668 = vmatprep.subr.bf16.mxu1 %v15160_v54 }
 0xab0   : > { %4556 = vmatprep.mubr.bf16.mxu0 %v15154_v52  ;;  %8682 = vmatprep.mubr.msk.bf16.mxu1 %vm10558_vm0, %v15160_v54 }
 0xab2   : > { %4527 = vmatpush1.bf16.msra.mxu0 %v12911_v11  ;;  %8669 = vmatpush3.bf16.msra.mxu1 %v12914_v6 }
 0xab3   : > { %4528 = vmatprep.subr.bf16.mxu0 %v12917_v12  ;;  %8670 = vmatprep.subr.bf16.mxu1 %v15160_v54 }
 0xab6   : > { %4529 = vmatpush1.bf16.msra.mxu0 %v12921_v10  ;;  %8671 = vmatpush3.bf16.msra.mxu1 %v12924_v39 }
 0xab7   : > { %4530 = vmatprep.subr.bf16.mxu0 %v12927_v31  ;;  %8672 = vmatprep.subr.bf16.mxu1 %v15160_v54 }
 0xaba   : > { %4531 = vmatpush1.bf16.msra.mxu0 %v12931_v46  ;;  %8673 = vmatpush3.bf16.msra.mxu1 %v12934_v50 }
 0xabb   : > { %4532 = vmatprep.subr.bf16.mxu0 %v12937_v1  ;;  %8674 = vmatprep.subr.bf16.mxu1 %v15160_v54 }
 0xabe   : > { %4533 = vmatpush1.bf16.msra.mxu0 %v12941_v27  ;;  %8675 = vmatpush3.bf16.msra.mxu1 %v12944_v4 }
 0xabf   : > { %4534 = vmatprep.subr.bf16.mxu0 %v12947_v61  ;;  %8676 = vmatprep.subr.bf16.mxu1 %v15160_v54 }
 0xac2   : > { %4535 = vmatpush1.bf16.msra.mxu0 %v12951_v23  ;;  %8677 = vmatpush3.bf16.msra.mxu1 %v12954_v2 }
 0xac3   : > { %4536 = vmatprep.subr.bf16.mxu0 %v12957_v43  ;;  %8678 = vmatprep.subr.bf16.mxu1 %v15160_v54 }
 0xac6   : > { %4537 = vmatpush1.bf16.msra.mxu0 %v12961_v0  ;;  %8679 = vmatpush3.bf16.msra.mxu1 %v12964_v55 }
 0xac7   : > { %4538 = vmatprep.subr.bf16.mxu0 %v12967_v33  ;;  %8680 = vmatprep.subr.bf16.mxu1 %v15160_v54 }
 0xaca   : > { %4539 = vmatpush1.bf16.msra.mxu0 %v12971_v24  ;;  %8681 = vmatpush3.bf16.msra.mxu1 %v12974_v14 }
 0xacb   : > { %4609 = vmatprep.subr.bf16.mxu0 %v12977_v9  ;;  %8686 = vmatprep.subr.bf16.mxu1 %v15160_v54 }
 0xb2d   : > { %v4243_v13 = vpop.f32.mrf.mxu1  ;;  %v4200_v15 = vpop.f32.mrf.mxu0 }
 0xb2e   : > { %v4201_v35 = vadd.f32 %v4200_v15, %v15590_v60  ;;  %v4244_v50 = vadd.f32 %v4243_v13, %v11443_v7 }
 0xb2f   : > { %v8624_v38 = vpop.f32.mrf.mxu1  ;;  %v4202_v26 = vpop.f32.mrf.mxu0 }
 0xb30   : > { %v4203_v23 = vadd.f32 %v4202_v26, %v11428_v29  ;;  %v15592_v26 = vld [vmem:[#allocation94_spill] sm:$0xff] }
 0xb31   : > { %v12981_v30 = vpop.f32.mrf.mxu1  ;;  %v4204_v47 = vpop.f32.mrf.mxu0 }
 0xb32   : > { %v4205_v9 = vadd.f32 %v4204_v47, %v15590_v60  ;;  %v15591_v60 = vld [vmem:[#allocation47_spill] sm:$0xff]  ;;  %v4247_v31 = vadd.f32 %v12981_v30, %v11443_v7 }
 0xb33   : > { %v8625_v17 = vpop.f32.mrf.mxu1  ;;  %v12983_v56 = vpop.f32.mrf.mxu0 }
 0xb4d   : > { %v4285_v24 = vpop.f32.mrf.mxu0  ;;  %v4328_v14 = vpop.f32.mrf.mxu1 }
 0xb4e   : > { %v4335_v33 = vadd.f32 %v4285_v24, %v4201_v35 }
 0xb4f   : > { %v4287_v55 = vpop.f32.mrf.mxu0  ;;  %v8644_v0 = vpop.f32.mrf.mxu1 }
 0xb50   : > { %v7587_v43 = vmul.f32 -1.442695, %v4335_v33  ;;  %v4336_v4 = vadd.f32 %v4287_v55, %v4203_v23  ;;  %v4738_v55 = vstv %s4737_s11 }
 0xb51   : > { %v4289_v2 = vpop.f32.mrf.mxu0  ;;  %v4331_v38 = vpop.f32.mrf.mxu1 }
 0xb52   : > { %9665 = vpow2.f32 %v7587_v43  ;;  %v4337_v17 = vadd.f32 %v4289_v2, %v4205_v9  ;;  %v7588_v15 = vmul.f32 -1.442695, %v4336_v4  ;;  %v765_v43 = vadd.f32 %v15592_v26, %v15591_v60  ;;  %v15593_v9 = vld [vmem:[#allocation51_spill] sm:$0xff] }
 0xb53   : > { %v8645_v61 = vpop.f32.mrf.mxu1  ;;  %v12988_v47 = vpop.f32.mrf.mxu0  ;;  %vm4739_vm2 = vcmp.eq.s32.totalorder %v15593_v9, %v4738_v55 }
 0xb54   : > { %v7589_v27 = vmul.f32 -1.442695, %v4337_v17  ;;  %v4741_v26 = vsel %vm4739_vm2, 1, %v15154_v52 }
 0xb55   : > { %4744 = vperm.xlu0 %9219, %v4741_v26   ;;  %v15597_v26 = vld [vmem:[#allocation13_spill] sm:$0xff] }
 0xb56   : > { %9667 = vpow2.f32 %v7589_v27  ;;  %v4363_v27 = vadd.f32 %v12574_v36, %v4328_v14 }
 0xb57   : > { %9669 = vpow2.f32 %v7588_v15  ;;  %v15595_v15 = vld [vmem:[#allocation16_spill] sm:$0xff] }
 0xb5f   : > { %v9666_v1 = vpop.eup %9665 }
 0xb60   : > { %v4351_v35 = vadd.f32 1.0, %v9666_v1  ;;  %v15594_v1 = vld [vmem:[#allocation52_spill] sm:$0xff] }
 0xb61   : > { %vm4740_vm3 = vcmp.eq.s32.totalorder %v15594_v1, %v4738_v55 }
 0xb62   : > { %9671 = vrcp.f32 %v4351_v35  ;;  %v769_v35 = vadd.f32 %v15595_v15, %v15591_v60  ;;  %v4364_v15 = vadd.f32 %v12574_v36, %v4331_v38 }
 0xb63   : > { %v9668_v0 = vpop.eup %9667 }
 0xb64   : > { %v4353_v24 = vadd.f32 1.0, %v9668_v0  ;;  %v9670_v33 = vpop.eup %9669 }
 0xb65   : > { %v4352_v2 = vadd.f32 1.0, %v9670_v33  ;;  %v4742_v33 = vsel %vm4740_vm3, 1, %v15154_v52 }
 0xb66   : > { %9673 = vrcp.f32 %v4353_v24  ;;  %4747 = vperm.xlu1 %9220, %v4742_v33   ;;  %v771_v33 = vadd.f32 %v15597_v26, %v11095_v28 }
 0xb67   : > { %9675 = vrcp.f32 %v4352_v2 }
 0xb6d   : > { %v4429_v61 = vpop.f32.mrf.mxu0  ;;  %v4472_v23 = vpop.f32.mrf.mxu1 }
 0xb6e   : > { %v4479_v4 = vadd.f32 %v4429_v61, %v765_v43  ;;  %v15596_v43 = vld [vmem:[#allocation95_spill] sm:$0xff] }
 0xb6f   : > { %v9672_v17 = vpop.eup %9671  ;;  %v4431_v0 = vpop.f32.mrf.mxu0  ;;  %v767_v61 = vadd.f32 %v15596_v43, %v11095_v28 }
 0xb70   : > { %v8664_v24 = vpop.f32.mrf.mxu1  ;;  %v4365_v46 = vmul.f32 %v9672_v17, %v4363_v27  ;;  %v7591_v14 = vmul.f32 -1.442695, %v4479_v4 }
 0xb71   : > { %v4433_v55 = vpop.f32.mrf.mxu0  ;;  %v4480_v27 = vadd.f32 %v4431_v0, %v767_v61 }
 0xb72   : > { %v4475_v1 = vpop.f32.mrf.mxu1  ;;  %v4367_v9 = vadd.f32 %v4365_v46, %v4244_v50  ;;  %9677 = vpow2.f32 %v7591_v14  ;;  %v4481_v24 = vadd.f32 %v4433_v55, %v769_v35 }
 0xb73   : > { %v9674_v60 = vpop.eup %9673  ;;  %v4435_v17 = vpop.f32.mrf.mxu0  ;;  %v7592_v36 = vmul.f32 -1.442695, %v4480_v27 }
 0xb74   : > { %v8665_v13 = vpop.f32.mrf.mxu1  ;;  %9679 = vtanh.f32 %v4367_v9  ;;  %v4366_v2 = vmul.f32 %v9674_v60, %v4364_v15  ;;  %v7593_v4 = vmul.f32 -1.442695, %v4481_v24  ;;  %v4482_v46 = vadd.f32 %v4435_v17, %v771_v33  ;;  %v9676_v38 = vpop.eup %9675 }
 0xb75   : > { %v4371_v14 = vsub.f32 1.0, %v9676_v38  ;;  %v4375_v0 = vmul.f32 %v9676_v38, %v12759_v5  ;;  %v4207_v33 = vadd.f32 %v12983_v56, %v11428_v29  ;;  %v13103_v5 = vld [vmem:[#allocation8 + $0xd8] ss:$12 sps:$4 sm:$0xff]  }
 0xb76   : > { %v13008_v43 = vadd.f32 %v4366_v2, %v4247_v31  ;;  %9681 = vpow2.f32 %v7593_v4  ;;  %v7594_v50 = vmul.f32 -1.442695, %v4482_v46  ;;  %v13016_v2 = vld [vmem:[%s14731_s5] ss:$0 sm:$0xff] }
 0xb77   : > { %9683 = vpow2.f32 %v7592_v36  ;;  %v4507_v27 = vadd.f32 %v13016_v2, %v4472_v23  ;;  %v15599_v46 = vld [vmem:[#allocation35_spill] sm:$0xff] }
 0xb78   : > { %9685 = vpow2.f32 %v7594_v50  ;;  %v4508_v50 = vadd.f32 %v13016_v2, %v4475_v1 }
 0xb7f   : > { %v9678_v35 = vpop.eup %9677 }
 0xb80   : > { %v4495_v30 = vadd.f32 1.0, %v9678_v35  ;;  %v15600_v35 = vld [vmem:[#allocation19_spill] sm:$0xff] }
 0xb81   : > { %v9680_v9 = vpop.eup %9679 }
 0xb82   : > { %9687 = vrcp.f32 %v4495_v30  ;;  %v4373_v60 = vmul.f32 %v9680_v9, %v4371_v14  ;;  %v15601_v30 = vld [vmem:[#allocation37_spill] sm:$0xff]  ;;  %v4338_v9 = vadd.f32 %v12988_v47, %v4207_v33 }
 0xb83   : > { %v9682_v61 = vpop.eup %9681  ;;  %v945_v14 = vadd.f32 %v15601_v30, %v15600_v35  ;;  %v13054_v30 = vld [vmem:[#allocation8 + $0x158] ss:$12 sps:$4 sm:$0xff]   ;;  %v13106_v35 = vld [vmem:[#allocation8 + $0xe0] ss:$12 sps:$4 sm:$0xff]  }
 0xb84   : > { %v4497_v55 = vadd.f32 1.0, %v9682_v61  ;;  %v13011_v15 = vadd.f32 %v4375_v0, %v4373_v60  ;;  %v9684_v31 = vpop.eup %9683  ;;  %v7590_v0 = vmul.f32 -1.442695, %v4338_v9  ;;  %v13062_v9 = vld [vmem:[#allocation8 + $0x138] ss:$12 sps:$4 sm:$0xff]  }
 0xb85   : > { %v9686_v24 = vpop.eup %9685  ;;  %v4496_v13 = vadd.f32 1.0, %v9684_v31 }
 0xb86   : > { %15598 = vst [vmem:[#allocation124_spill] sm:$0xff] %v13011_v15  ;;  %9689 = vrcp.f32 %v4497_v55  ;;  %v4498_v17 = vadd.f32 1.0, %v9686_v24 }
 0xb87   : > { %9691 = vrcp.f32 %v4496_v13 }
 0xb88   : > { %9693 = vrcp.f32 %v4498_v17 }
 0xb8f   : > { %v9688_v4 = vpop.eup %9687 }
 0xb90   : > { %v4509_v26 = vmul.f32 %v9688_v4, %v4507_v27 }
 0xb92   : > { %v4511_v36 = vadd.f32 %v4509_v26, %v15599_v46 }
 0xb93   : > { %v9690_v38 = vpop.eup %9689 }
 0xb94   : > { %9695 = vtanh.f32 %v4511_v36  ;;  %v4510_v23 = vmul.f32 %v9690_v38, %v4508_v50  ;;  %v9692_v61 = vpop.eup %9691  ;;  %v13041_v50 = vld [vmem:[#allocation8 + $0x170] ss:$12 sps:$4 sm:$0xff]  }
 0xb95   : > { %v9694_v55 = vpop.eup %9693  ;;  %v4515_v56 = vsub.f32 1.0, %v9692_v61  ;;  %v4519_v1 = vmul.f32 %v9692_v61, %v12769_v16  ;;  %v13038_v16 = vld [vmem:[#allocation8 + $0x168] ss:$12 sps:$4 sm:$0xff]   ;;  %v13051_v38 = vld [vmem:[#allocation8 + $0x150] ss:$12 sps:$4 sm:$0xff]  }
 0xb96   : > { %v4512_v60 = vadd.f32 %v4510_v23, %v945_v14  ;;  %v4516_v13 = vsub.f32 1.0, %v9694_v55  ;;  %v4520_v47 = vmul.f32 %v9694_v55, %v12772_v45  ;;  %v13044_v45 = vld [vmem:[#allocation8 + $0x154] ss:$12 sps:$4 sm:$0xff]   ;;  %v13058_v14 = vld [vmem:[#allocation8 + $0x13c] ss:$12 sps:$4 sm:$0xff]  }
 0xb97   : > { %v13065_v23 = vld [vmem:[#allocation8 + $0x140] ss:$12 sps:$4 sm:$0xff]  }
 0xb98   : > { %9697 = vtanh.f32 %v4512_v60  ;;  %v13068_v60 = vld [vmem:[#allocation8 + $0x124] ss:$12 sps:$4 sm:$0xff]   ;;  %v13078_v61 = vld [vmem:[#allocation8 + $0x10c] ss:$12 sps:$4 sm:$0xff]  }
 0xb99   : > { %9699 = vpow2.f32 %v7590_v0  ;;  %v13075_v0 = vld [vmem:[#allocation8 + $0x128] ss:$12 sps:$4 sm:$0xff]  }
 0xba1   : > { %v9696_v31 = vpop.eup %9695 }
 0xba2   : > { %v4517_v24 = vmul.f32 %v9696_v31, %v4515_v56  ;;  %v13082_v56 = vld [vmem:[#allocation8 + $0x108] ss:$12 sps:$4 sm:$0xff]   ;;  %v13085_v31 = vld [vmem:[#allocation8 + $0x110] ss:$12 sps:$4 sm:$0xff]  }
 0xba4   : > { %v13027_v27 = vadd.f32 %v4519_v1, %v4517_v24  ;;  %v13088_v24 = vld [vmem:[#allocation8 + $0xf4] ss:$12 sps:$4 sm:$0xff]  }
 0xba5   : > { %v9698_v4 = vpop.eup %9697 }
 0xba6   : > { %v4518_v17 = vmul.f32 %v9698_v4, %v4516_v13  ;;  %v9700_v33 = vpop.eup %9699  ;;  %v13092_v4 = vld [vmem:[#allocation8 + $0xf0] ss:$12 sps:$4 sm:$0xff]  }
 0xba7   : > { %v4354_v36 = vadd.f32 1.0, %v9700_v33  ;;  %15602 = vst [vmem:[#allocation125_spill] sm:$0xff] %v13092_v4  ;;  %v13098_v33 = vld [vmem:[#allocation8 + $0xdc] ss:$12 sps:$4 sm:$0xff]  }
 0xba8   : > { %v13030_v26 = vadd.f32 %v4520_v47, %v4518_v17  ;;  %v13095_v17 = vld [vmem:[#allocation8 + $0xf8] ss:$12 sps:$4 sm:$0xff]  }
 0xba9   : > { %9701 = vrcp.f32 %v4354_v36  ;;  %15603 = vst [vmem:[#allocation126_spill] sm:$0xff] %v13095_v17 }
 0xbaa   : > { %v13034_v46 = vpack.c.bf16 %v13030_v26, %v13027_v27  ;;  %9703 = vtanh.f32 %v13008_v43  ;;  %v13072_v43 = vld [vmem:[#allocation8 + $0x120] ss:$12 sps:$4 sm:$0xff]  }
 0xbac   : > { %4557 = vmatmul.mubr.bf16.vlgmr.msra.gmra.mxu0 %v13034_v46  ;;  %8683 = vmatmul.mubr.bf16.vlgmr.msra.gmra.mxu1 %v13034_v46 }
 0xbad   : > { %4610 = vmatpush1.bf16.msra.mxu0 %v13038_v16  ;;  %8687 = vmatpush3.bf16.msra.mxu1 %v13041_v50 }
 0xbae   : > { %4611 = vmatprep.subr.bf16.mxu0 %v13044_v45  ;;  %8688 = vmatprep.subr.bf16.mxu1 %v15160_v54 }
 0xbaf   : > { %4641 = vmatprep.mubr.bf16.mxu0 %v15154_v52  ;;  %8702 = vmatprep.mubr.msk.bf16.mxu1 %vm10558_vm0, %v15160_v54 }
 0xbb1   : > { %4612 = vmatpush1.bf16.msra.mxu0 %v13051_v38  ;;  %8689 = vmatpush3.bf16.msra.mxu1 %v13054_v30 }
 0xbb2   : > { %4613 = vmatprep.subr.bf16.mxu0 %v13058_v14  ;;  %8690 = vmatprep.subr.bf16.mxu1 %v15160_v54 }
 0xbb5   : > { %4614 = vmatpush1.bf16.msra.mxu0 %v13062_v9  ;;  %8691 = vmatpush3.bf16.msra.mxu1 %v13065_v23 }
 0xbb6   : > { %4615 = vmatprep.subr.bf16.mxu0 %v13068_v60  ;;  %8692 = vmatprep.subr.bf16.mxu1 %v15160_v54  ;;  %v9702_v55 = vpop.eup %9701 }
 0xbb7   : > { %v9704_v1 = vpop.eup %9703  ;;  %v4372_v13 = vsub.f32 1.0, %v9702_v55  ;;  %v4376_v36 = vmul.f32 %v9702_v55, %v12811_v41  ;;  %v13118_v55 = vld [vmem:[#allocation8 + $0xc8] ss:$12 sps:$4 sm:$0xff]   ;;  %v13123_v41 = vld [vmem:[#allocation8 + $0xac] ss:$12 sps:$4 sm:$0xff]  }
 0xbb8   : > { %15605 = vst [vmem:[#allocation128_spill] sm:$0xff] %v13123_v41 }
 0xbb9   : > { %4616 = vmatpush1.bf16.msra.mxu0 %v13072_v43  ;;  %8693 = vmatpush3.bf16.msra.mxu1 %v13075_v0  ;;  %v4374_v47 = vmul.f32 %v9704_v1, %v4372_v13  ;;  %v13115_v1 = vld [vmem:[#allocation8 + $0xc0] ss:$12 sps:$4 sm:$0xff]  }
 0xbba   : > { %4617 = vmatprep.subr.bf16.mxu0 %v13078_v61  ;;  %8694 = vmatprep.subr.bf16.mxu1 %v15160_v54 }
 0xbbd   : > { %4618 = vmatpush1.bf16.msra.mxu0 %v13082_v56  ;;  %8695 = vmatpush3.bf16.msra.mxu1 %v13085_v31 }
 0xbbe   : > { %4619 = vmatprep.subr.bf16.mxu0 %v13088_v24  ;;  %8696 = vmatprep.subr.bf16.mxu1 %v15160_v54 }
 0xbc1   : > { %4620 = vmatpush1.bf16.msra.mxu0 %v13092_v4  ;;  %8697 = vmatpush3.bf16.msra.mxu1 %v13095_v17  ;;  %v13109_v4 = vadd.f32 %v4376_v36, %v4374_v47  ;;  %v13111_v17 = vld [vmem:[#allocation8 + $0xc4] ss:$12 sps:$4 sm:$0xff]   ;;  %v13127_v47 = vld [vmem:[#allocation8 + $0xa8] ss:$12 sps:$4 sm:$0xff]  }
 0xbc2   : > { %4621 = vmatprep.subr.bf16.mxu0 %v13098_v33  ;;  %8698 = vmatprep.subr.bf16.mxu1 %v15160_v54  ;;  %v13131_v36 = vld [vmem:[#allocation8 + $0x94] ss:$12 sps:$4 sm:$0xff]  }
 0xbc3   : > { %15604 = vst [vmem:[#allocation127_spill] sm:$0xff] %v13109_v4  ;;  %v4608_v13 = vpack.c.bf16 %v13109_v4, %v13011_v15 }
 0xbc5   : > { %4622 = vmatpush1.bf16.msra.mxu0 %v13103_v5  ;;  %8699 = vmatpush3.bf16.msra.mxu1 %v13106_v35 }
 0xbc6   : > { %4623 = vmatprep.subr.bf16.mxu0 %v13111_v17  ;;  %8700 = vmatprep.subr.bf16.mxu1 %v15160_v54 }
 0xbc9   : > { %4624 = vmatpush1.bf16.msra.mxu0 %v13115_v1  ;;  %8701 = vmatpush3.bf16.msra.mxu1 %v13118_v55 }
 0xbca   : > { %4753 = vmatprep.subr.bf16.mxu0 %v13123_v41  ;;  %8706 = vmatprep.subr.bf16.mxu1 %v15160_v54  ;;  %v13138_v41 = vld [vmem:[#allocation8 + $0x90] ss:$12 sps:$4 sm:$0xff]  }
 0xbcc   : > { %4642 = vmatmul.mubr.bf16.vlgmr.msra.gmra.mxu0 %v4608_v13  ;;  %8703 = vmatmul.mubr.bf16.vlgmr.msra.gmra.mxu1 %v4608_v13  ;;  %v13142_v13 = vld [vmem:[#allocation8 + $0x7c] ss:$12 sps:$4 sm:$0xff]  }
 0xbcd   : > { %4754 = vmatpush1.bf16.msra.mxu0 %v13127_v47  ;;  %8707 = vmatpush3.bf16.msra.mxu1 %v12822_v53  ;;  %15606 = vst [vmem:[#allocation129_spill] sm:$0xff] %v13142_v13 }
 0xbce   : > { %4755 = vmatprep.subr.bf16.mxu0 %v13131_v36  ;;  %8708 = vmatprep.subr.bf16.mxu1 %v15160_v54 }
 0xbcf   : > { %4785 = vmatprep.mubr.bf16.mxu0 %v15154_v52  ;;  %8722 = vmatprep.mubr.msk.bf16.mxu1 %vm10558_vm0, %v15160_v54 }
 0xbd1   : > { %4756 = vmatpush1.bf16.msra.mxu0 %v13138_v41  ;;  %8709 = vmatpush3.bf16.msra.mxu1 %v12831_v51 }
 0xbd2   : > { %4757 = vmatprep.subr.bf16.mxu0 %v13142_v13  ;;  %8710 = vmatprep.subr.bf16.mxu1 %v15160_v54 }
 0xbd5   : > { %4758 = vmatpush1.bf16.msra.mxu0 %v12836_v21  ;;  %8711 = vmatpush3.bf16.msra.mxu1 %v12839_v44 }
 0xbd6   : > { %4759 = vmatprep.subr.bf16.mxu0 %v12842_v48  ;;  %8712 = vmatprep.subr.bf16.mxu1 %v15160_v54 }
 0xbd9   : > { %4760 = vmatpush1.bf16.msra.mxu0 %v12846_v8  ;;  %8713 = vmatpush3.bf16.msra.mxu1 %v12849_v25 }
 0xbda   : > { %4761 = vmatprep.subr.bf16.mxu0 %v12852_v49  ;;  %8714 = vmatprep.subr.bf16.mxu1 %v15160_v54 }
 0xbdd   : > { %4762 = vmatpush1.bf16.msra.mxu0 %v12856_v59  ;;  %8715 = vmatpush3.bf16.msra.mxu1 %v12859_v57 }
 0xbde   : > { %4763 = vmatprep.subr.bf16.mxu0 %v12862_v18  ;;  %8716 = vmatprep.subr.bf16.mxu1 %v15160_v54 }
 0xbe1   : > { %4764 = vmatpush1.bf16.msra.mxu0 %v12866_v40  ;;  %8717 = vmatpush3.bf16.msra.mxu1 %v12869_v63 }
 0xbe2   : > { %4765 = vmatprep.subr.bf16.mxu0 %v12872_v20  ;;  %8718 = vmatprep.subr.bf16.mxu1 %v15160_v54 }
 0xbe5   : > { %4766 = vmatpush1.bf16.msra.mxu0 %v12876_v3  ;;  %8719 = vmatpush3.bf16.msra.mxu1 %v12879_v22 }
 0xbe6   : > { %4767 = vmatprep.subr.bf16.mxu0 %v12882_v32  ;;  %8720 = vmatprep.subr.bf16.mxu1 %v15160_v54 }
 0xbe9   : > { %4768 = vmatpush1.bf16.msra.mxu0 %v12886_v62  ;;  %8721 = vmatpush3.bf16.msra.mxu1 %v12889_v58 }
 0xbea   : > { %4882 = vmatprep.subr.bf16.mxu0 %v12892_v34  ;;  %8726 = vmatprep.subr.bf16.mxu1 %v15160_v54 }
 0xbec   : > { %4786 = vmatmul.mubr.bf16.vlgmr.msra.gmra.mxu0 %v13034_v46  ;;  %8723 = vmatmul.mubr.bf16.vlgmr.msra.gmra.mxu1 %v13034_v46  ;;  %v15607_v46 = vld [vmem:[#allocation61_spill] sm:$0xff] }
 0xbed   : > { %4883 = vmatpush1.bf16.msra.mxu0 %v12898_v37  ;;  %8727 = vmatpush3.bf16.msra.mxu1 %v12901_v19  ;;  %v15609_v19 = vld [vmem:[#allocation64_spill] sm:$0xff]  ;;  %v15610_v37 = vld [vmem:[#allocation65_spill] sm:$0xff] }
 0xbee   : > { %4884 = vmatprep.subr.bf16.mxu0 %v12904_v42  ;;  %8728 = vmatprep.subr.bf16.mxu1 %v15160_v54  ;;  %v15608_v42 = vld [vmem:[#allocation62_spill] sm:$0xff] }
 0xbef   : > { %4914 = vmatprep.mubr.bf16.mxu0 %v15154_v52  ;;  %8742 = vmatprep.mubr.msk.bf16.mxu1 %vm10558_vm0, %v15160_v54 }
 0xbf1   : > { %4885 = vmatpush1.bf16.msra.mxu0 %v12911_v11  ;;  %8729 = vmatpush3.bf16.msra.mxu1 %v12914_v6  ;;  %v15611_v6 = vld [vmem:[#allocation66_spill] sm:$0xff]  ;;  %v15613_v11 = vld [vmem:[#allocation69_spill] sm:$0xff] }
 0xbf2   : > { %4886 = vmatprep.subr.bf16.mxu0 %v12917_v12  ;;  %8730 = vmatprep.subr.bf16.mxu1 %v15160_v54  ;;  %v15612_v12 = vld [vmem:[#allocation68_spill] sm:$0xff] }
 0xbf5   : > { %4887 = vmatpush1.bf16.msra.mxu0 %v12921_v10  ;;  %8731 = vmatpush3.bf16.msra.mxu1 %v12924_v39  ;;  %v15614_v39 = vld [vmem:[#allocation70_spill] sm:$0xff]  ;;  %v15616_v10 = vld [vmem:[#allocation73_spill] sm:$0xff] }
 0xbf6   : > { %4888 = vmatprep.subr.bf16.mxu0 %v15607_v46  ;;  %8732 = vmatprep.subr.bf16.mxu1 %v15160_v54  ;;  %v15615_v46 = vld [vmem:[#allocation72_spill] sm:$0xff] }
 0xbf9   : > { %4889 = vmatpush1.bf16.msra.mxu0 %v15608_v42  ;;  %8733 = vmatpush3.bf16.msra.mxu1 %v15609_v19  ;;  %v15617_v19 = vld [vmem:[#allocation74_spill] sm:$0xff]  ;;  %v15619_v42 = vld [vmem:[#allocation77_spill] sm:$0xff] }
 0xbfa   : > { %4890 = vmatprep.subr.bf16.mxu0 %v15610_v37  ;;  %8734 = vmatprep.subr.bf16.mxu1 %v15160_v54  ;;  %v15618_v37 = vld [vmem:[#allocation76_spill] sm:$0xff] }
 0xbfd   : > { %4891 = vmatpush1.bf16.msra.mxu0 %v15611_v6  ;;  %8735 = vmatpush3.bf16.msra.mxu1 %v15612_v12  ;;  %v15620_v12 = vld [vmem:[#allocation81_spill] sm:$0xff]  ;;  %v15622_v6 = vld [vmem:[#allocation123_spill] sm:$0xff] }
 0xbfe   : > { %4892 = vmatprep.subr.bf16.mxu0 %v15613_v11  ;;  %8736 = vmatprep.subr.bf16.mxu1 %v15160_v54  ;;  %v15621_v11 = vld [vmem:[#allocation122_spill] sm:$0xff] }
 0xc01   : > { %4893 = vmatpush1.bf16.msra.mxu0 %v15614_v39  ;;  %8737 = vmatpush3.bf16.msra.mxu1 %v15615_v46 }
 0xc02   : > { %4894 = vmatprep.subr.bf16.mxu0 %v15616_v10  ;;  %8738 = vmatprep.subr.bf16.mxu1 %v15160_v54 }
 0xc05   : > { %4895 = vmatpush1.bf16.msra.mxu0 %v15617_v19  ;;  %8739 = vmatpush3.bf16.msra.mxu1 %v15618_v37 }
 0xc06   : > { %4896 = vmatprep.subr.bf16.mxu0 %v15619_v42  ;;  %8740 = vmatprep.subr.bf16.mxu1 %v15160_v54  ;;  %v15623_v42 = vld [vmem:[#allocation17_spill] sm:$0xff] }
 0xc09   : > { %4897 = vmatpush1.bf16.msra.mxu0 %v15620_v12  ;;  %8741 = vmatpush3.bf16.msra.mxu1 %v15621_v11 }
 0xc0a   : > { %4967 = vmatprep.subr.bf16.mxu0 %v15622_v6  ;;  %8746 = vmatprep.subr.bf16.mxu1 %v15160_v54 }
 0xc6c   : > { %v4601_v46 = vpop.f32.mrf.mxu1  ;;  %v4558_v19 = vpop.f32.mrf.mxu0 }
 0xc6d   : > { %v4559_v32 = vadd.f32 %v4558_v19, %v15623_v42  ;;  %v4602_v48 = vadd.f32 %v4601_v46, %v11443_v7 }
 0xc6e   : > { %v8684_v10 = vpop.f32.mrf.mxu1  ;;  %v4560_v58 = vpop.f32.mrf.mxu0 }
 0xc6f   : > { %v4561_v18 = vadd.f32 %v4560_v58, %v11428_v29  ;;  %v15625_v58 = vld [vmem:[#allocation14_spill] sm:$0xff] }
 0xc70   : > { %v13207_v39 = vpop.f32.mrf.mxu1  ;;  %v4562_v37 = vpop.f32.mrf.mxu0 }
 0xc71   : > { %v4563_v6 = vadd.f32 %v4562_v37, %v15623_v42  ;;  %v15624_v42 = vld [vmem:[#allocation47_spill] sm:$0xff]  ;;  %v4605_v21 = vadd.f32 %v13207_v39, %v11443_v7 }
 0xc72   : > { %v8685_v34 = vpop.f32.mrf.mxu1  ;;  %v13209_v62 = vpop.f32.mrf.mxu0 }
 0xc8c   : > { %v4643_v22 = vpop.f32.mrf.mxu0  ;;  %v4686_v12 = vpop.f32.mrf.mxu1 }
 0xc8d   : > { %v4693_v3 = vadd.f32 %v4643_v22, %v4559_v32 }
 0xc8e   : > { %v4645_v11 = vpop.f32.mrf.mxu0  ;;  %v8704_v20 = vpop.f32.mrf.mxu1 }
 0xc8f   : > { %v7595_v63 = vmul.f32 -1.442695, %v4693_v3  ;;  %v4694_v59 = vadd.f32 %v4645_v11, %v4561_v18  ;;  %v5096_v11 = vstv %s5095_s28 }
 0xc90   : > { %v4647_v40 = vpop.f32.mrf.mxu0  ;;  %v4689_v10 = vpop.f32.mrf.mxu1 }
 0xc91   : > { %9705 = vpow2.f32 %v7595_v63  ;;  %v4695_v34 = vadd.f32 %v4647_v40, %v4563_v6  ;;  %v7596_v19 = vmul.f32 -1.442695, %v4694_v59  ;;  %v775_v63 = vadd.f32 %v15625_v58, %v15624_v42  ;;  %v15626_v6 = vld [vmem:[#allocation51_spill] sm:$0xff] }
 0xc92   : > { %v8705_v57 = vpop.f32.mrf.mxu1  ;;  %v13214_v37 = vpop.f32.mrf.mxu0  ;;  %vm5097_vm4 = vcmp.eq.s32.totalorder %v15626_v6, %v5096_v11 }
 0xc93   : > { %v7597_v49 = vmul.f32 -1.442695, %v4695_v34  ;;  %v15627_v34 = vld [vmem:[#allocation52_spill] sm:$0xff]  ;;  %v5099_v58 = vsel %vm5097_vm4, 1, %v15154_v52 }
 0xc94   : > { %vm5098_vm5 = vcmp.eq.s32.totalorder %v15627_v34, %v5096_v11  ;;  %5102 = vperm.xlu0 %9219, %v5099_v58  }
 0xc95   : > { %9707 = vpow2.f32 %v7597_v49  ;;  %v13222_v49 = vld [vmem:[%s14731_s5 + $0x1] ss:$0 sm:$0xff]  ;;  %v5100_v8 = vsel %vm5098_vm5, 1, %v15154_v52 }
 0xc96   : > { %9709 = vpow2.f32 %v7596_v19  ;;  %5105 = vperm.xlu1 %9220, %v5100_v8  }
 0xc9e   : > { %v9706_v25 = vpop.eup %9705 }
 0xc9f   : > { %v4709_v22 = vadd.f32 1.0, %v9706_v25  ;;  %v4721_v25 = vadd.f32 %v13222_v49, %v4686_v12 }
 0xca1   : > { %9711 = vrcp.f32 %v4709_v22  ;;  %v15628_v22 = vld [vmem:[#allocation15_spill] sm:$0xff] }
 0xca2   : > { %v9708_v20 = vpop.eup %9707 }
 0xca3   : > { %v4711_v32 = vadd.f32 1.0, %v9708_v20  ;;  %v9710_v3 = vpop.eup %9709  ;;  %v779_v20 = vadd.f32 %v15628_v22, %v15624_v42  ;;  %v4722_v22 = vadd.f32 %v13222_v49, %v4689_v10 }
 0xca4   : > { %v4710_v40 = vadd.f32 1.0, %v9710_v3 }
 0xca5   : > { %9713 = vrcp.f32 %v4711_v32 }
 0xca6   : > { %9715 = vrcp.f32 %v4710_v40 }
 0xcac   : > { %v4787_v57 = vpop.f32.mrf.mxu0  ;;  %v4830_v18 = vpop.f32.mrf.mxu1 }
 0xcad   : > { %v4837_v59 = vadd.f32 %v4787_v57, %v775_v63  ;;  %v15629_v63 = vld [vmem:[#allocation18_spill] sm:$0xff] }
 0xcae   : > { %v9712_v19 = vpop.eup %9711  ;;  %v4789_v32 = vpop.f32.mrf.mxu0  ;;  %v777_v57 = vadd.f32 %v15629_v63, %v11095_v28 }
 0xcaf   : > { %v8724_v3 = vpop.f32.mrf.mxu1  ;;  %v4723_v44 = vmul.f32 %v9712_v19, %v4721_v25  ;;  %v7599_v12 = vmul.f32 -1.442695, %v4837_v59  ;;  %v15630_v19 = vld [vmem:[#allocation96_spill] sm:$0xff] }
 0xcb0   : > { %v4791_v11 = vpop.f32.mrf.mxu0  ;;  %v4838_v25 = vadd.f32 %v4789_v32, %v777_v57  ;;  %v781_v58 = vadd.f32 %v15630_v19, %v11095_v28 }
 0xcb1   : > { %v4833_v34 = vpop.f32.mrf.mxu1  ;;  %v4725_v6 = vadd.f32 %v4723_v44, %v4602_v48  ;;  %9717 = vpow2.f32 %v7599_v12  ;;  %v4839_v3 = vadd.f32 %v4791_v11, %v779_v20 }
 0xcb2   : > { %v9714_v42 = vpop.eup %9713  ;;  %v4793_v8 = vpop.f32.mrf.mxu0  ;;  %v7600_v48 = vmul.f32 -1.442695, %v4838_v25  ;;  %v4865_v25 = vadd.f32 %v13016_v2, %v4830_v18 }
 0xcb3   : > { %v8725_v46 = vpop.f32.mrf.mxu1  ;;  %9719 = vtanh.f32 %v4725_v6  ;;  %v4724_v40 = vmul.f32 %v9714_v42, %v4722_v22  ;;  %v7601_v59 = vmul.f32 -1.442695, %v4839_v3  ;;  %v4840_v44 = vadd.f32 %v4793_v8, %v781_v58  ;;  %v9716_v20 = vpop.eup %9715 }
 0xcb4   : > { %v4729_v11 = vsub.f32 1.0, %v9716_v20  ;;  %v4733_v32 = vmul.f32 %v9716_v20, %v13011_v15  ;;  %v4565_v58 = vadd.f32 %v13209_v62, %v11428_v29 }
 0xcb5   : > { %v13239_v63 = vadd.f32 %v4724_v40, %v4605_v21  ;;  %9721 = vpow2.f32 %v7601_v59  ;;  %v7602_v10 = vmul.f32 -1.442695, %v4840_v44  ;;  %v15632_v44 = vld [vmem:[#allocation34_spill] sm:$0xff] }
 0xcb6   : > { %9723 = vpow2.f32 %v7600_v48 }
 0xcb7   : > { %9725 = vpow2.f32 %v7602_v10  ;;  %v4866_v10 = vadd.f32 %v13016_v2, %v4833_v34 }
 0xcbe   : > { %v9718_v12 = vpop.eup %9717 }
 0xcbf   : > { %v4853_v39 = vadd.f32 1.0, %v9718_v12  ;;  %v4696_v12 = vadd.f32 %v13214_v37, %v4565_v58 }
 0xcc0   : > { %v9720_v6 = vpop.eup %9719 }
 0xcc1   : > { %9727 = vrcp.f32 %v4853_v39  ;;  %v4731_v42 = vmul.f32 %v9720_v6, %v4729_v11  ;;  %v15633_v11 = vld [vmem:[#allocation36_spill] sm:$0xff]  ;;  %v7598_v18 = vmul.f32 -1.442695, %v4696_v12 }
 0xcc2   : > { %v9722_v57 = vpop.eup %9721 }
 0xcc3   : > { %v4855_v22 = vadd.f32 1.0, %v9722_v57  ;;  %v13242_v3 = vadd.f32 %v4733_v32, %v4731_v42  ;;  %v9724_v21 = vpop.eup %9723 }
 0xcc4   : > { %v9726_v46 = vpop.eup %9725  ;;  %v4854_v40 = vadd.f32 1.0, %v9724_v21 }
 0xcc5   : > { %15631 = vst [vmem:[#allocation130_spill] sm:$0xff] %v13242_v3  ;;  %9729 = vrcp.f32 %v4855_v22  ;;  %v4856_v8 = vadd.f32 1.0, %v9726_v46 }
 0xcc6   : > { %9731 = vrcp.f32 %v4854_v40 }
 0xcc7   : > { %9733 = vrcp.f32 %v4856_v8 }
 0xcce   : > { %v9728_v59 = vpop.eup %9727 }
 0xccf   : > { %v4867_v19 = vmul.f32 %v9728_v59, %v4865_v25 }
 0xcd1   : > { %v4869_v48 = vadd.f32 %v4867_v19, %v15632_v44  ;;  %v15634_v44 = vld [vmem:[#allocation125_spill] sm:$0xff] }
 0xcd2   : > { %v9730_v20 = vpop.eup %9729 }
 0xcd3   : > { %9735 = vtanh.f32 %v4869_v48  ;;  %v4868_v39 = vmul.f32 %v9730_v20, %v4866_v10  ;;  %v9732_v42 = vpop.eup %9731  ;;  %v15635_v48 = vld [vmem:[#allocation126_spill] sm:$0xff] }
 0xcd4   : > { %v9734_v32 = vpop.eup %9733  ;;  %v4873_v57 = vsub.f32 1.0, %v9732_v42  ;;  %v4877_v21 = vmul.f32 %v9732_v42, %v13027_v27  ;;  %v15641_v42 = vld [vmem:[#allocation83_spill] sm:$0xff] }
 0xcd5   : > { %v4870_v6 = vadd.f32 %v4868_v39, %v15633_v11  ;;  %v4874_v46 = vsub.f32 1.0, %v9734_v32  ;;  %v4878_v37 = vmul.f32 %v9734_v32, %v13030_v26  ;;  %v15637_v11 = vld [vmem:[#allocation128_spill] sm:$0xff]  ;;  %v15642_v32 = vld [vmem:[#allocation85_spill] sm:$0xff] }
 0xcd7   : > { %9737 = vtanh.f32 %v4870_v6  ;;  %v15638_v6 = vld [vmem:[#allocation144_spill] sm:$0xff] }
 0xcd8   : > { %9739 = vpow2.f32 %v7598_v18  ;;  %v15640_v18 = vld [vmem:[#allocation84_spill] sm:$0xff] }
 0xce0   : > { %v9736_v22 = vpop.eup %9735 }
 0xce1   : > { %v4875_v62 = vmul.f32 %v9736_v22, %v4873_v57  ;;  %v15643_v57 = vld [vmem:[#allocation26_spill] sm:$0xff] }
 0xce2   : > { %v15645_v22 = vld [vmem:[#allocation86_spill] sm:$0xff] }
 0xce3   : > { %v13252_v34 = vadd.f32 %v4877_v21, %v4875_v62  ;;  %v15646_v62 = vld [vmem:[#allocation88_spill] sm:$0xff]  ;;  %v15647_v21 = vld [vmem:[#allocation87_spill] sm:$0xff] }
 0xce4   : > { %v9738_v40 = vpop.eup %9737 }
 0xce5   : > { %v4876_v25 = vmul.f32 %v9738_v40, %v4874_v46  ;;  %v9740_v8 = vpop.eup %9739  ;;  %v15648_v46 = vld [vmem:[#allocation89_spill] sm:$0xff]  ;;  %v15649_v40 = vld [vmem:[#allocation31_spill] sm:$0xff] }
 0xce6   : > { %v4712_v58 = vadd.f32 1.0, %v9740_v8  ;;  %v15652_v8 = vld [vmem:[#allocation142_spill] sm:$0xff] }
 0xce7   : > { %v13255_v59 = vadd.f32 %v4878_v37, %v4876_v25  ;;  %v15650_v25 = vld [vmem:[#allocation33_spill] sm:$0xff] }
 0xce8   : > { %9741 = vrcp.f32 %v4712_v58  ;;  %v15651_v37 = vld [vmem:[#allocation141_spill] sm:$0xff]  ;;  %v15653_v58 = vld [vmem:[#allocation75_spill] sm:$0xff] }
 0xce9   : > { %v13259_v19 = vpack.c.bf16 %v13255_v59, %v13252_v34  ;;  %9743 = vtanh.f32 %v13239_v63 }
 0xceb   : > { %4915 = vmatmul.mubr.bf16.vlgmr.msra.gmra.mxu0 %v13259_v19  ;;  %8743 = vmatmul.mubr.bf16.vlgmr.msra.gmra.mxu1 %v13259_v19 }
 0xcec   : > { %4968 = vmatpush1.bf16.msra.mxu0 %v13038_v16  ;;  %8747 = vmatpush3.bf16.msra.mxu1 %v13041_v50 }
 0xced   : > { %4969 = vmatprep.subr.bf16.mxu0 %v13044_v45  ;;  %8748 = vmatprep.subr.bf16.mxu1 %v15160_v54 }
 0xcee   : > { %4999 = vmatprep.mubr.bf16.mxu0 %v15154_v52  ;;  %8762 = vmatprep.mubr.msk.bf16.mxu1 %vm10558_vm0, %v15160_v54 }
 0xcf0   : > { %4970 = vmatpush1.bf16.msra.mxu0 %v13051_v38  ;;  %8749 = vmatpush3.bf16.msra.mxu1 %v13054_v30 }
 0xcf1   : > { %4971 = vmatprep.subr.bf16.mxu0 %v13058_v14  ;;  %8750 = vmatprep.subr.bf16.mxu1 %v15160_v54 }
 0xcf4   : > { %4972 = vmatpush1.bf16.msra.mxu0 %v13062_v9  ;;  %8751 = vmatpush3.bf16.msra.mxu1 %v13065_v23 }
 0xcf5   : > { %4973 = vmatprep.subr.bf16.mxu0 %v13068_v60  ;;  %8752 = vmatprep.subr.bf16.mxu1 %v15160_v54  ;;  %v9742_v27 = vpop.eup %9741 }
 0xcf6   : > { %v9744_v26 = vpop.eup %9743  ;;  %v4730_v63 = vsub.f32 1.0, %v9742_v27  ;;  %v4734_v20 = vmul.f32 %v9742_v27, %v13109_v4  ;;  %v15654_v27 = vld [vmem:[#allocation22_spill] sm:$0xff]  ;;  %v15681_v4 = vld [vmem:[#allocation47_spill] sm:$0xff] }
 0xcf8   : > { %4974 = vmatpush1.bf16.msra.mxu0 %v13072_v43  ;;  %8753 = vmatpush3.bf16.msra.mxu1 %v13075_v0  ;;  %v4732_v10 = vmul.f32 %v9744_v26, %v4730_v63  ;;  %v15655_v26 = vld [vmem:[#allocation24_spill] sm:$0xff]  ;;  %v15656_v63 = vld [vmem:[#allocation55_spill] sm:$0xff] }
 0xcf9   : > { %4975 = vmatprep.subr.bf16.mxu0 %v13078_v61  ;;  %8754 = vmatprep.subr.bf16.mxu1 %v15160_v54 }
 0xcfa   : > { %v13294_v12 = vadd.f32 %v4734_v20, %v4732_v10  ;;  %v15657_v10 = vld [vmem:[#allocation54_spill] sm:$0xff]  ;;  %v15658_v20 = vld [vmem:[#allocation56_spill] sm:$0xff] }
 0xcfc   : > { %4976 = vmatpush1.bf16.msra.mxu0 %v13082_v56  ;;  %8755 = vmatpush3.bf16.msra.mxu1 %v13085_v31  ;;  %15636 = vst [vmem:[#allocation131_spill] sm:$0xff] %v13294_v12  ;;  %v4966_v39 = vpack.c.bf16 %v13294_v12, %v13242_v3 }
 0xcfd   : > { %4977 = vmatprep.subr.bf16.mxu0 %v13088_v24  ;;  %8756 = vmatprep.subr.bf16.mxu1 %v15160_v54 }
 0xd00   : > { %4978 = vmatpush1.bf16.msra.mxu0 %v15634_v44  ;;  %8757 = vmatpush3.bf16.msra.mxu1 %v15635_v48 }
 0xd01   : > { %4979 = vmatprep.subr.bf16.mxu0 %v13098_v33  ;;  %8758 = vmatprep.subr.bf16.mxu1 %v15160_v54 }
 0xd04   : > { %4980 = vmatpush1.bf16.msra.mxu0 %v13103_v5  ;;  %8759 = vmatpush3.bf16.msra.mxu1 %v13106_v35 }
 0xd05   : > { %4981 = vmatprep.subr.bf16.mxu0 %v13111_v17  ;;  %8760 = vmatprep.subr.bf16.mxu1 %v15160_v54 }
 0xd08   : > { %4982 = vmatpush1.bf16.msra.mxu0 %v13115_v1  ;;  %8761 = vmatpush3.bf16.msra.mxu1 %v13118_v55 }
 0xd09   : > { %5111 = vmatprep.subr.bf16.mxu0 %v15637_v11  ;;  %8766 = vmatprep.subr.bf16.mxu1 %v15160_v54 }
 0xd0b   : > { %5000 = vmatmul.mubr.bf16.vlgmr.msra.gmra.mxu0 %v4966_v39  ;;  %8763 = vmatmul.mubr.bf16.vlgmr.msra.gmra.mxu1 %v4966_v39  ;;  %v15659_v39 = vld [vmem:[#allocation25_spill] sm:$0xff] }
 0xd0c   : > { %5112 = vmatpush1.bf16.msra.mxu0 %v13127_v47  ;;  %8767 = vmatpush3.bf16.msra.mxu1 %v12822_v53  ;;  %v15639_v53 = vld [vmem:[#allocation82_spill] sm:$0xff] }
 0xd0d   : > { %5113 = vmatprep.subr.bf16.mxu0 %v13131_v36  ;;  %8768 = vmatprep.subr.bf16.mxu1 %v15160_v54 }
 0xd0e   : > { %5143 = vmatprep.mubr.bf16.mxu0 %v15154_v52  ;;  %8782 = vmatprep.mubr.msk.bf16.mxu1 %vm10558_vm0, %v15160_v54 }
 0xd10   : > { %5114 = vmatpush1.bf16.msra.mxu0 %v13138_v41  ;;  %8769 = vmatpush3.bf16.msra.mxu1 %v12831_v51  ;;  %v15644_v51 = vld [vmem:[#allocation28_spill] sm:$0xff] }
 0xd11   : > { %5115 = vmatprep.subr.bf16.mxu0 %v13142_v13  ;;  %8770 = vmatprep.subr.bf16.mxu1 %v15160_v54 }
 0xd14   : > { %5116 = vmatpush1.bf16.msra.mxu0 %v15638_v6  ;;  %8771 = vmatpush3.bf16.msra.mxu1 %v15639_v53  ;;  %v15660_v6 = vld [vmem:[#allocation21_spill] sm:$0xff] }
 0xd15   : > { %5117 = vmatprep.subr.bf16.mxu0 %v15640_v18  ;;  %8772 = vmatprep.subr.bf16.mxu1 %v15160_v54  ;;  %v15661_v53 = vld [vmem:[#allocation57_spill] sm:$0xff]  ;;  %v15663_v18 = vld [vmem:[#allocation60_spill] sm:$0xff] }
 0xd18   : > { %5118 = vmatpush1.bf16.msra.mxu0 %v15641_v42  ;;  %8773 = vmatpush3.bf16.msra.mxu1 %v15642_v32  ;;  %v15664_v42 = vld [vmem:[#allocation61_spill] sm:$0xff]  ;;  %v15665_v32 = vld [vmem:[#allocation62_spill] sm:$0xff] }
 0xd19   : > { %5119 = vmatprep.subr.bf16.mxu0 %v15643_v57  ;;  %8774 = vmatprep.subr.bf16.mxu1 %v15160_v54  ;;  %v15666_v57 = vld [vmem:[#allocation64_spill] sm:$0xff] }
 0xd1c   : > { %5120 = vmatpush1.bf16.msra.mxu0 %v15644_v51  ;;  %8775 = vmatpush3.bf16.msra.mxu1 %v15645_v22  ;;  %v15667_v51 = vld [vmem:[#allocation65_spill] sm:$0xff]  ;;  %v15668_v22 = vld [vmem:[#allocation66_spill] sm:$0xff] }
 0xd1d   : > { %5121 = vmatprep.subr.bf16.mxu0 %v15646_v62  ;;  %8776 = vmatprep.subr.bf16.mxu1 %v15160_v54  ;;  %v15669_v62 = vld [vmem:[#allocation68_spill] sm:$0xff] }
 0xd20   : > { %5122 = vmatpush1.bf16.msra.mxu0 %v15647_v21  ;;  %8777 = vmatpush3.bf16.msra.mxu1 %v15648_v46  ;;  %v15670_v21 = vld [vmem:[#allocation69_spill] sm:$0xff]  ;;  %v15671_v46 = vld [vmem:[#allocation70_spill] sm:$0xff] }
 0xd21   : > { %5123 = vmatprep.subr.bf16.mxu0 %v15649_v40  ;;  %8778 = vmatprep.subr.bf16.mxu1 %v15160_v54  ;;  %v15672_v40 = vld [vmem:[#allocation72_spill] sm:$0xff] }
 0xd24   : > { %5124 = vmatpush1.bf16.msra.mxu0 %v15650_v25  ;;  %8779 = vmatpush3.bf16.msra.mxu1 %v15651_v37  ;;  %v15673_v25 = vld [vmem:[#allocation73_spill] sm:$0xff]  ;;  %v15674_v37 = vld [vmem:[#allocation74_spill] sm:$0xff] }
 0xd25   : > { %5125 = vmatprep.subr.bf16.mxu0 %v15652_v8  ;;  %8780 = vmatprep.subr.bf16.mxu1 %v15160_v54  ;;  %v15675_v8 = vld [vmem:[#allocation76_spill] sm:$0xff] }
 0xd28   : > { %5126 = vmatpush1.bf16.msra.mxu0 %v15653_v58  ;;  %8781 = vmatpush3.bf16.msra.mxu1 %v15654_v27  ;;  %v15676_v58 = vld [vmem:[#allocation77_spill] sm:$0xff] }
 0xd29   : > { %5240 = vmatprep.subr.bf16.mxu0 %v15655_v26  ;;  %8786 = vmatprep.subr.bf16.mxu1 %v15160_v54  ;;  %v15677_v27 = vld [vmem:[#allocation81_spill] sm:$0xff]  ;;  %v15678_v26 = vld [vmem:[#allocation122_spill] sm:$0xff] }
 0xd2b   : > { %5144 = vmatmul.mubr.bf16.vlgmr.msra.gmra.mxu0 %v13259_v19  ;;  %8783 = vmatmul.mubr.bf16.vlgmr.msra.gmra.mxu1 %v13259_v19  ;;  %v15662_v19 = vld [vmem:[#allocation58_spill] sm:$0xff] }
 0xd2c   : > { %5241 = vmatpush1.bf16.msra.mxu0 %v15656_v63  ;;  %8787 = vmatpush3.bf16.msra.mxu1 %v15657_v10  ;;  %v15679_v63 = vld [vmem:[#allocation123_spill] sm:$0xff] }
 0xd2d   : > { %5242 = vmatprep.subr.bf16.mxu0 %v15658_v20  ;;  %8788 = vmatprep.subr.bf16.mxu1 %v15160_v54 }
 0xd2e   : > { %5272 = vmatprep.mubr.bf16.mxu0 %v15154_v52  ;;  %8802 = vmatprep.mubr.msk.bf16.mxu1 %vm10558_vm0, %v15160_v54 }
 0xd30   : > { %5243 = vmatpush1.bf16.msra.mxu0 %v15659_v39  ;;  %8789 = vmatpush3.bf16.msra.mxu1 %v15660_v6 }
 0xd31   : > { %5244 = vmatprep.subr.bf16.mxu0 %v15661_v53  ;;  %8790 = vmatprep.subr.bf16.mxu1 %v15160_v54 }
 0xd34   : > { %5245 = vmatpush1.bf16.msra.mxu0 %v15662_v19  ;;  %8791 = vmatpush3.bf16.msra.mxu1 %v15663_v18 }
 0xd35   : > { %5246 = vmatprep.subr.bf16.mxu0 %v15664_v42  ;;  %8792 = vmatprep.subr.bf16.mxu1 %v15160_v54 }
 0xd38   : > { %5247 = vmatpush1.bf16.msra.mxu0 %v15665_v32  ;;  %8793 = vmatpush3.bf16.msra.mxu1 %v15666_v57  ;;  %v15680_v32 = vld [vmem:[#allocation17_spill] sm:$0xff] }
 0xd39   : > { %5248 = vmatprep.subr.bf16.mxu0 %v15667_v51  ;;  %8794 = vmatprep.subr.bf16.mxu1 %v15160_v54 }
 0xd3c   : > { %5249 = vmatpush1.bf16.msra.mxu0 %v15668_v22  ;;  %8795 = vmatpush3.bf16.msra.mxu1 %v15669_v62 }
 0xd3d   : > { %5250 = vmatprep.subr.bf16.mxu0 %v15670_v21  ;;  %8796 = vmatprep.subr.bf16.mxu1 %v15160_v54 }
 0xd40   : > { %5251 = vmatpush1.bf16.msra.mxu0 %v15671_v46  ;;  %8797 = vmatpush3.bf16.msra.mxu1 %v15672_v40 }
 0xd41   : > { %5252 = vmatprep.subr.bf16.mxu0 %v15673_v25  ;;  %8798 = vmatprep.subr.bf16.mxu1 %v15160_v54 }
 0xd44   : > { %5253 = vmatpush1.bf16.msra.mxu0 %v15674_v37  ;;  %8799 = vmatpush3.bf16.msra.mxu1 %v15675_v8 }
 0xd45   : > { %5254 = vmatprep.subr.bf16.mxu0 %v15676_v58  ;;  %8800 = vmatprep.subr.bf16.mxu1 %v15160_v54 }
 0xd48   : > { %5255 = vmatpush1.bf16.msra.mxu0 %v15677_v27  ;;  %8801 = vmatpush3.bf16.msra.mxu1 %v15678_v26 }
 0xd49   : > { %5325 = vmatprep.subr.bf16.mxu0 %v15679_v63  ;;  %8806 = vmatprep.subr.bf16.mxu1 %v15160_v54 }
 0xdab   : > { %v4959_v10 = vpop.f32.mrf.mxu1  ;;  %v4916_v53 = vpop.f32.mrf.mxu0 }
 0xdac   : > { %v4917_v57 = vadd.f32 %v4916_v53, %v15680_v32  ;;  %v4960_v15 = vadd.f32 %v4959_v10, %v11443_v7 }
 0xdad   : > { %v8744_v20 = vpop.f32.mrf.mxu1  ;;  %v4918_v19 = vpop.f32.mrf.mxu0 }
 0xdae   : > { %v4919_v58 = vadd.f32 %v4918_v19, %v11428_v29  ;;  %v15682_v19 = vld [vmem:[#allocation97_spill] sm:$0xff] }
 0xdaf   : > { %v13376_v39 = vpop.f32.mrf.mxu1  ;;  %v4920_v18 = vpop.f32.mrf.mxu0 }
 0xdb0   : > { %v4921_v40 = vadd.f32 %v4920_v18, %v15680_v32  ;;  %v4963_v13 = vadd.f32 %v13376_v39, %v11443_v7 }
 0xdb1   : > { %v8745_v6 = vpop.f32.mrf.mxu1  ;;  %v13378_v42 = vpop.f32.mrf.mxu0 }
 0xdcb   : > { %v5001_v51 = vpop.f32.mrf.mxu0  ;;  %v5044_v22 = vpop.f32.mrf.mxu1 }
 0xdcc   : > { %v5051_v62 = vadd.f32 %v5001_v51, %v4917_v57 }
 0xdcd   : > { %v5003_v21 = vpop.f32.mrf.mxu0  ;;  %v8764_v46 = vpop.f32.mrf.mxu1 }
 0xdce   : > { %v7603_v25 = vmul.f32 -1.442695, %v5051_v62  ;;  %v5052_v63 = vadd.f32 %v5003_v21, %v4919_v58  ;;  %v5454_v58 = vstv %s5453_s13 }
 0xdcf   : > { %v5005_v37 = vpop.f32.mrf.mxu0  ;;  %v5047_v8 = vpop.f32.mrf.mxu1 }
 0xdd0   : > { %9745 = vpow2.f32 %v7603_v25  ;;  %v5053_v27 = vadd.f32 %v5005_v37, %v4921_v40  ;;  %v7604_v6 = vmul.f32 -1.442695, %v5052_v63  ;;  %v785_v25 = vadd.f32 %v15682_v19, %v15681_v4  ;;  %v15683_v63 = vld [vmem:[#allocation51_spill] sm:$0xff] }
 0xdd1   : > { %v8765_v26 = vpop.f32.mrf.mxu1  ;;  %v13383_v62 = vpop.f32.mrf.mxu0  ;;  %vm5455_vm6 = vcmp.eq.s32.totalorder %v15683_v63, %v5454_v58 }
 0xdd2   : > { %v7605_v20 = vmul.f32 -1.442695, %v5053_v27  ;;  %v5079_v27 = vadd.f32 %v13222_v49, %v5044_v22  ;;  %v5457_v19 = vsel %vm5455_vm6, 1, %v15154_v52 }
 0xdd3   : > { %5460 = vperm.xlu0 %9219, %v5457_v19   ;;  %v15687_v19 = vld [vmem:[#allocation100_spill] sm:$0xff] }
 0xdd4   : > { %9747 = vpow2.f32 %v7605_v20  ;;  %v15684_v20 = vld [vmem:[#allocation52_spill] sm:$0xff] }
 0xdd5   : > { %9749 = vpow2.f32 %v7604_v6  ;;  %vm5456_vm7 = vcmp.eq.s32.totalorder %v15684_v20, %v5454_v58 }
 0xddd   : > { %v9746_v53 = vpop.eup %9745 }
 0xdde   : > { %v5067_v57 = vadd.f32 1.0, %v9746_v53  ;;  %v15685_v53 = vld [vmem:[#allocation99_spill] sm:$0xff] }
 0xde0   : > { %9751 = vrcp.f32 %v5067_v57  ;;  %v789_v57 = vadd.f32 %v15685_v53, %v15681_v4  ;;  %v5080_v53 = vadd.f32 %v13222_v49, %v5047_v8 }
 0xde1   : > { %v9748_v51 = vpop.eup %9747 }
 0xde2   : > { %v5069_v46 = vadd.f32 1.0, %v9748_v51  ;;  %v9750_v18 = vpop.eup %9749 }
 0xde3   : > { %v5068_v40 = vadd.f32 1.0, %v9750_v18  ;;  %v5458_v18 = vsel %vm5456_vm7, 1, %v15154_v52 }
 0xde4   : > { %9753 = vrcp.f32 %v5069_v46  ;;  %5463 = vperm.xlu1 %9220, %v5458_v18   ;;  %v791_v18 = vadd.f32 %v15687_v19, %v11095_v28 }
 0xde5   : > { %9755 = vrcp.f32 %v5068_v40 }
 0xdeb   : > { %v5145_v37 = vpop.f32.mrf.mxu0  ;;  %v5188_v21 = vpop.f32.mrf.mxu1 }
 0xdec   : > { %v5195_v26 = vadd.f32 %v5145_v37, %v785_v25  ;;  %v15686_v25 = vld [vmem:[#allocation98_spill] sm:$0xff] }
 0xded   : > { %v9752_v6 = vpop.eup %9751  ;;  %v5147_v51 = vpop.f32.mrf.mxu0  ;;  %v787_v37 = vadd.f32 %v15686_v25, %v11095_v28 }
 0xdee   : > { %v8784_v46 = vpop.f32.mrf.mxu1  ;;  %v5081_v32 = vmul.f32 %v9752_v6, %v5079_v27  ;;  %v7607_v22 = vmul.f32 -1.442695, %v5195_v26 }
 0xdef   : > { %v5149_v58 = vpop.f32.mrf.mxu0  ;;  %v5196_v27 = vadd.f32 %v5147_v51, %v787_v37 }
 0xdf0   : > { %v5191_v20 = vpop.f32.mrf.mxu1  ;;  %v5083_v63 = vadd.f32 %v5081_v32, %v4960_v15  ;;  %9757 = vpow2.f32 %v7607_v22  ;;  %v5197_v46 = vadd.f32 %v5149_v58, %v789_v57 }
 0xdf1   : > { %v9754_v4 = vpop.eup %9753  ;;  %v5151_v6 = vpop.f32.mrf.mxu0  ;;  %v7608_v32 = vmul.f32 -1.442695, %v5196_v27  ;;  %v5223_v27 = vadd.f32 %v13016_v2, %v5188_v21 }
 0xdf2   : > { %v8785_v10 = vpop.f32.mrf.mxu1  ;;  %9759 = vtanh.f32 %v5083_v63  ;;  %v5082_v40 = vmul.f32 %v9754_v4, %v5080_v53  ;;  %v7609_v26 = vmul.f32 -1.442695, %v5197_v46  ;;  %v5198_v15 = vadd.f32 %v5151_v6, %v791_v18  ;;  %v9756_v57 = vpop.eup %9755 }
 0xdf3   : > { %v5087_v58 = vsub.f32 1.0, %v9756_v57  ;;  %v5091_v51 = vmul.f32 %v9756_v57, %v13242_v3  ;;  %v4923_v18 = vadd.f32 %v13378_v42, %v11428_v29  ;;  %v15736_v3 = vld [vmem:[#allocation17_spill] sm:$0xff] }
 0xdf4   : > { %v13403_v25 = vadd.f32 %v5082_v40, %v4963_v13  ;;  %9761 = vpow2.f32 %v7609_v26  ;;  %v7610_v8 = vmul.f32 -1.442695, %v5198_v15  ;;  %v15689_v15 = vld [vmem:[#allocation39_spill] sm:$0xff] }
 0xdf5   : > { %9763 = vpow2.f32 %v7608_v32 }
 0xdf6   : > { %9765 = vpow2.f32 %v7610_v8  ;;  %v5224_v8 = vadd.f32 %v13016_v2, %v5191_v20 }
 0xdfd   : > { %v9758_v22 = vpop.eup %9757 }
 0xdfe   : > { %v5211_v39 = vadd.f32 1.0, %v9758_v22  ;;  %v15690_v22 = vld [vmem:[#allocation19_spill] sm:$0xff] }
 0xdff   : > { %v9760_v63 = vpop.eup %9759 }
 0xe00   : > { %9767 = vrcp.f32 %v5211_v39  ;;  %v5089_v4 = vmul.f32 %v9760_v63, %v5087_v58  ;;  %v15691_v39 = vld [vmem:[#allocation41_spill] sm:$0xff]  ;;  %v5054_v63 = vadd.f32 %v13383_v62, %v4923_v18 }
 0xe01   : > { %v9762_v37 = vpop.eup %9761  ;;  %v961_v58 = vadd.f32 %v15691_v39, %v15690_v22  ;;  %v13565_v39 = vld [vmem:[#allocation6 + $0x13c] ss:$12 sps:$4 sm:$0xff]  }
 0xe02   : > { %v5213_v53 = vadd.f32 1.0, %v9762_v37  ;;  %v13406_v46 = vadd.f32 %v5091_v51, %v5089_v4  ;;  %v9764_v13 = vpop.eup %9763  ;;  %v7606_v51 = vmul.f32 -1.442695, %v5054_v63  ;;  %15717 = vst [vmem:[#allocation34_spill] sm:$0xff] %v13565_v39  ;;  %v13572_v63 = vld [vmem:[#allocation6 + $0x140] ss:$12 sps:$4 sm:$0xff]  }
 0xe03   : > { %v9766_v10 = vpop.eup %9765  ;;  %v5212_v40 = vadd.f32 1.0, %v9764_v13  ;;  %15719 = vst [vmem:[#allocation125_spill] sm:$0xff] %v13572_v63 }
 0xe04   : > { %15688 = vst [vmem:[#allocation132_spill] sm:$0xff] %v13406_v46  ;;  %9769 = vrcp.f32 %v5213_v53  ;;  %v5214_v6 = vadd.f32 1.0, %v9766_v10 }
 0xe05   : > { %9771 = vrcp.f32 %v5212_v40 }
 0xe06   : > { %9773 = vrcp.f32 %v5214_v6 }
 0xe0d   : > { %v9768_v26 = vpop.eup %9767 }
 0xe0e   : > { %v5225_v19 = vmul.f32 %v9768_v26, %v5223_v27 }
 0xe10   : > { %v5227_v32 = vadd.f32 %v5225_v19, %v15689_v15 }
 0xe11   : > { %v9770_v57 = vpop.eup %9769 }
 0xe12   : > { %9775 = vtanh.f32 %v5227_v32  ;;  %v5226_v21 = vmul.f32 %v9770_v57, %v5224_v8  ;;  %v9772_v37 = vpop.eup %9771  ;;  %v13552_v32 = vld [vmem:[#allocation6 + $0x154] ss:$12 sps:$4 sm:$0xff]   ;;  %v13559_v8 = vld [vmem:[#allocation6 + $0x150] ss:$12 sps:$4 sm:$0xff]   ;;  %v13562_v57 = vld [vmem:[#allocation6 + $0x158] ss:$12 sps:$4 sm:$0xff]  }
 0xe13   : > { %v9774_v53 = vpop.eup %9773  ;;  %v5231_v42 = vsub.f32 1.0, %v9772_v37  ;;  %v5235_v2 = vmul.f32 %v9772_v37, %v13252_v34  ;;  %v13530_v34 = vld [vmem:[#allocation8 + $0x4] ss:$12 sps:$4 sm:$0xff]   ;;  %15714 = vst [vmem:[#allocation15_spill] sm:$0xff] %v13552_v32  ;;  %15715 = vst [vmem:[#allocation18_spill] sm:$0xff] %v13559_v8 }
 0xe14   : > { %v5228_v4 = vadd.f32 %v5226_v21, %v961_v58  ;;  %v5232_v20 = vsub.f32 1.0, %v9774_v53  ;;  %v5236_v62 = vmul.f32 %v9774_v53, %v13255_v59  ;;  %15708 = vst [vmem:[#allocation16_spill] sm:$0xff] %v13530_v34  ;;  %v13534_v59 = vld [vmem:[#allocation8] ss:$12 sps:$4 sm:$0xff]   ;;  %15716 = vst [vmem:[#allocation96_spill] sm:$0xff] %v13562_v57 }
 0xe15   : > { %15709 = vst [vmem:[#allocation95_spill] sm:$0xff] %v13534_v59  ;;  %v13569_v58 = vld [vmem:[#allocation6 + $0x138] ss:$12 sps:$4 sm:$0xff]   ;;  %v13589_v53 = vld [vmem:[#allocation6 + $0x108] ss:$12 sps:$4 sm:$0xff]  }
 0xe16   : > { %9777 = vtanh.f32 %v5228_v4  ;;  %15718 = vst [vmem:[#allocation36_spill] sm:$0xff] %v13569_v58  ;;  %v13575_v21 = vld [vmem:[#allocation6 + $0x124] ss:$12 sps:$4 sm:$0xff]   ;;  %v13579_v4 = vld [vmem:[#allocation6 + $0x120] ss:$12 sps:$4 sm:$0xff]   ;;  %15724 = vst [vmem:[#allocation84_spill] sm:$0xff] %v13589_v53 }
 0xe17   : > { %9779 = vpow2.f32 %v7606_v51  ;;  %15720 = vst [vmem:[#allocation126_spill] sm:$0xff] %v13575_v21  ;;  %15721 = vst [vmem:[#allocation128_spill] sm:$0xff] %v13579_v4  ;;  %v13582_v51 = vld [vmem:[#allocation6 + $0x128] ss:$12 sps:$4 sm:$0xff]   ;;  %v13585_v37 = vld [vmem:[#allocation6 + $0x10c] ss:$12 sps:$4 sm:$0xff]  }
 0xe18   : > { %15722 = vst [vmem:[#allocation144_spill] sm:$0xff] %v13582_v51  ;;  %15723 = vst [vmem:[#allocation82_spill] sm:$0xff] %v13585_v37 }
 0xe1f   : > { %v9776_v13 = vpop.eup %9775 }
 0xe20   : > { %v5233_v10 = vmul.f32 %v9776_v13, %v5231_v42  ;;  %v13592_v42 = vld [vmem:[#allocation6 + $0x110] ss:$12 sps:$4 sm:$0xff]   ;;  %v13595_v13 = vld [vmem:[#allocation6 + $0xf4] ss:$12 sps:$4 sm:$0xff]  }
 0xe21   : > { %15725 = vst [vmem:[#allocation83_spill] sm:$0xff] %v13592_v42  ;;  %15726 = vst [vmem:[#allocation85_spill] sm:$0xff] %v13595_v13 }
 0xe22   : > { %v13417_v40 = vadd.f32 %v5235_v2, %v5233_v10  ;;  %v13599_v10 = vld [vmem:[#allocation6 + $0xf0] ss:$12 sps:$4 sm:$0xff]   ;;  %v13602_v2 = vld [vmem:[#allocation6 + $0xf8] ss:$12 sps:$4 sm:$0xff]  }
 0xe23   : > { %v9778_v27 = vpop.eup %9777  ;;  %15727 = vst [vmem:[#allocation26_spill] sm:$0xff] %v13599_v10  ;;  %15728 = vst [vmem:[#allocation28_spill] sm:$0xff] %v13602_v2 }
 0xe24   : > { %v5234_v26 = vmul.f32 %v9778_v27, %v5232_v20  ;;  %v9780_v19 = vpop.eup %9779  ;;  %v13605_v20 = vld [vmem:[#allocation6 + $0xdc] ss:$12 sps:$4 sm:$0xff]   ;;  %v13609_v27 = vld [vmem:[#allocation6 + $0xd8] ss:$12 sps:$4 sm:$0xff]  }
 0xe25   : > { %v5070_v15 = vadd.f32 1.0, %v9780_v19  ;;  %15729 = vst [vmem:[#allocation86_spill] sm:$0xff] %v13605_v20  ;;  %15730 = vst [vmem:[#allocation88_spill] sm:$0xff] %v13609_v27  ;;  %v13619_v19 = vld [vmem:[#allocation6 + $0xc0] ss:$12 sps:$4 sm:$0xff]  }
 0xe26   : > { %v13420_v6 = vadd.f32 %v5236_v62, %v5234_v26  ;;  %v13612_v26 = vld [vmem:[#allocation6 + $0xe0] ss:$12 sps:$4 sm:$0xff]   ;;  %v13615_v62 = vld [vmem:[#allocation6 + $0xc4] ss:$12 sps:$4 sm:$0xff]   ;;  %15733 = vst [vmem:[#allocation31_spill] sm:$0xff] %v13619_v19 }
 0xe27   : > { %9781 = vrcp.f32 %v5070_v15  ;;  %15731 = vst [vmem:[#allocation87_spill] sm:$0xff] %v13612_v26  ;;  %15732 = vst [vmem:[#allocation89_spill] sm:$0xff] %v13615_v62  ;;  %v13625_v15 = vld [vmem:[#allocation8 + $0x16c] ss:$12 sps:$4 sm:$0xff]  }
 0xe28   : > { %v13424_v18 = vpack.c.bf16 %v13420_v6, %v13417_v40  ;;  %9783 = vtanh.f32 %v13403_v25  ;;  %v13549_v25 = vld [vmem:[#allocation6 + $0x170] ss:$12 sps:$4 sm:$0xff]   ;;  %15735 = vst [vmem:[#allocation141_spill] sm:$0xff] %v13625_v15 }
 0xe29   : > { %15713 = vst [vmem:[#allocation14_spill] sm:$0xff] %v13549_v25 }
 0xe2a   : > { %5273 = vmatmul.mubr.bf16.vlgmr.msra.gmra.mxu0 %v13424_v18  ;;  %8803 = vmatmul.mubr.bf16.vlgmr.msra.gmra.mxu1 %v13424_v18 }
 0xe2b   : > { %5326 = vmatpush1.bf16.msra.mxu0 %v13038_v16  ;;  %8807 = vmatpush3.bf16.msra.mxu1 %v13041_v50 }
 0xe2c   : > { %5327 = vmatprep.subr.bf16.mxu0 %v13044_v45  ;;  %8808 = vmatprep.subr.bf16.mxu1 %v15160_v54 }
 0xe2d   : > { %5357 = vmatprep.mubr.bf16.mxu0 %v15154_v52  ;;  %8822 = vmatprep.mubr.msk.bf16.mxu1 %vm10558_vm0, %v15160_v54 }
 0xe2f   : > { %5328 = vmatpush1.bf16.msra.mxu0 %v13051_v38  ;;  %8809 = vmatpush3.bf16.msra.mxu1 %v13054_v30 }
 0xe30   : > { %5329 = vmatprep.subr.bf16.mxu0 %v13058_v14  ;;  %8810 = vmatprep.subr.bf16.mxu1 %v15160_v54 }
 0xe33   : > { %5330 = vmatpush1.bf16.msra.mxu0 %v13062_v9  ;;  %8811 = vmatpush3.bf16.msra.mxu1 %v13065_v23  ;;  %v15693_v23 = vld [vmem:[#allocation129_spill] sm:$0xff] }
 0xe34   : > { %5331 = vmatprep.subr.bf16.mxu0 %v13068_v60  ;;  %8812 = vmatprep.subr.bf16.mxu1 %v15160_v54  ;;  %v9782_v16 = vpop.eup %9781  ;;  %v13484_v60 = vld [vmem:[#allocation8 + $0x78] ss:$12 sps:$4 sm:$0xff]  }
 0xe35   : > { %v9784_v50 = vpop.eup %9783  ;;  %v5088_v45 = vsub.f32 1.0, %v9782_v16  ;;  %v5092_v30 = vmul.f32 %v9782_v16, %v13294_v12  ;;  %15694 = vst [vmem:[#allocation134_spill] sm:$0xff] %v13484_v60 }
 0xe37   : > { %5332 = vmatpush1.bf16.msra.mxu0 %v13072_v43  ;;  %8813 = vmatpush3.bf16.msra.mxu1 %v13075_v0  ;;  %v5090_v38 = vmul.f32 %v9784_v50, %v5088_v45  ;;  %v13487_v43 = vld [vmem:[#allocation8 + $0x80] ss:$12 sps:$4 sm:$0xff]   ;;  %v13490_v0 = vld [vmem:[#allocation8 + $0x64] ss:$12 sps:$4 sm:$0xff]  }
 0xe38   : > { %5333 = vmatprep.subr.bf16.mxu0 %v13078_v61  ;;  %8814 = vmatprep.subr.bf16.mxu1 %v15160_v54  ;;  %15695 = vst [vmem:[#allocation135_spill] sm:$0xff] %v13487_v43  ;;  %15696 = vst [vmem:[#allocation136_spill] sm:$0xff] %v13490_v0  ;;  %v13497_v61 = vld [vmem:[#allocation8 + $0x68] ss:$12 sps:$4 sm:$0xff]  }
 0xe39   : > { %v13459_v14 = vadd.f32 %v5092_v30, %v5090_v38  ;;  %15698 = vst [vmem:[#allocation138_spill] sm:$0xff] %v13497_v61 }
 0xe3b   : > { %5334 = vmatpush1.bf16.msra.mxu0 %v13082_v56  ;;  %8815 = vmatpush3.bf16.msra.mxu1 %v13085_v31  ;;  %15692 = vst [vmem:[#allocation133_spill] sm:$0xff] %v13459_v14  ;;  %v5324_v9 = vpack.c.bf16 %v13459_v14, %v13406_v46  ;;  %v13500_v56 = vld [vmem:[#allocation8 + $0x4c] ss:$12 sps:$4 sm:$0xff]   ;;  %v13504_v31 = vld [vmem:[#allocation8 + $0x48] ss:$12 sps:$4 sm:$0xff]  }
 0xe3c   : > { %5335 = vmatprep.subr.bf16.mxu0 %v13088_v24  ;;  %8816 = vmatprep.subr.bf16.mxu1 %v15160_v54  ;;  %15699 = vst [vmem:[#allocation139_spill] sm:$0xff] %v13500_v56  ;;  %15700 = vst [vmem:[#allocation90_spill] sm:$0xff] %v13504_v31  ;;  %v13507_v24 = vld [vmem:[#allocation8 + $0x50] ss:$12 sps:$4 sm:$0xff]  }
 0xe3d   : > { %15701 = vst [vmem:[#allocation92_spill] sm:$0xff] %v13507_v24 }
 0xe3f   : > { %5336 = vmatpush1.bf16.msra.mxu0 %v15634_v44  ;;  %8817 = vmatpush3.bf16.msra.mxu1 %v15635_v48  ;;  %v13537_v44 = vld [vmem:[#allocation8 + $0x8] ss:$12 sps:$4 sm:$0xff]   ;;  %v13540_v48 = vld [vmem:[#allocation6 + $0x16c] ss:$12 sps:$4 sm:$0xff]  }
 0xe40   : > { %5337 = vmatprep.subr.bf16.mxu0 %v13098_v33  ;;  %8818 = vmatprep.subr.bf16.mxu1 %v15160_v54  ;;  %v13514_v33 = vld [vmem:[#allocation8 + $0x30] ss:$12 sps:$4 sm:$0xff]   ;;  %15710 = vst [vmem:[#allocation13_spill] sm:$0xff] %v13537_v44  ;;  %15711 = vst [vmem:[#allocation35_spill] sm:$0xff] %v13540_v48 }
 0xe41   : > { %15703 = vst [vmem:[#allocation93_spill] sm:$0xff] %v13514_v33 }
 0xe43   : > { %5338 = vmatpush1.bf16.msra.mxu0 %v13103_v5  ;;  %8819 = vmatpush3.bf16.msra.mxu1 %v13106_v35  ;;  %v13470_v5 = vld [vmem:[#allocation8 + $0xb0] ss:$12 sps:$4 sm:$0xff]   ;;  %v13479_v35 = vld [vmem:[#allocation8 + $0x98] ss:$12 sps:$4 sm:$0xff]  }
 0xe44   : > { %5339 = vmatprep.subr.bf16.mxu0 %v13111_v17  ;;  %8820 = vmatprep.subr.bf16.mxu1 %v15160_v54  ;;  %v13510_v17 = vld [vmem:[#allocation8 + $0x34] ss:$12 sps:$4 sm:$0xff]  }
 0xe45   : > { %15702 = vst [vmem:[#allocation91_spill] sm:$0xff] %v13510_v17 }
 0xe47   : > { %5340 = vmatpush1.bf16.msra.mxu0 %v13115_v1  ;;  %8821 = vmatpush3.bf16.msra.mxu1 %v13118_v55  ;;  %v13517_v1 = vld [vmem:[#allocation8 + $0x38] ss:$12 sps:$4 sm:$0xff]   ;;  %v13520_v55 = vld [vmem:[#allocation8 + $0x1c] ss:$12 sps:$4 sm:$0xff]  }
 0xe48   : > { %5469 = vmatprep.subr.bf16.mxu0 %v15637_v11  ;;  %8826 = vmatprep.subr.bf16.mxu1 %v15160_v54  ;;  %15704 = vst [vmem:[#allocation30_spill] sm:$0xff] %v13517_v1  ;;  %15705 = vst [vmem:[#allocation32_spill] sm:$0xff] %v13520_v55  ;;  %v13546_v11 = vld [vmem:[#allocation6 + $0x168] ss:$12 sps:$4 sm:$0xff]  }
 0xe49   : > { %15712 = vst [vmem:[#allocation37_spill] sm:$0xff] %v13546_v11 }
 0xe4a   : > { %5358 = vmatmul.mubr.bf16.vlgmr.msra.gmra.mxu0 %v5324_v9  ;;  %8823 = vmatmul.mubr.bf16.vlgmr.msra.gmra.mxu1 %v5324_v9 }
 0xe4b   : > { %5470 = vmatpush1.bf16.msra.mxu0 %v13127_v47  ;;  %8827 = vmatpush3.bf16.msra.mxu1 %v13470_v5  ;;  %v13524_v47 = vld [vmem:[#allocation8 + $0x18] ss:$12 sps:$4 sm:$0xff]  }
 0xe4c   : > { %5471 = vmatprep.subr.bf16.mxu0 %v13131_v36  ;;  %8828 = vmatprep.subr.bf16.mxu1 %v15160_v54  ;;  %15706 = vst [vmem:[#allocation79_spill] sm:$0xff] %v13524_v47  ;;  %v13527_v36 = vld [vmem:[#allocation8 + $0x20] ss:$12 sps:$4 sm:$0xff]  }
 0xe4d   : > { %5501 = vmatprep.mubr.bf16.mxu0 %v15154_v52  ;;  %8842 = vmatprep.mubr.msk.bf16.mxu1 %vm10558_vm0, %v15160_v54  ;;  %15707 = vst [vmem:[#allocation94_spill] sm:$0xff] %v13527_v36 }
 0xe4f   : > { %5472 = vmatpush1.bf16.msra.mxu0 %v13138_v41  ;;  %8829 = vmatpush3.bf16.msra.mxu1 %v13479_v35  ;;  %v13494_v41 = vld [vmem:[#allocation8 + $0x60] ss:$12 sps:$4 sm:$0xff]  }
 0xe50   : > { %5473 = vmatprep.subr.bf16.mxu0 %v15693_v23  ;;  %8830 = vmatprep.subr.bf16.mxu1 %v15160_v54  ;;  %15697 = vst [vmem:[#allocation137_spill] sm:$0xff] %v13494_v41 }
 0xe53   : > { %5474 = vmatpush1.bf16.msra.mxu0 %v13484_v60  ;;  %8831 = vmatpush3.bf16.msra.mxu1 %v13487_v43 }
 0xe54   : > { %5475 = vmatprep.subr.bf16.mxu0 %v13490_v0  ;;  %8832 = vmatprep.subr.bf16.mxu1 %v15160_v54 }
 0xe57   : > { %5476 = vmatpush1.bf16.msra.mxu0 %v13494_v41  ;;  %8833 = vmatpush3.bf16.msra.mxu1 %v13497_v61 }
 0xe58   : > { %5477 = vmatprep.subr.bf16.mxu0 %v13500_v56  ;;  %8834 = vmatprep.subr.bf16.mxu1 %v15160_v54 }
 0xe5b   : > { %5478 = vmatpush1.bf16.msra.mxu0 %v13504_v31  ;;  %8835 = vmatpush3.bf16.msra.mxu1 %v13507_v24 }
 0xe5c   : > { %5479 = vmatprep.subr.bf16.mxu0 %v13510_v17  ;;  %8836 = vmatprep.subr.bf16.mxu1 %v15160_v54 }
 0xe5f   : > { %5480 = vmatpush1.bf16.msra.mxu0 %v13514_v33  ;;  %8837 = vmatpush3.bf16.msra.mxu1 %v13517_v1 }
 0xe60   : > { %5481 = vmatprep.subr.bf16.mxu0 %v13520_v55  ;;  %8838 = vmatprep.subr.bf16.mxu1 %v15160_v54 }
 0xe63   : > { %5482 = vmatpush1.bf16.msra.mxu0 %v13524_v47  ;;  %8839 = vmatpush3.bf16.msra.mxu1 %v13527_v36 }
 0xe64   : > { %5483 = vmatprep.subr.bf16.mxu0 %v13530_v34  ;;  %8840 = vmatprep.subr.bf16.mxu1 %v15160_v54 }
 0xe67   : > { %5484 = vmatpush1.bf16.msra.mxu0 %v13534_v59  ;;  %8841 = vmatpush3.bf16.msra.mxu1 %v13537_v44 }
 0xe68   : > { %5598 = vmatprep.subr.bf16.mxu0 %v13540_v48  ;;  %8846 = vmatprep.subr.bf16.mxu1 %v15160_v54 }
 0xe6a   : > { %5502 = vmatmul.mubr.bf16.vlgmr.msra.gmra.mxu0 %v13424_v18  ;;  %8843 = vmatmul.mubr.bf16.vlgmr.msra.gmra.mxu1 %v13424_v18  ;;  %v13622_v18 = vld [vmem:[#allocation6 + $0xc8] ss:$12 sps:$4 sm:$0xff]  }
 0xe6b   : > { %5599 = vmatpush1.bf16.msra.mxu0 %v13546_v11  ;;  %8847 = vmatpush3.bf16.msra.mxu1 %v13549_v25  ;;  %15734 = vst [vmem:[#allocation33_spill] sm:$0xff] %v13622_v18 }
 0xe6c   : > { %5600 = vmatprep.subr.bf16.mxu0 %v13552_v32  ;;  %8848 = vmatprep.subr.bf16.mxu1 %v15160_v54 }
 0xe6d   : > { %5630 = vmatprep.mubr.bf16.mxu0 %v15154_v52  ;;  %8862 = vmatprep.mubr.msk.bf16.mxu1 %vm10558_vm0, %v15160_v54 }
 0xe6f   : > { %5601 = vmatpush1.bf16.msra.mxu0 %v13559_v8  ;;  %8849 = vmatpush3.bf16.msra.mxu1 %v13562_v57 }
 0xe70   : > { %5602 = vmatprep.subr.bf16.mxu0 %v13565_v39  ;;  %8850 = vmatprep.subr.bf16.mxu1 %v15160_v54 }
 0xe73   : > { %5603 = vmatpush1.bf16.msra.mxu0 %v13569_v58  ;;  %8851 = vmatpush3.bf16.msra.mxu1 %v13572_v63 }
 0xe74   : > { %5604 = vmatprep.subr.bf16.mxu0 %v13575_v21  ;;  %8852 = vmatprep.subr.bf16.mxu1 %v15160_v54 }
 0xe77   : > { %5605 = vmatpush1.bf16.msra.mxu0 %v13579_v4  ;;  %8853 = vmatpush3.bf16.msra.mxu1 %v13582_v51 }
 0xe78   : > { %5606 = vmatprep.subr.bf16.mxu0 %v13585_v37  ;;  %8854 = vmatprep.subr.bf16.mxu1 %v15160_v54 }
 0xe7b   : > { %5607 = vmatpush1.bf16.msra.mxu0 %v13589_v53  ;;  %8855 = vmatpush3.bf16.msra.mxu1 %v13592_v42 }
 0xe7c   : > { %5608 = vmatprep.subr.bf16.mxu0 %v13595_v13  ;;  %8856 = vmatprep.subr.bf16.mxu1 %v15160_v54 }
 0xe7f   : > { %5609 = vmatpush1.bf16.msra.mxu0 %v13599_v10  ;;  %8857 = vmatpush3.bf16.msra.mxu1 %v13602_v2 }
 0xe80   : > { %5610 = vmatprep.subr.bf16.mxu0 %v13605_v20  ;;  %8858 = vmatprep.subr.bf16.mxu1 %v15160_v54 }
 0xe83   : > { %5611 = vmatpush1.bf16.msra.mxu0 %v13609_v27  ;;  %8859 = vmatpush3.bf16.msra.mxu1 %v13612_v26 }
 0xe84   : > { %5612 = vmatprep.subr.bf16.mxu0 %v13615_v62  ;;  %8860 = vmatprep.subr.bf16.mxu1 %v15160_v54 }
 0xe87   : > { %5613 = vmatpush1.bf16.msra.mxu0 %v13619_v19  ;;  %8861 = vmatpush3.bf16.msra.mxu1 %v13622_v18 }
 0xe88   : > { %5683 = vmatprep.subr.bf16.mxu0 %v13625_v15  ;;  %8866 = vmatprep.subr.bf16.mxu1 %v15160_v54 }
 0xeea   : > { %v5317_v16 = vpop.f32.mrf.mxu1  ;;  %v5274_v30 = vpop.f32.mrf.mxu0 }
 0xeeb   : > { %v5275_v22 = vadd.f32 %v5274_v30, %v15736_v3  ;;  %v5318_v51 = vadd.f32 %v5317_v16, %v11443_v7 }
 0xeec   : > { %v8804_v50 = vpop.f32.mrf.mxu1  ;;  %v5276_v9 = vpop.f32.mrf.mxu0 }
 0xeed   : > { %v5277_v10 = vadd.f32 %v5276_v9, %v11428_v29  ;;  %v15738_v9 = vld [vmem:[#allocation101_spill] sm:$0xff] }
 0xeee   : > { %v13629_v45 = vpop.f32.mrf.mxu1  ;;  %v5278_v23 = vpop.f32.mrf.mxu0 }
 0xeef   : > { %v5279_v15 = vadd.f32 %v5278_v23, %v15736_v3  ;;  %v15737_v3 = vld [vmem:[#allocation47_spill] sm:$0xff]  ;;  %v5321_v21 = vadd.f32 %v13629_v45, %v11443_v7 }
 0xef0   : > { %v8805_v38 = vpop.f32.mrf.mxu1  ;;  %v13631_v12 = vpop.f32.mrf.mxu0 }
 0xf0a   : > { %v5359_v19 = vpop.f32.mrf.mxu0  ;;  %v5402_v18 = vpop.f32.mrf.mxu1 }
 0xf0b   : > { %v5409_v62 = vadd.f32 %v5359_v19, %v5275_v22 }
 0xf0c   : > { %v5361_v26 = vpop.f32.mrf.mxu0  ;;  %v8824_v27 = vpop.f32.mrf.mxu1 }
 0xf0d   : > { %v7611_v20 = vmul.f32 -1.442695, %v5409_v62  ;;  %v5410_v42 = vadd.f32 %v5361_v26, %v5277_v10  ;;  %v5812_v26 = vstv %s5811_s17 }
 0xf0e   : > { %v5363_v2 = vpop.f32.mrf.mxu0  ;;  %v5405_v50 = vpop.f32.mrf.mxu1 }
 0xf0f   : > { %9785 = vpow2.f32 %v7611_v20  ;;  %v5411_v38 = vadd.f32 %v5363_v2, %v5279_v15  ;;  %v7612_v30 = vmul.f32 -1.442695, %v5410_v42  ;;  %v795_v20 = vadd.f32 %v15738_v9, %v15737_v3  ;;  %v15739_v15 = vld [vmem:[#allocation51_spill] sm:$0xff] }
 0xf10   : > { %v8825_v13 = vpop.f32.mrf.mxu1  ;;  %v13636_v23 = vpop.f32.mrf.mxu0  ;;  %vm5813_vm8 = vcmp.eq.s32.totalorder %v15739_v15, %v5812_v26 }
 0xf11   : > { %v7613_v53 = vmul.f32 -1.442695, %v5411_v38  ;;  %v5815_v9 = vsel %vm5813_vm8, 1, %v15154_v52 }
 0xf12   : > { %5818 = vperm.xlu0 %9219, %v5815_v9   ;;  %v15743_v9 = vld [vmem:[#allocation104_spill] sm:$0xff] }
 0xf13   : > { %9787 = vpow2.f32 %v7613_v53  ;;  %v5437_v53 = vadd.f32 %v13222_v49, %v5402_v18 }
 0xf14   : > { %9789 = vpow2.f32 %v7612_v30  ;;  %v15741_v30 = vld [vmem:[#allocation103_spill] sm:$0xff] }
 0xf1c   : > { %v9786_v37 = vpop.eup %9785 }
 0xf1d   : > { %v5425_v22 = vadd.f32 1.0, %v9786_v37  ;;  %v15740_v37 = vld [vmem:[#allocation52_spill] sm:$0xff] }
 0xf1e   : > { %vm5814_vm9 = vcmp.eq.s32.totalorder %v15740_v37, %v5812_v26 }
 0xf1f   : > { %9791 = vrcp.f32 %v5425_v22  ;;  %v799_v22 = vadd.f32 %v15741_v30, %v15737_v3  ;;  %v5438_v30 = vadd.f32 %v13222_v49, %v5405_v50 }
 0xf20   : > { %v9788_v27 = vpop.eup %9787 }
 0xf21   : > { %v5427_v19 = vadd.f32 1.0, %v9788_v27  ;;  %v9790_v62 = vpop.eup %9789 }
 0xf22   : > { %v5426_v2 = vadd.f32 1.0, %v9790_v62  ;;  %v5816_v62 = vsel %vm5814_vm9, 1, %v15154_v52 }
 0xf23   : > { %9793 = vrcp.f32 %v5427_v19  ;;  %5821 = vperm.xlu1 %9220, %v5816_v62   ;;  %v801_v62 = vadd.f32 %v15743_v9, %v11095_v28 }
 0xf24   : > { %9795 = vrcp.f32 %v5426_v2 }
 0xf2a   : > { %v5503_v13 = vpop.f32.mrf.mxu0  ;;  %v5546_v10 = vpop.f32.mrf.mxu1 }
 0xf2b   : > { %v5553_v42 = vadd.f32 %v5503_v13, %v795_v20  ;;  %v15742_v20 = vld [vmem:[#allocation102_spill] sm:$0xff] }
 0xf2c   : > { %v9792_v38 = vpop.eup %9791  ;;  %v5505_v27 = vpop.f32.mrf.mxu0  ;;  %v797_v13 = vadd.f32 %v15742_v20, %v11095_v28 }
 0xf2d   : > { %v8844_v19 = vpop.f32.mrf.mxu1  ;;  %v5439_v4 = vmul.f32 %v9792_v38, %v5437_v53  ;;  %v7615_v18 = vmul.f32 -1.442695, %v5553_v42 }
 0xf2e   : > { %v5507_v26 = vpop.f32.mrf.mxu0  ;;  %v5554_v53 = vadd.f32 %v5505_v27, %v797_v13 }
 0xf2f   : > { %v5549_v37 = vpop.f32.mrf.mxu1  ;;  %v5441_v15 = vadd.f32 %v5439_v4, %v5318_v51  ;;  %9797 = vpow2.f32 %v7615_v18  ;;  %v5555_v19 = vadd.f32 %v5507_v26, %v799_v22 }
 0xf30   : > { %v9794_v3 = vpop.eup %9793  ;;  %v5509_v38 = vpop.f32.mrf.mxu0  ;;  %v7616_v49 = vmul.f32 -1.442695, %v5554_v53 }
 0xf31   : > { %v8845_v16 = vpop.f32.mrf.mxu1  ;;  %9799 = vtanh.f32 %v5441_v15  ;;  %v5440_v2 = vmul.f32 %v9794_v3, %v5438_v30  ;;  %v7617_v42 = vmul.f32 -1.442695, %v5555_v19  ;;  %v5556_v4 = vadd.f32 %v5509_v38, %v801_v62  ;;  %v9796_v50 = vpop.eup %9795 }
 0xf32   : > { %v5445_v18 = vsub.f32 1.0, %v9796_v50  ;;  %v5449_v27 = vmul.f32 %v9796_v50, %v13406_v46  ;;  %v5281_v62 = vadd.f32 %v13631_v12, %v11428_v29  ;;  %v13753_v46 = vld [vmem:[#allocation8 + $0xe0] ss:$12 sps:$4 sm:$0xff]  }
 0xf33   : > { %v13656_v20 = vadd.f32 %v5440_v2, %v5321_v21  ;;  %9801 = vpow2.f32 %v7617_v42  ;;  %v7618_v51 = vmul.f32 -1.442695, %v5556_v4  ;;  %v13664_v2 = vld [vmem:[%s14731_s5] ss:$0 sm:$0xff]  ;;  %v15745_v4 = vld [vmem:[#allocation38_spill] sm:$0xff] }
 0xf34   : > { %9803 = vpow2.f32 %v7616_v49  ;;  %v5581_v53 = vadd.f32 %v13664_v2, %v5546_v10 }
 0xf35   : > { %9805 = vpow2.f32 %v7618_v51  ;;  %v5582_v51 = vadd.f32 %v13664_v2, %v5549_v37 }
 0xf3c   : > { %v9798_v22 = vpop.eup %9797 }
 0xf3d   : > { %v5569_v45 = vadd.f32 1.0, %v9798_v22  ;;  %v5412_v22 = vadd.f32 %v13636_v23, %v5281_v62 }
 0xf3e   : > { %v9800_v15 = vpop.eup %9799 }
 0xf3f   : > { %9807 = vrcp.f32 %v5569_v45  ;;  %v5447_v3 = vmul.f32 %v9800_v15, %v5445_v18  ;;  %v15746_v18 = vld [vmem:[#allocation40_spill] sm:$0xff]  ;;  %v7614_v10 = vmul.f32 -1.442695, %v5412_v22  ;;  %v13709_v22 = vld [vmem:[#allocation8 + $0x138] ss:$12 sps:$4 sm:$0xff]  }
 0xf40   : > { %v9802_v13 = vpop.eup %9801 }
 0xf41   : > { %v5571_v26 = vadd.f32 1.0, %v9802_v13  ;;  %v13659_v30 = vadd.f32 %v5449_v27, %v5447_v3  ;;  %v9804_v21 = vpop.eup %9803 }
 0xf42   : > { %v9806_v19 = vpop.eup %9805  ;;  %v5570_v16 = vadd.f32 1.0, %v9804_v21 }
 0xf43   : > { %15744 = vst [vmem:[#allocation142_spill] sm:$0xff] %v13659_v30  ;;  %9809 = vrcp.f32 %v5571_v26  ;;  %v5572_v38 = vadd.f32 1.0, %v9806_v19 }
 0xf44   : > { %9811 = vrcp.f32 %v5570_v16 }
 0xf45   : > { %9813 = vrcp.f32 %v5572_v38 }
 0xf4c   : > { %v9808_v42 = vpop.eup %9807 }
 0xf4d   : > { %v5583_v9 = vmul.f32 %v9808_v42, %v5581_v53 }
 0xf4f   : > { %v5585_v49 = vadd.f32 %v5583_v9, %v15745_v4  ;;  %v13688_v4 = vld [vmem:[#allocation8 + $0x170] ss:$12 sps:$4 sm:$0xff]  }
 0xf50   : > { %v9810_v50 = vpop.eup %9809 }
 0xf51   : > { %9815 = vtanh.f32 %v5585_v49  ;;  %v5584_v45 = vmul.f32 %v9810_v50, %v5582_v51  ;;  %v9812_v3 = vpop.eup %9811  ;;  %v13698_v49 = vld [vmem:[#allocation8 + $0x150] ss:$12 sps:$4 sm:$0xff]   ;;  %v13701_v51 = vld [vmem:[#allocation8 + $0x158] ss:$12 sps:$4 sm:$0xff]  }
 0xf52   : > { %v9814_v27 = vpop.eup %9813  ;;  %v5589_v13 = vsub.f32 1.0, %v9812_v3  ;;  %v5593_v21 = vmul.f32 %v9812_v3, %v13417_v40  ;;  %v13685_v40 = vld [vmem:[#allocation8 + $0x168] ss:$12 sps:$4 sm:$0xff]  }
 0xf53   : > { %v5586_v15 = vadd.f32 %v5584_v45, %v15746_v18  ;;  %v5590_v19 = vsub.f32 1.0, %v9814_v27  ;;  %v5594_v23 = vmul.f32 %v9814_v27, %v13420_v6  ;;  %v13691_v6 = vld [vmem:[#allocation8 + $0x154] ss:$12 sps:$4 sm:$0xff]   ;;  %v13705_v50 = vld [vmem:[#allocation8 + $0x13c] ss:$12 sps:$4 sm:$0xff]  }
 0xf54   : > { %v13712_v45 = vld [vmem:[#allocation8 + $0x140] ss:$12 sps:$4 sm:$0xff]   ;;  %v13715_v18 = vld [vmem:[#allocation8 + $0x124] ss:$12 sps:$4 sm:$0xff]   ;;  %v13729_v27 = vld [vmem:[#allocation8 + $0x108] ss:$12 sps:$4 sm:$0xff]  }
 0xf55   : > { %9817 = vtanh.f32 %v5586_v15  ;;  %v13722_v15 = vld [vmem:[#allocation8 + $0x128] ss:$12 sps:$4 sm:$0xff]  }
 0xf56   : > { %9819 = vpow2.f32 %v7614_v10  ;;  %v13725_v10 = vld [vmem:[#allocation8 + $0x10c] ss:$12 sps:$4 sm:$0xff]  }
 0xf5e   : > { %v9816_v26 = vpop.eup %9815 }
 0xf5f   : > { %v5591_v12 = vmul.f32 %v9816_v26, %v5589_v13  ;;  %v13732_v13 = vld [vmem:[#allocation8 + $0x110] ss:$12 sps:$4 sm:$0xff]   ;;  %v13735_v26 = vld [vmem:[#allocation8 + $0xf4] ss:$12 sps:$4 sm:$0xff]  }
 0xf61   : > { %v13674_v37 = vadd.f32 %v5593_v21, %v5591_v12 }
 0xf62   : > { %v9818_v16 = vpop.eup %9817 }
 0xf63   : > { %v5592_v53 = vmul.f32 %v9818_v16, %v5590_v19  ;;  %v9820_v38 = vpop.eup %9819  ;;  %v13739_v19 = vld [vmem:[#allocation8 + $0xf0] ss:$12 sps:$4 sm:$0xff]   ;;  %v13742_v16 = vld [vmem:[#allocation8 + $0xf8] ss:$12 sps:$4 sm:$0xff]  }
 0xf64   : > { %v5428_v62 = vadd.f32 1.0, %v9820_v38  ;;  %15747 = vst [vmem:[#allocation75_spill] sm:$0xff] %v13739_v19  ;;  %15748 = vst [vmem:[#allocation22_spill] sm:$0xff] %v13742_v16 }
 0xf65   : > { %v13677_v42 = vadd.f32 %v5594_v23, %v5592_v53  ;;  %v13745_v23 = vld [vmem:[#allocation8 + $0xdc] ss:$12 sps:$4 sm:$0xff]  }
 0xf66   : > { %9821 = vrcp.f32 %v5428_v62  ;;  %v13750_v62 = vld [vmem:[#allocation8 + $0xd8] ss:$12 sps:$4 sm:$0xff]  }
 0xf67   : > { %v13681_v9 = vpack.c.bf16 %v13677_v42, %v13674_v37  ;;  %9823 = vtanh.f32 %v13656_v20  ;;  %v13719_v20 = vld [vmem:[#allocation8 + $0x120] ss:$12 sps:$4 sm:$0xff]  }
 0xf69   : > { %5631 = vmatmul.mubr.bf16.vlgmr.msra.gmra.mxu0 %v13681_v9  ;;  %8863 = vmatmul.mubr.bf16.vlgmr.msra.gmra.mxu1 %v13681_v9 }
 0xf6a   : > { %5684 = vmatpush1.bf16.msra.mxu0 %v13685_v40  ;;  %8867 = vmatpush3.bf16.msra.mxu1 %v13688_v4 }
 0xf6b   : > { %5685 = vmatprep.subr.bf16.mxu0 %v13691_v6  ;;  %8868 = vmatprep.subr.bf16.mxu1 %v15160_v54 }
 0xf6c   : > { %5715 = vmatprep.mubr.bf16.mxu0 %v15154_v52  ;;  %8882 = vmatprep.mubr.msk.bf16.mxu1 %vm10558_vm0, %v15160_v54 }
 0xf6e   : > { %5686 = vmatpush1.bf16.msra.mxu0 %v13698_v49  ;;  %8869 = vmatpush3.bf16.msra.mxu1 %v13701_v51 }
 0xf6f   : > { %5687 = vmatprep.subr.bf16.mxu0 %v13705_v50  ;;  %8870 = vmatprep.subr.bf16.mxu1 %v15160_v54 }
 0xf72   : > { %5688 = vmatpush1.bf16.msra.mxu0 %v13709_v22  ;;  %8871 = vmatpush3.bf16.msra.mxu1 %v13712_v45 }
 0xf73   : > { %5689 = vmatprep.subr.bf16.mxu0 %v13715_v18  ;;  %8872 = vmatprep.subr.bf16.mxu1 %v15160_v54  ;;  %v9822_v3 = vpop.eup %9821 }
 0xf74   : > { %v9824_v12 = vpop.eup %9823  ;;  %v5446_v21 = vsub.f32 1.0, %v9822_v3  ;;  %v5450_v38 = vmul.f32 %v9822_v3, %v13459_v14  ;;  %v13765_v3 = vld [vmem:[#allocation8 + $0xc8] ss:$12 sps:$4 sm:$0xff]   ;;  %v13770_v14 = vld [vmem:[#allocation8 + $0xac] ss:$12 sps:$4 sm:$0xff]  }
 0xf75   : > { %15750 = vst [vmem:[#allocation55_spill] sm:$0xff] %v13770_v14 }
 0xf76   : > { %5690 = vmatpush1.bf16.msra.mxu0 %v13719_v20  ;;  %8873 = vmatpush3.bf16.msra.mxu1 %v13722_v15  ;;  %v5448_v53 = vmul.f32 %v9824_v12, %v5446_v21  ;;  %v13762_v12 = vld [vmem:[#allocation8 + $0xc0] ss:$12 sps:$4 sm:$0xff]  }
 0xf77   : > { %5691 = vmatprep.subr.bf16.mxu0 %v13725_v10  ;;  %8874 = vmatprep.subr.bf16.mxu1 %v15160_v54 }
 0xf7a   : > { %5692 = vmatpush1.bf16.msra.mxu0 %v13729_v27  ;;  %8875 = vmatpush3.bf16.msra.mxu1 %v13732_v13 }
 0xf7b   : > { %5693 = vmatprep.subr.bf16.mxu0 %v13735_v26  ;;  %8876 = vmatprep.subr.bf16.mxu1 %v15160_v54 }
 0xf7e   : > { %5694 = vmatpush1.bf16.msra.mxu0 %v13739_v19  ;;  %8877 = vmatpush3.bf16.msra.mxu1 %v13742_v16  ;;  %v13756_v19 = vadd.f32 %v5450_v38, %v5448_v53  ;;  %v13758_v16 = vld [vmem:[#allocation8 + $0xc4] ss:$12 sps:$4 sm:$0xff]   ;;  %v13774_v53 = vld [vmem:[#allocation8 + $0xa8] ss:$12 sps:$4 sm:$0xff]  }
 0xf7f   : > { %5695 = vmatprep.subr.bf16.mxu0 %v13745_v23  ;;  %8878 = vmatprep.subr.bf16.mxu1 %v15160_v54  ;;  %v13778_v38 = vld [vmem:[#allocation8 + $0x94] ss:$12 sps:$4 sm:$0xff]  }
 0xf80   : > { %15749 = vst [vmem:[#allocation24_spill] sm:$0xff] %v13756_v19  ;;  %v5682_v21 = vpack.c.bf16 %v13756_v19, %v13659_v30 }
 0xf82   : > { %5696 = vmatpush1.bf16.msra.mxu0 %v13750_v62  ;;  %8879 = vmatpush3.bf16.msra.mxu1 %v13753_v46 }
 0xf83   : > { %5697 = vmatprep.subr.bf16.mxu0 %v13758_v16  ;;  %8880 = vmatprep.subr.bf16.mxu1 %v15160_v54 }
 0xf86   : > { %5698 = vmatpush1.bf16.msra.mxu0 %v13762_v12  ;;  %8881 = vmatpush3.bf16.msra.mxu1 %v13765_v3 }
 0xf87   : > { %5827 = vmatprep.subr.bf16.mxu0 %v13770_v14  ;;  %8886 = vmatprep.subr.bf16.mxu1 %v15160_v54  ;;  %v13785_v14 = vld [vmem:[#allocation8 + $0x90] ss:$12 sps:$4 sm:$0xff]  }
 0xf89   : > { %5716 = vmatmul.mubr.bf16.vlgmr.msra.gmra.mxu0 %v5682_v21  ;;  %8883 = vmatmul.mubr.bf16.vlgmr.msra.gmra.mxu1 %v5682_v21  ;;  %v13789_v21 = vld [vmem:[#allocation8 + $0x7c] ss:$12 sps:$4 sm:$0xff]  }
 0xf8a   : > { %5828 = vmatpush1.bf16.msra.mxu0 %v13774_v53  ;;  %8887 = vmatpush3.bf16.msra.mxu1 %v13470_v5  ;;  %15751 = vst [vmem:[#allocation54_spill] sm:$0xff] %v13789_v21 }
 0xf8b   : > { %5829 = vmatprep.subr.bf16.mxu0 %v13778_v38  ;;  %8888 = vmatprep.subr.bf16.mxu1 %v15160_v54 }
 0xf8c   : > { %5859 = vmatprep.mubr.bf16.mxu0 %v15154_v52  ;;  %8902 = vmatprep.mubr.msk.bf16.mxu1 %vm10558_vm0, %v15160_v54 }
 0xf8e   : > { %5830 = vmatpush1.bf16.msra.mxu0 %v13785_v14  ;;  %8889 = vmatpush3.bf16.msra.mxu1 %v13479_v35 }
 0xf8f   : > { %5831 = vmatprep.subr.bf16.mxu0 %v13789_v21  ;;  %8890 = vmatprep.subr.bf16.mxu1 %v15160_v54 }
 0xf92   : > { %5832 = vmatpush1.bf16.msra.mxu0 %v13484_v60  ;;  %8891 = vmatpush3.bf16.msra.mxu1 %v13487_v43 }
 0xf93   : > { %5833 = vmatprep.subr.bf16.mxu0 %v13490_v0  ;;  %8892 = vmatprep.subr.bf16.mxu1 %v15160_v54 }
 0xf96   : > { %5834 = vmatpush1.bf16.msra.mxu0 %v13494_v41  ;;  %8893 = vmatpush3.bf16.msra.mxu1 %v13497_v61 }
 0xf97   : > { %5835 = vmatprep.subr.bf16.mxu0 %v13500_v56  ;;  %8894 = vmatprep.subr.bf16.mxu1 %v15160_v54 }
 0xf9a   : > { %5836 = vmatpush1.bf16.msra.mxu0 %v13504_v31  ;;  %8895 = vmatpush3.bf16.msra.mxu1 %v13507_v24 }
 0xf9b   : > { %5837 = vmatprep.subr.bf16.mxu0 %v13510_v17  ;;  %8896 = vmatprep.subr.bf16.mxu1 %v15160_v54 }
 0xf9e   : > { %5838 = vmatpush1.bf16.msra.mxu0 %v13514_v33  ;;  %8897 = vmatpush3.bf16.msra.mxu1 %v13517_v1 }
 0xf9f   : > { %5839 = vmatprep.subr.bf16.mxu0 %v13520_v55  ;;  %8898 = vmatprep.subr.bf16.mxu1 %v15160_v54 }
 0xfa2   : > { %5840 = vmatpush1.bf16.msra.mxu0 %v13524_v47  ;;  %8899 = vmatpush3.bf16.msra.mxu1 %v13527_v36 }
 0xfa3   : > { %5841 = vmatprep.subr.bf16.mxu0 %v13530_v34  ;;  %8900 = vmatprep.subr.bf16.mxu1 %v15160_v54 }
 0xfa6   : > { %5842 = vmatpush1.bf16.msra.mxu0 %v13534_v59  ;;  %8901 = vmatpush3.bf16.msra.mxu1 %v13537_v44 }
 0xfa7   : > { %5956 = vmatprep.subr.bf16.mxu0 %v13540_v48  ;;  %8906 = vmatprep.subr.bf16.mxu1 %v15160_v54 }
 0xfa9   : > { %5860 = vmatmul.mubr.bf16.vlgmr.msra.gmra.mxu0 %v13681_v9  ;;  %8903 = vmatmul.mubr.bf16.vlgmr.msra.gmra.mxu1 %v13681_v9  ;;  %v15752_v9 = vld [vmem:[#allocation126_spill] sm:$0xff] }
 0xfaa   : > { %5957 = vmatpush1.bf16.msra.mxu0 %v13546_v11  ;;  %8907 = vmatpush3.bf16.msra.mxu1 %v13549_v25  ;;  %v15754_v25 = vld [vmem:[#allocation144_spill] sm:$0xff]  ;;  %v15755_v11 = vld [vmem:[#allocation82_spill] sm:$0xff] }
 0xfab   : > { %5958 = vmatprep.subr.bf16.mxu0 %v13552_v32  ;;  %8908 = vmatprep.subr.bf16.mxu1 %v15160_v54  ;;  %v15753_v32 = vld [vmem:[#allocation128_spill] sm:$0xff] }
 0xfac   : > { %5988 = vmatprep.mubr.bf16.mxu0 %v15154_v52  ;;  %8922 = vmatprep.mubr.msk.bf16.mxu1 %vm10558_vm0, %v15160_v54 }
 0xfae   : > { %5959 = vmatpush1.bf16.msra.mxu0 %v13559_v8  ;;  %8909 = vmatpush3.bf16.msra.mxu1 %v13562_v57  ;;  %v15756_v57 = vld [vmem:[#allocation84_spill] sm:$0xff]  ;;  %v15758_v8 = vld [vmem:[#allocation85_spill] sm:$0xff] }
 0xfaf   : > { %5960 = vmatprep.subr.bf16.mxu0 %v13565_v39  ;;  %8910 = vmatprep.subr.bf16.mxu1 %v15160_v54  ;;  %v15757_v39 = vld [vmem:[#allocation83_spill] sm:$0xff] }
 0xfb2   : > { %5961 = vmatpush1.bf16.msra.mxu0 %v13569_v58  ;;  %8911 = vmatpush3.bf16.msra.mxu1 %v13572_v63  ;;  %v15759_v63 = vld [vmem:[#allocation26_spill] sm:$0xff] }
 0xfb3   : > { %5962 = vmatprep.subr.bf16.mxu0 %v15752_v9  ;;  %8912 = vmatprep.subr.bf16.mxu1 %v15160_v54  ;;  %v15760_v9 = vld [vmem:[#allocation28_spill] sm:$0xff]  ;;  %v15761_v58 = vld [vmem:[#allocation86_spill] sm:$0xff] }
 0xfb6   : > { %5963 = vmatpush1.bf16.msra.mxu0 %v15753_v32  ;;  %8913 = vmatpush3.bf16.msra.mxu1 %v15754_v25  ;;  %v15762_v25 = vld [vmem:[#allocation88_spill] sm:$0xff]  ;;  %v15764_v32 = vld [vmem:[#allocation89_spill] sm:$0xff] }
 0xfb7   : > { %5964 = vmatprep.subr.bf16.mxu0 %v15755_v11  ;;  %8914 = vmatprep.subr.bf16.mxu1 %v15160_v54  ;;  %v15763_v11 = vld [vmem:[#allocation87_spill] sm:$0xff] }
 0xfba   : > { %5965 = vmatpush1.bf16.msra.mxu0 %v15756_v57  ;;  %8915 = vmatpush3.bf16.msra.mxu1 %v15757_v39  ;;  %v15765_v39 = vld [vmem:[#allocation31_spill] sm:$0xff]  ;;  %v15767_v57 = vld [vmem:[#allocation141_spill] sm:$0xff] }
 0xfbb   : > { %5966 = vmatprep.subr.bf16.mxu0 %v15758_v8  ;;  %8916 = vmatprep.subr.bf16.mxu1 %v15160_v54  ;;  %v15766_v8 = vld [vmem:[#allocation33_spill] sm:$0xff] }
 0xfbe   : > { %5967 = vmatpush1.bf16.msra.mxu0 %v15759_v63  ;;  %8917 = vmatpush3.bf16.msra.mxu1 %v15760_v9 }
 0xfbf   : > { %5968 = vmatprep.subr.bf16.mxu0 %v15761_v58  ;;  %8918 = vmatprep.subr.bf16.mxu1 %v15160_v54 }
 0xfc2   : > { %5969 = vmatpush1.bf16.msra.mxu0 %v15762_v25  ;;  %8919 = vmatpush3.bf16.msra.mxu1 %v15763_v11 }
 0xfc3   : > { %5970 = vmatprep.subr.bf16.mxu0 %v15764_v32  ;;  %8920 = vmatprep.subr.bf16.mxu1 %v15160_v54  ;;  %v15768_v32 = vld [vmem:[#allocation17_spill] sm:$0xff] }
 0xfc6   : > { %5971 = vmatpush1.bf16.msra.mxu0 %v15765_v39  ;;  %8921 = vmatpush3.bf16.msra.mxu1 %v15766_v8 }
 0xfc7   : > { %6041 = vmatprep.subr.bf16.mxu0 %v15767_v57  ;;  %8926 = vmatprep.subr.bf16.mxu1 %v15160_v54 }
0x1029   : > { %v5675_v9 = vpop.f32.mrf.mxu1  ;;  %v5632_v25 = vpop.f32.mrf.mxu0 }
0x102a   : > { %v5633_v34 = vadd.f32 %v5632_v25, %v15768_v32  ;;  %v5676_v0 = vadd.f32 %v5675_v9, %v11443_v7 }
0x102b   : > { %v8864_v58 = vpop.f32.mrf.mxu1  ;;  %v5634_v44 = vpop.f32.mrf.mxu0 }
0x102c   : > { %v5635_v17 = vadd.f32 %v5634_v44, %v11428_v29  ;;  %v15770_v44 = vld [vmem:[#allocation105_spill] sm:$0xff] }
0x102d   : > { %v13854_v63 = vpop.f32.mrf.mxu1  ;;  %v5636_v11 = vpop.f32.mrf.mxu0 }
0x102e   : > { %v5637_v57 = vadd.f32 %v5636_v11, %v15768_v32  ;;  %v15769_v32 = vld [vmem:[#allocation47_spill] sm:$0xff]  ;;  %v5679_v60 = vadd.f32 %v13854_v63, %v11443_v7 }
0x102f   : > { %v8865_v48 = vpop.f32.mrf.mxu1  ;;  %v13856_v59 = vpop.f32.mrf.mxu0 }
0x1049   : > { %v5717_v36 = vpop.f32.mrf.mxu0  ;;  %v5760_v39 = vpop.f32.mrf.mxu1 }
0x104a   : > { %v5767_v47 = vadd.f32 %v5717_v36, %v5633_v34 }
0x104b   : > { %v5719_v8 = vpop.f32.mrf.mxu0  ;;  %v8884_v55 = vpop.f32.mrf.mxu1 }
0x104c   : > { %v7619_v1 = vmul.f32 -1.442695, %v5767_v47  ;;  %v5768_v31 = vadd.f32 %v5719_v8, %v5635_v17  ;;  %v6170_v8 = vstv %s6169_s8 }
0x104d   : > { %v5721_v33 = vpop.f32.mrf.mxu0  ;;  %v5763_v58 = vpop.f32.mrf.mxu1 }
0x104e   : > { %9825 = vpow2.f32 %v7619_v1  ;;  %v5769_v48 = vadd.f32 %v5721_v33, %v5637_v57  ;;  %v7620_v25 = vmul.f32 -1.442695, %v5768_v31  ;;  %v805_v1 = vadd.f32 %v15770_v44, %v15769_v32  ;;  %v15771_v57 = vld [vmem:[#allocation51_spill] sm:$0xff] }
0x104f   : > { %v8885_v24 = vpop.f32.mrf.mxu1  ;;  %v13861_v11 = vpop.f32.mrf.mxu0  ;;  %vm6171_vm10 = vcmp.eq.s32.totalorder %v15771_v57, %v6170_v8 }
0x1050   : > { %v7621_v56 = vmul.f32 -1.442695, %v5769_v48  ;;  %v15772_v48 = vld [vmem:[#allocation52_spill] sm:$0xff]  ;;  %v6173_v44 = vsel %vm6171_vm10, 1, %v15154_v52 }
0x1051   : > { %vm6172_vm11 = vcmp.eq.s32.totalorder %v15772_v48, %v6170_v8  ;;  %6176 = vperm.xlu0 %9219, %v6173_v44  }
0x1052   : > { %9827 = vpow2.f32 %v7621_v56  ;;  %v13869_v56 = vld [vmem:[%s14731_s5 + $0x1] ss:$0 sm:$0xff]  ;;  %v6174_v41 = vsel %vm6172_vm11, 1, %v15154_v52 }
0x1053   : > { %9829 = vpow2.f32 %v7620_v25  ;;  %6179 = vperm.xlu1 %9220, %v6174_v41  }
0x105b   : > { %v9826_v61 = vpop.eup %9825 }
0x105c   : > { %v5783_v36 = vadd.f32 1.0, %v9826_v61  ;;  %v5795_v61 = vadd.f32 %v13869_v56, %v5760_v39 }
0x105e   : > { %9831 = vrcp.f32 %v5783_v36  ;;  %v15773_v36 = vld [vmem:[#allocation107_spill] sm:$0xff] }
0x105f   : > { %v9828_v55 = vpop.eup %9827 }
0x1060   : > { %v5785_v34 = vadd.f32 1.0, %v9828_v55  ;;  %v9830_v47 = vpop.eup %9829  ;;  %v809_v55 = vadd.f32 %v15773_v36, %v15769_v32  ;;  %v5796_v36 = vadd.f32 %v13869_v56, %v5763_v58 }
0x1061   : > { %v5784_v33 = vadd.f32 1.0, %v9830_v47 }
0x1062   : > { %9833 = vrcp.f32 %v5785_v34 }
0x1063   : > { %9835 = vrcp.f32 %v5784_v33 }
0x1069   : > { %v5861_v24 = vpop.f32.mrf.mxu0  ;;  %v5904_v17 = vpop.f32.mrf.mxu1 }
0x106a   : > { %v5911_v31 = vadd.f32 %v5861_v24, %v805_v1  ;;  %v15774_v1 = vld [vmem:[#allocation106_spill] sm:$0xff] }
0x106b   : > { %v9832_v25 = vpop.eup %9831  ;;  %v5863_v34 = vpop.f32.mrf.mxu0  ;;  %v807_v24 = vadd.f32 %v15774_v1, %v11095_v28 }
0x106c   : > { %v8904_v47 = vpop.f32.mrf.mxu1  ;;  %v5797_v43 = vmul.f32 %v9832_v25, %v5795_v61  ;;  %v7623_v39 = vmul.f32 -1.442695, %v5911_v31  ;;  %v15775_v25 = vld [vmem:[#allocation108_spill] sm:$0xff] }
0x106d   : > { %v5865_v8 = vpop.f32.mrf.mxu0  ;;  %v5912_v61 = vadd.f32 %v5863_v34, %v807_v24  ;;  %v811_v44 = vadd.f32 %v15775_v25, %v11095_v28 }
0x106e   : > { %v5907_v48 = vpop.f32.mrf.mxu1  ;;  %v5799_v57 = vadd.f32 %v5797_v43, %v5676_v0  ;;  %9837 = vpow2.f32 %v7623_v39  ;;  %v5913_v47 = vadd.f32 %v5865_v8, %v809_v55 }
0x106f   : > { %v9834_v32 = vpop.eup %9833  ;;  %v5867_v41 = vpop.f32.mrf.mxu0  ;;  %v7624_v0 = vmul.f32 -1.442695, %v5912_v61  ;;  %v5939_v61 = vadd.f32 %v13664_v2, %v5904_v17 }
0x1070   : > { %v8905_v9 = vpop.f32.mrf.mxu1  ;;  %9839 = vtanh.f32 %v5799_v57  ;;  %v5798_v33 = vmul.f32 %v9834_v32, %v5796_v36  ;;  %v7625_v31 = vmul.f32 -1.442695, %v5913_v47  ;;  %v5914_v43 = vadd.f32 %v5867_v41, %v811_v44  ;;  %v9836_v55 = vpop.eup %9835 }
0x1071   : > { %v5803_v8 = vsub.f32 1.0, %v9836_v55  ;;  %v5807_v34 = vmul.f32 %v9836_v55, %v13659_v30  ;;  %v5639_v44 = vadd.f32 %v13856_v59, %v11428_v29  ;;  %v15827_v30 = vld [vmem:[#allocation47_spill] sm:$0xff] }
0x1072   : > { %v13886_v1 = vadd.f32 %v5798_v33, %v5679_v60  ;;  %9841 = vpow2.f32 %v7625_v31  ;;  %v7626_v58 = vmul.f32 -1.442695, %v5914_v43  ;;  %v15777_v43 = vld [vmem:[#allocation43_spill] sm:$0xff] }
0x1073   : > { %9843 = vpow2.f32 %v7624_v0 }
0x1074   : > { %9845 = vpow2.f32 %v7626_v58  ;;  %v5940_v58 = vadd.f32 %v13664_v2, %v5907_v48 }
0x107b   : > { %v9838_v39 = vpop.eup %9837 }
0x107c   : > { %v5927_v63 = vadd.f32 1.0, %v9838_v39  ;;  %v15778_v39 = vld [vmem:[#allocation19_spill] sm:$0xff] }
0x107d   : > { %v9840_v57 = vpop.eup %9839 }
0x107e   : > { %9847 = vrcp.f32 %v5927_v63  ;;  %v5805_v32 = vmul.f32 %v9840_v57, %v5803_v8  ;;  %v15779_v63 = vld [vmem:[#allocation45_spill] sm:$0xff]  ;;  %v5770_v57 = vadd.f32 %v13861_v11, %v5639_v44 }
0x107f   : > { %v9842_v24 = vpop.eup %9841  ;;  %v977_v8 = vadd.f32 %v15779_v63, %v15778_v39 }
0x1080   : > { %v5929_v36 = vadd.f32 1.0, %v9842_v24  ;;  %v13889_v47 = vadd.f32 %v5807_v34, %v5805_v32  ;;  %v9844_v60 = vpop.eup %9843  ;;  %v7622_v34 = vmul.f32 -1.442695, %v5770_v57 }
0x1081   : > { %v9846_v9 = vpop.eup %9845  ;;  %v5928_v33 = vadd.f32 1.0, %v9844_v60 }
0x1082   : > { %15776 = vst [vmem:[#allocation56_spill] sm:$0xff] %v13889_v47  ;;  %9849 = vrcp.f32 %v5929_v36  ;;  %v5930_v41 = vadd.f32 1.0, %v9846_v9 }
0x1083   : > { %9851 = vrcp.f32 %v5928_v33 }
0x1084   : > { %9853 = vrcp.f32 %v5930_v41 }
0x108b   : > { %v9848_v31 = vpop.eup %9847 }
0x108c   : > { %v5941_v25 = vmul.f32 %v9848_v31, %v5939_v61 }
0x108e   : > { %v5943_v0 = vadd.f32 %v5941_v25, %v15777_v43 }
0x108f   : > { %v9850_v55 = vpop.eup %9849 }
0x1090   : > { %9855 = vtanh.f32 %v5943_v0  ;;  %v5942_v17 = vmul.f32 %v9850_v55, %v5940_v58  ;;  %v9852_v24 = vpop.eup %9851  ;;  %v15780_v58 = vld [vmem:[#allocation75_spill] sm:$0xff]  ;;  %v15781_v55 = vld [vmem:[#allocation22_spill] sm:$0xff] }
0x1091   : > { %v9854_v36 = vpop.eup %9853  ;;  %v5947_v59 = vsub.f32 1.0, %v9852_v24  ;;  %v5951_v48 = vmul.f32 %v9852_v24, %v13674_v37  ;;  %v15786_v24 = vld [vmem:[#allocation136_spill] sm:$0xff] }
0x1092   : > { %v5944_v32 = vadd.f32 %v5942_v17, %v977_v8  ;;  %v5948_v33 = vsub.f32 1.0, %v9854_v36  ;;  %v5952_v11 = vmul.f32 %v9854_v36, %v13677_v42  ;;  %v15787_v36 = vld [vmem:[#allocation137_spill] sm:$0xff] }
0x1094   : > { %9857 = vtanh.f32 %v5944_v32  ;;  %v15783_v32 = vld [vmem:[#allocation55_spill] sm:$0xff] }
0x1095   : > { %9859 = vpow2.f32 %v7622_v34  ;;  %v15784_v34 = vld [vmem:[#allocation134_spill] sm:$0xff] }
0x109d   : > { %v9856_v60 = vpop.eup %9855 }
0x109e   : > { %v5949_v9 = vmul.f32 %v9856_v60, %v5947_v59  ;;  %v15788_v59 = vld [vmem:[#allocation138_spill] sm:$0xff]  ;;  %v15789_v60 = vld [vmem:[#allocation139_spill] sm:$0xff] }
0x10a0   : > { %v13900_v61 = vadd.f32 %v5951_v48, %v5949_v9  ;;  %v15791_v9 = vld [vmem:[#allocation92_spill] sm:$0xff]  ;;  %v15792_v48 = vld [vmem:[#allocation91_spill] sm:$0xff] }
0x10a1   : > { %v9858_v31 = vpop.eup %9857 }
0x10a2   : > { %v5950_v41 = vmul.f32 %v9858_v31, %v5948_v33  ;;  %v9860_v44 = vpop.eup %9859  ;;  %v15793_v33 = vld [vmem:[#allocation93_spill] sm:$0xff]  ;;  %v15794_v31 = vld [vmem:[#allocation30_spill] sm:$0xff] }
0x10a3   : > { %v5786_v0 = vadd.f32 1.0, %v9860_v44  ;;  %v15797_v44 = vld [vmem:[#allocation94_spill] sm:$0xff] }
0x10a4   : > { %v13903_v25 = vadd.f32 %v5952_v11, %v5950_v41  ;;  %v15795_v41 = vld [vmem:[#allocation32_spill] sm:$0xff]  ;;  %v15796_v11 = vld [vmem:[#allocation79_spill] sm:$0xff] }
0x10a5   : > { %9861 = vrcp.f32 %v5786_v0  ;;  %v15798_v0 = vld [vmem:[#allocation16_spill] sm:$0xff] }
0x10a6   : > { %v13907_v43 = vpack.c.bf16 %v13903_v25, %v13900_v61  ;;  %9863 = vtanh.f32 %v13886_v1 }
0x10a8   : > { %5989 = vmatmul.mubr.bf16.vlgmr.msra.gmra.mxu0 %v13907_v43  ;;  %8923 = vmatmul.mubr.bf16.vlgmr.msra.gmra.mxu1 %v13907_v43 }
0x10a9   : > { %6042 = vmatpush1.bf16.msra.mxu0 %v13685_v40  ;;  %8927 = vmatpush3.bf16.msra.mxu1 %v13688_v4 }
0x10aa   : > { %6043 = vmatprep.subr.bf16.mxu0 %v13691_v6  ;;  %8928 = vmatprep.subr.bf16.mxu1 %v15160_v54 }
0x10ab   : > { %6073 = vmatprep.mubr.bf16.mxu0 %v15154_v52  ;;  %8942 = vmatprep.mubr.msk.bf16.mxu1 %vm10558_vm0, %v15160_v54 }
0x10ad   : > { %6044 = vmatpush1.bf16.msra.mxu0 %v13698_v49  ;;  %8929 = vmatpush3.bf16.msra.mxu1 %v13701_v51 }
0x10ae   : > { %6045 = vmatprep.subr.bf16.mxu0 %v13705_v50  ;;  %8930 = vmatprep.subr.bf16.mxu1 %v15160_v54 }
0x10b1   : > { %6046 = vmatpush1.bf16.msra.mxu0 %v13709_v22  ;;  %8931 = vmatpush3.bf16.msra.mxu1 %v13712_v45 }
0x10b2   : > { %6047 = vmatprep.subr.bf16.mxu0 %v13715_v18  ;;  %8932 = vmatprep.subr.bf16.mxu1 %v15160_v54  ;;  %v9862_v37 = vpop.eup %9861 }
0x10b3   : > { %v9864_v42 = vpop.eup %9863  ;;  %v5804_v1 = vsub.f32 1.0, %v9862_v37  ;;  %v5808_v8 = vmul.f32 %v9862_v37, %v13756_v19  ;;  %v15799_v37 = vld [vmem:[#allocation95_spill] sm:$0xff] }
0x10b5   : > { %6048 = vmatpush1.bf16.msra.mxu0 %v13719_v20  ;;  %8933 = vmatpush3.bf16.msra.mxu1 %v13722_v15  ;;  %v5806_v63 = vmul.f32 %v9864_v42, %v5804_v1  ;;  %v15800_v42 = vld [vmem:[#allocation13_spill] sm:$0xff]  ;;  %v15801_v1 = vld [vmem:[#allocation35_spill] sm:$0xff] }
0x10b6   : > { %6049 = vmatprep.subr.bf16.mxu0 %v13725_v10  ;;  %8934 = vmatprep.subr.bf16.mxu1 %v15160_v54 }
0x10b7   : > { %v13942_v57 = vadd.f32 %v5808_v8, %v5806_v63  ;;  %v15802_v63 = vld [vmem:[#allocation37_spill] sm:$0xff]  ;;  %v15803_v8 = vld [vmem:[#allocation14_spill] sm:$0xff] }
0x10b9   : > { %6050 = vmatpush1.bf16.msra.mxu0 %v13729_v27  ;;  %8935 = vmatpush3.bf16.msra.mxu1 %v13732_v13  ;;  %15782 = vst [vmem:[#allocation25_spill] sm:$0xff] %v13942_v57  ;;  %v6040_v17 = vpack.c.bf16 %v13942_v57, %v13889_v47 }
0x10ba   : > { %6051 = vmatprep.subr.bf16.mxu0 %v13735_v26  ;;  %8936 = vmatprep.subr.bf16.mxu1 %v15160_v54 }
0x10bd   : > { %6052 = vmatpush1.bf16.msra.mxu0 %v15780_v58  ;;  %8937 = vmatpush3.bf16.msra.mxu1 %v15781_v55 }
0x10be   : > { %6053 = vmatprep.subr.bf16.mxu0 %v13745_v23  ;;  %8938 = vmatprep.subr.bf16.mxu1 %v15160_v54 }
0x10c1   : > { %6054 = vmatpush1.bf16.msra.mxu0 %v13750_v62  ;;  %8939 = vmatpush3.bf16.msra.mxu1 %v13753_v46 }
0x10c2   : > { %6055 = vmatprep.subr.bf16.mxu0 %v13758_v16  ;;  %8940 = vmatprep.subr.bf16.mxu1 %v15160_v54 }
0x10c5   : > { %6056 = vmatpush1.bf16.msra.mxu0 %v13762_v12  ;;  %8941 = vmatpush3.bf16.msra.mxu1 %v13765_v3 }
0x10c6   : > { %6185 = vmatprep.subr.bf16.mxu0 %v15783_v32  ;;  %8946 = vmatprep.subr.bf16.mxu1 %v15160_v54 }
0x10c8   : > { %6074 = vmatmul.mubr.bf16.vlgmr.msra.gmra.mxu0 %v6040_v17  ;;  %8943 = vmatmul.mubr.bf16.vlgmr.msra.gmra.mxu1 %v6040_v17  ;;  %v15804_v17 = vld [vmem:[#allocation15_spill] sm:$0xff] }
0x10c9   : > { %6186 = vmatpush1.bf16.msra.mxu0 %v13774_v53  ;;  %8947 = vmatpush3.bf16.msra.mxu1 %v13470_v5  ;;  %v15785_v5 = vld [vmem:[#allocation135_spill] sm:$0xff] }
0x10ca   : > { %6187 = vmatprep.subr.bf16.mxu0 %v13778_v38  ;;  %8948 = vmatprep.subr.bf16.mxu1 %v15160_v54 }
0x10cb   : > { %6217 = vmatprep.mubr.bf16.mxu0 %v15154_v52  ;;  %8962 = vmatprep.mubr.msk.bf16.mxu1 %vm10558_vm0, %v15160_v54 }
0x10cd   : > { %6188 = vmatpush1.bf16.msra.mxu0 %v13785_v14  ;;  %8949 = vmatpush3.bf16.msra.mxu1 %v13479_v35  ;;  %v15790_v35 = vld [vmem:[#allocation90_spill] sm:$0xff] }
0x10ce   : > { %6189 = vmatprep.subr.bf16.mxu0 %v13789_v21  ;;  %8950 = vmatprep.subr.bf16.mxu1 %v15160_v54 }
0x10d1   : > { %6190 = vmatpush1.bf16.msra.mxu0 %v15784_v34  ;;  %8951 = vmatpush3.bf16.msra.mxu1 %v15785_v5  ;;  %v15805_v34 = vld [vmem:[#allocation18_spill] sm:$0xff]  ;;  %v15806_v5 = vld [vmem:[#allocation96_spill] sm:$0xff] }
0x10d2   : > { %6191 = vmatprep.subr.bf16.mxu0 %v15786_v24  ;;  %8952 = vmatprep.subr.bf16.mxu1 %v15160_v54  ;;  %v15807_v24 = vld [vmem:[#allocation34_spill] sm:$0xff] }
0x10d5   : > { %6192 = vmatpush1.bf16.msra.mxu0 %v15787_v36  ;;  %8953 = vmatpush3.bf16.msra.mxu1 %v15788_v59  ;;  %v15809_v36 = vld [vmem:[#allocation125_spill] sm:$0xff]  ;;  %v15810_v59 = vld [vmem:[#allocation126_spill] sm:$0xff] }
0x10d6   : > { %6193 = vmatprep.subr.bf16.mxu0 %v15789_v60  ;;  %8954 = vmatprep.subr.bf16.mxu1 %v15160_v54  ;;  %v15811_v60 = vld [vmem:[#allocation128_spill] sm:$0xff] }
0x10d9   : > { %6194 = vmatpush1.bf16.msra.mxu0 %v15790_v35  ;;  %8955 = vmatpush3.bf16.msra.mxu1 %v15791_v9  ;;  %v15812_v35 = vld [vmem:[#allocation144_spill] sm:$0xff]  ;;  %v15813_v9 = vld [vmem:[#allocation82_spill] sm:$0xff] }
0x10da   : > { %6195 = vmatprep.subr.bf16.mxu0 %v15792_v48  ;;  %8956 = vmatprep.subr.bf16.mxu1 %v15160_v54  ;;  %v15814_v48 = vld [vmem:[#allocation84_spill] sm:$0xff] }
0x10dd   : > { %6196 = vmatpush1.bf16.msra.mxu0 %v15793_v33  ;;  %8957 = vmatpush3.bf16.msra.mxu1 %v15794_v31  ;;  %v15815_v33 = vld [vmem:[#allocation83_spill] sm:$0xff]  ;;  %v15816_v31 = vld [vmem:[#allocation85_spill] sm:$0xff] }
0x10de   : > { %6197 = vmatprep.subr.bf16.mxu0 %v15795_v41  ;;  %8958 = vmatprep.subr.bf16.mxu1 %v15160_v54  ;;  %v15817_v41 = vld [vmem:[#allocation26_spill] sm:$0xff] }
0x10e1   : > { %6198 = vmatpush1.bf16.msra.mxu0 %v15796_v11  ;;  %8959 = vmatpush3.bf16.msra.mxu1 %v15797_v44  ;;  %v15818_v11 = vld [vmem:[#allocation28_spill] sm:$0xff]  ;;  %v15819_v44 = vld [vmem:[#allocation86_spill] sm:$0xff] }
0x10e2   : > { %6199 = vmatprep.subr.bf16.mxu0 %v15798_v0  ;;  %8960 = vmatprep.subr.bf16.mxu1 %v15160_v54  ;;  %v15820_v0 = vld [vmem:[#allocation88_spill] sm:$0xff] }
0x10e5   : > { %6200 = vmatpush1.bf16.msra.mxu0 %v15799_v37  ;;  %8961 = vmatpush3.bf16.msra.mxu1 %v15800_v42  ;;  %v15821_v37 = vld [vmem:[#allocation87_spill] sm:$0xff]  ;;  %v15822_v42 = vld [vmem:[#allocation89_spill] sm:$0xff] }
0x10e6   : > { %6314 = vmatprep.subr.bf16.mxu0 %v15801_v1  ;;  %8966 = vmatprep.subr.bf16.mxu1 %v15160_v54  ;;  %v15823_v1 = vld [vmem:[#allocation31_spill] sm:$0xff] }
0x10e8   : > { %6218 = vmatmul.mubr.bf16.vlgmr.msra.gmra.mxu0 %v13907_v43  ;;  %8963 = vmatmul.mubr.bf16.vlgmr.msra.gmra.mxu1 %v13907_v43  ;;  %v15808_v43 = vld [vmem:[#allocation36_spill] sm:$0xff] }
0x10e9   : > { %6315 = vmatpush1.bf16.msra.mxu0 %v15802_v63  ;;  %8967 = vmatpush3.bf16.msra.mxu1 %v15803_v8  ;;  %v15824_v63 = vld [vmem:[#allocation33_spill] sm:$0xff] }
0x10ea   : > { %6316 = vmatprep.subr.bf16.mxu0 %v15804_v17  ;;  %8968 = vmatprep.subr.bf16.mxu1 %v15160_v54  ;;  %v15825_v8 = vld [vmem:[#allocation141_spill] sm:$0xff] }
0x10eb   : > { %6346 = vmatprep.mubr.bf16.mxu0 %v15154_v52  ;;  %8982 = vmatprep.mubr.msk.bf16.mxu1 %vm10558_vm0, %v15160_v54 }
0x10ed   : > { %6317 = vmatpush1.bf16.msra.mxu0 %v15805_v34  ;;  %8969 = vmatpush3.bf16.msra.mxu1 %v15806_v5 }
0x10ee   : > { %6318 = vmatprep.subr.bf16.mxu0 %v15807_v24  ;;  %8970 = vmatprep.subr.bf16.mxu1 %v15160_v54 }
0x10f1   : > { %6319 = vmatpush1.bf16.msra.mxu0 %v15808_v43  ;;  %8971 = vmatpush3.bf16.msra.mxu1 %v15809_v36 }
0x10f2   : > { %6320 = vmatprep.subr.bf16.mxu0 %v15810_v59  ;;  %8972 = vmatprep.subr.bf16.mxu1 %v15160_v54 }
0x10f5   : > { %6321 = vmatpush1.bf16.msra.mxu0 %v15811_v60  ;;  %8973 = vmatpush3.bf16.msra.mxu1 %v15812_v35  ;;  %v15826_v35 = vld [vmem:[#allocation17_spill] sm:$0xff] }
0x10f6   : > { %6322 = vmatprep.subr.bf16.mxu0 %v15813_v9  ;;  %8974 = vmatprep.subr.bf16.mxu1 %v15160_v54 }
0x10f9   : > { %6323 = vmatpush1.bf16.msra.mxu0 %v15814_v48  ;;  %8975 = vmatpush3.bf16.msra.mxu1 %v15815_v33 }
0x10fa   : > { %6324 = vmatprep.subr.bf16.mxu0 %v15816_v31  ;;  %8976 = vmatprep.subr.bf16.mxu1 %v15160_v54 }
0x10fd   : > { %6325 = vmatpush1.bf16.msra.mxu0 %v15817_v41  ;;  %8977 = vmatpush3.bf16.msra.mxu1 %v15818_v11 }
0x10fe   : > { %6326 = vmatprep.subr.bf16.mxu0 %v15819_v44  ;;  %8978 = vmatprep.subr.bf16.mxu1 %v15160_v54 }
0x1101   : > { %6327 = vmatpush1.bf16.msra.mxu0 %v15820_v0  ;;  %8979 = vmatpush3.bf16.msra.mxu1 %v15821_v37 }
0x1102   : > { %6328 = vmatprep.subr.bf16.mxu0 %v15822_v42  ;;  %8980 = vmatprep.subr.bf16.mxu1 %v15160_v54 }
0x1105   : > { %6329 = vmatpush1.bf16.msra.mxu0 %v15823_v1  ;;  %8981 = vmatpush3.bf16.msra.mxu1 %v15824_v63 }
0x1106   : > { %6399 = vmatprep.subr.bf16.mxu0 %v15825_v8  ;;  %8986 = vmatprep.subr.bf16.mxu1 %v15160_v54 }
0x1168   : > { %v6033_v17 = vpop.f32.mrf.mxu1  ;;  %v5990_v43 = vpop.f32.mrf.mxu0 }
0x1169   : > { %v5991_v9 = vadd.f32 %v5990_v43, %v15826_v35  ;;  %v6034_v39 = vadd.f32 %v6033_v17, %v11443_v7 }
0x116a   : > { %v8924_v34 = vpop.f32.mrf.mxu1  ;;  %v5992_v36 = vpop.f32.mrf.mxu0 }
0x116b   : > { %v5993_v1 = vadd.f32 %v5992_v36, %v11428_v29  ;;  %v15828_v36 = vld [vmem:[#allocation109_spill] sm:$0xff] }
0x116c   : > { %v14024_v5 = vpop.f32.mrf.mxu1  ;;  %v5994_v59 = vpop.f32.mrf.mxu0 }
0x116d   : > { %v5995_v44 = vadd.f32 %v5994_v59, %v15826_v35  ;;  %v6037_v21 = vadd.f32 %v14024_v5, %v11443_v7 }
0x116e   : > { %v8925_v24 = vpop.f32.mrf.mxu1  ;;  %v14026_v60 = vpop.f32.mrf.mxu0 }
0x1188   : > { %v6075_v48 = vpop.f32.mrf.mxu0  ;;  %v6118_v33 = vpop.f32.mrf.mxu1 }
0x1189   : > { %v6125_v31 = vadd.f32 %v6075_v48, %v5991_v9 }
0x118a   : > { %v6077_v41 = vpop.f32.mrf.mxu0  ;;  %v8944_v11 = vpop.f32.mrf.mxu1 }
0x118b   : > { %v7627_v0 = vmul.f32 -1.442695, %v6125_v31  ;;  %v6126_v34 = vadd.f32 %v6077_v41, %v5993_v1  ;;  %v6528_v1 = vstv %s6527_s15 }
0x118c   : > { %v6079_v37 = vpop.f32.mrf.mxu0  ;;  %v6121_v42 = vpop.f32.mrf.mxu1 }
0x118d   : > { %9865 = vpow2.f32 %v7627_v0  ;;  %v6127_v63 = vadd.f32 %v6079_v37, %v5995_v44  ;;  %v7628_v43 = vmul.f32 -1.442695, %v6126_v34  ;;  %v815_v0 = vadd.f32 %v15828_v36, %v15827_v30  ;;  %v15829_v34 = vld [vmem:[#allocation51_spill] sm:$0xff] }
0x118e   : > { %v8945_v8 = vpop.f32.mrf.mxu1  ;;  %v14031_v31 = vpop.f32.mrf.mxu0  ;;  %vm6529_vm12 = vcmp.eq.s32.totalorder %v15829_v34, %v6528_v1 }
0x118f   : > { %v7629_v24 = vmul.f32 -1.442695, %v6127_v63  ;;  %v6153_v63 = vadd.f32 %v13869_v56, %v6118_v33  ;;  %v6531_v36 = vsel %vm6529_vm12, 1, %v15154_v52 }
0x1190   : > { %6534 = vperm.xlu0 %9219, %v6531_v36   ;;  %v15833_v36 = vld [vmem:[#allocation112_spill] sm:$0xff] }
0x1191   : > { %9867 = vpow2.f32 %v7629_v24 }
0x1192   : > { %9869 = vpow2.f32 %v7628_v43  ;;  %v15831_v43 = vld [vmem:[#allocation111_spill] sm:$0xff] }
0x119a   : > { %v9866_v19 = vpop.eup %9865 }
0x119b   : > { %v6141_v9 = vadd.f32 1.0, %v9866_v19  ;;  %v15830_v19 = vld [vmem:[#allocation52_spill] sm:$0xff] }
0x119c   : > { %vm6530_vm13 = vcmp.eq.s32.totalorder %v15830_v19, %v6528_v1 }
0x119d   : > { %9871 = vrcp.f32 %v6141_v9  ;;  %v819_v9 = vadd.f32 %v15831_v43, %v15827_v30  ;;  %v6154_v43 = vadd.f32 %v13869_v56, %v6121_v42 }
0x119e   : > { %v9868_v48 = vpop.eup %9867 }
0x119f   : > { %v6143_v11 = vadd.f32 1.0, %v9868_v48  ;;  %v9870_v59 = vpop.eup %9869 }
0x11a0   : > { %v6142_v44 = vadd.f32 1.0, %v9870_v59  ;;  %v6532_v59 = vsel %vm6530_vm13, 1, %v15154_v52 }
0x11a1   : > { %9873 = vrcp.f32 %v6143_v11  ;;  %6537 = vperm.xlu1 %9220, %v6532_v59   ;;  %v821_v59 = vadd.f32 %v15833_v36, %v11095_v28 }
0x11a2   : > { %9875 = vrcp.f32 %v6142_v44 }
0x11a8   : > { %v6219_v37 = vpop.f32.mrf.mxu0  ;;  %v6262_v41 = vpop.f32.mrf.mxu1 }
0x11a9   : > { %v6269_v8 = vadd.f32 %v6219_v37, %v815_v0  ;;  %v15832_v0 = vld [vmem:[#allocation110_spill] sm:$0xff] }
0x11aa   : > { %v9872_v24 = vpop.eup %9871  ;;  %v6221_v48 = vpop.f32.mrf.mxu0  ;;  %v817_v37 = vadd.f32 %v15832_v0, %v11095_v28 }
0x11ab   : > { %v8964_v11 = vpop.f32.mrf.mxu1  ;;  %v6155_v35 = vmul.f32 %v9872_v24, %v6153_v63  ;;  %v7631_v33 = vmul.f32 -1.442695, %v6269_v8 }
0x11ac   : > { %v6223_v1 = vpop.f32.mrf.mxu0  ;;  %v6270_v63 = vadd.f32 %v6221_v48, %v817_v37 }
0x11ad   : > { %v6265_v19 = vpop.f32.mrf.mxu1  ;;  %v6157_v34 = vadd.f32 %v6155_v35, %v6034_v39  ;;  %9877 = vpow2.f32 %v7631_v33  ;;  %v6271_v11 = vadd.f32 %v6223_v1, %v819_v9 }
0x11ae   : > { %v9874_v30 = vpop.eup %9873  ;;  %v6225_v24 = vpop.f32.mrf.mxu0  ;;  %v7632_v35 = vmul.f32 -1.442695, %v6270_v63  ;;  %v6297_v63 = vadd.f32 %v13664_v2, %v6262_v41 }
0x11af   : > { %v8965_v17 = vpop.f32.mrf.mxu1  ;;  %9879 = vtanh.f32 %v6157_v34  ;;  %v6156_v44 = vmul.f32 %v9874_v30, %v6154_v43  ;;  %v7633_v8 = vmul.f32 -1.442695, %v6271_v11  ;;  %v6272_v39 = vadd.f32 %v6225_v24, %v821_v59  ;;  %v9876_v9 = vpop.eup %9875 }
0x11b0   : > { %v6161_v1 = vsub.f32 1.0, %v9876_v9  ;;  %v6165_v48 = vmul.f32 %v9876_v9, %v13889_v47  ;;  %v5997_v59 = vadd.f32 %v14026_v60, %v11428_v29 }
0x11b1   : > { %v14051_v0 = vadd.f32 %v6156_v44, %v6037_v21  ;;  %9881 = vpow2.f32 %v7633_v8  ;;  %v7634_v42 = vmul.f32 -1.442695, %v6272_v39  ;;  %v15835_v39 = vld [vmem:[#allocation42_spill] sm:$0xff] }
0x11b2   : > { %9883 = vpow2.f32 %v7632_v35 }
0x11b3   : > { %9885 = vpow2.f32 %v7634_v42  ;;  %v6298_v42 = vadd.f32 %v13664_v2, %v6265_v19 }
0x11ba   : > { %v9878_v33 = vpop.eup %9877 }
0x11bb   : > { %v6285_v5 = vadd.f32 1.0, %v9878_v33  ;;  %v6128_v33 = vadd.f32 %v14031_v31, %v5997_v59  ;;  %v14199_v59 = vld [vmem:[#allocation6 + $0x154] ss:$12 sps:$4 sm:$0xff]  }
0x11bc   : > { %v9880_v34 = vpop.eup %9879 }
0x11bd   : > { %9887 = vrcp.f32 %v6285_v5  ;;  %v6163_v30 = vmul.f32 %v9880_v34, %v6161_v1  ;;  %v15836_v1 = vld [vmem:[#allocation44_spill] sm:$0xff]  ;;  %v7630_v41 = vmul.f32 -1.442695, %v6128_v33 }
0x11be   : > { %v9882_v37 = vpop.eup %9881  ;;  %v14219_v33 = vld [vmem:[#allocation6 + $0x140] ss:$12 sps:$4 sm:$0xff]  }
0x11bf   : > { %v6287_v43 = vadd.f32 1.0, %v9882_v37  ;;  %v14054_v11 = vadd.f32 %v6165_v48, %v6163_v30  ;;  %v9884_v21 = vpop.eup %9883 }
0x11c0   : > { %v9886_v17 = vpop.eup %9885  ;;  %v6286_v44 = vadd.f32 1.0, %v9884_v21 }
0x11c1   : > { %15834 = vst [vmem:[#allocation21_spill] sm:$0xff] %v14054_v11  ;;  %9889 = vrcp.f32 %v6287_v43  ;;  %v6288_v24 = vadd.f32 1.0, %v9886_v17 }
0x11c2   : > { %9891 = vrcp.f32 %v6286_v44 }
0x11c3   : > { %9893 = vrcp.f32 %v6288_v24 }
0x11ca   : > { %v9888_v8 = vpop.eup %9887 }
0x11cb   : > { %v6299_v36 = vmul.f32 %v9888_v8, %v6297_v63 }
0x11cd   : > { %v6301_v35 = vadd.f32 %v6299_v36, %v15835_v39  ;;  %v14206_v39 = vld [vmem:[#allocation6 + $0x150] ss:$12 sps:$4 sm:$0xff]  }
0x11ce   : > { %v9890_v9 = vpop.eup %9889 }
0x11cf   : > { %9895 = vtanh.f32 %v6301_v35  ;;  %v6300_v5 = vmul.f32 %v9890_v9, %v6298_v42  ;;  %v9892_v30 = vpop.eup %9891  ;;  %v14209_v35 = vld [vmem:[#allocation6 + $0x158] ss:$12 sps:$4 sm:$0xff]   ;;  %v14212_v42 = vld [vmem:[#allocation6 + $0x13c] ss:$12 sps:$4 sm:$0xff]  }
0x11d0   : > { %v9894_v48 = vpop.eup %9893  ;;  %v6305_v37 = vsub.f32 1.0, %v9892_v30  ;;  %v6309_v21 = vmul.f32 %v9892_v30, %v13900_v61  ;;  %v14177_v61 = vld [vmem:[#allocation8 + $0x4] ss:$12 sps:$4 sm:$0xff]   ;;  %v14236_v30 = vld [vmem:[#allocation6 + $0x108] ss:$12 sps:$4 sm:$0xff]  }
0x11d1   : > { %v6302_v34 = vadd.f32 %v6300_v5, %v15836_v1  ;;  %v6306_v17 = vsub.f32 1.0, %v9894_v48  ;;  %v6310_v31 = vmul.f32 %v9894_v48, %v13903_v25  ;;  %v14181_v25 = vld [vmem:[#allocation8] ss:$12 sps:$4 sm:$0xff]   ;;  %v14216_v9 = vld [vmem:[#allocation6 + $0x138] ss:$12 sps:$4 sm:$0xff]   ;;  %15843 = vst [vmem:[#allocation64_spill] sm:$0xff] %v14236_v30 }
0x11d2   : > { %v14222_v5 = vld [vmem:[#allocation6 + $0x124] ss:$12 sps:$4 sm:$0xff]   ;;  %v14226_v1 = vld [vmem:[#allocation6 + $0x120] ss:$12 sps:$4 sm:$0xff]  }
0x11d3   : > { %9897 = vtanh.f32 %v6302_v34  ;;  %15839 = vst [vmem:[#allocation58_spill] sm:$0xff] %v14222_v5  ;;  %15840 = vst [vmem:[#allocation60_spill] sm:$0xff] %v14226_v1  ;;  %v14229_v34 = vld [vmem:[#allocation6 + $0x128] ss:$12 sps:$4 sm:$0xff]   ;;  %v14239_v48 = vld [vmem:[#allocation6 + $0x110] ss:$12 sps:$4 sm:$0xff]  }
0x11d4   : > { %9899 = vpow2.f32 %v7630_v41  ;;  %15841 = vst [vmem:[#allocation61_spill] sm:$0xff] %v14229_v34  ;;  %v14232_v41 = vld [vmem:[#allocation6 + $0x10c] ss:$12 sps:$4 sm:$0xff]   ;;  %15844 = vst [vmem:[#allocation65_spill] sm:$0xff] %v14239_v48 }
0x11d5   : > { %15842 = vst [vmem:[#allocation62_spill] sm:$0xff] %v14232_v41 }
0x11dc   : > { %v9896_v43 = vpop.eup %9895 }
0x11dd   : > { %v6307_v60 = vmul.f32 %v9896_v43, %v6305_v37  ;;  %v14242_v37 = vld [vmem:[#allocation6 + $0xf4] ss:$12 sps:$4 sm:$0xff]   ;;  %v14246_v43 = vld [vmem:[#allocation6 + $0xf0] ss:$12 sps:$4 sm:$0xff]  }
0x11de   : > { %15845 = vst [vmem:[#allocation66_spill] sm:$0xff] %v14242_v37  ;;  %15846 = vst [vmem:[#allocation68_spill] sm:$0xff] %v14246_v43 }
0x11df   : > { %v14064_v2 = vadd.f32 %v6309_v21, %v6307_v60  ;;  %v14249_v60 = vld [vmem:[#allocation6 + $0xf8] ss:$12 sps:$4 sm:$0xff]   ;;  %v14252_v21 = vld [vmem:[#allocation6 + $0xdc] ss:$12 sps:$4 sm:$0xff]  }
0x11e0   : > { %v9898_v19 = vpop.eup %9897  ;;  %15847 = vst [vmem:[#allocation69_spill] sm:$0xff] %v14249_v60  ;;  %15848 = vst [vmem:[#allocation70_spill] sm:$0xff] %v14252_v21 }
0x11e1   : > { %v6308_v44 = vmul.f32 %v9898_v19, %v6306_v17  ;;  %v9900_v8 = vpop.eup %9899  ;;  %v14256_v17 = vld [vmem:[#allocation6 + $0xd8] ss:$12 sps:$4 sm:$0xff]   ;;  %v14259_v19 = vld [vmem:[#allocation6 + $0xe0] ss:$12 sps:$4 sm:$0xff]  }
0x11e2   : > { %v6144_v36 = vadd.f32 1.0, %v9900_v8  ;;  %15849 = vst [vmem:[#allocation72_spill] sm:$0xff] %v14256_v17  ;;  %15850 = vst [vmem:[#allocation73_spill] sm:$0xff] %v14259_v19  ;;  %v14269_v8 = vld [vmem:[#allocation6 + $0xc8] ss:$12 sps:$4 sm:$0xff]  }
0x11e3   : > { %v14067_v63 = vadd.f32 %v6310_v31, %v6308_v44  ;;  %v14262_v44 = vld [vmem:[#allocation6 + $0xc4] ss:$12 sps:$4 sm:$0xff]   ;;  %v14266_v31 = vld [vmem:[#allocation6 + $0xc0] ss:$12 sps:$4 sm:$0xff]   ;;  %15853 = vst [vmem:[#allocation77_spill] sm:$0xff] %v14269_v8 }
0x11e4   : > { %9901 = vrcp.f32 %v6144_v36  ;;  %15851 = vst [vmem:[#allocation74_spill] sm:$0xff] %v14262_v44  ;;  %15852 = vst [vmem:[#allocation76_spill] sm:$0xff] %v14266_v31 }
0x11e5   : > { %v14071_v24 = vpack.c.bf16 %v14067_v63, %v14064_v2  ;;  %9903 = vtanh.f32 %v14051_v0  ;;  %v14196_v0 = vld [vmem:[#allocation6 + $0x170] ss:$12 sps:$4 sm:$0xff]  }
0x11e7   : > { %6347 = vmatmul.mubr.bf16.vlgmr.msra.gmra.mxu0 %v14071_v24  ;;  %8983 = vmatmul.mubr.bf16.vlgmr.msra.gmra.mxu1 %v14071_v24 }
0x11e8   : > { %6400 = vmatpush1.bf16.msra.mxu0 %v13685_v40  ;;  %8987 = vmatpush3.bf16.msra.mxu1 %v13688_v4 }
0x11e9   : > { %6401 = vmatprep.subr.bf16.mxu0 %v13691_v6  ;;  %8988 = vmatprep.subr.bf16.mxu1 %v15160_v54 }
0x11ea   : > { %6431 = vmatprep.mubr.bf16.mxu0 %v15154_v52  ;;  %9002 = vmatprep.mubr.msk.bf16.mxu1 %vm10558_vm0, %v15160_v54 }
0x11ec   : > { %6402 = vmatpush1.bf16.msra.mxu0 %v13698_v49  ;;  %8989 = vmatpush3.bf16.msra.mxu1 %v13701_v51 }
0x11ed   : > { %6403 = vmatprep.subr.bf16.mxu0 %v13705_v50  ;;  %8990 = vmatprep.subr.bf16.mxu1 %v15160_v54 }
0x11f0   : > { %6404 = vmatpush1.bf16.msra.mxu0 %v13709_v22  ;;  %8991 = vmatpush3.bf16.msra.mxu1 %v13712_v45  ;;  %v14126_v45 = vld [vmem:[#allocation8 + $0x98] ss:$12 sps:$4 sm:$0xff]  }
0x11f1   : > { %6405 = vmatprep.subr.bf16.mxu0 %v13715_v18  ;;  %8992 = vmatprep.subr.bf16.mxu1 %v15160_v54  ;;  %v9902_v40 = vpop.eup %9901  ;;  %v15838_v18 = vld [vmem:[#allocation54_spill] sm:$0xff] }
0x11f2   : > { %v9904_v4 = vpop.eup %9903  ;;  %v6162_v6 = vsub.f32 1.0, %v9902_v40  ;;  %v6166_v51 = vmul.f32 %v9902_v40, %v13942_v57  ;;  %v15855_v57 = vld [vmem:[#allocation17_spill] sm:$0xff] }
0x11f4   : > { %6406 = vmatpush1.bf16.msra.mxu0 %v13719_v20  ;;  %8993 = vmatpush3.bf16.msra.mxu1 %v13722_v15  ;;  %v6164_v49 = vmul.f32 %v9904_v4, %v6162_v6  ;;  %v14131_v20 = vld [vmem:[#allocation8 + $0x78] ss:$12 sps:$4 sm:$0xff]   ;;  %v14134_v15 = vld [vmem:[#allocation8 + $0x80] ss:$12 sps:$4 sm:$0xff]  }
0x11f5   : > { %6407 = vmatprep.subr.bf16.mxu0 %v13725_v10  ;;  %8994 = vmatprep.subr.bf16.mxu1 %v15160_v54  ;;  %v14137_v10 = vld [vmem:[#allocation8 + $0x64] ss:$12 sps:$4 sm:$0xff]  }
0x11f6   : > { %v14106_v50 = vadd.f32 %v6166_v51, %v6164_v49 }
0x11f8   : > { %6408 = vmatpush1.bf16.msra.mxu0 %v13729_v27  ;;  %8995 = vmatpush3.bf16.msra.mxu1 %v13732_v13  ;;  %15837 = vst [vmem:[#allocation57_spill] sm:$0xff] %v14106_v50  ;;  %v6398_v22 = vpack.c.bf16 %v14106_v50, %v14054_v11  ;;  %v14144_v27 = vld [vmem:[#allocation8 + $0x68] ss:$12 sps:$4 sm:$0xff]   ;;  %v14147_v13 = vld [vmem:[#allocation8 + $0x4c] ss:$12 sps:$4 sm:$0xff]  }
0x11f9   : > { %6409 = vmatprep.subr.bf16.mxu0 %v13735_v26  ;;  %8996 = vmatprep.subr.bf16.mxu1 %v15160_v54  ;;  %v14151_v26 = vld [vmem:[#allocation8 + $0x48] ss:$12 sps:$4 sm:$0xff]  }
0x11fc   : > { %6410 = vmatpush1.bf16.msra.mxu0 %v15780_v58  ;;  %8997 = vmatpush3.bf16.msra.mxu1 %v15781_v55  ;;  %v14184_v58 = vld [vmem:[#allocation8 + $0x8] ss:$12 sps:$4 sm:$0xff]   ;;  %v14187_v55 = vld [vmem:[#allocation6 + $0x16c] ss:$12 sps:$4 sm:$0xff]  }
0x11fd   : > { %6411 = vmatprep.subr.bf16.mxu0 %v13745_v23  ;;  %8998 = vmatprep.subr.bf16.mxu1 %v15160_v54  ;;  %v14157_v23 = vld [vmem:[#allocation8 + $0x34] ss:$12 sps:$4 sm:$0xff]  }
0x1200   : > { %6412 = vmatpush1.bf16.msra.mxu0 %v13750_v62  ;;  %8999 = vmatpush3.bf16.msra.mxu1 %v13753_v46  ;;  %v14117_v46 = vld [vmem:[#allocation8 + $0xb0] ss:$12 sps:$4 sm:$0xff]  }
0x1201   : > { %6413 = vmatprep.subr.bf16.mxu0 %v13758_v16  ;;  %9000 = vmatprep.subr.bf16.mxu1 %v15160_v54  ;;  %v14154_v16 = vld [vmem:[#allocation8 + $0x50] ss:$12 sps:$4 sm:$0xff]  }
0x1202   : > { %v14161_v62 = vld [vmem:[#allocation8 + $0x30] ss:$12 sps:$4 sm:$0xff]  }
0x1204   : > { %6414 = vmatpush1.bf16.msra.mxu0 %v13762_v12  ;;  %9001 = vmatpush3.bf16.msra.mxu1 %v13765_v3  ;;  %v14164_v12 = vld [vmem:[#allocation8 + $0x38] ss:$12 sps:$4 sm:$0xff]   ;;  %v14167_v3 = vld [vmem:[#allocation8 + $0x1c] ss:$12 sps:$4 sm:$0xff]  }
0x1205   : > { %6543 = vmatprep.subr.bf16.mxu0 %v15783_v32  ;;  %9006 = vmatprep.subr.bf16.mxu1 %v15160_v54  ;;  %v14193_v32 = vld [vmem:[#allocation6 + $0x168] ss:$12 sps:$4 sm:$0xff]  }
0x1207   : > { %6432 = vmatmul.mubr.bf16.vlgmr.msra.gmra.mxu0 %v6398_v22  ;;  %9003 = vmatmul.mubr.bf16.vlgmr.msra.gmra.mxu1 %v6398_v22 }
0x1208   : > { %6544 = vmatpush1.bf16.msra.mxu0 %v13774_v53  ;;  %9007 = vmatpush3.bf16.msra.mxu1 %v14117_v46  ;;  %v14171_v53 = vld [vmem:[#allocation8 + $0x18] ss:$12 sps:$4 sm:$0xff]  }
0x1209   : > { %6545 = vmatprep.subr.bf16.mxu0 %v13778_v38  ;;  %9008 = vmatprep.subr.bf16.mxu1 %v15160_v54  ;;  %v14174_v38 = vld [vmem:[#allocation8 + $0x20] ss:$12 sps:$4 sm:$0xff]  }
0x120a   : > { %6575 = vmatprep.mubr.bf16.mxu0 %v15154_v52  ;;  %9022 = vmatprep.mubr.msk.bf16.mxu1 %vm10558_vm0, %v15160_v54 }
0x120c   : > { %6546 = vmatpush1.bf16.msra.mxu0 %v13785_v14  ;;  %9009 = vmatpush3.bf16.msra.mxu1 %v14126_v45  ;;  %v14141_v14 = vld [vmem:[#allocation8 + $0x60] ss:$12 sps:$4 sm:$0xff]  }
0x120d   : > { %6547 = vmatprep.subr.bf16.mxu0 %v15838_v18  ;;  %9010 = vmatprep.subr.bf16.mxu1 %v15160_v54 }
0x1210   : > { %6548 = vmatpush1.bf16.msra.mxu0 %v14131_v20  ;;  %9011 = vmatpush3.bf16.msra.mxu1 %v14134_v15 }
0x1211   : > { %6549 = vmatprep.subr.bf16.mxu0 %v14137_v10  ;;  %9012 = vmatprep.subr.bf16.mxu1 %v15160_v54 }
0x1214   : > { %6550 = vmatpush1.bf16.msra.mxu0 %v14141_v14  ;;  %9013 = vmatpush3.bf16.msra.mxu1 %v14144_v27 }
0x1215   : > { %6551 = vmatprep.subr.bf16.mxu0 %v14147_v13  ;;  %9014 = vmatprep.subr.bf16.mxu1 %v15160_v54 }
0x1218   : > { %6552 = vmatpush1.bf16.msra.mxu0 %v14151_v26  ;;  %9015 = vmatpush3.bf16.msra.mxu1 %v14154_v16 }
0x1219   : > { %6553 = vmatprep.subr.bf16.mxu0 %v14157_v23  ;;  %9016 = vmatprep.subr.bf16.mxu1 %v15160_v54 }
0x121c   : > { %6554 = vmatpush1.bf16.msra.mxu0 %v14161_v62  ;;  %9017 = vmatpush3.bf16.msra.mxu1 %v14164_v12 }
0x121d   : > { %6555 = vmatprep.subr.bf16.mxu0 %v14167_v3  ;;  %9018 = vmatprep.subr.bf16.mxu1 %v15160_v54 }
0x1220   : > { %6556 = vmatpush1.bf16.msra.mxu0 %v14171_v53  ;;  %9019 = vmatpush3.bf16.msra.mxu1 %v14174_v38 }
0x1221   : > { %6557 = vmatprep.subr.bf16.mxu0 %v14177_v61  ;;  %9020 = vmatprep.subr.bf16.mxu1 %v15160_v54 }
0x1224   : > { %6558 = vmatpush1.bf16.msra.mxu0 %v14181_v25  ;;  %9021 = vmatpush3.bf16.msra.mxu1 %v14184_v58 }
0x1225   : > { %6672 = vmatprep.subr.bf16.mxu0 %v14187_v55  ;;  %9026 = vmatprep.subr.bf16.mxu1 %v15160_v54 }
0x1227   : > { %6576 = vmatmul.mubr.bf16.vlgmr.msra.gmra.mxu0 %v14071_v24  ;;  %9023 = vmatmul.mubr.bf16.vlgmr.msra.gmra.mxu1 %v14071_v24  ;;  %v14272_v24 = vld [vmem:[#allocation8 + $0x16c] ss:$12 sps:$4 sm:$0xff]  }
0x1228   : > { %6673 = vmatpush1.bf16.msra.mxu0 %v14193_v32  ;;  %9027 = vmatpush3.bf16.msra.mxu1 %v14196_v0  ;;  %15854 = vst [vmem:[#allocation81_spill] sm:$0xff] %v14272_v24 }
0x1229   : > { %6674 = vmatprep.subr.bf16.mxu0 %v14199_v59  ;;  %9028 = vmatprep.subr.bf16.mxu1 %v15160_v54 }
0x122a   : > { %6704 = vmatprep.mubr.bf16.mxu0 %v15154_v52  ;;  %9042 = vmatprep.mubr.msk.bf16.mxu1 %vm10558_vm0, %v15160_v54 }
0x122c   : > { %6675 = vmatpush1.bf16.msra.mxu0 %v14206_v39  ;;  %9029 = vmatpush3.bf16.msra.mxu1 %v14209_v35 }
0x122d   : > { %6676 = vmatprep.subr.bf16.mxu0 %v14212_v42  ;;  %9030 = vmatprep.subr.bf16.mxu1 %v15160_v54 }
0x1230   : > { %6677 = vmatpush1.bf16.msra.mxu0 %v14216_v9  ;;  %9031 = vmatpush3.bf16.msra.mxu1 %v14219_v33 }
0x1231   : > { %6678 = vmatprep.subr.bf16.mxu0 %v14222_v5  ;;  %9032 = vmatprep.subr.bf16.mxu1 %v15160_v54 }
0x1234   : > { %6679 = vmatpush1.bf16.msra.mxu0 %v14226_v1  ;;  %9033 = vmatpush3.bf16.msra.mxu1 %v14229_v34 }
0x1235   : > { %6680 = vmatprep.subr.bf16.mxu0 %v14232_v41  ;;  %9034 = vmatprep.subr.bf16.mxu1 %v15160_v54 }
0x1238   : > { %6681 = vmatpush1.bf16.msra.mxu0 %v14236_v30  ;;  %9035 = vmatpush3.bf16.msra.mxu1 %v14239_v48 }
0x1239   : > { %6682 = vmatprep.subr.bf16.mxu0 %v14242_v37  ;;  %9036 = vmatprep.subr.bf16.mxu1 %v15160_v54 }
0x123c   : > { %6683 = vmatpush1.bf16.msra.mxu0 %v14246_v43  ;;  %9037 = vmatpush3.bf16.msra.mxu1 %v14249_v60 }
0x123d   : > { %6684 = vmatprep.subr.bf16.mxu0 %v14252_v21  ;;  %9038 = vmatprep.subr.bf16.mxu1 %v15160_v54 }
0x1240   : > { %6685 = vmatpush1.bf16.msra.mxu0 %v14256_v17  ;;  %9039 = vmatpush3.bf16.msra.mxu1 %v14259_v19 }
0x1241   : > { %6686 = vmatprep.subr.bf16.mxu0 %v14262_v44  ;;  %9040 = vmatprep.subr.bf16.mxu1 %v15160_v54 }
0x1244   : > { %6687 = vmatpush1.bf16.msra.mxu0 %v14266_v31  ;;  %9041 = vmatpush3.bf16.msra.mxu1 %v14269_v8 }
0x1245   : > { %6757 = vmatprep.subr.bf16.mxu0 %v14272_v24  ;;  %9046 = vmatprep.subr.bf16.mxu1 %v15160_v54 }
0x12a7   : > { %v6391_v36 = vpop.f32.mrf.mxu1  ;;  %v6348_v49 = vpop.f32.mrf.mxu0 }
0x12a8   : > { %v6349_v47 = vadd.f32 %v6348_v49, %v15855_v57  ;;  %v6392_v34 = vadd.f32 %v6391_v36, %v11443_v7 }
0x12a9   : > { %v8984_v40 = vpop.f32.mrf.mxu1  ;;  %v6350_v51 = vpop.f32.mrf.mxu0 }
0x12aa   : > { %v6351_v43 = vadd.f32 %v6350_v51, %v11428_v29  ;;  %v15857_v51 = vld [vmem:[#allocation113_spill] sm:$0xff] }
0x12ab   : > { %v14276_v4 = vpop.f32.mrf.mxu1  ;;  %v6352_v22 = vpop.f32.mrf.mxu0 }
0x12ac   : > { %v6353_v24 = vadd.f32 %v6352_v22, %v15855_v57  ;;  %v15856_v57 = vld [vmem:[#allocation47_spill] sm:$0xff]  ;;  %v6395_v5 = vadd.f32 %v14276_v4, %v11443_v7 }
0x12ad   : > { %v8985_v6 = vpop.f32.mrf.mxu1  ;;  %v14278_v18 = vpop.f32.mrf.mxu0 }
0x12c7   : > { %v6433_v31 = vpop.f32.mrf.mxu0  ;;  %v6476_v8 = vpop.f32.mrf.mxu1 }
0x12c8   : > { %v6483_v44 = vadd.f32 %v6433_v31, %v6349_v47 }
0x12c9   : > { %v6435_v19 = vpop.f32.mrf.mxu0  ;;  %v9004_v17 = vpop.f32.mrf.mxu1 }
0x12ca   : > { %v7635_v21 = vmul.f32 -1.442695, %v6483_v44  ;;  %v6484_v48 = vadd.f32 %v6435_v19, %v6351_v43  ;;  %v6886_v19 = vstv %s6885_s7 }
0x12cb   : > { %v6437_v60 = vpop.f32.mrf.mxu0  ;;  %v6479_v40 = vpop.f32.mrf.mxu1 }
0x12cc   : > { %9905 = vpow2.f32 %v7635_v21  ;;  %v6485_v6 = vadd.f32 %v6437_v60, %v6353_v24  ;;  %v7636_v49 = vmul.f32 -1.442695, %v6484_v48  ;;  %v825_v21 = vadd.f32 %v15857_v51, %v15856_v57  ;;  %v15858_v24 = vld [vmem:[#allocation51_spill] sm:$0xff] }
0x12cd   : > { %v9005_v37 = vpop.f32.mrf.mxu1  ;;  %v14283_v22 = vpop.f32.mrf.mxu0  ;;  %vm6887_vm14 = vcmp.eq.s32.totalorder %v15858_v24, %v6886_v19 }
0x12ce   : > { %v7637_v30 = vmul.f32 -1.442695, %v6485_v6  ;;  %v6889_v51 = vsel %vm6887_vm14, 1, %v15154_v52 }
0x12cf   : > { %6892 = vperm.xlu0 %9219, %v6889_v51   ;;  %v15862_v51 = vld [vmem:[#allocation116_spill] sm:$0xff] }
0x12d0   : > { %9907 = vpow2.f32 %v7637_v30  ;;  %v6511_v30 = vadd.f32 %v13869_v56, %v6476_v8 }
0x12d1   : > { %9909 = vpow2.f32 %v7636_v49  ;;  %v15860_v49 = vld [vmem:[#allocation115_spill] sm:$0xff] }
0x12d9   : > { %v9906_v41 = vpop.eup %9905 }
0x12da   : > { %v6499_v47 = vadd.f32 1.0, %v9906_v41  ;;  %v15859_v41 = vld [vmem:[#allocation52_spill] sm:$0xff] }
0x12db   : > { %vm6888_vm15 = vcmp.eq.s32.totalorder %v15859_v41, %v6886_v19 }
0x12dc   : > { %9911 = vrcp.f32 %v6499_v47  ;;  %v829_v47 = vadd.f32 %v15860_v49, %v15856_v57  ;;  %v6512_v49 = vadd.f32 %v13869_v56, %v6479_v40 }
0x12dd   : > { %v9908_v17 = vpop.eup %9907 }
0x12de   : > { %v6501_v31 = vadd.f32 1.0, %v9908_v17  ;;  %v9910_v44 = vpop.eup %9909 }
0x12df   : > { %v6500_v60 = vadd.f32 1.0, %v9910_v44  ;;  %v6890_v44 = vsel %vm6888_vm15, 1, %v15154_v52 }
0x12e0   : > { %9913 = vrcp.f32 %v6501_v31  ;;  %6895 = vperm.xlu1 %9220, %v6890_v44   ;;  %v831_v44 = vadd.f32 %v15862_v51, %v11095_v28 }
0x12e1   : > { %9915 = vrcp.f32 %v6500_v60 }
0x12e7   : > { %v6577_v37 = vpop.f32.mrf.mxu0  ;;  %v6620_v43 = vpop.f32.mrf.mxu1 }
0x12e8   : > { %v6627_v48 = vadd.f32 %v6577_v37, %v825_v21  ;;  %v15861_v21 = vld [vmem:[#allocation114_spill] sm:$0xff] }
0x12e9   : > { %v9912_v6 = vpop.eup %9911  ;;  %v6579_v17 = vpop.f32.mrf.mxu0  ;;  %v827_v37 = vadd.f32 %v15861_v21, %v11095_v28 }
0x12ea   : > { %v9024_v31 = vpop.f32.mrf.mxu1  ;;  %v6513_v1 = vmul.f32 %v9912_v6, %v6511_v30  ;;  %v7639_v8 = vmul.f32 -1.442695, %v6627_v48 }
0x12eb   : > { %v6581_v19 = vpop.f32.mrf.mxu0  ;;  %v6628_v30 = vadd.f32 %v6579_v17, %v827_v37 }
0x12ec   : > { %v6623_v24 = vpop.f32.mrf.mxu1  ;;  %v6515_v41 = vadd.f32 %v6513_v1, %v6392_v34  ;;  %9917 = vpow2.f32 %v7639_v8  ;;  %v6629_v31 = vadd.f32 %v6581_v19, %v829_v47 }
0x12ed   : > { %v9914_v57 = vpop.eup %9913  ;;  %v6583_v6 = vpop.f32.mrf.mxu0  ;;  %v7640_v56 = vmul.f32 -1.442695, %v6628_v30 }
0x12ee   : > { %v9025_v36 = vpop.f32.mrf.mxu1  ;;  %9919 = vtanh.f32 %v6515_v41  ;;  %v6514_v60 = vmul.f32 %v9914_v57, %v6512_v49  ;;  %v7641_v48 = vmul.f32 -1.442695, %v6629_v31  ;;  %v6630_v1 = vadd.f32 %v6583_v6, %v831_v44  ;;  %v9916_v40 = vpop.eup %9915 }
0x12ef   : > { %v6519_v8 = vsub.f32 1.0, %v9916_v40  ;;  %v6523_v17 = vmul.f32 %v9916_v40, %v14054_v11  ;;  %v6355_v44 = vadd.f32 %v14278_v18, %v11428_v29  ;;  %v14401_v11 = vld [vmem:[#allocation8 + $0xe0] ss:$12 sps:$4 sm:$0xff]  }
0x12f0   : > { %v14303_v21 = vadd.f32 %v6514_v60, %v6395_v5  ;;  %9921 = vpow2.f32 %v7641_v48  ;;  %v7642_v34 = vmul.f32 -1.442695, %v6630_v1  ;;  %v14311_v60 = vld [vmem:[%s14731_s5] ss:$0 sm:$0xff]  ;;  %v15863_v1 = vld [vmem:[#allocation48_spill] sm:$0xff] }
0x12f1   : > { %9923 = vpow2.f32 %v7640_v56  ;;  %v6655_v30 = vadd.f32 %v14311_v60, %v6620_v43 }
0x12f2   : > { %9925 = vpow2.f32 %v7642_v34  ;;  %v6656_v34 = vadd.f32 %v14311_v60, %v6623_v24 }
0x12f9   : > { %v9918_v47 = vpop.eup %9917 }
0x12fa   : > { %v6643_v4 = vadd.f32 1.0, %v9918_v47  ;;  %v15864_v47 = vld [vmem:[#allocation19_spill] sm:$0xff] }
0x12fb   : > { %v9920_v41 = vpop.eup %9919 }
0x12fc   : > { %9927 = vrcp.f32 %v6643_v4  ;;  %v6521_v57 = vmul.f32 %v9920_v41, %v6519_v8  ;;  %v15865_v4 = vld [vmem:[#allocation50_spill] sm:$0xff]  ;;  %v6486_v41 = vadd.f32 %v14283_v22, %v6355_v44 }
0x12fd   : > { %v9922_v37 = vpop.eup %9921  ;;  %v993_v8 = vadd.f32 %v15865_v4, %v15864_v47  ;;  %v14349_v47 = vld [vmem:[#allocation8 + $0x158] ss:$12 sps:$4 sm:$0xff]   ;;  %v14353_v4 = vld [vmem:[#allocation8 + $0x13c] ss:$12 sps:$4 sm:$0xff]  }
0x12fe   : > { %v6645_v19 = vadd.f32 1.0, %v9922_v37  ;;  %v14306_v49 = vadd.f32 %v6523_v17, %v6521_v57  ;;  %v9924_v5 = vpop.eup %9923  ;;  %v7638_v17 = vmul.f32 -1.442695, %v6486_v41  ;;  %v14360_v41 = vld [vmem:[#allocation8 + $0x140] ss:$12 sps:$4 sm:$0xff]  }
0x12ff   : > { %v9926_v31 = vpop.eup %9925  ;;  %v6644_v36 = vadd.f32 1.0, %v9924_v5 }
0x1300   : > { %9929 = vrcp.f32 %v6645_v19  ;;  %v6646_v6 = vadd.f32 1.0, %v9926_v31 }
0x1301   : > { %9931 = vrcp.f32 %v6644_v36 }
0x1302   : > { %9933 = vrcp.f32 %v6646_v6 }
0x1309   : > { %v9928_v48 = vpop.eup %9927 }
0x130a   : > { %v6657_v51 = vmul.f32 %v9928_v48, %v6655_v30 }
0x130c   : > { %v6659_v56 = vadd.f32 %v6657_v51, %v15863_v1 }
0x130d   : > { %v9930_v40 = vpop.eup %9929 }
0x130e   : > { %9935 = vtanh.f32 %v6659_v56  ;;  %v6658_v43 = vmul.f32 %v9930_v40, %v6656_v34  ;;  %v9932_v37 = vpop.eup %9931  ;;  %v14336_v34 = vld [vmem:[#allocation8 + $0x170] ss:$12 sps:$4 sm:$0xff]  }
0x130f   : > { %v9934_v19 = vpop.eup %9933  ;;  %v6663_v18 = vsub.f32 1.0, %v9932_v37  ;;  %v6667_v24 = vmul.f32 %v9932_v37, %v14064_v2  ;;  %v14333_v2 = vld [vmem:[#allocation8 + $0x168] ss:$12 sps:$4 sm:$0xff]   ;;  %v14346_v40 = vld [vmem:[#allocation8 + $0x150] ss:$12 sps:$4 sm:$0xff]  }
0x1310   : > { %v6660_v57 = vadd.f32 %v6658_v43, %v993_v8  ;;  %v6664_v36 = vsub.f32 1.0, %v9934_v19  ;;  %v6668_v22 = vmul.f32 %v9934_v19, %v14067_v63  ;;  %v14339_v63 = vld [vmem:[#allocation8 + $0x154] ss:$12 sps:$4 sm:$0xff]   ;;  %v14357_v8 = vld [vmem:[#allocation8 + $0x138] ss:$12 sps:$4 sm:$0xff]  }
0x1311   : > { %v14363_v43 = vld [vmem:[#allocation8 + $0x124] ss:$12 sps:$4 sm:$0xff]   ;;  %v14377_v19 = vld [vmem:[#allocation8 + $0x108] ss:$12 sps:$4 sm:$0xff]  }
0x1312   : > { %9937 = vtanh.f32 %v6660_v57  ;;  %v14370_v57 = vld [vmem:[#allocation8 + $0x128] ss:$12 sps:$4 sm:$0xff]  }
0x1313   : > { %9939 = vpow2.f32 %v7638_v17  ;;  %v14373_v17 = vld [vmem:[#allocation8 + $0x10c] ss:$12 sps:$4 sm:$0xff]  }
0x131b   : > { %v9936_v5 = vpop.eup %9935 }
0x131c   : > { %v6665_v31 = vmul.f32 %v9936_v5, %v6663_v18  ;;  %v14380_v18 = vld [vmem:[#allocation8 + $0x110] ss:$12 sps:$4 sm:$0xff]   ;;  %v14383_v5 = vld [vmem:[#allocation8 + $0xf4] ss:$12 sps:$4 sm:$0xff]  }
0x131e   : > { %v14322_v30 = vadd.f32 %v6667_v24, %v6665_v31 }
0x131f   : > { %v9938_v48 = vpop.eup %9937 }
0x1320   : > { %v6666_v6 = vmul.f32 %v9938_v48, %v6664_v36  ;;  %v9940_v44 = vpop.eup %9939  ;;  %v14387_v36 = vld [vmem:[#allocation8 + $0xf0] ss:$12 sps:$4 sm:$0xff]   ;;  %v14390_v48 = vld [vmem:[#allocation8 + $0xf8] ss:$12 sps:$4 sm:$0xff]  }
0x1321   : > { %v6502_v56 = vadd.f32 1.0, %v9940_v44  ;;  %15866 = vst [vmem:[#allocation122_spill] sm:$0xff] %v14387_v36  ;;  %15867 = vst [vmem:[#allocation123_spill] sm:$0xff] %v14390_v48 }
0x1322   : > { %v14325_v51 = vadd.f32 %v6668_v22, %v6666_v6  ;;  %v14393_v22 = vld [vmem:[#allocation8 + $0xdc] ss:$12 sps:$4 sm:$0xff]  }
0x1323   : > { %9941 = vrcp.f32 %v6502_v56  ;;  %v14398_v56 = vld [vmem:[#allocation8 + $0xd8] ss:$12 sps:$4 sm:$0xff]  }
0x1324   : > { %v14329_v1 = vpack.c.bf16 %v14325_v51, %v14322_v30  ;;  %9943 = vtanh.f32 %v14303_v21  ;;  %v14367_v21 = vld [vmem:[#allocation8 + $0x120] ss:$12 sps:$4 sm:$0xff]  }
0x1326   : > { %6705 = vmatmul.mubr.bf16.vlgmr.msra.gmra.mxu0 %v14329_v1  ;;  %9043 = vmatmul.mubr.bf16.vlgmr.msra.gmra.mxu1 %v14329_v1 }
0x1327   : > { %6758 = vmatpush1.bf16.msra.mxu0 %v14333_v2  ;;  %9047 = vmatpush3.bf16.msra.mxu1 %v14336_v34 }
0x1328   : > { %6759 = vmatprep.subr.bf16.mxu0 %v14339_v63  ;;  %9048 = vmatprep.subr.bf16.mxu1 %v15160_v54 }
0x1329   : > { %6789 = vmatprep.mubr.bf16.mxu0 %v15154_v52  ;;  %9062 = vmatprep.mubr.msk.bf16.mxu1 %vm10558_vm0, %v15160_v54 }
0x132b   : > { %6760 = vmatpush1.bf16.msra.mxu0 %v14346_v40  ;;  %9049 = vmatpush3.bf16.msra.mxu1 %v14349_v47 }
0x132c   : > { %6761 = vmatprep.subr.bf16.mxu0 %v14353_v4  ;;  %9050 = vmatprep.subr.bf16.mxu1 %v15160_v54 }
0x132f   : > { %6762 = vmatpush1.bf16.msra.mxu0 %v14357_v8  ;;  %9051 = vmatpush3.bf16.msra.mxu1 %v14360_v41 }
0x1330   : > { %6763 = vmatprep.subr.bf16.mxu0 %v14363_v43  ;;  %9052 = vmatprep.subr.bf16.mxu1 %v15160_v54  ;;  %v9942_v37 = vpop.eup %9941 }
0x1331   : > { %v9944_v31 = vpop.eup %9943  ;;  %v6520_v24 = vsub.f32 1.0, %v9942_v37  ;;  %v6524_v44 = vmul.f32 %v9942_v37, %v14106_v50  ;;  %v14413_v37 = vld [vmem:[#allocation8 + $0xc8] ss:$12 sps:$4 sm:$0xff]   ;;  %v10374_v50 = vld [vmem:[#allocation8 + $0xac] ss:$12 sps:$4 sm:$0xff]  }
0x1332   : > { %15868 = vst [vmem:[#allocation97_spill] sm:$0xff] %v14413_v37 }
0x1333   : > { %6764 = vmatpush1.bf16.msra.mxu0 %v14367_v21  ;;  %9053 = vmatpush3.bf16.msra.mxu1 %v14370_v57  ;;  %v6522_v6 = vmul.f32 %v9944_v31, %v6520_v24  ;;  %v14410_v31 = vld [vmem:[#allocation8 + $0xc0] ss:$12 sps:$4 sm:$0xff]  }
0x1334   : > { %6765 = vmatprep.subr.bf16.mxu0 %v14373_v17  ;;  %9054 = vmatprep.subr.bf16.mxu1 %v15160_v54 }
0x1337   : > { %6766 = vmatpush1.bf16.msra.mxu0 %v14377_v19  ;;  %9055 = vmatpush3.bf16.msra.mxu1 %v14380_v18 }
0x1338   : > { %6767 = vmatprep.subr.bf16.mxu0 %v14383_v5  ;;  %9056 = vmatprep.subr.bf16.mxu1 %v15160_v54 }
0x133b   : > { %6768 = vmatpush1.bf16.msra.mxu0 %v14387_v36  ;;  %9057 = vmatpush3.bf16.msra.mxu1 %v14390_v48  ;;  %v14404_v36 = vadd.f32 %v6524_v44, %v6522_v6  ;;  %v14406_v48 = vld [vmem:[#allocation8 + $0xc4] ss:$12 sps:$4 sm:$0xff]   ;;  %v10375_v6 = vld [vmem:[#allocation8 + $0xa8] ss:$12 sps:$4 sm:$0xff]  }
0x133c   : > { %6769 = vmatprep.subr.bf16.mxu0 %v14393_v22  ;;  %9058 = vmatprep.subr.bf16.mxu1 %v15160_v54  ;;  %v10376_v44 = vld [vmem:[#allocation8 + $0x94] ss:$12 sps:$4 sm:$0xff]  }
0x133d   : > { %v6756_v24 = vpack.c.bf16 %v14404_v36, %v14306_v49 }
0x133f   : > { %6770 = vmatpush1.bf16.msra.mxu0 %v14398_v56  ;;  %9059 = vmatpush3.bf16.msra.mxu1 %v14401_v11 }
0x1340   : > { %6771 = vmatprep.subr.bf16.mxu0 %v14406_v48  ;;  %9060 = vmatprep.subr.bf16.mxu1 %v15160_v54 }
0x1343   : > { %6772 = vmatpush1.bf16.msra.mxu0 %v14410_v31  ;;  %9061 = vmatpush3.bf16.msra.mxu1 %v14413_v37  ;;  %v10377_v37 = vld [vmem:[#allocation8 + $0x90] ss:$12 sps:$4 sm:$0xff]  }
0x1344   : > { %6901 = vmatprep.subr.bf16.mxu0 %v10374_v50  ;;  %9066 = vmatprep.subr.bf16.mxu1 %v15160_v54  ;;  %v10378_v50 = vld [vmem:[#allocation8 + $0x7c] ss:$12 sps:$4 sm:$0xff]  }
0x1346   : > { %6790 = vmatmul.mubr.bf16.vlgmr.msra.gmra.mxu0 %v6756_v24  ;;  %9063 = vmatmul.mubr.bf16.vlgmr.msra.gmra.mxu1 %v6756_v24  ;;  %v15886_v24 = vld [vmem:[#allocation52_spill] sm:$0xff] }
0x1347   : > { %6902 = vmatpush1.bf16.msra.mxu0 %v10375_v6  ;;  %9067 = vmatpush3.bf16.msra.mxu1 %v14117_v46  ;;  %v15869_v46 = vld [vmem:[#allocation58_spill] sm:$0xff]  ;;  %v15887_v6 = vld [vmem:[#allocation51_spill] sm:$0xff] }
0x1348   : > { %6903 = vmatprep.subr.bf16.mxu0 %v10376_v44  ;;  %9068 = vmatprep.subr.bf16.mxu1 %v15160_v54 }
0x1349   : > { %6933 = vmatprep.mubr.bf16.mxu0 %v15154_v52  ;;  %9082 = vmatprep.mubr.msk.bf16.mxu1 %vm10558_vm0, %v15160_v54 }
0x134b   : > { %6904 = vmatpush1.bf16.msra.mxu0 %v10377_v37  ;;  %9069 = vmatpush3.bf16.msra.mxu1 %v14126_v45  ;;  %v15870_v45 = vld [vmem:[#allocation60_spill] sm:$0xff] }
0x134c   : > { %6905 = vmatprep.subr.bf16.mxu0 %v10378_v50  ;;  %9070 = vmatprep.subr.bf16.mxu1 %v15160_v54 }
0x134f   : > { %6906 = vmatpush1.bf16.msra.mxu0 %v14131_v20  ;;  %9071 = vmatpush3.bf16.msra.mxu1 %v14134_v15  ;;  %v15871_v20 = vld [vmem:[#allocation61_spill] sm:$0xff]  ;;  %v15872_v15 = vld [vmem:[#allocation62_spill] sm:$0xff] }
0x1350   : > { %6907 = vmatprep.subr.bf16.mxu0 %v14137_v10  ;;  %9072 = vmatprep.subr.bf16.mxu1 %v15160_v54  ;;  %v15873_v10 = vld [vmem:[#allocation64_spill] sm:$0xff] }
0x1353   : > { %6908 = vmatpush1.bf16.msra.mxu0 %v14141_v14  ;;  %9073 = vmatpush3.bf16.msra.mxu1 %v14144_v27  ;;  %v15874_v14 = vld [vmem:[#allocation65_spill] sm:$0xff]  ;;  %v15875_v27 = vld [vmem:[#allocation66_spill] sm:$0xff] }
0x1354   : > { %6909 = vmatprep.subr.bf16.mxu0 %v14147_v13  ;;  %9074 = vmatprep.subr.bf16.mxu1 %v15160_v54  ;;  %v15876_v13 = vld [vmem:[#allocation68_spill] sm:$0xff] }
0x1357   : > { %6910 = vmatpush1.bf16.msra.mxu0 %v14151_v26  ;;  %9075 = vmatpush3.bf16.msra.mxu1 %v14154_v16  ;;  %v15877_v26 = vld [vmem:[#allocation69_spill] sm:$0xff]  ;;  %v15878_v16 = vld [vmem:[#allocation70_spill] sm:$0xff] }
0x1358   : > { %6911 = vmatprep.subr.bf16.mxu0 %v14157_v23  ;;  %9076 = vmatprep.subr.bf16.mxu1 %v15160_v54  ;;  %v15879_v23 = vld [vmem:[#allocation72_spill] sm:$0xff] }
0x135b   : > { %6912 = vmatpush1.bf16.msra.mxu0 %v14161_v62  ;;  %9077 = vmatpush3.bf16.msra.mxu1 %v14164_v12  ;;  %v15880_v62 = vld [vmem:[#allocation73_spill] sm:$0xff]  ;;  %v15881_v12 = vld [vmem:[#allocation74_spill] sm:$0xff] }
0x135c   : > { %6913 = vmatprep.subr.bf16.mxu0 %v14167_v3  ;;  %9078 = vmatprep.subr.bf16.mxu1 %v15160_v54  ;;  %v15882_v3 = vld [vmem:[#allocation76_spill] sm:$0xff] }
0x135f   : > { %6914 = vmatpush1.bf16.msra.mxu0 %v14171_v53  ;;  %9079 = vmatpush3.bf16.msra.mxu1 %v14174_v38  ;;  %v15883_v53 = vld [vmem:[#allocation77_spill] sm:$0xff] }
0x1360   : > { %6915 = vmatprep.subr.bf16.mxu0 %v14177_v61  ;;  %9080 = vmatprep.subr.bf16.mxu1 %v15160_v54  ;;  %v15884_v38 = vld [vmem:[#allocation81_spill] sm:$0xff] }
0x1363   : > { %6916 = vmatpush1.bf16.msra.mxu0 %v14181_v25  ;;  %9081 = vmatpush3.bf16.msra.mxu1 %v14184_v58 }
0x1364   : > { %7030 = vmatprep.subr.bf16.mxu0 %v14187_v55  ;;  %9086 = vmatprep.subr.bf16.mxu1 %v15160_v54 }
0x1366   : > { %6934 = vmatmul.mubr.bf16.vlgmr.msra.gmra.mxu0 %v14329_v1  ;;  %9083 = vmatmul.mubr.bf16.vlgmr.msra.gmra.mxu1 %v14329_v1  ;;  %v7244_v1 = vstv %s7243_s21 }
0x1367   : > { %7031 = vmatpush1.bf16.msra.mxu0 %v14193_v32  ;;  %9087 = vmatpush3.bf16.msra.mxu1 %v14196_v0  ;;  %vm7246_vm1 = vcmp.eq.s32.totalorder %v15886_v24, %v7244_v1  ;;  %vm7245_vm2 = vcmp.eq.s32.totalorder %v15887_v6, %v7244_v1 }
0x1368   : > { %7032 = vmatprep.subr.bf16.mxu0 %v14199_v59  ;;  %9088 = vmatprep.subr.bf16.mxu1 %v15160_v54 }
0x1369   : > { %7062 = vmatprep.mubr.bf16.mxu0 %v15154_v52  ;;  %9102 = vmatprep.mubr.msk.bf16.mxu1 %vm10558_vm0, %v15160_v54 }
0x136b   : > { %7033 = vmatpush1.bf16.msra.mxu0 %v14206_v39  ;;  %9089 = vmatpush3.bf16.msra.mxu1 %v14209_v35  ;;  %v15885_v35 = vld [vmem:[#allocation17_spill] sm:$0xff] }
0x136c   : > { %7034 = vmatprep.subr.bf16.mxu0 %v14212_v42  ;;  %9090 = vmatprep.subr.bf16.mxu1 %v15160_v54 }
0x136f   : > { %7035 = vmatpush1.bf16.msra.mxu0 %v14216_v9  ;;  %9091 = vmatpush3.bf16.msra.mxu1 %v14219_v33 }
0x1370   : > { %7036 = vmatprep.subr.bf16.mxu0 %v15869_v46  ;;  %9092 = vmatprep.subr.bf16.mxu1 %v15160_v54  ;;  %v7248_v46 = vsel %vm7246_vm1, 1, %v15154_v52 }
0x1371   : > { %7253 = vperm.xlu1 %9220, %v7248_v46  }
0x1373   : > { %7037 = vmatpush1.bf16.msra.mxu0 %v15870_v45  ;;  %9093 = vmatpush3.bf16.msra.mxu1 %v15871_v20  ;;  %v7247_v45 = vsel %vm7245_vm2, 1, %v15154_v52 }
0x1374   : > { %7038 = vmatprep.subr.bf16.mxu0 %v15872_v15  ;;  %9094 = vmatprep.subr.bf16.mxu1 %v15160_v54 }
0x1375   : > { %7250 = vperm.xlu0 %9219, %v7247_v45  }
0x1377   : > { %7039 = vmatpush1.bf16.msra.mxu0 %v15873_v10  ;;  %9095 = vmatpush3.bf16.msra.mxu1 %v15874_v14 }
0x1378   : > { %7040 = vmatprep.subr.bf16.mxu0 %v15875_v27  ;;  %9096 = vmatprep.subr.bf16.mxu1 %v15160_v54 }
0x137b   : > { %7041 = vmatpush1.bf16.msra.mxu0 %v15876_v13  ;;  %9097 = vmatpush3.bf16.msra.mxu1 %v15877_v26 }
0x137c   : > { %7042 = vmatprep.subr.bf16.mxu0 %v15878_v16  ;;  %9098 = vmatprep.subr.bf16.mxu1 %v15160_v54 }
0x137f   : > { %7043 = vmatpush1.bf16.msra.mxu0 %v15879_v23  ;;  %9099 = vmatpush3.bf16.msra.mxu1 %v15880_v62 }
0x1380   : > { %7044 = vmatprep.subr.bf16.mxu0 %v15881_v12  ;;  %9100 = vmatprep.subr.bf16.mxu1 %v15160_v54 }
0x1383   : > { %7045 = vmatpush1.bf16.msra.mxu0 %v15882_v3  ;;  %9101 = vmatpush3.bf16.msra.mxu1 %v15883_v53 }
0x1384   : > { %7115 = vmatprep.subr.bf16.mxu0 %v15884_v38  ;;  %9106 = vmatprep.subr.bf16.mxu1 %v15160_v54 }
0x13e6   : > { %v6749_v61 = vpop.f32.mrf.mxu1  ;;  %v6706_v32 = vpop.f32.mrf.mxu0 }
0x13e7   : > { %v6707_v42 = vadd.f32 %v6706_v32, %v15885_v35  ;;  %v15888_v32 = vld [vmem:[#allocation47_spill] sm:$0xff] }
0x13e8   : > { %v9044_v25 = vpop.f32.mrf.mxu1  ;;  %v6708_v0 = vpop.f32.mrf.mxu0 }
0x13e9   : > { %v6709_v27 = vadd.f32 %v6708_v0, %v11428_v29 }
0x13ea   : > { %v14487_v58 = vpop.f32.mrf.mxu1  ;;  %v6710_v59 = vpop.f32.mrf.mxu0 }
0x13eb   : > { %v6711_v20 = vadd.f32 %v6710_v59, %v15885_v35  ;;  %v15889_v59 = vld [vmem:[#allocation117_spill] sm:$0xff] }
0x13ec   : > { %v9045_v55 = vpop.f32.mrf.mxu1  ;;  %v14489_v39 = vpop.f32.mrf.mxu0  ;;  %v835_v0 = vadd.f32 %v15889_v59, %v15888_v32 }
0x1406   : > { %v6791_v9 = vpop.f32.mrf.mxu0  ;;  %v6834_v33 = vpop.f32.mrf.mxu1 }
0x1407   : > { %v6841_v37 = vadd.f32 %v6791_v9, %v6707_v42 }
0x1408   : > { %v6793_v44 = vpop.f32.mrf.mxu0  ;;  %v9064_v50 = vpop.f32.mrf.mxu1 }
0x1409   : > { %v7643_v15 = vmul.f32 -1.442695, %v6841_v37  ;;  %v6842_v16 = vadd.f32 %v6793_v44, %v6709_v27  ;;  %v14506_v37 = vld [vmem:[%s14731_s5 + $0x1] ss:$0 sm:$0xff] }
0x140a   : > { %v6795_v10 = vpop.f32.mrf.mxu0  ;;  %v6837_v14 = vpop.f32.mrf.mxu1  ;;  %v6869_v24 = vadd.f32 %v14506_v37, %v6834_v33  ;;  %v15890_v50 = vld [vmem:[#allocation119_spill] sm:$0xff] }
0x140b   : > { %9945 = vpow2.f32 %v7643_v15  ;;  %v6843_v13 = vadd.f32 %v6795_v10, %v6711_v20  ;;  %v7644_v62 = vmul.f32 -1.442695, %v6842_v16  ;;  %v839_v46 = vadd.f32 %v15890_v50, %v15888_v32 }
0x140c   : > { %v9065_v26 = vpop.f32.mrf.mxu1  ;;  %v14499_v55 = vpop.f32.mrf.mxu0  ;;  %v6750_v15 = vadd.f32 %v6749_v61, %v11443_v7  ;;  %v6870_v33 = vadd.f32 %v14506_v37, %v6837_v14 }
0x140d   : > { %v7645_v23 = vmul.f32 -1.442695, %v6843_v13  ;;  %v15891_v13 = vld [vmem:[#allocation118_spill] sm:$0xff] }
0x140e   : > { %v837_v26 = vadd.f32 %v15891_v13, %v11095_v28 }
0x140f   : > { %9947 = vpow2.f32 %v7645_v23 }
0x1410   : > { %9949 = vpow2.f32 %v7644_v62 }
0x1418   : > { %v9946_v12 = vpop.eup %9945 }
0x1419   : > { %v6857_v3 = vadd.f32 1.0, %v9946_v12 }
0x141b   : > { %9951 = vrcp.f32 %v6857_v3 }
0x141c   : > { %v9948_v53 = vpop.eup %9947 }
0x141d   : > { %v6859_v38 = vadd.f32 1.0, %v9948_v53  ;;  %v9950_v25 = vpop.eup %9949  ;;  %v6753_v53 = vadd.f32 %v14487_v58, %v11443_v7 }
0x141e   : > { %v6858_v42 = vadd.f32 1.0, %v9950_v25 }
0x141f   : > { %9953 = vrcp.f32 %v6859_v38 }
0x1420   : > { %9955 = vrcp.f32 %v6858_v42 }
0x1426   : > { %v6935_v9 = vpop.f32.mrf.mxu0  ;;  %v6978_v1 = vpop.f32.mrf.mxu1 }
0x1427   : > { %v6985_v6 = vadd.f32 %v6935_v9, %v835_v0  ;;  %v15892_v0 = vld [vmem:[#allocation120_spill] sm:$0xff] }
0x1428   : > { %v9952_v44 = vpop.eup %9951  ;;  %v6937_v45 = vpop.f32.mrf.mxu0  ;;  %v841_v42 = vadd.f32 %v15892_v0, %v11095_v28 }
0x1429   : > { %v9084_v20 = vpop.f32.mrf.mxu1  ;;  %v6871_v10 = vmul.f32 %v9952_v44, %v6869_v24  ;;  %v7647_v27 = vmul.f32 -1.442695, %v6985_v6  ;;  %v6986_v25 = vadd.f32 %v6937_v45, %v837_v26 }
0x142a   : > { %v6939_v16 = vpop.f32.mrf.mxu0 }
0x142b   : > { %v6981_v23 = vpop.f32.mrf.mxu1  ;;  %v6873_v62 = vadd.f32 %v6871_v10, %v6750_v15  ;;  %9957 = vpow2.f32 %v7647_v27  ;;  %v6987_v12 = vadd.f32 %v6939_v16, %v839_v46  ;;  %v7648_v14 = vmul.f32 -1.442695, %v6986_v25 }
0x142c   : > { %v9954_v3 = vpop.eup %9953  ;;  %v6941_v59 = vpop.f32.mrf.mxu0  ;;  %v7014_v25 = vadd.f32 %v14311_v60, %v6981_v23 }
0x142d   : > { %v9085_v38 = vpop.f32.mrf.mxu1  ;;  %9959 = vtanh.f32 %v6873_v62  ;;  %v6872_v61 = vmul.f32 %v9954_v3, %v6870_v33  ;;  %v7649_v32 = vmul.f32 -1.442695, %v6987_v12  ;;  %v6988_v24 = vadd.f32 %v6941_v59, %v841_v42  ;;  %v9956_v44 = vpop.eup %9955  ;;  %v15894_v42 = vld [vmem:[#allocation49_spill] sm:$0xff] }
0x142e   : > { %v6877_v46 = vsub.f32 1.0, %v9956_v44  ;;  %v6881_v15 = vmul.f32 %v9956_v44, %v14306_v49  ;;  %v7013_v62 = vadd.f32 %v14311_v60, %v6978_v1  ;;  %v15893_v38 = vld [vmem:[#allocation46_spill] sm:$0xff] }
0x142f   : > { %v14519_v9 = vadd.f32 %v6872_v61, %v6753_v53  ;;  %9961 = vpow2.f32 %v7649_v32  ;;  %v7650_v6 = vmul.f32 -1.442695, %v6988_v24  ;;  %v6713_v53 = vadd.f32 %v14489_v39, %v11428_v29 }
0x1430   : > { %9963 = vpow2.f32 %v7648_v14 }
0x1431   : > { %9965 = vpow2.f32 %v7650_v6  ;;  %v6844_v59 = vadd.f32 %v14499_v55, %v6713_v53 }
0x1433   : > { %v7646_v1 = vmul.f32 -1.442695, %v6844_v59 }
0x1438   : > { %v9958_v50 = vpop.eup %9957 }
0x1439   : > { %v7001_v58 = vadd.f32 1.0, %v9958_v50 }
0x143a   : > { %v9960_v20 = vpop.eup %9959 }
0x143b   : > { %9967 = vrcp.f32 %v7001_v58  ;;  %v6879_v45 = vmul.f32 %v9960_v20, %v6877_v46 }
0x143c   : > { %v9962_v10 = vpop.eup %9961 }
0x143d   : > { %v7003_v27 = vadd.f32 1.0, %v9962_v10  ;;  %v14522_v28 = vadd.f32 %v6881_v15, %v6879_v45  ;;  %v9964_v13 = vpop.eup %9963 }
0x143e   : > { %v9966_v26 = vpop.eup %9965  ;;  %v7002_v16 = vadd.f32 1.0, %v9964_v13 }
0x143f   : > { %9969 = vrcp.f32 %v7003_v27  ;;  %v7004_v12 = vadd.f32 1.0, %v9966_v26 }
0x1440   : > { %9971 = vrcp.f32 %v7002_v16 }
0x1441   : > { %9973 = vrcp.f32 %v7004_v12 }
0x1448   : > { %v9968_v33 = vpop.eup %9967 }
0x1449   : > { %v7015_v3 = vmul.f32 %v9968_v33, %v7013_v62 }
0x144b   : > { %v7017_v61 = vadd.f32 %v7015_v3, %v15893_v38 }
0x144c   : > { %v9970_v32 = vpop.eup %9969 }
0x144d   : > { %9975 = vtanh.f32 %v7017_v61  ;;  %v7016_v0 = vmul.f32 %v9970_v32, %v7014_v25  ;;  %v9972_v14 = vpop.eup %9971 }
0x144e   : > { %v9974_v6 = vpop.eup %9973  ;;  %v7021_v44 = vsub.f32 1.0, %v9972_v14  ;;  %v7025_v58 = vmul.f32 %v9972_v14, %v14322_v30 }
0x144f   : > { %v7018_v24 = vadd.f32 %v7016_v0, %v15894_v42  ;;  %v7022_v46 = vsub.f32 1.0, %v9974_v6  ;;  %v7026_v55 = vmul.f32 %v9974_v6, %v14325_v51 }
0x1451   : > { %9977 = vtanh.f32 %v7018_v24 }
0x1452   : > { %9979 = vpow2.f32 %v7646_v1 }
0x145a   : > { %v9976_v50 = vpop.eup %9975 }
0x145b   : > { %v7023_v39 = vmul.f32 %v9976_v50, %v7021_v44 }
0x145d   : > { %v7027_v60 = vadd.f32 %v7025_v58, %v7023_v39 }
0x145e   : > { %v9978_v23 = vpop.eup %9977 }
0x145f   : > { %v7024_v20 = vmul.f32 %v9978_v23, %v7022_v46  ;;  %7259 = vst [vmem:[#allocation2 + $0x10] sm:$0xff] %v7027_v60  ;;  %v9980_v15 = vpop.eup %9979 }
0x1460   : > { %v6860_v27 = vadd.f32 1.0, %v9980_v15 }
0x1461   : > { %v7028_v45 = vadd.f32 %v7026_v55, %v7024_v20 }
0x1462   : > { %9981 = vrcp.f32 %v6860_v27 }
0x1463   : > { %v7029_v10 = vpack.c.bf16 %v7028_v45, %v7027_v60  ;;  %7260 = vst [vmem:[#allocation2] sm:$0xff] %v7028_v45  ;;  %9983 = vtanh.f32 %v14519_v9 }
0x1465   : > { %7063 = vmatmul.mubr.bf16.vlgmr.msra.gmra.mxu0 %v7029_v10  ;;  %9103 = vmatmul.mubr.bf16.vlgmr.msra.gmra.mxu1 %v7029_v10 }
0x1466   : > { %7116 = vmatpush1.bf16.msra.mxu0 %v14333_v2  ;;  %9107 = vmatpush3.bf16.msra.mxu1 %v14336_v34  ;;  %v15895_v2 = vld [vmem:[#allocation122_spill] sm:$0xff]  ;;  %v15896_v34 = vld [vmem:[#allocation123_spill] sm:$0xff] }
0x1467   : > { %7117 = vmatprep.subr.bf16.mxu0 %v14339_v63  ;;  %9108 = vmatprep.subr.bf16.mxu1 %v15160_v54 }
0x1468   : > { %7147 = vmatprep.mubr.bf16.mxu0 %v15154_v52  ;;  %9122 = vmatprep.mubr.msk.bf16.mxu1 %vm10558_vm0, %v15160_v54 }
0x146a   : > { %7118 = vmatpush1.bf16.msra.mxu0 %v14346_v40  ;;  %9109 = vmatpush3.bf16.msra.mxu1 %v14349_v47 }
0x146b   : > { %7119 = vmatprep.subr.bf16.mxu0 %v14353_v4  ;;  %9110 = vmatprep.subr.bf16.mxu1 %v15160_v54  ;;  %v15897_v4 = vld [vmem:[#allocation97_spill] sm:$0xff] }
0x146e   : > { %7120 = vmatpush1.bf16.msra.mxu0 %v14357_v8  ;;  %9111 = vmatpush3.bf16.msra.mxu1 %v14360_v41 }
0x146f   : > { %7121 = vmatprep.subr.bf16.mxu0 %v14363_v43  ;;  %9112 = vmatprep.subr.bf16.mxu1 %v15160_v54  ;;  %v9982_v52 = vpop.eup %9981 }
0x1470   : > { %v9984_v30 = vpop.eup %9983  ;;  %v6878_v51 = vsub.f32 1.0, %v9982_v52  ;;  %v6882_v40 = vmul.f32 %v9982_v52, %v14404_v36 }
0x1472   : > { %7122 = vmatpush1.bf16.msra.mxu0 %v14367_v21  ;;  %9113 = vmatpush3.bf16.msra.mxu1 %v14370_v57  ;;  %v6880_v63 = vmul.f32 %v9984_v30, %v6878_v51 }
0x1473   : > { %7123 = vmatprep.subr.bf16.mxu0 %v14373_v17  ;;  %9114 = vmatprep.subr.bf16.mxu1 %v15160_v54 }
0x1474   : > { %v14564_v47 = vadd.f32 %v6882_v40, %v6880_v63 }
0x1476   : > { %7124 = vmatpush1.bf16.msra.mxu0 %v14377_v19  ;;  %9115 = vmatpush3.bf16.msra.mxu1 %v14380_v18  ;;  %v7114_v8 = vpack.c.bf16 %v14564_v47, %v14522_v28  ;;  %v14576_v19 = vpop.permute.xlu0 %1880  ;;  %v14578_v18 = vpop.permute.xlu1 %2238 }
0x1477   : > { %7125 = vmatprep.subr.bf16.mxu0 %v14383_v5  ;;  %9116 = vmatprep.subr.bf16.mxu1 %v15160_v54  ;;  %vm1885_vm0 = vcmp.eq.s32.totalorder %v14576_v19, 1  ;;  %vm2243_vm4 = vcmp.eq.s32.totalorder %v14578_v18, 1  ;;  %v15900_v18 = vld [vmem:[#allocation53_spill] sm:$0xff] }
0x147a   : > { %7126 = vmatpush1.bf16.msra.mxu0 %v15895_v2  ;;  %9117 = vmatpush3.bf16.msra.mxu1 %v15896_v34  ;;  %v14580_v5 = vpop.permute.xlu0 %1883  ;;  %v14583_v9 = vpop.permute.xlu1 %2241 }
0x147b   : > { %7127 = vmatprep.subr.bf16.mxu0 %v14393_v22  ;;  %9118 = vmatprep.subr.bf16.mxu1 %v15160_v54  ;;  %vm1886_vm3 = vcmp.eq.s32.totalorder %v14580_v5, 1  ;;  %vm2244_vm5 = vcmp.eq.s32.totalorder %v14583_v9, 1  ;;  %v15902_v9 = vld [vmem:[#allocation59_spill] sm:$0xff] }
0x147e   : > { %7128 = vmatpush1.bf16.msra.mxu0 %v14398_v56  ;;  %9119 = vmatpush3.bf16.msra.mxu1 %v14401_v11  ;;  %v14585_v13 = vpop.permute.xlu0 %2596  ;;  %v14588_v38 = vpop.permute.xlu1 %2599 }
0x147f   : > { %7129 = vmatprep.subr.bf16.mxu0 %v14406_v48  ;;  %9120 = vmatprep.subr.bf16.mxu1 %v15160_v54  ;;  %vm2601_vm6 = vcmp.eq.s32.totalorder %v14585_v13, 1  ;;  %vm2602_vm7 = vcmp.eq.s32.totalorder %v14588_v38, 1  ;;  %v15903_v38 = vld [vmem:[#allocation67_spill] sm:$0xff] }
0x1482   : > { %7130 = vmatpush1.bf16.msra.mxu0 %v14410_v31  ;;  %9121 = vmatpush3.bf16.msra.mxu1 %v15897_v4  ;;  %v14590_v61 = vpop.permute.xlu0 %2954  ;;  %v14594_v14 = vpop.permute.xlu1 %2957 }
0x1483   : > { %vm2959_vm8 = vcmp.eq.s32.totalorder %v14590_v61, 1  ;;  %vm2960_vm9 = vcmp.eq.s32.totalorder %v14594_v14, 1  ;;  %v15905_v61 = vld [vmem:[#allocation71_spill] sm:$0xff] }
0x1485   : > { %7148 = vmatmul.mubr.bf16.vlgmr.msra.gmra.mxu0 %v7114_v8  ;;  %9123 = vmatmul.mubr.bf16.vlgmr.msra.gmra.mxu1 %v7114_v8 }
0x1486   : > { %v14598_v50 = vpop.permute.xlu1 %3315 }
0x1487   : > { %vm3318_vm11 = vcmp.eq.s32.totalorder %v14598_v50, 1 }
0x148a   : > { %v14602_v46 = vpop.permute.xlu1 %3673 }
0x148b   : > { %vm3676_vm13 = vcmp.eq.s32.totalorder %v14602_v46, 1 }
0x148e   : > { %v14606_v20 = vpop.permute.xlu1 %4031 }
0x148f   : > { %vm4034_vm15 = vcmp.eq.s32.totalorder %v14606_v20, 1 }
0x1492   : > { %v14610_v10 = vpop.permute.xlu1 %4389 }
0x1493   : > { %vm4392_vm2 = vcmp.eq.s32.totalorder %v14610_v10, 1 }
0x1496   : > { %v14614_v30 = vpop.permute.xlu1 %4747 }
0x149a   : > { %v14618_v63 = vpop.permute.xlu1 %5105 }
0x1525   : > { %v14572_v41 = vpop.f32.mrf.mxu1  ;;  %v7064_v57 = vpop.f32.mrf.mxu0 }
0x1526   : > { %v7065_v22 = vadd.f32 %v7064_v57, %v15885_v35 }
0x1527   : > { %v9104_v43 = vpop.f32.mrf.mxu1  ;;  %v7066_v17 = vpop.f32.mrf.mxu0 }
0x1528   : > { %v7067_v25 = vadd.f32 %v7066_v17, %v11428_v29  ;;  %v14625_v17 = vpop.permute.xlu1 %5463 }
0x1529   : > { %v14574_v21 = vpop.f32.mrf.mxu1  ;;  %v7068_v54 = vpop.f32.mrf.mxu0 }
0x152a   : > { %v7069_v33 = vadd.f32 %v7068_v54, %v15885_v35  ;;  %v14596_v35 = vpop.permute.xlu0 %3312 }
0x152b   : > { %v9105_v11 = vpop.f32.mrf.mxu1  ;;  %v7070_v48 = vpop.f32.mrf.mxu0  ;;  %vm3317_vm10 = vcmp.eq.s32.totalorder %v14596_v35, 1  ;;  %v15907_v35 = vld [vmem:[#allocation143_spill] sm:$0xff] }
0x152c   : > { %v7071_v1 = vadd.f32 %v7070_v48, %v11428_v29  ;;  %v7108_v11 = vadd.f32 %v14572_v41, %v11443_v7  ;;  %v7111_v41 = vadd.f32 %v14574_v21, %v11443_v7  ;;  %v15901_v7 = vld [vmem:[#allocation23_spill] sm:$0xff] }
0x152e   : > { %v14600_v39 = vpop.permute.xlu0 %3670 }
0x152f   : > { %vm3675_vm12 = vcmp.eq.s32.totalorder %v14600_v39, 1  ;;  %v15909_v39 = vld [vmem:[#allocation80_spill] sm:$0xff] }
0x1532   : > { %v14604_v60 = vpop.permute.xlu0 %4028 }
0x1533   : > { %vm4033_vm14 = vcmp.eq.s32.totalorder %v14604_v60, 1  ;;  %v15910_v60 = vld [vmem:[#allocation27_spill] sm:$0xff] }
0x1536   : > { %v14608_v55 = vpop.permute.xlu0 %4386 }
0x1537   : > { %vm4391_vm1 = vcmp.eq.s32.totalorder %v14608_v55, 1  ;;  %v15913_v55 = vld [vmem:[#allocation127_spill] sm:$0xff] }
0x153a   : > { %v14612_v27 = vpop.permute.xlu0 %4744 }
0x153e   : > { %v14616_v51 = vpop.permute.xlu0 %5102 }
0x1542   : > { %v14620_v40 = vpop.permute.xlu0 %5460 }
0x1545   : > { %v7149_v56 = vpop.f32.mrf.mxu0  ;;  %v7192_v31 = vpop.f32.mrf.mxu1 }
0x1546   : > { %v7199_v26 = vadd.f32 %v7149_v56, %v7065_v22  ;;  %v7227_v4 = vadd.f32 %v14506_v37, %v7192_v31  ;;  %v14627_v54 = vpop.permute.xlu0 %5818  ;;  %v1020_v31 = vld [vmem:[#allocation9 + $0x8] sm:$0xff] }
0x1547   : > { %v7151_v16 = vpop.f32.mrf.mxu0  ;;  %v9124_v62 = vpop.f32.mrf.mxu1 }
0x1548   : > { %v7651_v12 = vmul.f32 -1.442695, %v7199_v26  ;;  %v7200_v0 = vadd.f32 %v7151_v16, %v7067_v25  ;;  %v1019_v26 = vld [vmem:[#allocation9] sm:$0xff]  ;;  %v15898_v62 = vld [vmem:[#allocation121_spill] sm:$0xff] }
0x1549   : > { %v7153_v3 = vpop.f32.mrf.mxu0  ;;  %v7195_v53 = vpop.f32.mrf.mxu1 }
0x154a   : > { %9985 = vpow2.f32 %v7651_v12  ;;  %v7201_v32 = vadd.f32 %v7153_v3, %v7069_v33  ;;  %v7652_v44 = vmul.f32 -1.442695, %v7200_v0  ;;  %v7228_v22 = vadd.f32 %v14506_v37, %v7195_v53  ;;  %v14639_v37 = vpop.permute.xlu1 %5821  ;;  %v6177_v19 = vpop.permute.xlu0 %6176  ;;  %v15899_v12 = vld [vmem:[#allocation20_spill] sm:$0xff] }
0x154b   : > { %v9125_v59 = vpop.f32.mrf.mxu1  ;;  %v7155_v24 = vpop.f32.mrf.mxu0  ;;  %v1887_v33 = vsel %vm1885_vm0, %v15898_v62, %v1019_v26  ;;  %v1888_v3 = vsel %vm1886_vm3, %v15899_v12, %v1020_v31  ;;  %vm4749_vm0 = vcmp.eq.s32.totalorder %v14612_v27, 1  ;;  %vm4750_vm3 = vcmp.eq.s32.totalorder %v14614_v30, 1  ;;  %v15914_v27 = vld [vmem:[#allocation130_spill] sm:$0xff]  ;;  %v15915_v30 = vld [vmem:[#allocation131_spill] sm:$0xff]  ;;  %v15920_v62 = vld [vmem:[#allocation24_spill] sm:$0xff] }
0x154c   : > { %v7653_v42 = vmul.f32 -1.442695, %v7201_v32  ;;  %v7202_v6 = vadd.f32 %v7155_v24, %v7071_v1  ;;  %v2245_v53 = vsel %vm2243_vm4, %v15900_v18, %v1887_v33  ;;  %v2246_v21 = vsel %vm2244_vm5, %v15901_v7, %v1888_v3  ;;  %v15904_v32 = vld [vmem:[#allocation63_spill] sm:$0xff]  ;;  %v15906_v1 = vld [vmem:[#allocation140_spill] sm:$0xff]  ;;  %v15921_v33 = vld [vmem:[#allocation21_spill] sm:$0xff] }
0x154d   : > { %v2603_v13 = vsel %vm2601_vm6, %v15902_v9, %v2245_v53  ;;  %v2604_v25 = vsel %vm2602_vm7, %v15903_v38, %v2246_v21  ;;  %vm5107_vm4 = vcmp.eq.s32.totalorder %v14616_v51, 1  ;;  %vm5108_vm5 = vcmp.eq.s32.totalorder %v14618_v63, 1 }
0x154e   : > { %9987 = vpow2.f32 %v7653_v42  ;;  %v7654_v58 = vmul.f32 -1.442695, %v7202_v6  ;;  %v2961_v59 = vsel %vm2959_vm8, %v15904_v32, %v2603_v13  ;;  %v2962_v0 = vsel %vm2960_vm9, %v15905_v61, %v2604_v25  ;;  %v6180_v42 = vpop.permute.xlu1 %6179  ;;  %v6535_v24 = vpop.permute.xlu0 %6534  ;;  %v15923_v25 = vld [vmem:[#allocation57_spill] sm:$0xff] }
0x154f   : > { %9989 = vpow2.f32 %v7652_v44  ;;  %v3319_v14 = vsel %vm3317_vm10, %v15906_v1, %v2961_v59  ;;  %v3320_v6 = vsel %vm3318_vm11, %v15907_v35, %v2962_v0  ;;  %v15908_v44 = vld [vmem:[#allocation78_spill] sm:$0xff]  ;;  %vm5465_vm6 = vcmp.eq.s32.totalorder %v14620_v40, 1 }
0x1550   : > { %9991 = vpow2.f32 %v7654_v58  ;;  %v3677_v50 = vsel %vm3675_vm12, %v15908_v44, %v3319_v14  ;;  %v3678_v58 = vsel %vm3676_vm13, %v15909_v39, %v3320_v6  ;;  %vm5823_vm7 = vcmp.eq.s32.totalorder %v14627_v54, 1 }
0x1551   : > { %vm5466_vm8 = vcmp.eq.s32.totalorder %v14625_v17, 1  ;;  %vm6181_vm9 = vcmp.eq.s32.totalorder %v6177_v19, 1  ;;  %vm5824_vm10 = vcmp.eq.s32.totalorder %v14639_v37, 1  ;;  %vm6539_vm11 = vcmp.eq.s32.totalorder %v6535_v24, 1  ;;  %v15922_v37 = vld [vmem:[#allocation25_spill] sm:$0xff] }
0x1552   : > { %v6538_v10 = vpop.permute.xlu1 %6537  ;;  %vm6182_vm13 = vcmp.eq.s32.totalorder %v6180_v42, 1 }
0x1556   : > { %v6896_v31 = vpop.permute.xlu1 %6895 }
0x1557   : > { %v9986_v23 = vpop.eup %9985 }
0x1558   : > { %v7215_v29 = vadd.f32 1.0, %v9986_v23  ;;  %v4035_v23 = vsel %vm4033_vm14, %v15910_v60, %v3677_v50  ;;  %vm6540_vm14 = vcmp.eq.s32.totalorder %v6538_v10, 1 }
0x155a   : > { %9993 = vrcp.f32 %v7215_v29  ;;  %v15911_v29 = vld [vmem:[#allocation29_spill] sm:$0xff]  ;;  %v7254_v21 = vpop.permute.xlu1 %7253 }
0x155b   : > { %v9988_v45 = vpop.eup %9987  ;;  %v4036_v20 = vsel %vm4034_vm15, %v15911_v29, %v3678_v58 }
0x155c   : > { %v7217_v15 = vadd.f32 1.0, %v9988_v45  ;;  %v9990_v52 = vpop.eup %9989  ;;  %v15912_v45 = vld [vmem:[#allocation124_spill] sm:$0xff] }
0x155d   : > { %v9992_v2 = vpop.eup %9991  ;;  %v7216_v34 = vadd.f32 1.0, %v9990_v52  ;;  %v4394_v52 = vsel %vm4392_vm2, %v15913_v55, %v4036_v20  ;;  %vm7256_vm2 = vcmp.eq.s32.totalorder %v7254_v21, 1 }
0x155e   : > { %9995 = vrcp.f32 %v7217_v15  ;;  %v7218_v43 = vadd.f32 1.0, %v9992_v2  ;;  %v4393_v15 = vsel %vm4391_vm1, %v15912_v45, %v4035_v23  ;;  %v6893_v2 = vpop.permute.xlu0 %6892  ;;  %vm6898_vm1 = vcmp.eq.s32.totalorder %v6896_v31, 1 }
0x155f   : > { %9997 = vrcp.f32 %v7216_v34  ;;  %v4751_v34 = vsel %vm4749_vm0, %v15914_v27, %v4393_v15  ;;  %vm6897_vm12 = vcmp.eq.s32.totalorder %v6893_v2, 1 }
0x1560   : > { %9999 = vrcp.f32 %v7218_v43  ;;  %v15916_v43 = vld [vmem:[#allocation132_spill] sm:$0xff] }
0x1562   : > { %v7251_v54 = vpop.permute.xlu0 %7250 }
0x1563   : > { %vm7255_vm15 = vcmp.eq.s32.totalorder %v7251_v54, 1 }
0x1567   : > { %v9994_v8 = vpop.eup %9993 }
0x1568   : > { %v7229_v57 = vmul.f32 %v9994_v8, %v7227_v4  ;;  %v4752_v4 = vsel %vm4750_vm3, %v15915_v30, %v4394_v52 }
0x156a   : > { %v7231_v48 = vadd.f32 %v7229_v57, %v7108_v11  ;;  %v5109_v11 = vsel %vm5107_vm4, %v15916_v43, %v4751_v34 }
0x156b   : > { %v9996_v56 = vpop.eup %9995 }
0x156c   : > { %10001 = vtanh.f32 %v7231_v48  ;;  %v7230_v16 = vmul.f32 %v9996_v56, %v7228_v22  ;;  %v9998_v46 = vpop.eup %9997  ;;  %v15917_v48 = vld [vmem:[#allocation133_spill] sm:$0xff]  ;;  %v15918_v22 = vld [vmem:[#allocation142_spill] sm:$0xff]  ;;  %v15919_v56 = vld [vmem:[#allocation56_spill] sm:$0xff] }
0x156d   : > { %v10000_v8 = vpop.eup %9999  ;;  %v7235_v51 = vsub.f32 1.0, %v9998_v46  ;;  %v5110_v63 = vsel %vm5108_vm5, %v15917_v48, %v4752_v4  ;;  %v5467_v40 = vsel %vm5465_vm6, %v15918_v22, %v5109_v11 }
0x156e   : > { %v7232_v5 = vadd.f32 %v7230_v16, %v7111_v41  ;;  %v5825_v26 = vsel %vm5823_vm7, %v15919_v56, %v5467_v40  ;;  %v7239_v16 = vmul.f32 %v9998_v46, %v14522_v28  ;;  %v5468_v17 = vsel %vm5466_vm8, %v15920_v62, %v5110_v63 }
0x156f   : > { %v6183_v19 = vsel %vm6181_vm9, %v15921_v33, %v5825_v26  ;;  %v7236_v3 = vsub.f32 1.0, %v10000_v8  ;;  %v5826_v53 = vsel %vm5824_vm10, %v15922_v37, %v5468_v17  ;;  %v7240_v38 = vmul.f32 %v10000_v8, %v14564_v47 }
0x1570   : > { %10003 = vtanh.f32 %v7232_v5  ;;  %v6541_v5 = vsel %vm6539_vm11, %v14306_v49, %v6183_v19  ;;  %v6184_v32 = vsel %vm6182_vm13, %v15923_v25, %v5826_v53 }
0x1571   : > { %v6899_v7 = vsel %vm6897_vm12, %v14522_v28, %v6541_v5  ;;  %v6542_v49 = vsel %vm6540_vm14, %v14404_v36, %v6184_v32 }
0x1572   : > { %v6900_v61 = vsel %vm6898_vm1, %v14564_v47, %v6542_v49 }
0x1579   : > { %v10002_v57 = vpop.eup %10001 }
0x157a   : > { %v7237_v41 = vmul.f32 %v10002_v57, %v7235_v51 }
0x157c   : > { %v7241_v12 = vadd.f32 %v7239_v16, %v7237_v41 }
0x157d   : > { %v10004_v18 = vpop.eup %10003 }
0x157e   : > { %v7257_v9 = vsel %vm7255_vm15, %v7241_v12, %v6899_v7  ;;  %7261 = vst [vmem:[#allocation2 + $0x18] sm:$0xff] %v7241_v12  ;;  %v7238_v13 = vmul.f32 %v10004_v18, %v7236_v3 }
0x157f   : > { %7263 = vst [vmem:[#allocation9] sm:$0xff] %v7257_v9  ;;  %7268 = sbr.rel (%p7655_p4) target bundleno = 5672 (0x1628), region = 64 }
0x1580   : > { %v7242_v59 = vadd.f32 %v7240_v38, %v7238_v13 }
0x1582   : > { %v7258_v0 = vsel %vm7256_vm2, %v7242_v59, %v6900_v61  ;;  %7262 = vst [vmem:[#allocation2 + $0x8] sm:$0xff] %v7242_v59 }
0x1583   : > { %7264 = vst [vmem:[#allocation9 + $0x8] sm:$0xff] %v7258_v0 }
0x1586   : > { %v7269_v28 = vld [vmem:[#allocation9] sm:$0xff] }
0x1587   : > { %v7271_v24 = vmul.f32 %v7269_v28, %v7269_v28 }
0x1589   : > { %7273 = vadd.xlane.f32.xlu0 %v7271_v24 }
0x158a   : > { %v7270_v42 = vld [vmem:[#allocation9 + $0x8] sm:$0xff] }
0x158b   : > { %v7272_v1 = vmul.f32 %v7270_v42, %v7270_v42 }
0x158d   : > { %7275 = vadd.xlane.f32.xlu0 %v7272_v1 }
0x1612   : > { %v7274_v14 = vpop.xlane.xlu0 %7273 }
0x1613   : > { %10380 = vrsqrt.f32 %v7274_v14 }
0x1616   : > { %v7276_v35 = vpop.xlane.xlu0 %7275 }
0x1617   : > { %10382 = vrsqrt.f32 %v7276_v35 }
0x1620   : > { %v10381_v36 = vpop.eup %10380 }
0x1621   : > { %v7279_v6 = vmul.f32 %v10381_v36, %v7269_v28 }
0x1623   : > { %7281 = vst [vmem:[#allocation9] sm:$0xff] %v7279_v6 }
0x1624   : > { %v10383_v47 = vpop.eup %10382 }
0x1625   : > { %v7280_v44 = vmul.f32 %v10383_v47, %v7270_v42 }
0x1627   : > { %7282 = vst [vmem:[#allocation9 + $0x8] sm:$0xff] %v7280_v44 }
0x1628 PF: > { %p14693_p2 = scmp.eq.s32.totalorder %s7393_s27, 1  ;;  %s10559_s29 = smov [#allocation9]  }
0x1629   : > { %s7292_s30 = sshll.u32 %s10559_s29, 4  ;;  %s7293_s30 = int_to_ptr.vmem [resolvable:$true] %s7292_s30 }
0x162a   : > { %s10464_s13 = scalar_lea.vmem %s7293_s30, 256  ;;  %p10471_p9 = scmp.lt.s32.totalorder %s7293_s30, %s7293_s30 }
0x162b   : > { %p10465_p3 = scmp.ne.s32.totalorder %s7293_s30, %s10464_s13  ;;  %p10472_p10 = scmp.lt.s32.totalorder %s10464_s13, %s10464_s13 }
0x162d   : > { %p10466_p7 = pnand %p10465_p3, %p14693_p2  ;;  %p10473_p12 = por %p10472_p10, %p10471_p9 }
0x162f   : > { %p10467_p6 = pneg %p10466_p7 }
0x1631   : > { %p10474_p11 = pnand %p10473_p12, %p10467_p6 }
0x1633   : > { %10477 = shalt.err (!%p10474_p11)
}
0x1634   : > { %s10560_s17 = smov 128   ;;  %s10561_s27 = smov 8  }
0x1635   : > { %9137 = dma.vmem_to_hbm [thread:$0]  (%p14693_p2), %s7293_s30, 256, %s14732_s6, [#allocation5], %s10560_s17, %s10560_s17, %s10561_s27  }
0x1636   : > { %10521 = dma.done.wait (%p14693_p2), [#allocation5], 256  }
0x1637   : > { %10523 = vsyncadd (%p14693_p2), [#allocation5], 4294967040 }
0x1638 PF: > { %s21_s26 = sadd.s32 1, %s10546_s26   ;;  %s15925_s21 = smov %s10530_s22 }
0x1639   : > { %p18_p1 = scmp.ge.s32.totalorder %s21_s26, 4   ;;  %s15926_s22 = smov %s10534_s23 }
0x163a   : > { %s15927_s23 = smov %s10684_s12  ;;  %s15928_s24 = smov %s10542_s25 }
0x163b   : > { %s15929_s25 = smov %s15931_s20  ;;  %20 = sbr.rel (!%p18_p1) target bundleno = 6 (0x6), region = 106 }
0x1640   :  { %7308 = vsyncpa [#allocation4], 1 }
0x1641   :  { %7310 = vsyncpa [#allocation4 + $0x1], 1 }
0x1642   :  { %7311 = vsyncpa [#allocation7], 1 }
0x1643   :  { %7312 = vsyncpa [#allocation5], 1 }
0x1644   :  { %7314 = vsyncpa [#allocation5 + $0x1], 1 }

</bundles_post_ra>
